<compile_context>
chip_gen: v7x
topology: tpu7x:2x2x1
jax: 0.10.0
libtpu: 0.0.40
codegen_flags: <defaults>
</compile_context>

<pallas_src>
import jax
import jax.numpy as jnp
from jax.experimental import pallas as pl
from jax.experimental.pallas import tpu as pltpu

FS = 100
_EPS = 1e-5  # PyTorch BatchNorm1d default

LAYER_NAMES = ("conv_time", "conv_time_1", "conv_time_2", "conv_time_3",
               "conv_fre", "conv_fre_1", "conv_fre_2", "conv_fre_3")


# ---------------------------------------------------------------------------
# Fused encoder kernel: one grid step == one batch element, both branches.
# ---------------------------------------------------------------------------
def _encoder_kernel(
    xt_ref, xf_ref,
    wt0_ref, st0_ref, tt0_ref,     # conv_time   (+bn_time)
    wt1_ref, st1_ref, tt1_ref,     # conv_time_1 (+bn_time_1)
    wt2_ref, st2_ref, tt2_ref,     # conv_time_2 (+bn_time_2)
    wt3_ref, st3_ref, tt3_ref,     # conv_time_3 (+bn_time_3)
    wf0_ref, sf0_ref, tf0_ref,     # conv_fre    (+bn_fre)
    wf1_ref, sf1_ref, tf1_ref,     # conv_fre_1  (+bn_fre_1)
    wf2_ref, sf2_ref, tf2_ref,     # conv_fre_2  (+bn_fre_2)
    wf3_ref, sf3_ref, tf3_ref,     # conv_fre_3  (+bn_fre_3)
    o_ref,                         # (15, 128) channels-last output slab
    act_buf, pool_buf, pad_buf,    # VMEM scratch
):
    f32 = jnp.float32
    bf16 = jnp.bfloat16

    def bn_relu(acc, s_ref, t_ref):
        # acc: (L, C) f32; s/t: (1, C) f32 (bias+BN folded)
        return jnp.maximum(acc * s_ref[...] + t_ref[...], 0.0)

    def maxpool(h, k):
        # h: (L, C) f32 value -> (L // k, C); floor mode (remainder dropped)
        L, C = h.shape
        Lo = L // k
        act_buf[0:L, :C] = h
        for i in range(Lo):
            pool_buf[i:i + 1, :C] = jnp.max(
                act_buf[i * k:(i + 1) * k, :C], axis=0, keepdims=True)
        return pool_buf[0:Lo, :C]

    def conv_bn_relu(h, w_ref, s_ref, t_ref, pad):
        # stride-1 conv as K shifted slices; h: (Lin, Cin) f32,
        # w_ref: (K, Cin, Cout) bf16.
        Lin, Cin = h.shape
        K, _, Cout = w_ref.shape
        Lout = Lin + 2 * pad - K + 1
        if pad:
            pad_buf[...] = jnp.zeros_like(pad_buf)
            pad_buf[pad:pad + Lin, :Cin] = h

            def tap(k):
                return pad_buf[k:k + Lout, :Cin]
        else:
            def tap(k):
                return h[k:k + Lout, :]
        acc = jnp.zeros((Lout, Cout), f32)
        for k in range(K):   # static unroll: K small MXU matmuls
            acc = acc + jnp.dot(tap(k).astype(bf16), w_ref[k],
                                preferred_element_type=f32)
        return bn_relu(acc, s_ref, t_ref)

    # ------------------------- time branch -------------------------
    h = jnp.dot(xt_ref[...], wt0_ref[...], preferred_element_type=f32)  # (492, 64)
    h = bn_relu(h, st0_ref, tt0_ref)
    h = maxpool(h, 8)                                    # (61, 64)
    # dropout_time: identity (inference)
    h = conv_bn_relu(h, wt1_ref, st1_ref, tt1_ref, 0)    # (54, 128)
    h = conv_bn_relu(h, wt2_ref, st2_ref, tt2_ref, 0)    # (47, 128)
    h = conv_bn_relu(h, wt3_ref, st3_ref, tt3_ref, 0)    # (40, 128)
    x1 = maxpool(h, 4)                                   # (10, 128)
    o_ref[0:10, :] = x1

    # ---------------------- frequency branch -----------------------
    g = jnp.dot(xf_ref[...], wf0_ref[...], preferred_element_type=f32)  # (53, 64)
    g = bn_relu(g, sf0_ref, tf0_ref)
    g = maxpool(g, 4)                                    # (13, 64)
    # dropout_fre: identity (inference)
    g = conv_bn_relu(g, wf1_ref, sf1_ref, tf1_ref, 2)    # (12, 128)
    g = conv_bn_relu(g, wf2_ref, sf2_ref, tf2_ref, 2)    # (11, 128)
    g = conv_bn_relu(g, wf3_ref, sf3_ref, tf3_ref, 2)    # (10, 128)
    x2 = maxpool(g, 2)                                   # (5, 128)
    o_ref[10:15, :] = x2
    # dp (final dropout): identity (inference)


# ---------------------------------------------------------------------------
# Host-side glue: first-layer im2col (Cin=1), weight/BN packing, pallas_call.
# ---------------------------------------------------------------------------
def _im2col_1d(xs, kernel, stride, pad):
    # xs: (B, L), Cin == 1  ->  (B, Lout, kernel)
    if pad:
        xs = jnp.pad(xs, ((0, 0), (pad, pad)))
    L = xs.shape[1]
    lout = (L - kernel) // stride + 1
    idx = jnp.arange(lout)[:, None] * stride + jnp.arange(kernel)[None, :]
    return xs[:, idx]


def _pack_layer(q):
    w = q["w"]                                            # (Cout, Cin, K)
    cout, cin, k = w.shape
    scale = q["gamma"] / jnp.sqrt(q["var"] + _EPS)
    shift = q["beta"] + (q["b"] - q["mean"]) * scale
    if cin == 1:
        wp = jnp.transpose(w.reshape(cout, k), (1, 0))    # (K, Cout)
    else:
        wp = jnp.transpose(w, (2, 1, 0))                  # (K, Cin, Cout)
    return (wp.astype(jnp.bfloat16),
            scale.reshape(1, cout).astype(jnp.float32),
            shift.reshape(1, cout).astype(jnp.float32))


@jax.jit
def encoder_forward(params, x):
    """x: (B, 1, 3000) float32 (PyTorch NCL). Returns (B, 128, 15)."""
    B = x.shape[0]
    xs = x[:, 0, :]                                       # (B, 3000)

    # im2col for the two Cin=1 strided first convs (small, one-time glue).
    xt = _im2col_1d(xs, FS // 2, FS // 16, 0).astype(jnp.bfloat16)   # (B, 492, 50)
    xf = _im2col_1d(xs, FS * 4, FS // 2, 2).astype(jnp.bfloat16)     # (B, 53, 400)

    packed = []
    for name in LAYER_NAMES:
        packed.extend(_pack_layer(params[name]))

    in_specs = [
        pl.BlockSpec((None,) + xt.shape[1:], lambda b: (b, 0, 0)),
        pl.BlockSpec((None,) + xf.shape[1:], lambda b: (b, 0, 0)),
    ]
    for arr in packed:   # weights / scales / shifts: full-block, grid-invariant
        zeros = (0,) * arr.ndim
        in_specs.append(pl.BlockSpec(arr.shape, lambda b, z=zeros: z))

    out_nlc = pl.pallas_call(
        _encoder_kernel,
        out_shape=jax.ShapeDtypeStruct((B, 15, 128), jnp.float32),
        grid=(B,),
        in_specs=in_specs,
        out_specs=pl.BlockSpec((None, 15, 128), lambda b: (b, 0, 0)),
        scratch_shapes=[
            pltpu.VMEM((496, 128), jnp.float32),   # pre-pool activation staging
            pltpu.VMEM((64, 128), jnp.float32),    # pooled rows staging
            pltpu.VMEM((24, 128), jnp.float32),    # zero-padded input (pad=2 convs)
        ],
        compiler_params=pltpu.CompilerParams(
            dimension_semantics=("parallel",),     # batch -> both TCs on v7x
        ),
    )(xt, xf, *packed)                             # (B, 15, 128) channels-last

    # Match PyTorch output layout (B, C=128, L=15); tiny final transpose.
    return jnp.transpose(out_nlc, (0, 2, 1))


# ---------------------------------------------------------------------------
# Parameters (deterministic, synthetic)
# ---------------------------------------------------------------------------
def init_params(key):
    def conv_bn(key, cout, cin, k):
        k1, k2, k3, k4, k5, k6 = jax.random.split(key, 6)
        return dict(
            w=0.05 * jax.random.normal(k1, (cout, cin, k), jnp.float32),
            b=0.05 * jax.random.normal(k2, (cout,), jnp.float32),
            gamma=1.0 + 0.1 * jax.random.normal(k3, (cout,), jnp.float32),
            beta=0.1 * jax.random.normal(k4, (cout,), jnp.float32),
            mean=0.1 * jax.random.normal(k5, (cout,), jnp.float32),
            var=jax.random.uniform(k6, (cout,), jnp.float32, 0.5, 1.5),
        )

    ks = jax.random.split(key, 8)
    return dict(
        conv_time=conv_bn(ks[0], 64, 1, FS // 2),      # k=50, stride=6
        conv_time_1=conv_bn(ks[1], 128, 64, 8),
        conv_time_2=conv_bn(ks[2], 128, 128, 8),
        conv_time_3=conv_bn(ks[3], 128, 128, 8),
        conv_fre=conv_bn(ks[4], 64, 1, FS * 4),        # k=400, stride=50, pad=2
        conv_fre_1=conv_bn(ks[5], 128, 64, 6),
        conv_fre_2=conv_bn(ks[6], 128, 128, 6),
        conv_fre_3=conv_bn(ks[7], 128, 128, 6),
    )


if __name__ == "__main__":
    key = jax.random.PRNGKey(0)
    k_param, k_x = jax.random.split(key)
    params = init_params(k_param)

    B = 2
    x = jax.random.normal(k_x, (B, 1, 3000), jnp.float32)  # NCL, as in PyTorch

    out = jax.block_until_ready(encoder_forward(params, x))

    assert out.shape == (B, 128, 15), out.shape
    assert bool(jnp.all(jnp.isfinite(out)))
    print("KERNEL_OK")
</pallas_src>

<mosaic_0001>
module attributes {stable_mosaic.version = 11 : i64} {
  func.func @_encoder_kernel(%arg0: i32, %arg1: memref<1x492x50xbf16, #tpu.memory_space<vmem>>, %arg2: memref<1x53x400xbf16, #tpu.memory_space<vmem>>, %arg3: memref<50x64xbf16, #tpu.memory_space<vmem>>, %arg4: memref<1x64xf32, #tpu.memory_space<vmem>>, %arg5: memref<1x64xf32, #tpu.memory_space<vmem>>, %arg6: memref<8x64x128xbf16, #tpu.memory_space<vmem>>, %arg7: memref<1x128xf32, #tpu.memory_space<vmem>>, %arg8: memref<1x128xf32, #tpu.memory_space<vmem>>, %arg9: memref<8x128x128xbf16, #tpu.memory_space<vmem>>, %arg10: memref<1x128xf32, #tpu.memory_space<vmem>>, %arg11: memref<1x128xf32, #tpu.memory_space<vmem>>, %arg12: memref<8x128x128xbf16, #tpu.memory_space<vmem>>, %arg13: memref<1x128xf32, #tpu.memory_space<vmem>>, %arg14: memref<1x128xf32, #tpu.memory_space<vmem>>, %arg15: memref<400x64xbf16, #tpu.memory_space<vmem>>, %arg16: memref<1x64xf32, #tpu.memory_space<vmem>>, %arg17: memref<1x64xf32, #tpu.memory_space<vmem>>, %arg18: memref<6x64x128xbf16, #tpu.memory_space<vmem>>, %arg19: memref<1x128xf32, #tpu.memory_space<vmem>>, %arg20: memref<1x128xf32, #tpu.memory_space<vmem>>, %arg21: memref<6x128x128xbf16, #tpu.memory_space<vmem>>, %arg22: memref<1x128xf32, #tpu.memory_space<vmem>>, %arg23: memref<1x128xf32, #tpu.memory_space<vmem>>, %arg24: memref<6x128x128xbf16, #tpu.memory_space<vmem>>, %arg25: memref<1x128xf32, #tpu.memory_space<vmem>>, %arg26: memref<1x128xf32, #tpu.memory_space<vmem>>, %arg27: memref<1x15x128xf32, #tpu.memory_space<vmem>>, %arg28: memref<496x128xf32, #tpu.memory_space<vmem>>, %arg29: memref<64x128xf32, #tpu.memory_space<vmem>>, %arg30: memref<24x128xf32, #tpu.memory_space<vmem>>) attributes {dimension_semantics = [#tpu.dimension_semantics<parallel>], iteration_bounds = array<i64: 2>, scalar_prefetch = 0 : i64, scratch_operands = 3 : i64, tpu.core_type = #tpu.core_type<tc>, window_params = [{transform_indices = @transform_0, window_bounds = array<i64: 1, 492, 50>}, {transform_indices = @transform_1, window_bounds = array<i64: 1, 53, 400>}, {pipeline_mode = #tpu.pipeline_mode<synchronous>, transform_indices = @transform_2, window_bounds = array<i64: 50, 64>}, {pipeline_mode = #tpu.pipeline_mode<synchronous>, transform_indices = @transform_3, window_bounds = array<i64: 1, 64>}, {pipeline_mode = #tpu.pipeline_mode<synchronous>, transform_indices = @transform_4, window_bounds = array<i64: 1, 64>}, {pipeline_mode = #tpu.pipeline_mode<synchronous>, transform_indices = @transform_5, window_bounds = array<i64: 8, 64, 128>}, {pipeline_mode = #tpu.pipeline_mode<synchronous>, transform_indices = @transform_6, window_bounds = array<i64: 1, 128>}, {pipeline_mode = #tpu.pipeline_mode<synchronous>, transform_indices = @transform_7, window_bounds = array<i64: 1, 128>}, {pipeline_mode = #tpu.pipeline_mode<synchronous>, transform_indices = @transform_8, window_bounds = array<i64: 8, 128, 128>}, {pipeline_mode = #tpu.pipeline_mode<synchronous>, transform_indices = @transform_9, window_bounds = array<i64: 1, 128>}, {pipeline_mode = #tpu.pipeline_mode<synchronous>, transform_indices = @transform_10, window_bounds = array<i64: 1, 128>}, {pipeline_mode = #tpu.pipeline_mode<synchronous>, transform_indices = @transform_11, window_bounds = array<i64: 8, 128, 128>}, {pipeline_mode = #tpu.pipeline_mode<synchronous>, transform_indices = @transform_12, window_bounds = array<i64: 1, 128>}, {pipeline_mode = #tpu.pipeline_mode<synchronous>, transform_indices = @transform_13, window_bounds = array<i64: 1, 128>}, {pipeline_mode = #tpu.pipeline_mode<synchronous>, transform_indices = @transform_14, window_bounds = array<i64: 400, 64>}, {pipeline_mode = #tpu.pipeline_mode<synchronous>, transform_indices = @transform_15, window_bounds = array<i64: 1, 64>}, {pipeline_mode = #tpu.pipeline_mode<synchronous>, transform_indices = @transform_16, window_bounds = array<i64: 1, 64>}, {pipeline_mode = #tpu.pipeline_mode<synchronous>, transform_indices = @transform_17, window_bounds = array<i64: 6, 64, 128>}, {pipeline_mode = #tpu.pipeline_mode<synchronous>, transform_indices = @transform_18, window_bounds = array<i64: 1, 128>}, {pipeline_mode = #tpu.pipeline_mode<synchronous>, transform_indices = @transform_19, window_bounds = array<i64: 1, 128>}, {pipeline_mode = #tpu.pipeline_mode<synchronous>, transform_indices = @transform_20, window_bounds = array<i64: 6, 128, 128>}, {pipeline_mode = #tpu.pipeline_mode<synchronous>, transform_indices = @transform_21, window_bounds = array<i64: 1, 128>}, {pipeline_mode = #tpu.pipeline_mode<synchronous>, transform_indices = @transform_22, window_bounds = array<i64: 1, 128>}, {pipeline_mode = #tpu.pipeline_mode<synchronous>, transform_indices = @transform_23, window_bounds = array<i64: 6, 128, 128>}, {pipeline_mode = #tpu.pipeline_mode<synchronous>, transform_indices = @transform_24, window_bounds = array<i64: 1, 128>}, {pipeline_mode = #tpu.pipeline_mode<synchronous>, transform_indices = @transform_25, window_bounds = array<i64: 1, 128>}, {transform_indices = @transform_26, window_bounds = array<i64: 1, 15, 128>}]} {
    %c0 = arith.constant 0 : index
    %c0_0 = arith.constant 0 : index
    %c0_1 = arith.constant 0 : index
    %0 = vector.load %arg1[%c0, %c0_0, %c0_1] : memref<1x492x50xbf16, #tpu.memory_space<vmem>>, vector<1x492x50xbf16>
    %1 = vector.shape_cast %0 : vector<1x492x50xbf16> to vector<492x50xbf16>
    %c0_2 = arith.constant 0 : index
    %c0_3 = arith.constant 0 : index
    %2 = vector.load %arg3[%c0_2, %c0_3] : memref<50x64xbf16, #tpu.memory_space<vmem>>, vector<50x64xbf16>
    %cst = arith.constant dense<0.000000e+00> : vector<492x64xf32>
    %3 = tpu.matmul %1, %2, %cst {dimension_numbers = #tpu.dot_dimension_numbers<[1], [0], [0], [1], [0, 0, 1, 1], [], []>} : vector<492x50xbf16>, vector<50x64xbf16>, vector<492x64xf32> -> vector<492x64xf32>
    %c0_4 = arith.constant 0 : index
    %c0_5 = arith.constant 0 : index
    %4 = vector.load %arg4[%c0_4, %c0_5] : memref<1x64xf32, #tpu.memory_space<vmem>>, vector<1x64xf32>
    %5 = vector.broadcast %4 : vector<1x64xf32> to vector<492x64xf32>
    %6 = arith.mulf %3, %5 : vector<492x64xf32>
    %c0_6 = arith.constant 0 : index
    %c0_7 = arith.constant 0 : index
    %7 = vector.load %arg5[%c0_6, %c0_7] : memref<1x64xf32, #tpu.memory_space<vmem>>, vector<1x64xf32>
    %8 = vector.broadcast %7 : vector<1x64xf32> to vector<492x64xf32>
    %9 = arith.addf %6, %8 : vector<492x64xf32>
    %cst_8 = arith.constant 0.000000e+00 : f32
    %10 = vector.broadcast %cst_8 : f32 to vector<492x64xf32>
    %11 = arith.maximumf %9, %10 : vector<492x64xf32>
    %c0_9 = arith.constant 0 : index
    %c0_10 = arith.constant 0 : index
    %12 = vector.load %arg28[%c0_9, %c0_10] : memref<496x128xf32, #tpu.memory_space<vmem>>, vector<492x64xf32>
    tpu.vector_store %arg28[%c0_9, %c0_10], %11 {strides = array<i32>} : memref<496x128xf32, #tpu.memory_space<vmem>>, vector<492x64xf32>,
    %c0_11 = arith.constant 0 : index
    %c0_12 = arith.constant 0 : index
    %13 = vector.load %arg28[%c0_11, %c0_12] : memref<496x128xf32, #tpu.memory_space<vmem>>, vector<8x64xf32>
    %cst_13 = arith.constant dense<0xFF800000> : vector<64xf32>
    %14 = vector.multi_reduction <maximumf>, %13, %cst_13 [0] : vector<8x64xf32> to vector<64xf32>
    %15 = vector.shape_cast %14 : vector<64xf32> to vector<1x64xf32>
    %c0_14 = arith.constant 0 : index
    %c0_15 = arith.constant 0 : index
    %16 = vector.load %arg29[%c0_14, %c0_15] : memref<64x128xf32, #tpu.memory_space<vmem>>, vector<1x64xf32>
    tpu.vector_store %arg29[%c0_14, %c0_15], %15 {strides = array<i32>} : memref<64x128xf32, #tpu.memory_space<vmem>>, vector<1x64xf32>,
    %c8 = arith.constant 8 : index
    %c0_16 = arith.constant 0 : index
    %17 = vector.load %arg28[%c8, %c0_16] : memref<496x128xf32, #tpu.memory_space<vmem>>, vector<8x64xf32>
    %cst_17 = arith.constant dense<0xFF800000> : vector<64xf32>
    %18 = vector.multi_reduction <maximumf>, %17, %cst_17 [0] : vector<8x64xf32> to vector<64xf32>
    %19 = vector.shape_cast %18 : vector<64xf32> to vector<1x64xf32>
    %c1 = arith.constant 1 : index
    %c0_18 = arith.constant 0 : index
    %20 = vector.load %arg29[%c1, %c0_18] : memref<64x128xf32, #tpu.memory_space<vmem>>, vector<1x64xf32>
    tpu.vector_store %arg29[%c1, %c0_18], %19 {strides = array<i32>} : memref<64x128xf32, #tpu.memory_space<vmem>>, vector<1x64xf32>,
    %c16 = arith.constant 16 : index
    %c0_19 = arith.constant 0 : index
    %21 = vector.load %arg28[%c16, %c0_19] : memref<496x128xf32, #tpu.memory_space<vmem>>, vector<8x64xf32>
    %cst_20 = arith.constant dense<0xFF800000> : vector<64xf32>
    %22 = vector.multi_reduction <maximumf>, %21, %cst_20 [0] : vector<8x64xf32> to vector<64xf32>
    %23 = vector.shape_cast %22 : vector<64xf32> to vector<1x64xf32>
    %c2 = arith.constant 2 : index
    %c0_21 = arith.constant 0 : index
    %24 = vector.load %arg29[%c2, %c0_21] : memref<64x128xf32, #tpu.memory_space<vmem>>, vector<1x64xf32>
    tpu.vector_store %arg29[%c2, %c0_21], %23 {strides = array<i32>} : memref<64x128xf32, #tpu.memory_space<vmem>>, vector<1x64xf32>,
    %c24 = arith.constant 24 : index
    %c0_22 = arith.constant 0 : index
    %25 = vector.load %arg28[%c24, %c0_22] : memref<496x128xf32, #tpu.memory_space<vmem>>, vector<8x64xf32>
    %cst_23 = arith.constant dense<0xFF800000> : vector<64xf32>
    %26 = vector.multi_reduction <maximumf>, %25, %cst_23 [0] : vector<8x64xf32> to vector<64xf32>
    %27 = vector.shape_cast %26 : vector<64xf32> to vector<1x64xf32>
    %c3 = arith.constant 3 : index
    %c0_24 = arith.constant 0 : index
    %28 = vector.load %arg29[%c3, %c0_24] : memref<64x128xf32, #tpu.memory_space<vmem>>, vector<1x64xf32>
    tpu.vector_store %arg29[%c3, %c0_24], %27 {strides = array<i32>} : memref<64x128xf32, #tpu.memory_space<vmem>>, vector<1x64xf32>,
    %c32 = arith.constant 32 : index
    %c0_25 = arith.constant 0 : index
    %29 = vector.load %arg28[%c32, %c0_25] : memref<496x128xf32, #tpu.memory_space<vmem>>, vector<8x64xf32>
    %cst_26 = arith.constant dense<0xFF800000> : vector<64xf32>
    %30 = vector.multi_reduction <maximumf>, %29, %cst_26 [0] : vector<8x64xf32> to vector<64xf32>
    %31 = vector.shape_cast %30 : vector<64xf32> to vector<1x64xf32>
    %c4 = arith.constant 4 : index
    %c0_27 = arith.constant 0 : index
    %32 = vector.load %arg29[%c4, %c0_27] : memref<64x128xf32, #tpu.memory_space<vmem>>, vector<1x64xf32>
    tpu.vector_store %arg29[%c4, %c0_27], %31 {strides = array<i32>} : memref<64x128xf32, #tpu.memory_space<vmem>>, vector<1x64xf32>,
    %c40 = arith.constant 40 : index
    %c0_28 = arith.constant 0 : index
    %33 = vector.load %arg28[%c40, %c0_28] : memref<496x128xf32, #tpu.memory_space<vmem>>, vector<8x64xf32>
    %cst_29 = arith.constant dense<0xFF800000> : vector<64xf32>
    %34 = vector.multi_reduction <maximumf>, %33, %cst_29 [0] : vector<8x64xf32> to vector<64xf32>
    %35 = vector.shape_cast %34 : vector<64xf32> to vector<1x64xf32>
    %c5 = arith.constant 5 : index
    %c0_30 = arith.constant 0 : index
    %36 = vector.load %arg29[%c5, %c0_30] : memref<64x128xf32, #tpu.memory_space<vmem>>, vector<1x64xf32>
    tpu.vector_store %arg29[%c5, %c0_30], %35 {strides = array<i32>} : memref<64x128xf32, #tpu.memory_space<vmem>>, vector<1x64xf32>,
    %c48 = arith.constant 48 : index
    %c0_31 = arith.constant 0 : index
    %37 = vector.load %arg28[%c48, %c0_31] : memref<496x128xf32, #tpu.memory_space<vmem>>, vector<8x64xf32>
    %cst_32 = arith.constant dense<0xFF800000> : vector<64xf32>
    %38 = vector.multi_reduction <maximumf>, %37, %cst_32 [0] : vector<8x64xf32> to vector<64xf32>
    %39 = vector.shape_cast %38 : vector<64xf32> to vector<1x64xf32>
    %c6 = arith.constant 6 : index
    %c0_33 = arith.constant 0 : index
    %40 = vector.load %arg29[%c6, %c0_33] : memref<64x128xf32, #tpu.memory_space<vmem>>, vector<1x64xf32>
    tpu.vector_store %arg29[%c6, %c0_33], %39 {strides = array<i32>} : memref<64x128xf32, #tpu.memory_space<vmem>>, vector<1x64xf32>,
    %c56 = arith.constant 56 : index
    %c0_34 = arith.constant 0 : index
    %41 = vector.load %arg28[%c56, %c0_34] : memref<496x128xf32, #tpu.memory_space<vmem>>, vector<8x64xf32>
    %cst_35 = arith.constant dense<0xFF800000> : vector<64xf32>
    %42 = vector.multi_reduction <maximumf>, %41, %cst_35 [0] : vector<8x64xf32> to vector<64xf32>
    %43 = vector.shape_cast %42 : vector<64xf32> to vector<1x64xf32>
    %c7 = arith.constant 7 : index
    %c0_36 = arith.constant 0 : index
    %44 = vector.load %arg29[%c7, %c0_36] : memref<64x128xf32, #tpu.memory_space<vmem>>, vector<1x64xf32>
    tpu.vector_store %arg29[%c7, %c0_36], %43 {strides = array<i32>} : memref<64x128xf32, #tpu.memory_space<vmem>>, vector<1x64xf32>,
    %c64 = arith.constant 64 : index
    %c0_37 = arith.constant 0 : index
    %45 = vector.load %arg28[%c64, %c0_37] : memref<496x128xf32, #tpu.memory_space<vmem>>, vector<8x64xf32>
    %cst_38 = arith.constant dense<0xFF800000> : vector<64xf32>
    %46 = vector.multi_reduction <maximumf>, %45, %cst_38 [0] : vector<8x64xf32> to vector<64xf32>
    %47 = vector.shape_cast %46 : vector<64xf32> to vector<1x64xf32>
    %c8_39 = arith.constant 8 : index
    %c0_40 = arith.constant 0 : index
    %48 = vector.load %arg29[%c8_39, %c0_40] : memref<64x128xf32, #tpu.memory_space<vmem>>, vector<1x64xf32>
    tpu.vector_store %arg29[%c8_39, %c0_40], %47 {strides = array<i32>} : memref<64x128xf32, #tpu.memory_space<vmem>>, vector<1x64xf32>,
    %c72 = arith.constant 72 : index
    %c0_41 = arith.constant 0 : index
    %49 = vector.load %arg28[%c72, %c0_41] : memref<496x128xf32, #tpu.memory_space<vmem>>, vector<8x64xf32>
    %cst_42 = arith.constant dense<0xFF800000> : vector<64xf32>
    %50 = vector.multi_reduction <maximumf>, %49, %cst_42 [0] : vector<8x64xf32> to vector<64xf32>
    %51 = vector.shape_cast %50 : vector<64xf32> to vector<1x64xf32>
    %c9 = arith.constant 9 : index
    %c0_43 = arith.constant 0 : index
    %52 = vector.load %arg29[%c9, %c0_43] : memref<64x128xf32, #tpu.memory_space<vmem>>, vector<1x64xf32>
    tpu.vector_store %arg29[%c9, %c0_43], %51 {strides = array<i32>} : memref<64x128xf32, #tpu.memory_space<vmem>>, vector<1x64xf32>,
    %c80 = arith.constant 80 : index
    %c0_44 = arith.constant 0 : index
    %53 = vector.load %arg28[%c80, %c0_44] : memref<496x128xf32, #tpu.memory_space<vmem>>, vector<8x64xf32>
    %cst_45 = arith.constant dense<0xFF800000> : vector<64xf32>
    %54 = vector.multi_reduction <maximumf>, %53, %cst_45 [0] : vector<8x64xf32> to vector<64xf32>
    %55 = vector.shape_cast %54 : vector<64xf32> to vector<1x64xf32>
    %c10 = arith.constant 10 : index
    %c0_46 = arith.constant 0 : index
    %56 = vector.load %arg29[%c10, %c0_46] : memref<64x128xf32, #tpu.memory_space<vmem>>, vector<1x64xf32>
    tpu.vector_store %arg29[%c10, %c0_46], %55 {strides = array<i32>} : memref<64x128xf32, #tpu.memory_space<vmem>>, vector<1x64xf32>,
    %c88 = arith.constant 88 : index
    %c0_47 = arith.constant 0 : index
    %57 = vector.load %arg28[%c88, %c0_47] : memref<496x128xf32, #tpu.memory_space<vmem>>, vector<8x64xf32>
    %cst_48 = arith.constant dense<0xFF800000> : vector<64xf32>
    %58 = vector.multi_reduction <maximumf>, %57, %cst_48 [0] : vector<8x64xf32> to vector<64xf32>
    %59 = vector.shape_cast %58 : vector<64xf32> to vector<1x64xf32>
    %c11 = arith.constant 11 : index
    %c0_49 = arith.constant 0 : index
    %60 = vector.load %arg29[%c11, %c0_49] : memref<64x128xf32, #tpu.memory_space<vmem>>, vector<1x64xf32>
    tpu.vector_store %arg29[%c11, %c0_49], %59 {strides = array<i32>} : memref<64x128xf32, #tpu.memory_space<vmem>>, vector<1x64xf32>,
    %c96 = arith.constant 96 : index
    %c0_50 = arith.constant 0 : index
    %61 = vector.load %arg28[%c96, %c0_50] : memref<496x128xf32, #tpu.memory_space<vmem>>, vector<8x64xf32>
    %cst_51 = arith.constant dense<0xFF800000> : vector<64xf32>
    %62 = vector.multi_reduction <maximumf>, %61, %cst_51 [0] : vector<8x64xf32> to vector<64xf32>
    %63 = vector.shape_cast %62 : vector<64xf32> to vector<1x64xf32>
    %c12 = arith.constant 12 : index
    %c0_52 = arith.constant 0 : index
    %64 = vector.load %arg29[%c12, %c0_52] : memref<64x128xf32, #tpu.memory_space<vmem>>, vector<1x64xf32>
    tpu.vector_store %arg29[%c12, %c0_52], %63 {strides = array<i32>} : memref<64x128xf32, #tpu.memory_space<vmem>>, vector<1x64xf32>,
    %c104 = arith.constant 104 : index
    %c0_53 = arith.constant 0 : index
    %65 = vector.load %arg28[%c104, %c0_53] : memref<496x128xf32, #tpu.memory_space<vmem>>, vector<8x64xf32>
    %cst_54 = arith.constant dense<0xFF800000> : vector<64xf32>
    %66 = vector.multi_reduction <maximumf>, %65, %cst_54 [0] : vector<8x64xf32> to vector<64xf32>
    %67 = vector.shape_cast %66 : vector<64xf32> to vector<1x64xf32>
    %c13 = arith.constant 13 : index
    %c0_55 = arith.constant 0 : index
    %68 = vector.load %arg29[%c13, %c0_55] : memref<64x128xf32, #tpu.memory_space<vmem>>, vector<1x64xf32>
    tpu.vector_store %arg29[%c13, %c0_55], %67 {strides = array<i32>} : memref<64x128xf32, #tpu.memory_space<vmem>>, vector<1x64xf32>,
    %c112 = arith.constant 112 : index
    %c0_56 = arith.constant 0 : index
    %69 = vector.load %arg28[%c112, %c0_56] : memref<496x128xf32, #tpu.memory_space<vmem>>, vector<8x64xf32>
    %cst_57 = arith.constant dense<0xFF800000> : vector<64xf32>
    %70 = vector.multi_reduction <maximumf>, %69, %cst_57 [0] : vector<8x64xf32> to vector<64xf32>
    %71 = vector.shape_cast %70 : vector<64xf32> to vector<1x64xf32>
    %c14 = arith.constant 14 : index
    %c0_58 = arith.constant 0 : index
    %72 = vector.load %arg29[%c14, %c0_58] : memref<64x128xf32, #tpu.memory_space<vmem>>, vector<1x64xf32>
    tpu.vector_store %arg29[%c14, %c0_58], %71 {strides = array<i32>} : memref<64x128xf32, #tpu.memory_space<vmem>>, vector<1x64xf32>,
    %c120 = arith.constant 120 : index
    %c0_59 = arith.constant 0 : index
    %73 = vector.load %arg28[%c120, %c0_59] : memref<496x128xf32, #tpu.memory_space<vmem>>, vector<8x64xf32>
    %cst_60 = arith.constant dense<0xFF800000> : vector<64xf32>
    %74 = vector.multi_reduction <maximumf>, %73, %cst_60 [0] : vector<8x64xf32> to vector<64xf32>
    %75 = vector.shape_cast %74 : vector<64xf32> to vector<1x64xf32>
    %c15 = arith.constant 15 : index
    %c0_61 = arith.constant 0 : index
    %76 = vector.load %arg29[%c15, %c0_61] : memref<64x128xf32, #tpu.memory_space<vmem>>, vector<1x64xf32>
    tpu.vector_store %arg29[%c15, %c0_61], %75 {strides = array<i32>} : memref<64x128xf32, #tpu.memory_space<vmem>>, vector<1x64xf32>,
    %c128 = arith.constant 128 : index
    %c0_62 = arith.constant 0 : index
    %77 = vector.load %arg28[%c128, %c0_62] : memref<496x128xf32, #tpu.memory_space<vmem>>, vector<8x64xf32>
    %cst_63 = arith.constant dense<0xFF800000> : vector<64xf32>
    %78 = vector.multi_reduction <maximumf>, %77, %cst_63 [0] : vector<8x64xf32> to vector<64xf32>
    %79 = vector.shape_cast %78 : vector<64xf32> to vector<1x64xf32>
    %c16_64 = arith.constant 16 : index
    %c0_65 = arith.constant 0 : index
    %80 = vector.load %arg29[%c16_64, %c0_65] : memref<64x128xf32, #tpu.memory_space<vmem>>, vector<1x64xf32>
    tpu.vector_store %arg29[%c16_64, %c0_65], %79 {strides = array<i32>} : memref<64x128xf32, #tpu.memory_space<vmem>>, vector<1x64xf32>,
    %c136 = arith.constant 136 : index
    %c0_66 = arith.constant 0 : index
    %81 = vector.load %arg28[%c136, %c0_66] : memref<496x128xf32, #tpu.memory_space<vmem>>, vector<8x64xf32>
    %cst_67 = arith.constant dense<0xFF800000> : vector<64xf32>
    %82 = vector.multi_reduction <maximumf>, %81, %cst_67 [0] : vector<8x64xf32> to vector<64xf32>
    %83 = vector.shape_cast %82 : vector<64xf32> to vector<1x64xf32>
    %c17 = arith.constant 17 : index
    %c0_68 = arith.constant 0 : index
    %84 = vector.load %arg29[%c17, %c0_68] : memref<64x128xf32, #tpu.memory_space<vmem>>, vector<1x64xf32>
    tpu.vector_store %arg29[%c17, %c0_68], %83 {strides = array<i32>} : memref<64x128xf32, #tpu.memory_space<vmem>>, vector<1x64xf32>,
    %c144 = arith.constant 144 : index
    %c0_69 = arith.constant 0 : index
    %85 = vector.load %arg28[%c144, %c0_69] : memref<496x128xf32, #tpu.memory_space<vmem>>, vector<8x64xf32>
    %cst_70 = arith.constant dense<0xFF800000> : vector<64xf32>
    %86 = vector.multi_reduction <maximumf>, %85, %cst_70 [0] : vector<8x64xf32> to vector<64xf32>
    %87 = vector.shape_cast %86 : vector<64xf32> to vector<1x64xf32>
    %c18 = arith.constant 18 : index
    %c0_71 = arith.constant 0 : index
    %88 = vector.load %arg29[%c18, %c0_71] : memref<64x128xf32, #tpu.memory_space<vmem>>, vector<1x64xf32>
    tpu.vector_store %arg29[%c18, %c0_71], %87 {strides = array<i32>} : memref<64x128xf32, #tpu.memory_space<vmem>>, vector<1x64xf32>,
    %c152 = arith.constant 152 : index
    %c0_72 = arith.constant 0 : index
    %89 = vector.load %arg28[%c152, %c0_72] : memref<496x128xf32, #tpu.memory_space<vmem>>, vector<8x64xf32>
    %cst_73 = arith.constant dense<0xFF800000> : vector<64xf32>
    %90 = vector.multi_reduction <maximumf>, %89, %cst_73 [0] : vector<8x64xf32> to vector<64xf32>
    %91 = vector.shape_cast %90 : vector<64xf32> to vector<1x64xf32>
    %c19 = arith.constant 19 : index
    %c0_74 = arith.constant 0 : index
    %92 = vector.load %arg29[%c19, %c0_74] : memref<64x128xf32, #tpu.memory_space<vmem>>, vector<1x64xf32>
    tpu.vector_store %arg29[%c19, %c0_74], %91 {strides = array<i32>} : memref<64x128xf32, #tpu.memory_space<vmem>>, vector<1x64xf32>,
    %c160 = arith.constant 160 : index
    %c0_75 = arith.constant 0 : index
    %93 = vector.load %arg28[%c160, %c0_75] : memref<496x128xf32, #tpu.memory_space<vmem>>, vector<8x64xf32>
    %cst_76 = arith.constant dense<0xFF800000> : vector<64xf32>
    %94 = vector.multi_reduction <maximumf>, %93, %cst_76 [0] : vector<8x64xf32> to vector<64xf32>
    %95 = vector.shape_cast %94 : vector<64xf32> to vector<1x64xf32>
    %c20 = arith.constant 20 : index
    %c0_77 = arith.constant 0 : index
    %96 = vector.load %arg29[%c20, %c0_77] : memref<64x128xf32, #tpu.memory_space<vmem>>, vector<1x64xf32>
    tpu.vector_store %arg29[%c20, %c0_77], %95 {strides = array<i32>} : memref<64x128xf32, #tpu.memory_space<vmem>>, vector<1x64xf32>,
    %c168 = arith.constant 168 : index
    %c0_78 = arith.constant 0 : index
    %97 = vector.load %arg28[%c168, %c0_78] : memref<496x128xf32, #tpu.memory_space<vmem>>, vector<8x64xf32>
    %cst_79 = arith.constant dense<0xFF800000> : vector<64xf32>
    %98 = vector.multi_reduction <maximumf>, %97, %cst_79 [0] : vector<8x64xf32> to vector<64xf32>
    %99 = vector.shape_cast %98 : vector<64xf32> to vector<1x64xf32>
    %c21 = arith.constant 21 : index
    %c0_80 = arith.constant 0 : index
    %100 = vector.load %arg29[%c21, %c0_80] : memref<64x128xf32, #tpu.memory_space<vmem>>, vector<1x64xf32>
    tpu.vector_store %arg29[%c21, %c0_80], %99 {strides = array<i32>} : memref<64x128xf32, #tpu.memory_space<vmem>>, vector<1x64xf32>,
    %c176 = arith.constant 176 : index
    %c0_81 = arith.constant 0 : index
    %101 = vector.load %arg28[%c176, %c0_81] : memref<496x128xf32, #tpu.memory_space<vmem>>, vector<8x64xf32>
    %cst_82 = arith.constant dense<0xFF800000> : vector<64xf32>
    %102 = vector.multi_reduction <maximumf>, %101, %cst_82 [0] : vector<8x64xf32> to vector<64xf32>
    %103 = vector.shape_cast %102 : vector<64xf32> to vector<1x64xf32>
    %c22 = arith.constant 22 : index
    %c0_83 = arith.constant 0 : index
    %104 = vector.load %arg29[%c22, %c0_83] : memref<64x128xf32, #tpu.memory_space<vmem>>, vector<1x64xf32>
    tpu.vector_store %arg29[%c22, %c0_83], %103 {strides = array<i32>} : memref<64x128xf32, #tpu.memory_space<vmem>>, vector<1x64xf32>,
    %c184 = arith.constant 184 : index
    %c0_84 = arith.constant 0 : index
    %105 = vector.load %arg28[%c184, %c0_84] : memref<496x128xf32, #tpu.memory_space<vmem>>, vector<8x64xf32>
    %cst_85 = arith.constant dense<0xFF800000> : vector<64xf32>
    %106 = vector.multi_reduction <maximumf>, %105, %cst_85 [0] : vector<8x64xf32> to vector<64xf32>
    %107 = vector.shape_cast %106 : vector<64xf32> to vector<1x64xf32>
    %c23 = arith.constant 23 : index
    %c0_86 = arith.constant 0 : index
    %108 = vector.load %arg29[%c23, %c0_86] : memref<64x128xf32, #tpu.memory_space<vmem>>, vector<1x64xf32>
    tpu.vector_store %arg29[%c23, %c0_86], %107 {strides = array<i32>} : memref<64x128xf32, #tpu.memory_space<vmem>>, vector<1x64xf32>,
    %c192 = arith.constant 192 : index
    %c0_87 = arith.constant 0 : index
    %109 = vector.load %arg28[%c192, %c0_87] : memref<496x128xf32, #tpu.memory_space<vmem>>, vector<8x64xf32>
    %cst_88 = arith.constant dense<0xFF800000> : vector<64xf32>
    %110 = vector.multi_reduction <maximumf>, %109, %cst_88 [0] : vector<8x64xf32> to vector<64xf32>
    %111 = vector.shape_cast %110 : vector<64xf32> to vector<1x64xf32>
    %c24_89 = arith.constant 24 : index
    %c0_90 = arith.constant 0 : index
    %112 = vector.load %arg29[%c24_89, %c0_90] : memref<64x128xf32, #tpu.memory_space<vmem>>, vector<1x64xf32>
    tpu.vector_store %arg29[%c24_89, %c0_90], %111 {strides = array<i32>} : memref<64x128xf32, #tpu.memory_space<vmem>>, vector<1x64xf32>,
    %c200 = arith.constant 200 : index
    %c0_91 = arith.constant 0 : index
    %113 = vector.load %arg28[%c200, %c0_91] : memref<496x128xf32, #tpu.memory_space<vmem>>, vector<8x64xf32>
    %cst_92 = arith.constant dense<0xFF800000> : vector<64xf32>
    %114 = vector.multi_reduction <maximumf>, %113, %cst_92 [0] : vector<8x64xf32> to vector<64xf32>
    %115 = vector.shape_cast %114 : vector<64xf32> to vector<1x64xf32>
    %c25 = arith.constant 25 : index
    %c0_93 = arith.constant 0 : index
    %116 = vector.load %arg29[%c25, %c0_93] : memref<64x128xf32, #tpu.memory_space<vmem>>, vector<1x64xf32>
    tpu.vector_store %arg29[%c25, %c0_93], %115 {strides = array<i32>} : memref<64x128xf32, #tpu.memory_space<vmem>>, vector<1x64xf32>,
    %c208 = arith.constant 208 : index
    %c0_94 = arith.constant 0 : index
    %117 = vector.load %arg28[%c208, %c0_94] : memref<496x128xf32, #tpu.memory_space<vmem>>, vector<8x64xf32>
    %cst_95 = arith.constant dense<0xFF800000> : vector<64xf32>
    %118 = vector.multi_reduction <maximumf>, %117, %cst_95 [0] : vector<8x64xf32> to vector<64xf32>
    %119 = vector.shape_cast %118 : vector<64xf32> to vector<1x64xf32>
    %c26 = arith.constant 26 : index
    %c0_96 = arith.constant 0 : index
    %120 = vector.load %arg29[%c26, %c0_96] : memref<64x128xf32, #tpu.memory_space<vmem>>, vector<1x64xf32>
    tpu.vector_store %arg29[%c26, %c0_96], %119 {strides = array<i32>} : memref<64x128xf32, #tpu.memory_space<vmem>>, vector<1x64xf32>,
    %c216 = arith.constant 216 : index
    %c0_97 = arith.constant 0 : index
    %121 = vector.load %arg28[%c216, %c0_97] : memref<496x128xf32, #tpu.memory_space<vmem>>, vector<8x64xf32>
    %cst_98 = arith.constant dense<0xFF800000> : vector<64xf32>
    %122 = vector.multi_reduction <maximumf>, %121, %cst_98 [0] : vector<8x64xf32> to vector<64xf32>
    %123 = vector.shape_cast %122 : vector<64xf32> to vector<1x64xf32>
    %c27 = arith.constant 27 : index
    %c0_99 = arith.constant 0 : index
    %124 = vector.load %arg29[%c27, %c0_99] : memref<64x128xf32, #tpu.memory_space<vmem>>, vector<1x64xf32>
    tpu.vector_store %arg29[%c27, %c0_99], %123 {strides = array<i32>} : memref<64x128xf32, #tpu.memory_space<vmem>>, vector<1x64xf32>,
    %c224 = arith.constant 224 : index
    %c0_100 = arith.constant 0 : index
    %125 = vector.load %arg28[%c224, %c0_100] : memref<496x128xf32, #tpu.memory_space<vmem>>, vector<8x64xf32>
    %cst_101 = arith.constant dense<0xFF800000> : vector<64xf32>
    %126 = vector.multi_reduction <maximumf>, %125, %cst_101 [0] : vector<8x64xf32> to vector<64xf32>
    %127 = vector.shape_cast %126 : vector<64xf32> to vector<1x64xf32>
    %c28 = arith.constant 28 : index
    %c0_102 = arith.constant 0 : index
    %128 = vector.load %arg29[%c28, %c0_102] : memref<64x128xf32, #tpu.memory_space<vmem>>, vector<1x64xf32>
    tpu.vector_store %arg29[%c28, %c0_102], %127 {strides = array<i32>} : memref<64x128xf32, #tpu.memory_space<vmem>>, vector<1x64xf32>,
    %c232 = arith.constant 232 : index
    %c0_103 = arith.constant 0 : index
    %129 = vector.load %arg28[%c232, %c0_103] : memref<496x128xf32, #tpu.memory_space<vmem>>, vector<8x64xf32>
    %cst_104 = arith.constant dense<0xFF800000> : vector<64xf32>
    %130 = vector.multi_reduction <maximumf>, %129, %cst_104 [0] : vector<8x64xf32> to vector<64xf32>
    %131 = vector.shape_cast %130 : vector<64xf32> to vector<1x64xf32>
    %c29 = arith.constant 29 : index
    %c0_105 = arith.constant 0 : index
    %132 = vector.load %arg29[%c29, %c0_105] : memref<64x128xf32, #tpu.memory_space<vmem>>, vector<1x64xf32>
    tpu.vector_store %arg29[%c29, %c0_105], %131 {strides = array<i32>} : memref<64x128xf32, #tpu.memory_space<vmem>>, vector<1x64xf32>,
    %c240 = arith.constant 240 : index
    %c0_106 = arith.constant 0 : index
    %133 = vector.load %arg28[%c240, %c0_106] : memref<496x128xf32, #tpu.memory_space<vmem>>, vector<8x64xf32>
    %cst_107 = arith.constant dense<0xFF800000> : vector<64xf32>
    %134 = vector.multi_reduction <maximumf>, %133, %cst_107 [0] : vector<8x64xf32> to vector<64xf32>
    %135 = vector.shape_cast %134 : vector<64xf32> to vector<1x64xf32>
    %c30 = arith.constant 30 : index
    %c0_108 = arith.constant 0 : index
    %136 = vector.load %arg29[%c30, %c0_108] : memref<64x128xf32, #tpu.memory_space<vmem>>, vector<1x64xf32>
    tpu.vector_store %arg29[%c30, %c0_108], %135 {strides = array<i32>} : memref<64x128xf32, #tpu.memory_space<vmem>>, vector<1x64xf32>,
    %c248 = arith.constant 248 : index
    %c0_109 = arith.constant 0 : index
    %137 = vector.load %arg28[%c248, %c0_109] : memref<496x128xf32, #tpu.memory_space<vmem>>, vector<8x64xf32>
    %cst_110 = arith.constant dense<0xFF800000> : vector<64xf32>
    %138 = vector.multi_reduction <maximumf>, %137, %cst_110 [0] : vector<8x64xf32> to vector<64xf32>
    %139 = vector.shape_cast %138 : vector<64xf32> to vector<1x64xf32>
    %c31 = arith.constant 31 : index
    %c0_111 = arith.constant 0 : index
    %140 = vector.load %arg29[%c31, %c0_111] : memref<64x128xf32, #tpu.memory_space<vmem>>, vector<1x64xf32>
    tpu.vector_store %arg29[%c31, %c0_111], %139 {strides = array<i32>} : memref<64x128xf32, #tpu.memory_space<vmem>>, vector<1x64xf32>,
    %c256 = arith.constant 256 : index
    %c0_112 = arith.constant 0 : index
    %141 = vector.load %arg28[%c256, %c0_112] : memref<496x128xf32, #tpu.memory_space<vmem>>, vector<8x64xf32>
    %cst_113 = arith.constant dense<0xFF800000> : vector<64xf32>
    %142 = vector.multi_reduction <maximumf>, %141, %cst_113 [0] : vector<8x64xf32> to vector<64xf32>
    %143 = vector.shape_cast %142 : vector<64xf32> to vector<1x64xf32>
    %c32_114 = arith.constant 32 : index
    %c0_115 = arith.constant 0 : index
    %144 = vector.load %arg29[%c32_114, %c0_115] : memref<64x128xf32, #tpu.memory_space<vmem>>, vector<1x64xf32>
    tpu.vector_store %arg29[%c32_114, %c0_115], %143 {strides = array<i32>} : memref<64x128xf32, #tpu.memory_space<vmem>>, vector<1x64xf32>,
    %c264 = arith.constant 264 : index
    %c0_116 = arith.constant 0 : index
    %145 = vector.load %arg28[%c264, %c0_116] : memref<496x128xf32, #tpu.memory_space<vmem>>, vector<8x64xf32>
    %cst_117 = arith.constant dense<0xFF800000> : vector<64xf32>
    %146 = vector.multi_reduction <maximumf>, %145, %cst_117 [0] : vector<8x64xf32> to vector<64xf32>
    %147 = vector.shape_cast %146 : vector<64xf32> to vector<1x64xf32>
    %c33 = arith.constant 33 : index
    %c0_118 = arith.constant 0 : index
    %148 = vector.load %arg29[%c33, %c0_118] : memref<64x128xf32, #tpu.memory_space<vmem>>, vector<1x64xf32>
    tpu.vector_store %arg29[%c33, %c0_118], %147 {strides = array<i32>} : memref<64x128xf32, #tpu.memory_space<vmem>>, vector<1x64xf32>,
    %c272 = arith.constant 272 : index
    %c0_119 = arith.constant 0 : index
    %149 = vector.load %arg28[%c272, %c0_119] : memref<496x128xf32, #tpu.memory_space<vmem>>, vector<8x64xf32>
    %cst_120 = arith.constant dense<0xFF800000> : vector<64xf32>
    %150 = vector.multi_reduction <maximumf>, %149, %cst_120 [0] : vector<8x64xf32> to vector<64xf32>
    %151 = vector.shape_cast %150 : vector<64xf32> to vector<1x64xf32>
    %c34 = arith.constant 34 : index
    %c0_121 = arith.constant 0 : index
    %152 = vector.load %arg29[%c34, %c0_121] : memref<64x128xf32, #tpu.memory_space<vmem>>, vector<1x64xf32>
    tpu.vector_store %arg29[%c34, %c0_121], %151 {strides = array<i32>} : memref<64x128xf32, #tpu.memory_space<vmem>>, vector<1x64xf32>,
    %c280 = arith.constant 280 : index
    %c0_122 = arith.constant 0 : index
    %153 = vector.load %arg28[%c280, %c0_122] : memref<496x128xf32, #tpu.memory_space<vmem>>, vector<8x64xf32>
    %cst_123 = arith.constant dense<0xFF800000> : vector<64xf32>
    %154 = vector.multi_reduction <maximumf>, %153, %cst_123 [0] : vector<8x64xf32> to vector<64xf32>
    %155 = vector.shape_cast %154 : vector<64xf32> to vector<1x64xf32>
    %c35 = arith.constant 35 : index
    %c0_124 = arith.constant 0 : index
    %156 = vector.load %arg29[%c35, %c0_124] : memref<64x128xf32, #tpu.memory_space<vmem>>, vector<1x64xf32>
    tpu.vector_store %arg29[%c35, %c0_124], %155 {strides = array<i32>} : memref<64x128xf32, #tpu.memory_space<vmem>>, vector<1x64xf32>,
    %c288 = arith.constant 288 : index
    %c0_125 = arith.constant 0 : index
    %157 = vector.load %arg28[%c288, %c0_125] : memref<496x128xf32, #tpu.memory_space<vmem>>, vector<8x64xf32>
    %cst_126 = arith.constant dense<0xFF800000> : vector<64xf32>
    %158 = vector.multi_reduction <maximumf>, %157, %cst_126 [0] : vector<8x64xf32> to vector<64xf32>
    %159 = vector.shape_cast %158 : vector<64xf32> to vector<1x64xf32>
    %c36 = arith.constant 36 : index
    %c0_127 = arith.constant 0 : index
    %160 = vector.load %arg29[%c36, %c0_127] : memref<64x128xf32, #tpu.memory_space<vmem>>, vector<1x64xf32>
    tpu.vector_store %arg29[%c36, %c0_127], %159 {strides = array<i32>} : memref<64x128xf32, #tpu.memory_space<vmem>>, vector<1x64xf32>,
    %c296 = arith.constant 296 : index
    %c0_128 = arith.constant 0 : index
    %161 = vector.load %arg28[%c296, %c0_128] : memref<496x128xf32, #tpu.memory_space<vmem>>, vector<8x64xf32>
    %cst_129 = arith.constant dense<0xFF800000> : vector<64xf32>
    %162 = vector.multi_reduction <maximumf>, %161, %cst_129 [0] : vector<8x64xf32> to vector<64xf32>
    %163 = vector.shape_cast %162 : vector<64xf32> to vector<1x64xf32>
    %c37 = arith.constant 37 : index
    %c0_130 = arith.constant 0 : index
    %164 = vector.load %arg29[%c37, %c0_130] : memref<64x128xf32, #tpu.memory_space<vmem>>, vector<1x64xf32>
    tpu.vector_store %arg29[%c37, %c0_130], %163 {strides = array<i32>} : memref<64x128xf32, #tpu.memory_space<vmem>>, vector<1x64xf32>,
    %c304 = arith.constant 304 : index
    %c0_131 = arith.constant 0 : index
    %165 = vector.load %arg28[%c304, %c0_131] : memref<496x128xf32, #tpu.memory_space<vmem>>, vector<8x64xf32>
    %cst_132 = arith.constant dense<0xFF800000> : vector<64xf32>
    %166 = vector.multi_reduction <maximumf>, %165, %cst_132 [0] : vector<8x64xf32> to vector<64xf32>
    %167 = vector.shape_cast %166 : vector<64xf32> to vector<1x64xf32>
    %c38 = arith.constant 38 : index
    %c0_133 = arith.constant 0 : index
    %168 = vector.load %arg29[%c38, %c0_133] : memref<64x128xf32, #tpu.memory_space<vmem>>, vector<1x64xf32>
    tpu.vector_store %arg29[%c38, %c0_133], %167 {strides = array<i32>} : memref<64x128xf32, #tpu.memory_space<vmem>>, vector<1x64xf32>,
    %c312 = arith.constant 312 : index
    %c0_134 = arith.constant 0 : index
    %169 = vector.load %arg28[%c312, %c0_134] : memref<496x128xf32, #tpu.memory_space<vmem>>, vector<8x64xf32>
    %cst_135 = arith.constant dense<0xFF800000> : vector<64xf32>
    %170 = vector.multi_reduction <maximumf>, %169, %cst_135 [0] : vector<8x64xf32> to vector<64xf32>
    %171 = vector.shape_cast %170 : vector<64xf32> to vector<1x64xf32>
    %c39 = arith.constant 39 : index
    %c0_136 = arith.constant 0 : index
    %172 = vector.load %arg29[%c39, %c0_136] : memref<64x128xf32, #tpu.memory_space<vmem>>, vector<1x64xf32>
    tpu.vector_store %arg29[%c39, %c0_136], %171 {strides = array<i32>} : memref<64x128xf32, #tpu.memory_space<vmem>>, vector<1x64xf32>,
    %c320 = arith.constant 320 : index
    %c0_137 = arith.constant 0 : index
    %173 = vector.load %arg28[%c320, %c0_137] : memref<496x128xf32, #tpu.memory_space<vmem>>, vector<8x64xf32>
    %cst_138 = arith.constant dense<0xFF800000> : vector<64xf32>
    %174 = vector.multi_reduction <maximumf>, %173, %cst_138 [0] : vector<8x64xf32> to vector<64xf32>
    %175 = vector.shape_cast %174 : vector<64xf32> to vector<1x64xf32>
    %c40_139 = arith.constant 40 : index
    %c0_140 = arith.constant 0 : index
    %176 = vector.load %arg29[%c40_139, %c0_140] : memref<64x128xf32, #tpu.memory_space<vmem>>, vector<1x64xf32>
    tpu.vector_store %arg29[%c40_139, %c0_140], %175 {strides = array<i32>} : memref<64x128xf32, #tpu.memory_space<vmem>>, vector<1x64xf32>,
    %c328 = arith.constant 328 : index
    %c0_141 = arith.constant 0 : index
    %177 = vector.load %arg28[%c328, %c0_141] : memref<496x128xf32, #tpu.memory_space<vmem>>, vector<8x64xf32>
    %cst_142 = arith.constant dense<0xFF800000> : vector<64xf32>
    %178 = vector.multi_reduction <maximumf>, %177, %cst_142 [0] : vector<8x64xf32> to vector<64xf32>
    %179 = vector.shape_cast %178 : vector<64xf32> to vector<1x64xf32>
    %c41 = arith.constant 41 : index
    %c0_143 = arith.constant 0 : index
    %180 = vector.load %arg29[%c41, %c0_143] : memref<64x128xf32, #tpu.memory_space<vmem>>, vector<1x64xf32>
    tpu.vector_store %arg29[%c41, %c0_143], %179 {strides = array<i32>} : memref<64x128xf32, #tpu.memory_space<vmem>>, vector<1x64xf32>,
    %c336 = arith.constant 336 : index
    %c0_144 = arith.constant 0 : index
    %181 = vector.load %arg28[%c336, %c0_144] : memref<496x128xf32, #tpu.memory_space<vmem>>, vector<8x64xf32>
    %cst_145 = arith.constant dense<0xFF800000> : vector<64xf32>
    %182 = vector.multi_reduction <maximumf>, %181, %cst_145 [0] : vector<8x64xf32> to vector<64xf32>
    %183 = vector.shape_cast %182 : vector<64xf32> to vector<1x64xf32>
    %c42 = arith.constant 42 : index
    %c0_146 = arith.constant 0 : index
    %184 = vector.load %arg29[%c42, %c0_146] : memref<64x128xf32, #tpu.memory_space<vmem>>, vector<1x64xf32>
    tpu.vector_store %arg29[%c42, %c0_146], %183 {strides = array<i32>} : memref<64x128xf32, #tpu.memory_space<vmem>>, vector<1x64xf32>,
    %c344 = arith.constant 344 : index
    %c0_147 = arith.constant 0 : index
    %185 = vector.load %arg28[%c344, %c0_147] : memref<496x128xf32, #tpu.memory_space<vmem>>, vector<8x64xf32>
    %cst_148 = arith.constant dense<0xFF800000> : vector<64xf32>
    %186 = vector.multi_reduction <maximumf>, %185, %cst_148 [0] : vector<8x64xf32> to vector<64xf32>
    %187 = vector.shape_cast %186 : vector<64xf32> to vector<1x64xf32>
    %c43 = arith.constant 43 : index
    %c0_149 = arith.constant 0 : index
    %188 = vector.load %arg29[%c43, %c0_149] : memref<64x128xf32, #tpu.memory_space<vmem>>, vector<1x64xf32>
    tpu.vector_store %arg29[%c43, %c0_149], %187 {strides = array<i32>} : memref<64x128xf32, #tpu.memory_space<vmem>>, vector<1x64xf32>,
    %c352 = arith.constant 352 : index
    %c0_150 = arith.constant 0 : index
    %189 = vector.load %arg28[%c352, %c0_150] : memref<496x128xf32, #tpu.memory_space<vmem>>, vector<8x64xf32>
    %cst_151 = arith.constant dense<0xFF800000> : vector<64xf32>
    %190 = vector.multi_reduction <maximumf>, %189, %cst_151 [0] : vector<8x64xf32> to vector<64xf32>
    %191 = vector.shape_cast %190 : vector<64xf32> to vector<1x64xf32>
    %c44 = arith.constant 44 : index
    %c0_152 = arith.constant 0 : index
    %192 = vector.load %arg29[%c44, %c0_152] : memref<64x128xf32, #tpu.memory_space<vmem>>, vector<1x64xf32>
    tpu.vector_store %arg29[%c44, %c0_152], %191 {strides = array<i32>} : memref<64x128xf32, #tpu.memory_space<vmem>>, vector<1x64xf32>,
    %c360 = arith.constant 360 : index
    %c0_153 = arith.constant 0 : index
    %193 = vector.load %arg28[%c360, %c0_153] : memref<496x128xf32, #tpu.memory_space<vmem>>, vector<8x64xf32>
    %cst_154 = arith.constant dense<0xFF800000> : vector<64xf32>
    %194 = vector.multi_reduction <maximumf>, %193, %cst_154 [0] : vector<8x64xf32> to vector<64xf32>
    %195 = vector.shape_cast %194 : vector<64xf32> to vector<1x64xf32>
    %c45 = arith.constant 45 : index
    %c0_155 = arith.constant 0 : index
    %196 = vector.load %arg29[%c45, %c0_155] : memref<64x128xf32, #tpu.memory_space<vmem>>, vector<1x64xf32>
    tpu.vector_store %arg29[%c45, %c0_155], %195 {strides = array<i32>} : memref<64x128xf32, #tpu.memory_space<vmem>>, vector<1x64xf32>,
    %c368 = arith.constant 368 : index
    %c0_156 = arith.constant 0 : index
    %197 = vector.load %arg28[%c368, %c0_156] : memref<496x128xf32, #tpu.memory_space<vmem>>, vector<8x64xf32>
    %cst_157 = arith.constant dense<0xFF800000> : vector<64xf32>
    %198 = vector.multi_reduction <maximumf>, %197, %cst_157 [0] : vector<8x64xf32> to vector<64xf32>
    %199 = vector.shape_cast %198 : vector<64xf32> to vector<1x64xf32>
    %c46 = arith.constant 46 : index
    %c0_158 = arith.constant 0 : index
    %200 = vector.load %arg29[%c46, %c0_158] : memref<64x128xf32, #tpu.memory_space<vmem>>, vector<1x64xf32>
    tpu.vector_store %arg29[%c46, %c0_158], %199 {strides = array<i32>} : memref<64x128xf32, #tpu.memory_space<vmem>>, vector<1x64xf32>,
    %c376 = arith.constant 376 : index
    %c0_159 = arith.constant 0 : index
    %201 = vector.load %arg28[%c376, %c0_159] : memref<496x128xf32, #tpu.memory_space<vmem>>, vector<8x64xf32>
    %cst_160 = arith.constant dense<0xFF800000> : vector<64xf32>
    %202 = vector.multi_reduction <maximumf>, %201, %cst_160 [0] : vector<8x64xf32> to vector<64xf32>
    %203 = vector.shape_cast %202 : vector<64xf32> to vector<1x64xf32>
    %c47 = arith.constant 47 : index
    %c0_161 = arith.constant 0 : index
    %204 = vector.load %arg29[%c47, %c0_161] : memref<64x128xf32, #tpu.memory_space<vmem>>, vector<1x64xf32>
    tpu.vector_store %arg29[%c47, %c0_161], %203 {strides = array<i32>} : memref<64x128xf32, #tpu.memory_space<vmem>>, vector<1x64xf32>,
    %c384 = arith.constant 384 : index
    %c0_162 = arith.constant 0 : index
    %205 = vector.load %arg28[%c384, %c0_162] : memref<496x128xf32, #tpu.memory_space<vmem>>, vector<8x64xf32>
    %cst_163 = arith.constant dense<0xFF800000> : vector<64xf32>
    %206 = vector.multi_reduction <maximumf>, %205, %cst_163 [0] : vector<8x64xf32> to vector<64xf32>
    %207 = vector.shape_cast %206 : vector<64xf32> to vector<1x64xf32>
    %c48_164 = arith.constant 48 : index
    %c0_165 = arith.constant 0 : index
    %208 = vector.load %arg29[%c48_164, %c0_165] : memref<64x128xf32, #tpu.memory_space<vmem>>, vector<1x64xf32>
    tpu.vector_store %arg29[%c48_164, %c0_165], %207 {strides = array<i32>} : memref<64x128xf32, #tpu.memory_space<vmem>>, vector<1x64xf32>,
    %c392 = arith.constant 392 : index
    %c0_166 = arith.constant 0 : index
    %209 = vector.load %arg28[%c392, %c0_166] : memref<496x128xf32, #tpu.memory_space<vmem>>, vector<8x64xf32>
    %cst_167 = arith.constant dense<0xFF800000> : vector<64xf32>
    %210 = vector.multi_reduction <maximumf>, %209, %cst_167 [0] : vector<8x64xf32> to vector<64xf32>
    %211 = vector.shape_cast %210 : vector<64xf32> to vector<1x64xf32>
    %c49 = arith.constant 49 : index
    %c0_168 = arith.constant 0 : index
    %212 = vector.load %arg29[%c49, %c0_168] : memref<64x128xf32, #tpu.memory_space<vmem>>, vector<1x64xf32>
    tpu.vector_store %arg29[%c49, %c0_168], %211 {strides = array<i32>} : memref<64x128xf32, #tpu.memory_space<vmem>>, vector<1x64xf32>,
    %c400 = arith.constant 400 : index
    %c0_169 = arith.constant 0 : index
    %213 = vector.load %arg28[%c400, %c0_169] : memref<496x128xf32, #tpu.memory_space<vmem>>, vector<8x64xf32>
    %cst_170 = arith.constant dense<0xFF800000> : vector<64xf32>
    %214 = vector.multi_reduction <maximumf>, %213, %cst_170 [0] : vector<8x64xf32> to vector<64xf32>
    %215 = vector.shape_cast %214 : vector<64xf32> to vector<1x64xf32>
    %c50 = arith.constant 50 : index
    %c0_171 = arith.constant 0 : index
    %216 = vector.load %arg29[%c50, %c0_171] : memref<64x128xf32, #tpu.memory_space<vmem>>, vector<1x64xf32>
    tpu.vector_store %arg29[%c50, %c0_171], %215 {strides = array<i32>} : memref<64x128xf32, #tpu.memory_space<vmem>>, vector<1x64xf32>,
    %c408 = arith.constant 408 : index
    %c0_172 = arith.constant 0 : index
    %217 = vector.load %arg28[%c408, %c0_172] : memref<496x128xf32, #tpu.memory_space<vmem>>, vector<8x64xf32>
    %cst_173 = arith.constant dense<0xFF800000> : vector<64xf32>
    %218 = vector.multi_reduction <maximumf>, %217, %cst_173 [0] : vector<8x64xf32> to vector<64xf32>
    %219 = vector.shape_cast %218 : vector<64xf32> to vector<1x64xf32>
    %c51 = arith.constant 51 : index
    %c0_174 = arith.constant 0 : index
    %220 = vector.load %arg29[%c51, %c0_174] : memref<64x128xf32, #tpu.memory_space<vmem>>, vector<1x64xf32>
    tpu.vector_store %arg29[%c51, %c0_174], %219 {strides = array<i32>} : memref<64x128xf32, #tpu.memory_space<vmem>>, vector<1x64xf32>,
    %c416 = arith.constant 416 : index
    %c0_175 = arith.constant 0 : index
    %221 = vector.load %arg28[%c416, %c0_175] : memref<496x128xf32, #tpu.memory_space<vmem>>, vector<8x64xf32>
    %cst_176 = arith.constant dense<0xFF800000> : vector<64xf32>
    %222 = vector.multi_reduction <maximumf>, %221, %cst_176 [0] : vector<8x64xf32> to vector<64xf32>
    %223 = vector.shape_cast %222 : vector<64xf32> to vector<1x64xf32>
    %c52 = arith.constant 52 : index
    %c0_177 = arith.constant 0 : index
    %224 = vector.load %arg29[%c52, %c0_177] : memref<64x128xf32, #tpu.memory_space<vmem>>, vector<1x64xf32>
    tpu.vector_store %arg29[%c52, %c0_177], %223 {strides = array<i32>} : memref<64x128xf32, #tpu.memory_space<vmem>>, vector<1x64xf32>,
    %c424 = arith.constant 424 : index
    %c0_178 = arith.constant 0 : index
    %225 = vector.load %arg28[%c424, %c0_178] : memref<496x128xf32, #tpu.memory_space<vmem>>, vector<8x64xf32>
    %cst_179 = arith.constant dense<0xFF800000> : vector<64xf32>
    %226 = vector.multi_reduction <maximumf>, %225, %cst_179 [0] : vector<8x64xf32> to vector<64xf32>
    %227 = vector.shape_cast %226 : vector<64xf32> to vector<1x64xf32>
    %c53 = arith.constant 53 : index
    %c0_180 = arith.constant 0 : index
    %228 = vector.load %arg29[%c53, %c0_180] : memref<64x128xf32, #tpu.memory_space<vmem>>, vector<1x64xf32>
    tpu.vector_store %arg29[%c53, %c0_180], %227 {strides = array<i32>} : memref<64x128xf32, #tpu.memory_space<vmem>>, vector<1x64xf32>,
    %c432 = arith.constant 432 : index
    %c0_181 = arith.constant 0 : index
    %229 = vector.load %arg28[%c432, %c0_181] : memref<496x128xf32, #tpu.memory_space<vmem>>, vector<8x64xf32>
    %cst_182 = arith.constant dense<0xFF800000> : vector<64xf32>
    %230 = vector.multi_reduction <maximumf>, %229, %cst_182 [0] : vector<8x64xf32> to vector<64xf32>
    %231 = vector.shape_cast %230 : vector<64xf32> to vector<1x64xf32>
    %c54 = arith.constant 54 : index
    %c0_183 = arith.constant 0 : index
    %232 = vector.load %arg29[%c54, %c0_183] : memref<64x128xf32, #tpu.memory_space<vmem>>, vector<1x64xf32>
    tpu.vector_store %arg29[%c54, %c0_183], %231 {strides = array<i32>} : memref<64x128xf32, #tpu.memory_space<vmem>>, vector<1x64xf32>,
    %c440 = arith.constant 440 : index
    %c0_184 = arith.constant 0 : index
    %233 = vector.load %arg28[%c440, %c0_184] : memref<496x128xf32, #tpu.memory_space<vmem>>, vector<8x64xf32>
    %cst_185 = arith.constant dense<0xFF800000> : vector<64xf32>
    %234 = vector.multi_reduction <maximumf>, %233, %cst_185 [0] : vector<8x64xf32> to vector<64xf32>
    %235 = vector.shape_cast %234 : vector<64xf32> to vector<1x64xf32>
    %c55 = arith.constant 55 : index
    %c0_186 = arith.constant 0 : index
    %236 = vector.load %arg29[%c55, %c0_186] : memref<64x128xf32, #tpu.memory_space<vmem>>, vector<1x64xf32>
    tpu.vector_store %arg29[%c55, %c0_186], %235 {strides = array<i32>} : memref<64x128xf32, #tpu.memory_space<vmem>>, vector<1x64xf32>,
    %c448 = arith.constant 448 : index
    %c0_187 = arith.constant 0 : index
    %237 = vector.load %arg28[%c448, %c0_187] : memref<496x128xf32, #tpu.memory_space<vmem>>, vector<8x64xf32>
    %cst_188 = arith.constant dense<0xFF800000> : vector<64xf32>
    %238 = vector.multi_reduction <maximumf>, %237, %cst_188 [0] : vector<8x64xf32> to vector<64xf32>
    %239 = vector.shape_cast %238 : vector<64xf32> to vector<1x64xf32>
    %c56_189 = arith.constant 56 : index
    %c0_190 = arith.constant 0 : index
    %240 = vector.load %arg29[%c56_189, %c0_190] : memref<64x128xf32, #tpu.memory_space<vmem>>, vector<1x64xf32>
    tpu.vector_store %arg29[%c56_189, %c0_190], %239 {strides = array<i32>} : memref<64x128xf32, #tpu.memory_space<vmem>>, vector<1x64xf32>,
    %c456 = arith.constant 456 : index
    %c0_191 = arith.constant 0 : index
    %241 = vector.load %arg28[%c456, %c0_191] : memref<496x128xf32, #tpu.memory_space<vmem>>, vector<8x64xf32>
    %cst_192 = arith.constant dense<0xFF800000> : vector<64xf32>
    %242 = vector.multi_reduction <maximumf>, %241, %cst_192 [0] : vector<8x64xf32> to vector<64xf32>
    %243 = vector.shape_cast %242 : vector<64xf32> to vector<1x64xf32>
    %c57 = arith.constant 57 : index
    %c0_193 = arith.constant 0 : index
    %244 = vector.load %arg29[%c57, %c0_193] : memref<64x128xf32, #tpu.memory_space<vmem>>, vector<1x64xf32>
    tpu.vector_store %arg29[%c57, %c0_193], %243 {strides = array<i32>} : memref<64x128xf32, #tpu.memory_space<vmem>>, vector<1x64xf32>,
    %c464 = arith.constant 464 : index
    %c0_194 = arith.constant 0 : index
    %245 = vector.load %arg28[%c464, %c0_194] : memref<496x128xf32, #tpu.memory_space<vmem>>, vector<8x64xf32>
    %cst_195 = arith.constant dense<0xFF800000> : vector<64xf32>
    %246 = vector.multi_reduction <maximumf>, %245, %cst_195 [0] : vector<8x64xf32> to vector<64xf32>
    %247 = vector.shape_cast %246 : vector<64xf32> to vector<1x64xf32>
    %c58 = arith.constant 58 : index
    %c0_196 = arith.constant 0 : index
    %248 = vector.load %arg29[%c58, %c0_196] : memref<64x128xf32, #tpu.memory_space<vmem>>, vector<1x64xf32>
    tpu.vector_store %arg29[%c58, %c0_196], %247 {strides = array<i32>} : memref<64x128xf32, #tpu.memory_space<vmem>>, vector<1x64xf32>,
    %c472 = arith.constant 472 : index
    %c0_197 = arith.constant 0 : index
    %249 = vector.load %arg28[%c472, %c0_197] : memref<496x128xf32, #tpu.memory_space<vmem>>, vector<8x64xf32>
    %cst_198 = arith.constant dense<0xFF800000> : vector<64xf32>
    %250 = vector.multi_reduction <maximumf>, %249, %cst_198 [0] : vector<8x64xf32> to vector<64xf32>
    %251 = vector.shape_cast %250 : vector<64xf32> to vector<1x64xf32>
    %c59 = arith.constant 59 : index
    %c0_199 = arith.constant 0 : index
    %252 = vector.load %arg29[%c59, %c0_199] : memref<64x128xf32, #tpu.memory_space<vmem>>, vector<1x64xf32>
    tpu.vector_store %arg29[%c59, %c0_199], %251 {strides = array<i32>} : memref<64x128xf32, #tpu.memory_space<vmem>>, vector<1x64xf32>,
    %c480 = arith.constant 480 : index
    %c0_200 = arith.constant 0 : index
    %253 = vector.load %arg28[%c480, %c0_200] : memref<496x128xf32, #tpu.memory_space<vmem>>, vector<8x64xf32>
    %cst_201 = arith.constant dense<0xFF800000> : vector<64xf32>
    %254 = vector.multi_reduction <maximumf>, %253, %cst_201 [0] : vector<8x64xf32> to vector<64xf32>
    %255 = vector.shape_cast %254 : vector<64xf32> to vector<1x64xf32>
    %c60 = arith.constant 60 : index
    %c0_202 = arith.constant 0 : index
    %256 = vector.load %arg29[%c60, %c0_202] : memref<64x128xf32, #tpu.memory_space<vmem>>, vector<1x64xf32>
    tpu.vector_store %arg29[%c60, %c0_202], %255 {strides = array<i32>} : memref<64x128xf32, #tpu.memory_space<vmem>>, vector<1x64xf32>,
    %c0_203 = arith.constant 0 : index
    %c0_204 = arith.constant 0 : index
    %257 = vector.load %arg29[%c0_203, %c0_204] : memref<64x128xf32, #tpu.memory_space<vmem>>, vector<61x64xf32>
    %cst_205 = arith.constant 0.000000e+00 : f32
    %258 = vector.broadcast %cst_205 : f32 to vector<54x128xf32>
    %259 = vector.extract_strided_slice %257 {offsets = [0, 0], sizes = [54, 64], strides = [1, 1]} : vector<61x64xf32> to vector<54x64xf32>
    %260 = arith.truncf %259 : vector<54x64xf32> to vector<54x64xbf16>
    %c0_206 = arith.constant 0 : index
    %c0_207 = arith.constant 0 : index
    %c0_208 = arith.constant 0 : index
    %261 = vector.load %arg6[%c0_206, %c0_207, %c0_208] : memref<8x64x128xbf16, #tpu.memory_space<vmem>>, vector<1x64x128xbf16>
    %262 = vector.shape_cast %261 : vector<1x64x128xbf16> to vector<64x128xbf16>
    %cst_209 = arith.constant dense<0.000000e+00> : vector<54x128xf32>
    %263 = tpu.matmul %260, %262, %cst_209 {dimension_numbers = #tpu.dot_dimension_numbers<[1], [0], [0], [1], [0, 0, 1, 1], [], []>} : vector<54x64xbf16>, vector<64x128xbf16>, vector<54x128xf32> -> vector<54x128xf32>
    %264 = arith.addf %258, %263 : vector<54x128xf32>
    %265 = vector.extract_strided_slice %257 {offsets = [1, 0], sizes = [54, 64], strides = [1, 1]} : vector<61x64xf32> to vector<54x64xf32>
    %266 = arith.truncf %265 : vector<54x64xf32> to vector<54x64xbf16>
    %c1_210 = arith.constant 1 : index
    %c0_211 = arith.constant 0 : index
    %c0_212 = arith.constant 0 : index
    %267 = vector.load %arg6[%c1_210, %c0_211, %c0_212] : memref<8x64x128xbf16, #tpu.memory_space<vmem>>, vector<1x64x128xbf16>
    %268 = vector.shape_cast %267 : vector<1x64x128xbf16> to vector<64x128xbf16>
    %cst_213 = arith.constant dense<0.000000e+00> : vector<54x128xf32>
    %269 = tpu.matmul %266, %268, %cst_213 {dimension_numbers = #tpu.dot_dimension_numbers<[1], [0], [0], [1], [0, 0, 1, 1], [], []>} : vector<54x64xbf16>, vector<64x128xbf16>, vector<54x128xf32> -> vector<54x128xf32>
    %270 = arith.addf %264, %269 : vector<54x128xf32>
    %271 = vector.extract_strided_slice %257 {offsets = [2, 0], sizes = [54, 64], strides = [1, 1]} : vector<61x64xf32> to vector<54x64xf32>
    %272 = arith.truncf %271 : vector<54x64xf32> to vector<54x64xbf16>
    %c2_214 = arith.constant 2 : index
    %c0_215 = arith.constant 0 : index
    %c0_216 = arith.constant 0 : index
    %273 = vector.load %arg6[%c2_214, %c0_215, %c0_216] : memref<8x64x128xbf16, #tpu.memory_space<vmem>>, vector<1x64x128xbf16>
    %274 = vector.shape_cast %273 : vector<1x64x128xbf16> to vector<64x128xbf16>
    %cst_217 = arith.constant dense<0.000000e+00> : vector<54x128xf32>
    %275 = tpu.matmul %272, %274, %cst_217 {dimension_numbers = #tpu.dot_dimension_numbers<[1], [0], [0], [1], [0, 0, 1, 1], [], []>} : vector<54x64xbf16>, vector<64x128xbf16>, vector<54x128xf32> -> vector<54x128xf32>
    %276 = arith.addf %270, %275 : vector<54x128xf32>
    %277 = vector.extract_strided_slice %257 {offsets = [3, 0], sizes = [54, 64], strides = [1, 1]} : vector<61x64xf32> to vector<54x64xf32>
    %278 = arith.truncf %277 : vector<54x64xf32> to vector<54x64xbf16>
    %c3_218 = arith.constant 3 : index
    %c0_219 = arith.constant 0 : index
    %c0_220 = arith.constant 0 : index
    %279 = vector.load %arg6[%c3_218, %c0_219, %c0_220] : memref<8x64x128xbf16, #tpu.memory_space<vmem>>, vector<1x64x128xbf16>
    %280 = vector.shape_cast %279 : vector<1x64x128xbf16> to vector<64x128xbf16>
    %cst_221 = arith.constant dense<0.000000e+00> : vector<54x128xf32>
    %281 = tpu.matmul %278, %280, %cst_221 {dimension_numbers = #tpu.dot_dimension_numbers<[1], [0], [0], [1], [0, 0, 1, 1], [], []>} : vector<54x64xbf16>, vector<64x128xbf16>, vector<54x128xf32> -> vector<54x128xf32>
    %282 = arith.addf %276, %281 : vector<54x128xf32>
    %283 = vector.extract_strided_slice %257 {offsets = [4, 0], sizes = [54, 64], strides = [1, 1]} : vector<61x64xf32> to vector<54x64xf32>
    %284 = arith.truncf %283 : vector<54x64xf32> to vector<54x64xbf16>
    %c4_222 = arith.constant 4 : index
    %c0_223 = arith.constant 0 : index
    %c0_224 = arith.constant 0 : index
    %285 = vector.load %arg6[%c4_222, %c0_223, %c0_224] : memref<8x64x128xbf16, #tpu.memory_space<vmem>>, vector<1x64x128xbf16>
    %286 = vector.shape_cast %285 : vector<1x64x128xbf16> to vector<64x128xbf16>
    %cst_225 = arith.constant dense<0.000000e+00> : vector<54x128xf32>
    %287 = tpu.matmul %284, %286, %cst_225 {dimension_numbers = #tpu.dot_dimension_numbers<[1], [0], [0], [1], [0, 0, 1, 1], [], []>} : vector<54x64xbf16>, vector<64x128xbf16>, vector<54x128xf32> -> vector<54x128xf32>
    %288 = arith.addf %282, %287 : vector<54x128xf32>
    %289 = vector.extract_strided_slice %257 {offsets = [5, 0], sizes = [54, 64], strides = [1, 1]} : vector<61x64xf32> to vector<54x64xf32>
    %290 = arith.truncf %289 : vector<54x64xf32> to vector<54x64xbf16>
    %c5_226 = arith.constant 5 : index
    %c0_227 = arith.constant 0 : index
    %c0_228 = arith.constant 0 : index
    %291 = vector.load %arg6[%c5_226, %c0_227, %c0_228] : memref<8x64x128xbf16, #tpu.memory_space<vmem>>, vector<1x64x128xbf16>
    %292 = vector.shape_cast %291 : vector<1x64x128xbf16> to vector<64x128xbf16>
    %cst_229 = arith.constant dense<0.000000e+00> : vector<54x128xf32>
    %293 = tpu.matmul %290, %292, %cst_229 {dimension_numbers = #tpu.dot_dimension_numbers<[1], [0], [0], [1], [0, 0, 1, 1], [], []>} : vector<54x64xbf16>, vector<64x128xbf16>, vector<54x128xf32> -> vector<54x128xf32>
    %294 = arith.addf %288, %293 : vector<54x128xf32>
    %295 = vector.extract_strided_slice %257 {offsets = [6, 0], sizes = [54, 64], strides = [1, 1]} : vector<61x64xf32> to vector<54x64xf32>
    %296 = arith.truncf %295 : vector<54x64xf32> to vector<54x64xbf16>
    %c6_230 = arith.constant 6 : index
    %c0_231 = arith.constant 0 : index
    %c0_232 = arith.constant 0 : index
    %297 = vector.load %arg6[%c6_230, %c0_231, %c0_232] : memref<8x64x128xbf16, #tpu.memory_space<vmem>>, vector<1x64x128xbf16>
    %298 = vector.shape_cast %297 : vector<1x64x128xbf16> to vector<64x128xbf16>
    %cst_233 = arith.constant dense<0.000000e+00> : vector<54x128xf32>
    %299 = tpu.matmul %296, %298, %cst_233 {dimension_numbers = #tpu.dot_dimension_numbers<[1], [0], [0], [1], [0, 0, 1, 1], [], []>} : vector<54x64xbf16>, vector<64x128xbf16>, vector<54x128xf32> -> vector<54x128xf32>
    %300 = arith.addf %294, %299 : vector<54x128xf32>
    %301 = vector.extract_strided_slice %257 {offsets = [7, 0], sizes = [54, 64], strides = [1, 1]} : vector<61x64xf32> to vector<54x64xf32>
    %302 = arith.truncf %301 : vector<54x64xf32> to vector<54x64xbf16>
    %c7_234 = arith.constant 7 : index
    %c0_235 = arith.constant 0 : index
    %c0_236 = arith.constant 0 : index
    %303 = vector.load %arg6[%c7_234, %c0_235, %c0_236] : memref<8x64x128xbf16, #tpu.memory_space<vmem>>, vector<1x64x128xbf16>
    %304 = vector.shape_cast %303 : vector<1x64x128xbf16> to vector<64x128xbf16>
    %cst_237 = arith.constant dense<0.000000e+00> : vector<54x128xf32>
    %305 = tpu.matmul %302, %304, %cst_237 {dimension_numbers = #tpu.dot_dimension_numbers<[1], [0], [0], [1], [0, 0, 1, 1], [], []>} : vector<54x64xbf16>, vector<64x128xbf16>, vector<54x128xf32> -> vector<54x128xf32>
    %306 = arith.addf %300, %305 : vector<54x128xf32>
    %c0_238 = arith.constant 0 : index
    %c0_239 = arith.constant 0 : index
    %307 = vector.load %arg7[%c0_238, %c0_239] : memref<1x128xf32, #tpu.memory_space<vmem>>, vector<1x128xf32>
    %308 = vector.broadcast %307 : vector<1x128xf32> to vector<54x128xf32>
    %309 = arith.mulf %306, %308 : vector<54x128xf32>
    %c0_240 = arith.constant 0 : index
    %c0_241 = arith.constant 0 : index
    %310 = vector.load %arg8[%c0_240, %c0_241] : memref<1x128xf32, #tpu.memory_space<vmem>>, vector<1x128xf32>
    %311 = vector.broadcast %310 : vector<1x128xf32> to vector<54x128xf32>
    %312 = arith.addf %309, %311 : vector<54x128xf32>
    %cst_242 = arith.constant 0.000000e+00 : f32
    %313 = vector.broadcast %cst_242 : f32 to vector<54x128xf32>
    %314 = arith.maximumf %312, %313 : vector<54x128xf32>
    %cst_243 = arith.constant 0.000000e+00 : f32
    %315 = vector.broadcast %cst_243 : f32 to vector<47x128xf32>
    %316 = vector.extract_strided_slice %314 {offsets = [0, 0], sizes = [47, 128], strides = [1, 1]} : vector<54x128xf32> to vector<47x128xf32>
    %317 = arith.truncf %316 : vector<47x128xf32> to vector<47x128xbf16>
    %c0_244 = arith.constant 0 : index
    %c0_245 = arith.constant 0 : index
    %c0_246 = arith.constant 0 : index
    %318 = vector.load %arg9[%c0_244, %c0_245, %c0_246] : memref<8x128x128xbf16, #tpu.memory_space<vmem>>, vector<1x128x128xbf16>
    %319 = vector.shape_cast %318 : vector<1x128x128xbf16> to vector<128x128xbf16>
    %cst_247 = arith.constant dense<0.000000e+00> : vector<47x128xf32>
    %320 = tpu.matmul %317, %319, %cst_247 {dimension_numbers = #tpu.dot_dimension_numbers<[1], [0], [0], [1], [0, 0, 1, 1], [], []>} : vector<47x128xbf16>, vector<128x128xbf16>, vector<47x128xf32> -> vector<47x128xf32>
    %321 = arith.addf %315, %320 : vector<47x128xf32>
    %322 = vector.extract_strided_slice %314 {offsets = [1, 0], sizes = [47, 128], strides = [1, 1]} : vector<54x128xf32> to vector<47x128xf32>
    %323 = arith.truncf %322 : vector<47x128xf32> to vector<47x128xbf16>
    %c1_248 = arith.constant 1 : index
    %c0_249 = arith.constant 0 : index
    %c0_250 = arith.constant 0 : index
    %324 = vector.load %arg9[%c1_248, %c0_249, %c0_250] : memref<8x128x128xbf16, #tpu.memory_space<vmem>>, vector<1x128x128xbf16>
    %325 = vector.shape_cast %324 : vector<1x128x128xbf16> to vector<128x128xbf16>
    %cst_251 = arith.constant dense<0.000000e+00> : vector<47x128xf32>
    %326 = tpu.matmul %323, %325, %cst_251 {dimension_numbers = #tpu.dot_dimension_numbers<[1], [0], [0], [1], [0, 0, 1, 1], [], []>} : vector<47x128xbf16>, vector<128x128xbf16>, vector<47x128xf32> -> vector<47x128xf32>
    %327 = arith.addf %321, %326 : vector<47x128xf32>
    %328 = vector.extract_strided_slice %314 {offsets = [2, 0], sizes = [47, 128], strides = [1, 1]} : vector<54x128xf32> to vector<47x128xf32>
    %329 = arith.truncf %328 : vector<47x128xf32> to vector<47x128xbf16>
    %c2_252 = arith.constant 2 : index
    %c0_253 = arith.constant 0 : index
    %c0_254 = arith.constant 0 : index
    %330 = vector.load %arg9[%c2_252, %c0_253, %c0_254] : memref<8x128x128xbf16, #tpu.memory_space<vmem>>, vector<1x128x128xbf16>
    %331 = vector.shape_cast %330 : vector<1x128x128xbf16> to vector<128x128xbf16>
    %cst_255 = arith.constant dense<0.000000e+00> : vector<47x128xf32>
    %332 = tpu.matmul %329, %331, %cst_255 {dimension_numbers = #tpu.dot_dimension_numbers<[1], [0], [0], [1], [0, 0, 1, 1], [], []>} : vector<47x128xbf16>, vector<128x128xbf16>, vector<47x128xf32> -> vector<47x128xf32>
    %333 = arith.addf %327, %332 : vector<47x128xf32>
    %334 = vector.extract_strided_slice %314 {offsets = [3, 0], sizes = [47, 128], strides = [1, 1]} : vector<54x128xf32> to vector<47x128xf32>
    %335 = arith.truncf %334 : vector<47x128xf32> to vector<47x128xbf16>
    %c3_256 = arith.constant 3 : index
    %c0_257 = arith.constant 0 : index
    %c0_258 = arith.constant 0 : index
    %336 = vector.load %arg9[%c3_256, %c0_257, %c0_258] : memref<8x128x128xbf16, #tpu.memory_space<vmem>>, vector<1x128x128xbf16>
    %337 = vector.shape_cast %336 : vector<1x128x128xbf16> to vector<128x128xbf16>
    %cst_259 = arith.constant dense<0.000000e+00> : vector<47x128xf32>
    %338 = tpu.matmul %335, %337, %cst_259 {dimension_numbers = #tpu.dot_dimension_numbers<[1], [0], [0], [1], [0, 0, 1, 1], [], []>} : vector<47x128xbf16>, vector<128x128xbf16>, vector<47x128xf32> -> vector<47x128xf32>
    %339 = arith.addf %333, %338 : vector<47x128xf32>
    %340 = vector.extract_strided_slice %314 {offsets = [4, 0], sizes = [47, 128], strides = [1, 1]} : vector<54x128xf32> to vector<47x128xf32>
    %341 = arith.truncf %340 : vector<47x128xf32> to vector<47x128xbf16>
    %c4_260 = arith.constant 4 : index
    %c0_261 = arith.constant 0 : index
    %c0_262 = arith.constant 0 : index
    %342 = vector.load %arg9[%c4_260, %c0_261, %c0_262] : memref<8x128x128xbf16, #tpu.memory_space<vmem>>, vector<1x128x128xbf16>
    %343 = vector.shape_cast %342 : vector<1x128x128xbf16> to vector<128x128xbf16>
    %cst_263 = arith.constant dense<0.000000e+00> : vector<47x128xf32>
    %344 = tpu.matmul %341, %343, %cst_263 {dimension_numbers = #tpu.dot_dimension_numbers<[1], [0], [0], [1], [0, 0, 1, 1], [], []>} : vector<47x128xbf16>, vector<128x128xbf16>, vector<47x128xf32> -> vector<47x128xf32>
    %345 = arith.addf %339, %344 : vector<47x128xf32>
    %346 = vector.extract_strided_slice %314 {offsets = [5, 0], sizes = [47, 128], strides = [1, 1]} : vector<54x128xf32> to vector<47x128xf32>
    %347 = arith.truncf %346 : vector<47x128xf32> to vector<47x128xbf16>
    %c5_264 = arith.constant 5 : index
    %c0_265 = arith.constant 0 : index
    %c0_266 = arith.constant 0 : index
    %348 = vector.load %arg9[%c5_264, %c0_265, %c0_266] : memref<8x128x128xbf16, #tpu.memory_space<vmem>>, vector<1x128x128xbf16>
    %349 = vector.shape_cast %348 : vector<1x128x128xbf16> to vector<128x128xbf16>
    %cst_267 = arith.constant dense<0.000000e+00> : vector<47x128xf32>
    %350 = tpu.matmul %347, %349, %cst_267 {dimension_numbers = #tpu.dot_dimension_numbers<[1], [0], [0], [1], [0, 0, 1, 1], [], []>} : vector<47x128xbf16>, vector<128x128xbf16>, vector<47x128xf32> -> vector<47x128xf32>
    %351 = arith.addf %345, %350 : vector<47x128xf32>
    %352 = vector.extract_strided_slice %314 {offsets = [6, 0], sizes = [47, 128], strides = [1, 1]} : vector<54x128xf32> to vector<47x128xf32>
    %353 = arith.truncf %352 : vector<47x128xf32> to vector<47x128xbf16>
    %c6_268 = arith.constant 6 : index
    %c0_269 = arith.constant 0 : index
    %c0_270 = arith.constant 0 : index
    %354 = vector.load %arg9[%c6_268, %c0_269, %c0_270] : memref<8x128x128xbf16, #tpu.memory_space<vmem>>, vector<1x128x128xbf16>
    %355 = vector.shape_cast %354 : vector<1x128x128xbf16> to vector<128x128xbf16>
    %cst_271 = arith.constant dense<0.000000e+00> : vector<47x128xf32>
    %356 = tpu.matmul %353, %355, %cst_271 {dimension_numbers = #tpu.dot_dimension_numbers<[1], [0], [0], [1], [0, 0, 1, 1], [], []>} : vector<47x128xbf16>, vector<128x128xbf16>, vector<47x128xf32> -> vector<47x128xf32>
    %357 = arith.addf %351, %356 : vector<47x128xf32>
    %358 = vector.extract_strided_slice %314 {offsets = [7, 0], sizes = [47, 128], strides = [1, 1]} : vector<54x128xf32> to vector<47x128xf32>
    %359 = arith.truncf %358 : vector<47x128xf32> to vector<47x128xbf16>
    %c7_272 = arith.constant 7 : index
    %c0_273 = arith.constant 0 : index
    %c0_274 = arith.constant 0 : index
    %360 = vector.load %arg9[%c7_272, %c0_273, %c0_274] : memref<8x128x128xbf16, #tpu.memory_space<vmem>>, vector<1x128x128xbf16>
    %361 = vector.shape_cast %360 : vector<1x128x128xbf16> to vector<128x128xbf16>
    %cst_275 = arith.constant dense<0.000000e+00> : vector<47x128xf32>
    %362 = tpu.matmul %359, %361, %cst_275 {dimension_numbers = #tpu.dot_dimension_numbers<[1], [0], [0], [1], [0, 0, 1, 1], [], []>} : vector<47x128xbf16>, vector<128x128xbf16>, vector<47x128xf32> -> vector<47x128xf32>
    %363 = arith.addf %357, %362 : vector<47x128xf32>
    %c0_276 = arith.constant 0 : index
    %c0_277 = arith.constant 0 : index
    %364 = vector.load %arg10[%c0_276, %c0_277] : memref<1x128xf32, #tpu.memory_space<vmem>>, vector<1x128xf32>
    %365 = vector.broadcast %364 : vector<1x128xf32> to vector<47x128xf32>
    %366 = arith.mulf %363, %365 : vector<47x128xf32>
    %c0_278 = arith.constant 0 : index
    %c0_279 = arith.constant 0 : index
    %367 = vector.load %arg11[%c0_278, %c0_279] : memref<1x128xf32, #tpu.memory_space<vmem>>, vector<1x128xf32>
    %368 = vector.broadcast %367 : vector<1x128xf32> to vector<47x128xf32>
    %369 = arith.addf %366, %368 : vector<47x128xf32>
    %cst_280 = arith.constant 0.000000e+00 : f32
    %370 = vector.broadcast %cst_280 : f32 to vector<47x128xf32>
    %371 = arith.maximumf %369, %370 : vector<47x128xf32>
    %cst_281 = arith.constant 0.000000e+00 : f32
    %372 = vector.broadcast %cst_281 : f32 to vector<40x128xf32>
    %373 = vector.extract_strided_slice %371 {offsets = [0, 0], sizes = [40, 128], strides = [1, 1]} : vector<47x128xf32> to vector<40x128xf32>
    %374 = arith.truncf %373 : vector<40x128xf32> to vector<40x128xbf16>
    %c0_282 = arith.constant 0 : index
    %c0_283 = arith.constant 0 : index
    %c0_284 = arith.constant 0 : index
    %375 = vector.load %arg12[%c0_282, %c0_283, %c0_284] : memref<8x128x128xbf16, #tpu.memory_space<vmem>>, vector<1x128x128xbf16>
    %376 = vector.shape_cast %375 : vector<1x128x128xbf16> to vector<128x128xbf16>
    %cst_285 = arith.constant dense<0.000000e+00> : vector<40x128xf32>
    %377 = tpu.matmul %374, %376, %cst_285 {dimension_numbers = #tpu.dot_dimension_numbers<[1], [0], [0], [1], [0, 0, 1, 1], [], []>} : vector<40x128xbf16>, vector<128x128xbf16>, vector<40x128xf32> -> vector<40x128xf32>
    %378 = arith.addf %372, %377 : vector<40x128xf32>
    %379 = vector.extract_strided_slice %371 {offsets = [1, 0], sizes = [40, 128], strides = [1, 1]} : vector<47x128xf32> to vector<40x128xf32>
    %380 = arith.truncf %379 : vector<40x128xf32> to vector<40x128xbf16>
    %c1_286 = arith.constant 1 : index
    %c0_287 = arith.constant 0 : index
    %c0_288 = arith.constant 0 : index
    %381 = vector.load %arg12[%c1_286, %c0_287, %c0_288] : memref<8x128x128xbf16, #tpu.memory_space<vmem>>, vector<1x128x128xbf16>
    %382 = vector.shape_cast %381 : vector<1x128x128xbf16> to vector<128x128xbf16>
    %cst_289 = arith.constant dense<0.000000e+00> : vector<40x128xf32>
    %383 = tpu.matmul %380, %382, %cst_289 {dimension_numbers = #tpu.dot_dimension_numbers<[1], [0], [0], [1], [0, 0, 1, 1], [], []>} : vector<40x128xbf16>, vector<128x128xbf16>, vector<40x128xf32> -> vector<40x128xf32>
    %384 = arith.addf %378, %383 : vector<40x128xf32>
    %385 = vector.extract_strided_slice %371 {offsets = [2, 0], sizes = [40, 128], strides = [1, 1]} : vector<47x128xf32> to vector<40x128xf32>
    %386 = arith.truncf %385 : vector<40x128xf32> to vector<40x128xbf16>
    %c2_290 = arith.constant 2 : index
    %c0_291 = arith.constant 0 : index
    %c0_292 = arith.constant 0 : index
    %387 = vector.load %arg12[%c2_290, %c0_291, %c0_292] : memref<8x128x128xbf16, #tpu.memory_space<vmem>>, vector<1x128x128xbf16>
    %388 = vector.shape_cast %387 : vector<1x128x128xbf16> to vector<128x128xbf16>
    %cst_293 = arith.constant dense<0.000000e+00> : vector<40x128xf32>
    %389 = tpu.matmul %386, %388, %cst_293 {dimension_numbers = #tpu.dot_dimension_numbers<[1], [0], [0], [1], [0, 0, 1, 1], [], []>} : vector<40x128xbf16>, vector<128x128xbf16>, vector<40x128xf32> -> vector<40x128xf32>
    %390 = arith.addf %384, %389 : vector<40x128xf32>
    %391 = vector.extract_strided_slice %371 {offsets = [3, 0], sizes = [40, 128], strides = [1, 1]} : vector<47x128xf32> to vector<40x128xf32>
    %392 = arith.truncf %391 : vector<40x128xf32> to vector<40x128xbf16>
    %c3_294 = arith.constant 3 : index
    %c0_295 = arith.constant 0 : index
    %c0_296 = arith.constant 0 : index
    %393 = vector.load %arg12[%c3_294, %c0_295, %c0_296] : memref<8x128x128xbf16, #tpu.memory_space<vmem>>, vector<1x128x128xbf16>
    %394 = vector.shape_cast %393 : vector<1x128x128xbf16> to vector<128x128xbf16>
    %cst_297 = arith.constant dense<0.000000e+00> : vector<40x128xf32>
    %395 = tpu.matmul %392, %394, %cst_297 {dimension_numbers = #tpu.dot_dimension_numbers<[1], [0], [0], [1], [0, 0, 1, 1], [], []>} : vector<40x128xbf16>, vector<128x128xbf16>, vector<40x128xf32> -> vector<40x128xf32>
    %396 = arith.addf %390, %395 : vector<40x128xf32>
    %397 = vector.extract_strided_slice %371 {offsets = [4, 0], sizes = [40, 128], strides = [1, 1]} : vector<47x128xf32> to vector<40x128xf32>
    %398 = arith.truncf %397 : vector<40x128xf32> to vector<40x128xbf16>
    %c4_298 = arith.constant 4 : index
    %c0_299 = arith.constant 0 : index
    %c0_300 = arith.constant 0 : index
    %399 = vector.load %arg12[%c4_298, %c0_299, %c0_300] : memref<8x128x128xbf16, #tpu.memory_space<vmem>>, vector<1x128x128xbf16>
    %400 = vector.shape_cast %399 : vector<1x128x128xbf16> to vector<128x128xbf16>
    %cst_301 = arith.constant dense<0.000000e+00> : vector<40x128xf32>
    %401 = tpu.matmul %398, %400, %cst_301 {dimension_numbers = #tpu.dot_dimension_numbers<[1], [0], [0], [1], [0, 0, 1, 1], [], []>} : vector<40x128xbf16>, vector<128x128xbf16>, vector<40x128xf32> -> vector<40x128xf32>
    %402 = arith.addf %396, %401 : vector<40x128xf32>
    %403 = vector.extract_strided_slice %371 {offsets = [5, 0], sizes = [40, 128], strides = [1, 1]} : vector<47x128xf32> to vector<40x128xf32>
    %404 = arith.truncf %403 : vector<40x128xf32> to vector<40x128xbf16>
    %c5_302 = arith.constant 5 : index
    %c0_303 = arith.constant 0 : index
    %c0_304 = arith.constant 0 : index
    %405 = vector.load %arg12[%c5_302, %c0_303, %c0_304] : memref<8x128x128xbf16, #tpu.memory_space<vmem>>, vector<1x128x128xbf16>
    %406 = vector.shape_cast %405 : vector<1x128x128xbf16> to vector<128x128xbf16>
    %cst_305 = arith.constant dense<0.000000e+00> : vector<40x128xf32>
    %407 = tpu.matmul %404, %406, %cst_305 {dimension_numbers = #tpu.dot_dimension_numbers<[1], [0], [0], [1], [0, 0, 1, 1], [], []>} : vector<40x128xbf16>, vector<128x128xbf16>, vector<40x128xf32> -> vector<40x128xf32>
    %408 = arith.addf %402, %407 : vector<40x128xf32>
    %409 = vector.extract_strided_slice %371 {offsets = [6, 0], sizes = [40, 128], strides = [1, 1]} : vector<47x128xf32> to vector<40x128xf32>
    %410 = arith.truncf %409 : vector<40x128xf32> to vector<40x128xbf16>
    %c6_306 = arith.constant 6 : index
    %c0_307 = arith.constant 0 : index
    %c0_308 = arith.constant 0 : index
    %411 = vector.load %arg12[%c6_306, %c0_307, %c0_308] : memref<8x128x128xbf16, #tpu.memory_space<vmem>>, vector<1x128x128xbf16>
    %412 = vector.shape_cast %411 : vector<1x128x128xbf16> to vector<128x128xbf16>
    %cst_309 = arith.constant dense<0.000000e+00> : vector<40x128xf32>
    %413 = tpu.matmul %410, %412, %cst_309 {dimension_numbers = #tpu.dot_dimension_numbers<[1], [0], [0], [1], [0, 0, 1, 1], [], []>} : vector<40x128xbf16>, vector<128x128xbf16>, vector<40x128xf32> -> vector<40x128xf32>
    %414 = arith.addf %408, %413 : vector<40x128xf32>
    %415 = vector.extract_strided_slice %371 {offsets = [7, 0], sizes = [40, 128], strides = [1, 1]} : vector<47x128xf32> to vector<40x128xf32>
    %416 = arith.truncf %415 : vector<40x128xf32> to vector<40x128xbf16>
    %c7_310 = arith.constant 7 : index
    %c0_311 = arith.constant 0 : index
    %c0_312 = arith.constant 0 : index
    %417 = vector.load %arg12[%c7_310, %c0_311, %c0_312] : memref<8x128x128xbf16, #tpu.memory_space<vmem>>, vector<1x128x128xbf16>
    %418 = vector.shape_cast %417 : vector<1x128x128xbf16> to vector<128x128xbf16>
    %cst_313 = arith.constant dense<0.000000e+00> : vector<40x128xf32>
    %419 = tpu.matmul %416, %418, %cst_313 {dimension_numbers = #tpu.dot_dimension_numbers<[1], [0], [0], [1], [0, 0, 1, 1], [], []>} : vector<40x128xbf16>, vector<128x128xbf16>, vector<40x128xf32> -> vector<40x128xf32>
    %420 = arith.addf %414, %419 : vector<40x128xf32>
    %c0_314 = arith.constant 0 : index
    %c0_315 = arith.constant 0 : index
    %421 = vector.load %arg13[%c0_314, %c0_315] : memref<1x128xf32, #tpu.memory_space<vmem>>, vector<1x128xf32>
    %422 = vector.broadcast %421 : vector<1x128xf32> to vector<40x128xf32>
    %423 = arith.mulf %420, %422 : vector<40x128xf32>
    %c0_316 = arith.constant 0 : index
    %c0_317 = arith.constant 0 : index
    %424 = vector.load %arg14[%c0_316, %c0_317] : memref<1x128xf32, #tpu.memory_space<vmem>>, vector<1x128xf32>
    %425 = vector.broadcast %424 : vector<1x128xf32> to vector<40x128xf32>
    %426 = arith.addf %423, %425 : vector<40x128xf32>
    %cst_318 = arith.constant 0.000000e+00 : f32
    %427 = vector.broadcast %cst_318 : f32 to vector<40x128xf32>
    %428 = arith.maximumf %426, %427 : vector<40x128xf32>
    %c0_319 = arith.constant 0 : index
    %c0_320 = arith.constant 0 : index
    %429 = vector.load %arg28[%c0_319, %c0_320] : memref<496x128xf32, #tpu.memory_space<vmem>>, vector<40x128xf32>
    tpu.vector_store %arg28[%c0_319, %c0_320], %428 {strides = array<i32>} : memref<496x128xf32, #tpu.memory_space<vmem>>, vector<40x128xf32>,
    %c0_321 = arith.constant 0 : index
    %c0_322 = arith.constant 0 : index
    %430 = vector.load %arg28[%c0_321, %c0_322] : memref<496x128xf32, #tpu.memory_space<vmem>>, vector<4x128xf32>
    %cst_323 = arith.constant dense<0xFF800000> : vector<128xf32>
    %431 = vector.multi_reduction <maximumf>, %430, %cst_323 [0] : vector<4x128xf32> to vector<128xf32>
    %432 = vector.shape_cast %431 : vector<128xf32> to vector<1x128xf32>
    %c0_324 = arith.constant 0 : index
    %c0_325 = arith.constant 0 : index
    %433 = vector.load %arg29[%c0_324, %c0_325] : memref<64x128xf32, #tpu.memory_space<vmem>>, vector<1x128xf32>
    tpu.vector_store %arg29[%c0_324, %c0_325], %432 {strides = array<i32>} : memref<64x128xf32, #tpu.memory_space<vmem>>, vector<1x128xf32>,
    %c4_326 = arith.constant 4 : index
    %c0_327 = arith.constant 0 : index
    %434 = vector.load %arg28[%c4_326, %c0_327] : memref<496x128xf32, #tpu.memory_space<vmem>>, vector<4x128xf32>
    %cst_328 = arith.constant dense<0xFF800000> : vector<128xf32>
    %435 = vector.multi_reduction <maximumf>, %434, %cst_328 [0] : vector<4x128xf32> to vector<128xf32>
    %436 = vector.shape_cast %435 : vector<128xf32> to vector<1x128xf32>
    %c1_329 = arith.constant 1 : index
    %c0_330 = arith.constant 0 : index
    %437 = vector.load %arg29[%c1_329, %c0_330] : memref<64x128xf32, #tpu.memory_space<vmem>>, vector<1x128xf32>
    tpu.vector_store %arg29[%c1_329, %c0_330], %436 {strides = array<i32>} : memref<64x128xf32, #tpu.memory_space<vmem>>, vector<1x128xf32>,
    %c8_331 = arith.constant 8 : index
    %c0_332 = arith.constant 0 : index
    %438 = vector.load %arg28[%c8_331, %c0_332] : memref<496x128xf32, #tpu.memory_space<vmem>>, vector<4x128xf32>
    %cst_333 = arith.constant dense<0xFF800000> : vector<128xf32>
    %439 = vector.multi_reduction <maximumf>, %438, %cst_333 [0] : vector<4x128xf32> to vector<128xf32>
    %440 = vector.shape_cast %439 : vector<128xf32> to vector<1x128xf32>
    %c2_334 = arith.constant 2 : index
    %c0_335 = arith.constant 0 : index
    %441 = vector.load %arg29[%c2_334, %c0_335] : memref<64x128xf32, #tpu.memory_space<vmem>>, vector<1x128xf32>
    tpu.vector_store %arg29[%c2_334, %c0_335], %440 {strides = array<i32>} : memref<64x128xf32, #tpu.memory_space<vmem>>, vector<1x128xf32>,
    %c12_336 = arith.constant 12 : index
    %c0_337 = arith.constant 0 : index
    %442 = vector.load %arg28[%c12_336, %c0_337] : memref<496x128xf32, #tpu.memory_space<vmem>>, vector<4x128xf32>
    %cst_338 = arith.constant dense<0xFF800000> : vector<128xf32>
    %443 = vector.multi_reduction <maximumf>, %442, %cst_338 [0] : vector<4x128xf32> to vector<128xf32>
    %444 = vector.shape_cast %443 : vector<128xf32> to vector<1x128xf32>
    %c3_339 = arith.constant 3 : index
    %c0_340 = arith.constant 0 : index
    %445 = vector.load %arg29[%c3_339, %c0_340] : memref<64x128xf32, #tpu.memory_space<vmem>>, vector<1x128xf32>
    tpu.vector_store %arg29[%c3_339, %c0_340], %444 {strides = array<i32>} : memref<64x128xf32, #tpu.memory_space<vmem>>, vector<1x128xf32>,
    %c16_341 = arith.constant 16 : index
    %c0_342 = arith.constant 0 : index
    %446 = vector.load %arg28[%c16_341, %c0_342] : memref<496x128xf32, #tpu.memory_space<vmem>>, vector<4x128xf32>
    %cst_343 = arith.constant dense<0xFF800000> : vector<128xf32>
    %447 = vector.multi_reduction <maximumf>, %446, %cst_343 [0] : vector<4x128xf32> to vector<128xf32>
    %448 = vector.shape_cast %447 : vector<128xf32> to vector<1x128xf32>
    %c4_344 = arith.constant 4 : index
    %c0_345 = arith.constant 0 : index
    %449 = vector.load %arg29[%c4_344, %c0_345] : memref<64x128xf32, #tpu.memory_space<vmem>>, vector<1x128xf32>
    tpu.vector_store %arg29[%c4_344, %c0_345], %448 {strides = array<i32>} : memref<64x128xf32, #tpu.memory_space<vmem>>, vector<1x128xf32>,
    %c20_346 = arith.constant 20 : index
    %c0_347 = arith.constant 0 : index
    %450 = vector.load %arg28[%c20_346, %c0_347] : memref<496x128xf32, #tpu.memory_space<vmem>>, vector<4x128xf32>
    %cst_348 = arith.constant dense<0xFF800000> : vector<128xf32>
    %451 = vector.multi_reduction <maximumf>, %450, %cst_348 [0] : vector<4x128xf32> to vector<128xf32>
    %452 = vector.shape_cast %451 : vector<128xf32> to vector<1x128xf32>
    %c5_349 = arith.constant 5 : index
    %c0_350 = arith.constant 0 : index
    %453 = vector.load %arg29[%c5_349, %c0_350] : memref<64x128xf32, #tpu.memory_space<vmem>>, vector<1x128xf32>
    tpu.vector_store %arg29[%c5_349, %c0_350], %452 {strides = array<i32>} : memref<64x128xf32, #tpu.memory_space<vmem>>, vector<1x128xf32>,
    %c24_351 = arith.constant 24 : index
    %c0_352 = arith.constant 0 : index
    %454 = vector.load %arg28[%c24_351, %c0_352] : memref<496x128xf32, #tpu.memory_space<vmem>>, vector<4x128xf32>
    %cst_353 = arith.constant dense<0xFF800000> : vector<128xf32>
    %455 = vector.multi_reduction <maximumf>, %454, %cst_353 [0] : vector<4x128xf32> to vector<128xf32>
    %456 = vector.shape_cast %455 : vector<128xf32> to vector<1x128xf32>
    %c6_354 = arith.constant 6 : index
    %c0_355 = arith.constant 0 : index
    %457 = vector.load %arg29[%c6_354, %c0_355] : memref<64x128xf32, #tpu.memory_space<vmem>>, vector<1x128xf32>
    tpu.vector_store %arg29[%c6_354, %c0_355], %456 {strides = array<i32>} : memref<64x128xf32, #tpu.memory_space<vmem>>, vector<1x128xf32>,
    %c28_356 = arith.constant 28 : index
    %c0_357 = arith.constant 0 : index
    %458 = vector.load %arg28[%c28_356, %c0_357] : memref<496x128xf32, #tpu.memory_space<vmem>>, vector<4x128xf32>
    %cst_358 = arith.constant dense<0xFF800000> : vector<128xf32>
    %459 = vector.multi_reduction <maximumf>, %458, %cst_358 [0] : vector<4x128xf32> to vector<128xf32>
    %460 = vector.shape_cast %459 : vector<128xf32> to vector<1x128xf32>
    %c7_359 = arith.constant 7 : index
    %c0_360 = arith.constant 0 : index
    %461 = vector.load %arg29[%c7_359, %c0_360] : memref<64x128xf32, #tpu.memory_space<vmem>>, vector<1x128xf32>
    tpu.vector_store %arg29[%c7_359, %c0_360], %460 {strides = array<i32>} : memref<64x128xf32, #tpu.memory_space<vmem>>, vector<1x128xf32>,
    %c32_361 = arith.constant 32 : index
    %c0_362 = arith.constant 0 : index
    %462 = vector.load %arg28[%c32_361, %c0_362] : memref<496x128xf32, #tpu.memory_space<vmem>>, vector<4x128xf32>
    %cst_363 = arith.constant dense<0xFF800000> : vector<128xf32>
    %463 = vector.multi_reduction <maximumf>, %462, %cst_363 [0] : vector<4x128xf32> to vector<128xf32>
    %464 = vector.shape_cast %463 : vector<128xf32> to vector<1x128xf32>
    %c8_364 = arith.constant 8 : index
    %c0_365 = arith.constant 0 : index
    %465 = vector.load %arg29[%c8_364, %c0_365] : memref<64x128xf32, #tpu.memory_space<vmem>>, vector<1x128xf32>
    tpu.vector_store %arg29[%c8_364, %c0_365], %464 {strides = array<i32>} : memref<64x128xf32, #tpu.memory_space<vmem>>, vector<1x128xf32>,
    %c36_366 = arith.constant 36 : index
    %c0_367 = arith.constant 0 : index
    %466 = vector.load %arg28[%c36_366, %c0_367] : memref<496x128xf32, #tpu.memory_space<vmem>>, vector<4x128xf32>
    %cst_368 = arith.constant dense<0xFF800000> : vector<128xf32>
    %467 = vector.multi_reduction <maximumf>, %466, %cst_368 [0] : vector<4x128xf32> to vector<128xf32>
    %468 = vector.shape_cast %467 : vector<128xf32> to vector<1x128xf32>
    %c9_369 = arith.constant 9 : index
    %c0_370 = arith.constant 0 : index
    %469 = vector.load %arg29[%c9_369, %c0_370] : memref<64x128xf32, #tpu.memory_space<vmem>>, vector<1x128xf32>
    tpu.vector_store %arg29[%c9_369, %c0_370], %468 {strides = array<i32>} : memref<64x128xf32, #tpu.memory_space<vmem>>, vector<1x128xf32>,
    %c0_371 = arith.constant 0 : index
    %c0_372 = arith.constant 0 : index
    %470 = vector.load %arg29[%c0_371, %c0_372] : memref<64x128xf32, #tpu.memory_space<vmem>>, vector<10x128xf32>
    %c0_373 = arith.constant 0 : index
    %c0_374 = arith.constant 0 : index
    %c0_375 = arith.constant 0 : index
    %471 = vector.load %arg27[%c0_373, %c0_374, %c0_375] : memref<1x15x128xf32, #tpu.memory_space<vmem>>, vector<1x10x128xf32>
    %472 = vector.shape_cast %471 : vector<1x10x128xf32> to vector<10x128xf32>
    %473 = vector.shape_cast %470 : vector<10x128xf32> to vector<1x10x128xf32>
    tpu.vector_store %arg27[%c0_373, %c0_374, %c0_375], %473 {strides = array<i32>} : memref<1x15x128xf32, #tpu.memory_space<vmem>>, vector<1x10x128xf32>,
    %c0_376 = arith.constant 0 : index
    %c0_377 = arith.constant 0 : index
    %c0_378 = arith.constant 0 : index
    %474 = vector.load %arg2[%c0_376, %c0_377, %c0_378] : memref<1x53x400xbf16, #tpu.memory_space<vmem>>, vector<1x53x400xbf16>
    %475 = vector.shape_cast %474 : vector<1x53x400xbf16> to vector<53x400xbf16>
    %c0_379 = arith.constant 0 : index
    %c0_380 = arith.constant 0 : index
    %476 = vector.load %arg15[%c0_379, %c0_380] : memref<400x64xbf16, #tpu.memory_space<vmem>>, vector<400x64xbf16>
    %cst_381 = arith.constant dense<0.000000e+00> : vector<53x64xf32>
    %477 = tpu.matmul %475, %476, %cst_381 {dimension_numbers = #tpu.dot_dimension_numbers<[1], [0], [0], [1], [0, 0, 1, 1], [], []>} : vector<53x400xbf16>, vector<400x64xbf16>, vector<53x64xf32> -> vector<53x64xf32>
    %c0_382 = arith.constant 0 : index
    %c0_383 = arith.constant 0 : index
    %478 = vector.load %arg16[%c0_382, %c0_383] : memref<1x64xf32, #tpu.memory_space<vmem>>, vector<1x64xf32>
    %479 = vector.broadcast %478 : vector<1x64xf32> to vector<53x64xf32>
    %480 = arith.mulf %477, %479 : vector<53x64xf32>
    %c0_384 = arith.constant 0 : index
    %c0_385 = arith.constant 0 : index
    %481 = vector.load %arg17[%c0_384, %c0_385] : memref<1x64xf32, #tpu.memory_space<vmem>>, vector<1x64xf32>
    %482 = vector.broadcast %481 : vector<1x64xf32> to vector<53x64xf32>
    %483 = arith.addf %480, %482 : vector<53x64xf32>
    %cst_386 = arith.constant 0.000000e+00 : f32
    %484 = vector.broadcast %cst_386 : f32 to vector<53x64xf32>
    %485 = arith.maximumf %483, %484 : vector<53x64xf32>
    %c0_387 = arith.constant 0 : index
    %c0_388 = arith.constant 0 : index
    %486 = vector.load %arg28[%c0_387, %c0_388] : memref<496x128xf32, #tpu.memory_space<vmem>>, vector<53x64xf32>
    tpu.vector_store %arg28[%c0_387, %c0_388], %485 {strides = array<i32>} : memref<496x128xf32, #tpu.memory_space<vmem>>, vector<53x64xf32>,
    %c0_389 = arith.constant 0 : index
    %c0_390 = arith.constant 0 : index
    %487 = vector.load %arg28[%c0_389, %c0_390] : memref<496x128xf32, #tpu.memory_space<vmem>>, vector<4x64xf32>
    %cst_391 = arith.constant dense<0xFF800000> : vector<64xf32>
    %488 = vector.multi_reduction <maximumf>, %487, %cst_391 [0] : vector<4x64xf32> to vector<64xf32>
    %489 = vector.shape_cast %488 : vector<64xf32> to vector<1x64xf32>
    %c0_392 = arith.constant 0 : index
    %c0_393 = arith.constant 0 : index
    %490 = vector.load %arg29[%c0_392, %c0_393] : memref<64x128xf32, #tpu.memory_space<vmem>>, vector<1x64xf32>
    tpu.vector_store %arg29[%c0_392, %c0_393], %489 {strides = array<i32>} : memref<64x128xf32, #tpu.memory_space<vmem>>, vector<1x64xf32>,
    %c4_394 = arith.constant 4 : index
    %c0_395 = arith.constant 0 : index
    %491 = vector.load %arg28[%c4_394, %c0_395] : memref<496x128xf32, #tpu.memory_space<vmem>>, vector<4x64xf32>
    %cst_396 = arith.constant dense<0xFF800000> : vector<64xf32>
    %492 = vector.multi_reduction <maximumf>, %491, %cst_396 [0] : vector<4x64xf32> to vector<64xf32>
    %493 = vector.shape_cast %492 : vector<64xf32> to vector<1x64xf32>
    %c1_397 = arith.constant 1 : index
    %c0_398 = arith.constant 0 : index
    %494 = vector.load %arg29[%c1_397, %c0_398] : memref<64x128xf32, #tpu.memory_space<vmem>>, vector<1x64xf32>
    tpu.vector_store %arg29[%c1_397, %c0_398], %493 {strides = array<i32>} : memref<64x128xf32, #tpu.memory_space<vmem>>, vector<1x64xf32>,
    %c8_399 = arith.constant 8 : index
    %c0_400 = arith.constant 0 : index
    %495 = vector.load %arg28[%c8_399, %c0_400] : memref<496x128xf32, #tpu.memory_space<vmem>>, vector<4x64xf32>
    %cst_401 = arith.constant dense<0xFF800000> : vector<64xf32>
    %496 = vector.multi_reduction <maximumf>, %495, %cst_401 [0] : vector<4x64xf32> to vector<64xf32>
    %497 = vector.shape_cast %496 : vector<64xf32> to vector<1x64xf32>
    %c2_402 = arith.constant 2 : index
    %c0_403 = arith.constant 0 : index
    %498 = vector.load %arg29[%c2_402, %c0_403] : memref<64x128xf32, #tpu.memory_space<vmem>>, vector<1x64xf32>
    tpu.vector_store %arg29[%c2_402, %c0_403], %497 {strides = array<i32>} : memref<64x128xf32, #tpu.memory_space<vmem>>, vector<1x64xf32>,
    %c12_404 = arith.constant 12 : index
    %c0_405 = arith.constant 0 : index
    %499 = vector.load %arg28[%c12_404, %c0_405] : memref<496x128xf32, #tpu.memory_space<vmem>>, vector<4x64xf32>
    %cst_406 = arith.constant dense<0xFF800000> : vector<64xf32>
    %500 = vector.multi_reduction <maximumf>, %499, %cst_406 [0] : vector<4x64xf32> to vector<64xf32>
    %501 = vector.shape_cast %500 : vector<64xf32> to vector<1x64xf32>
    %c3_407 = arith.constant 3 : index
    %c0_408 = arith.constant 0 : index
    %502 = vector.load %arg29[%c3_407, %c0_408] : memref<64x128xf32, #tpu.memory_space<vmem>>, vector<1x64xf32>
    tpu.vector_store %arg29[%c3_407, %c0_408], %501 {strides = array<i32>} : memref<64x128xf32, #tpu.memory_space<vmem>>, vector<1x64xf32>,
    %c16_409 = arith.constant 16 : index
    %c0_410 = arith.constant 0 : index
    %503 = vector.load %arg28[%c16_409, %c0_410] : memref<496x128xf32, #tpu.memory_space<vmem>>, vector<4x64xf32>
    %cst_411 = arith.constant dense<0xFF800000> : vector<64xf32>
    %504 = vector.multi_reduction <maximumf>, %503, %cst_411 [0] : vector<4x64xf32> to vector<64xf32>
    %505 = vector.shape_cast %504 : vector<64xf32> to vector<1x64xf32>
    %c4_412 = arith.constant 4 : index
    %c0_413 = arith.constant 0 : index
    %506 = vector.load %arg29[%c4_412, %c0_413] : memref<64x128xf32, #tpu.memory_space<vmem>>, vector<1x64xf32>
    tpu.vector_store %arg29[%c4_412, %c0_413], %505 {strides = array<i32>} : memref<64x128xf32, #tpu.memory_space<vmem>>, vector<1x64xf32>,
    %c20_414 = arith.constant 20 : index
    %c0_415 = arith.constant 0 : index
    %507 = vector.load %arg28[%c20_414, %c0_415] : memref<496x128xf32, #tpu.memory_space<vmem>>, vector<4x64xf32>
    %cst_416 = arith.constant dense<0xFF800000> : vector<64xf32>
    %508 = vector.multi_reduction <maximumf>, %507, %cst_416 [0] : vector<4x64xf32> to vector<64xf32>
    %509 = vector.shape_cast %508 : vector<64xf32> to vector<1x64xf32>
    %c5_417 = arith.constant 5 : index
    %c0_418 = arith.constant 0 : index
    %510 = vector.load %arg29[%c5_417, %c0_418] : memref<64x128xf32, #tpu.memory_space<vmem>>, vector<1x64xf32>
    tpu.vector_store %arg29[%c5_417, %c0_418], %509 {strides = array<i32>} : memref<64x128xf32, #tpu.memory_space<vmem>>, vector<1x64xf32>,
    %c24_419 = arith.constant 24 : index
    %c0_420 = arith.constant 0 : index
    %511 = vector.load %arg28[%c24_419, %c0_420] : memref<496x128xf32, #tpu.memory_space<vmem>>, vector<4x64xf32>
    %cst_421 = arith.constant dense<0xFF800000> : vector<64xf32>
    %512 = vector.multi_reduction <maximumf>, %511, %cst_421 [0] : vector<4x64xf32> to vector<64xf32>
    %513 = vector.shape_cast %512 : vector<64xf32> to vector<1x64xf32>
    %c6_422 = arith.constant 6 : index
    %c0_423 = arith.constant 0 : index
    %514 = vector.load %arg29[%c6_422, %c0_423] : memref<64x128xf32, #tpu.memory_space<vmem>>, vector<1x64xf32>
    tpu.vector_store %arg29[%c6_422, %c0_423], %513 {strides = array<i32>} : memref<64x128xf32, #tpu.memory_space<vmem>>, vector<1x64xf32>,
    %c28_424 = arith.constant 28 : index
    %c0_425 = arith.constant 0 : index
    %515 = vector.load %arg28[%c28_424, %c0_425] : memref<496x128xf32, #tpu.memory_space<vmem>>, vector<4x64xf32>
    %cst_426 = arith.constant dense<0xFF800000> : vector<64xf32>
    %516 = vector.multi_reduction <maximumf>, %515, %cst_426 [0] : vector<4x64xf32> to vector<64xf32>
    %517 = vector.shape_cast %516 : vector<64xf32> to vector<1x64xf32>
    %c7_427 = arith.constant 7 : index
    %c0_428 = arith.constant 0 : index
    %518 = vector.load %arg29[%c7_427, %c0_428] : memref<64x128xf32, #tpu.memory_space<vmem>>, vector<1x64xf32>
    tpu.vector_store %arg29[%c7_427, %c0_428], %517 {strides = array<i32>} : memref<64x128xf32, #tpu.memory_space<vmem>>, vector<1x64xf32>,
    %c32_429 = arith.constant 32 : index
    %c0_430 = arith.constant 0 : index
    %519 = vector.load %arg28[%c32_429, %c0_430] : memref<496x128xf32, #tpu.memory_space<vmem>>, vector<4x64xf32>
    %cst_431 = arith.constant dense<0xFF800000> : vector<64xf32>
    %520 = vector.multi_reduction <maximumf>, %519, %cst_431 [0] : vector<4x64xf32> to vector<64xf32>
    %521 = vector.shape_cast %520 : vector<64xf32> to vector<1x64xf32>
    %c8_432 = arith.constant 8 : index
    %c0_433 = arith.constant 0 : index
    %522 = vector.load %arg29[%c8_432, %c0_433] : memref<64x128xf32, #tpu.memory_space<vmem>>, vector<1x64xf32>
    tpu.vector_store %arg29[%c8_432, %c0_433], %521 {strides = array<i32>} : memref<64x128xf32, #tpu.memory_space<vmem>>, vector<1x64xf32>,
    %c36_434 = arith.constant 36 : index
    %c0_435 = arith.constant 0 : index
    %523 = vector.load %arg28[%c36_434, %c0_435] : memref<496x128xf32, #tpu.memory_space<vmem>>, vector<4x64xf32>
    %cst_436 = arith.constant dense<0xFF800000> : vector<64xf32>
    %524 = vector.multi_reduction <maximumf>, %523, %cst_436 [0] : vector<4x64xf32> to vector<64xf32>
    %525 = vector.shape_cast %524 : vector<64xf32> to vector<1x64xf32>
    %c9_437 = arith.constant 9 : index
    %c0_438 = arith.constant 0 : index
    %526 = vector.load %arg29[%c9_437, %c0_438] : memref<64x128xf32, #tpu.memory_space<vmem>>, vector<1x64xf32>
    tpu.vector_store %arg29[%c9_437, %c0_438], %525 {strides = array<i32>} : memref<64x128xf32, #tpu.memory_space<vmem>>, vector<1x64xf32>,
    %c40_439 = arith.constant 40 : index
    %c0_440 = arith.constant 0 : index
    %527 = vector.load %arg28[%c40_439, %c0_440] : memref<496x128xf32, #tpu.memory_space<vmem>>, vector<4x64xf32>
    %cst_441 = arith.constant dense<0xFF800000> : vector<64xf32>
    %528 = vector.multi_reduction <maximumf>, %527, %cst_441 [0] : vector<4x64xf32> to vector<64xf32>
    %529 = vector.shape_cast %528 : vector<64xf32> to vector<1x64xf32>
    %c10_442 = arith.constant 10 : index
    %c0_443 = arith.constant 0 : index
    %530 = vector.load %arg29[%c10_442, %c0_443] : memref<64x128xf32, #tpu.memory_space<vmem>>, vector<1x64xf32>
    tpu.vector_store %arg29[%c10_442, %c0_443], %529 {strides = array<i32>} : memref<64x128xf32, #tpu.memory_space<vmem>>, vector<1x64xf32>,
    %c44_444 = arith.constant 44 : index
    %c0_445 = arith.constant 0 : index
    %531 = vector.load %arg28[%c44_444, %c0_445] : memref<496x128xf32, #tpu.memory_space<vmem>>, vector<4x64xf32>
    %cst_446 = arith.constant dense<0xFF800000> : vector<64xf32>
    %532 = vector.multi_reduction <maximumf>, %531, %cst_446 [0] : vector<4x64xf32> to vector<64xf32>
    %533 = vector.shape_cast %532 : vector<64xf32> to vector<1x64xf32>
    %c11_447 = arith.constant 11 : index
    %c0_448 = arith.constant 0 : index
    %534 = vector.load %arg29[%c11_447, %c0_448] : memref<64x128xf32, #tpu.memory_space<vmem>>, vector<1x64xf32>
    tpu.vector_store %arg29[%c11_447, %c0_448], %533 {strides = array<i32>} : memref<64x128xf32, #tpu.memory_space<vmem>>, vector<1x64xf32>,
    %c48_449 = arith.constant 48 : index
    %c0_450 = arith.constant 0 : index
    %535 = vector.load %arg28[%c48_449, %c0_450] : memref<496x128xf32, #tpu.memory_space<vmem>>, vector<4x64xf32>
    %cst_451 = arith.constant dense<0xFF800000> : vector<64xf32>
    %536 = vector.multi_reduction <maximumf>, %535, %cst_451 [0] : vector<4x64xf32> to vector<64xf32>
    %537 = vector.shape_cast %536 : vector<64xf32> to vector<1x64xf32>
    %c12_452 = arith.constant 12 : index
    %c0_453 = arith.constant 0 : index
    %538 = vector.load %arg29[%c12_452, %c0_453] : memref<64x128xf32, #tpu.memory_space<vmem>>, vector<1x64xf32>
    tpu.vector_store %arg29[%c12_452, %c0_453], %537 {strides = array<i32>} : memref<64x128xf32, #tpu.memory_space<vmem>>, vector<1x64xf32>,
    %c0_454 = arith.constant 0 : index
    %c0_455 = arith.constant 0 : index
    %539 = vector.load %arg29[%c0_454, %c0_455] : memref<64x128xf32, #tpu.memory_space<vmem>>, vector<13x64xf32>
    %cst_456 = arith.constant 0.000000e+00 : f32
    %540 = vector.broadcast %cst_456 : f32 to vector<24x128xf32>
    %c0_457 = arith.constant 0 : index
    %c0_458 = arith.constant 0 : index
    %541 = vector.load %arg30[%c0_457, %c0_458] : memref<24x128xf32, #tpu.memory_space<vmem>>, vector<24x128xf32>
    tpu.vector_store %arg30[%c0_457, %c0_458], %540 {strides = array<i32>} : memref<24x128xf32, #tpu.memory_space<vmem>>, vector<24x128xf32>,
    %c2_459 = arith.constant 2 : index
    %c0_460 = arith.constant 0 : index
    %542 = vector.load %arg30[%c2_459, %c0_460] : memref<24x128xf32, #tpu.memory_space<vmem>>, vector<13x64xf32>
    tpu.vector_store %arg30[%c2_459, %c0_460], %539 {strides = array<i32>} : memref<24x128xf32, #tpu.memory_space<vmem>>, vector<13x64xf32>,
    %cst_461 = arith.constant 0.000000e+00 : f32
    %543 = vector.broadcast %cst_461 : f32 to vector<12x128xf32>
    %c0_462 = arith.constant 0 : index
    %c0_463 = arith.constant 0 : index
    %544 = vector.load %arg30[%c0_462, %c0_463] : memref<24x128xf32, #tpu.memory_space<vmem>>, vector<12x64xf32>
    %545 = arith.truncf %544 : vector<12x64xf32> to vector<12x64xbf16>
    %c0_464 = arith.constant 0 : index
    %c0_465 = arith.constant 0 : index
    %c0_466 = arith.constant 0 : index
    %546 = vector.load %arg18[%c0_464, %c0_465, %c0_466] : memref<6x64x128xbf16, #tpu.memory_space<vmem>>, vector<1x64x128xbf16>
    %547 = vector.shape_cast %546 : vector<1x64x128xbf16> to vector<64x128xbf16>
    %cst_467 = arith.constant dense<0.000000e+00> : vector<12x128xf32>
    %548 = tpu.matmul %545, %547, %cst_467 {dimension_numbers = #tpu.dot_dimension_numbers<[1], [0], [0], [1], [0, 0, 1, 1], [], []>} : vector<12x64xbf16>, vector<64x128xbf16>, vector<12x128xf32> -> vector<12x128xf32>
    %549 = arith.addf %543, %548 : vector<12x128xf32>
    %c1_468 = arith.constant 1 : index
    %c0_469 = arith.constant 0 : index
    %550 = vector.load %arg30[%c1_468, %c0_469] : memref<24x128xf32, #tpu.memory_space<vmem>>, vector<12x64xf32>
    %551 = arith.truncf %550 : vector<12x64xf32> to vector<12x64xbf16>
    %c1_470 = arith.constant 1 : index
    %c0_471 = arith.constant 0 : index
    %c0_472 = arith.constant 0 : index
    %552 = vector.load %arg18[%c1_470, %c0_471, %c0_472] : memref<6x64x128xbf16, #tpu.memory_space<vmem>>, vector<1x64x128xbf16>
    %553 = vector.shape_cast %552 : vector<1x64x128xbf16> to vector<64x128xbf16>
    %cst_473 = arith.constant dense<0.000000e+00> : vector<12x128xf32>
    %554 = tpu.matmul %551, %553, %cst_473 {dimension_numbers = #tpu.dot_dimension_numbers<[1], [0], [0], [1], [0, 0, 1, 1], [], []>} : vector<12x64xbf16>, vector<64x128xbf16>, vector<12x128xf32> -> vector<12x128xf32>
    %555 = arith.addf %549, %554 : vector<12x128xf32>
    %c2_474 = arith.constant 2 : index
    %c0_475 = arith.constant 0 : index
    %556 = vector.load %arg30[%c2_474, %c0_475] : memref<24x128xf32, #tpu.memory_space<vmem>>, vector<12x64xf32>
    %557 = arith.truncf %556 : vector<12x64xf32> to vector<12x64xbf16>
    %c2_476 = arith.constant 2 : index
    %c0_477 = arith.constant 0 : index
    %c0_478 = arith.constant 0 : index
    %558 = vector.load %arg18[%c2_476, %c0_477, %c0_478] : memref<6x64x128xbf16, #tpu.memory_space<vmem>>, vector<1x64x128xbf16>
    %559 = vector.shape_cast %558 : vector<1x64x128xbf16> to vector<64x128xbf16>
    %cst_479 = arith.constant dense<0.000000e+00> : vector<12x128xf32>
    %560 = tpu.matmul %557, %559, %cst_479 {dimension_numbers = #tpu.dot_dimension_numbers<[1], [0], [0], [1], [0, 0, 1, 1], [], []>} : vector<12x64xbf16>, vector<64x128xbf16>, vector<12x128xf32> -> vector<12x128xf32>
    %561 = arith.addf %555, %560 : vector<12x128xf32>
    %c3_480 = arith.constant 3 : index
    %c0_481 = arith.constant 0 : index
    %562 = vector.load %arg30[%c3_480, %c0_481] : memref<24x128xf32, #tpu.memory_space<vmem>>, vector<12x64xf32>
    %563 = arith.truncf %562 : vector<12x64xf32> to vector<12x64xbf16>
    %c3_482 = arith.constant 3 : index
    %c0_483 = arith.constant 0 : index
    %c0_484 = arith.constant 0 : index
    %564 = vector.load %arg18[%c3_482, %c0_483, %c0_484] : memref<6x64x128xbf16, #tpu.memory_space<vmem>>, vector<1x64x128xbf16>
    %565 = vector.shape_cast %564 : vector<1x64x128xbf16> to vector<64x128xbf16>
    %cst_485 = arith.constant dense<0.000000e+00> : vector<12x128xf32>
    %566 = tpu.matmul %563, %565, %cst_485 {dimension_numbers = #tpu.dot_dimension_numbers<[1], [0], [0], [1], [0, 0, 1, 1], [], []>} : vector<12x64xbf16>, vector<64x128xbf16>, vector<12x128xf32> -> vector<12x128xf32>
    %567 = arith.addf %561, %566 : vector<12x128xf32>
    %c4_486 = arith.constant 4 : index
    %c0_487 = arith.constant 0 : index
    %568 = vector.load %arg30[%c4_486, %c0_487] : memref<24x128xf32, #tpu.memory_space<vmem>>, vector<12x64xf32>
    %569 = arith.truncf %568 : vector<12x64xf32> to vector<12x64xbf16>
    %c4_488 = arith.constant 4 : index
    %c0_489 = arith.constant 0 : index
    %c0_490 = arith.constant 0 : index
    %570 = vector.load %arg18[%c4_488, %c0_489, %c0_490] : memref<6x64x128xbf16, #tpu.memory_space<vmem>>, vector<1x64x128xbf16>
    %571 = vector.shape_cast %570 : vector<1x64x128xbf16> to vector<64x128xbf16>
    %cst_491 = arith.constant dense<0.000000e+00> : vector<12x128xf32>
    %572 = tpu.matmul %569, %571, %cst_491 {dimension_numbers = #tpu.dot_dimension_numbers<[1], [0], [0], [1], [0, 0, 1, 1], [], []>} : vector<12x64xbf16>, vector<64x128xbf16>, vector<12x128xf32> -> vector<12x128xf32>
    %573 = arith.addf %567, %572 : vector<12x128xf32>
    %c5_492 = arith.constant 5 : index
    %c0_493 = arith.constant 0 : index
    %574 = vector.load %arg30[%c5_492, %c0_493] : memref<24x128xf32, #tpu.memory_space<vmem>>, vector<12x64xf32>
    %575 = arith.truncf %574 : vector<12x64xf32> to vector<12x64xbf16>
    %c5_494 = arith.constant 5 : index
    %c0_495 = arith.constant 0 : index
    %c0_496 = arith.constant 0 : index
    %576 = vector.load %arg18[%c5_494, %c0_495, %c0_496] : memref<6x64x128xbf16, #tpu.memory_space<vmem>>, vector<1x64x128xbf16>
    %577 = vector.shape_cast %576 : vector<1x64x128xbf16> to vector<64x128xbf16>
    %cst_497 = arith.constant dense<0.000000e+00> : vector<12x128xf32>
    %578 = tpu.matmul %575, %577, %cst_497 {dimension_numbers = #tpu.dot_dimension_numbers<[1], [0], [0], [1], [0, 0, 1, 1], [], []>} : vector<12x64xbf16>, vector<64x128xbf16>, vector<12x128xf32> -> vector<12x128xf32>
    %579 = arith.addf %573, %578 : vector<12x128xf32>
    %c0_498 = arith.constant 0 : index
    %c0_499 = arith.constant 0 : index
    %580 = vector.load %arg19[%c0_498, %c0_499] : memref<1x128xf32, #tpu.memory_space<vmem>>, vector<1x128xf32>
    %581 = vector.broadcast %580 : vector<1x128xf32> to vector<12x128xf32>
    %582 = arith.mulf %579, %581 : vector<12x128xf32>
    %c0_500 = arith.constant 0 : index
    %c0_501 = arith.constant 0 : index
    %583 = vector.load %arg20[%c0_500, %c0_501] : memref<1x128xf32, #tpu.memory_space<vmem>>, vector<1x128xf32>
    %584 = vector.broadcast %583 : vector<1x128xf32> to vector<12x128xf32>
    %585 = arith.addf %582, %584 : vector<12x128xf32>
    %cst_502 = arith.constant 0.000000e+00 : f32
    %586 = vector.broadcast %cst_502 : f32 to vector<12x128xf32>
    %587 = arith.maximumf %585, %586 : vector<12x128xf32>
    %cst_503 = arith.constant 0.000000e+00 : f32
    %588 = vector.broadcast %cst_503 : f32 to vector<24x128xf32>
    %c0_504 = arith.constant 0 : index
    %c0_505 = arith.constant 0 : index
    %589 = vector.load %arg30[%c0_504, %c0_505] : memref<24x128xf32, #tpu.memory_space<vmem>>, vector<24x128xf32>
    tpu.vector_store %arg30[%c0_504, %c0_505], %588 {strides = array<i32>} : memref<24x128xf32, #tpu.memory_space<vmem>>, vector<24x128xf32>,
    %c2_506 = arith.constant 2 : index
    %c0_507 = arith.constant 0 : index
    %590 = vector.load %arg30[%c2_506, %c0_507] : memref<24x128xf32, #tpu.memory_space<vmem>>, vector<12x128xf32>
    tpu.vector_store %arg30[%c2_506, %c0_507], %587 {strides = array<i32>} : memref<24x128xf32, #tpu.memory_space<vmem>>, vector<12x128xf32>,
    %cst_508 = arith.constant 0.000000e+00 : f32
    %591 = vector.broadcast %cst_508 : f32 to vector<11x128xf32>
    %c0_509 = arith.constant 0 : index
    %c0_510 = arith.constant 0 : index
    %592 = vector.load %arg30[%c0_509, %c0_510] : memref<24x128xf32, #tpu.memory_space<vmem>>, vector<11x128xf32>
    %593 = arith.truncf %592 : vector<11x128xf32> to vector<11x128xbf16>
    %c0_511 = arith.constant 0 : index
    %c0_512 = arith.constant 0 : index
    %c0_513 = arith.constant 0 : index
    %594 = vector.load %arg21[%c0_511, %c0_512, %c0_513] : memref<6x128x128xbf16, #tpu.memory_space<vmem>>, vector<1x128x128xbf16>
    %595 = vector.shape_cast %594 : vector<1x128x128xbf16> to vector<128x128xbf16>
    %cst_514 = arith.constant dense<0.000000e+00> : vector<11x128xf32>
    %596 = tpu.matmul %593, %595, %cst_514 {dimension_numbers = #tpu.dot_dimension_numbers<[1], [0], [0], [1], [0, 0, 1, 1], [], []>} : vector<11x128xbf16>, vector<128x128xbf16>, vector<11x128xf32> -> vector<11x128xf32>
    %597 = arith.addf %591, %596 : vector<11x128xf32>
    %c1_515 = arith.constant 1 : index
    %c0_516 = arith.constant 0 : index
    %598 = vector.load %arg30[%c1_515, %c0_516] : memref<24x128xf32, #tpu.memory_space<vmem>>, vector<11x128xf32>
    %599 = arith.truncf %598 : vector<11x128xf32> to vector<11x128xbf16>
    %c1_517 = arith.constant 1 : index
    %c0_518 = arith.constant 0 : index
    %c0_519 = arith.constant 0 : index
    %600 = vector.load %arg21[%c1_517, %c0_518, %c0_519] : memref<6x128x128xbf16, #tpu.memory_space<vmem>>, vector<1x128x128xbf16>
    %601 = vector.shape_cast %600 : vector<1x128x128xbf16> to vector<128x128xbf16>
    %cst_520 = arith.constant dense<0.000000e+00> : vector<11x128xf32>
    %602 = tpu.matmul %599, %601, %cst_520 {dimension_numbers = #tpu.dot_dimension_numbers<[1], [0], [0], [1], [0, 0, 1, 1], [], []>} : vector<11x128xbf16>, vector<128x128xbf16>, vector<11x128xf32> -> vector<11x128xf32>
    %603 = arith.addf %597, %602 : vector<11x128xf32>
    %c2_521 = arith.constant 2 : index
    %c0_522 = arith.constant 0 : index
    %604 = vector.load %arg30[%c2_521, %c0_522] : memref<24x128xf32, #tpu.memory_space<vmem>>, vector<11x128xf32>
    %605 = arith.truncf %604 : vector<11x128xf32> to vector<11x128xbf16>
    %c2_523 = arith.constant 2 : index
    %c0_524 = arith.constant 0 : index
    %c0_525 = arith.constant 0 : index
    %606 = vector.load %arg21[%c2_523, %c0_524, %c0_525] : memref<6x128x128xbf16, #tpu.memory_space<vmem>>, vector<1x128x128xbf16>
    %607 = vector.shape_cast %606 : vector<1x128x128xbf16> to vector<128x128xbf16>
    %cst_526 = arith.constant dense<0.000000e+00> : vector<11x128xf32>
    %608 = tpu.matmul %605, %607, %cst_526 {dimension_numbers = #tpu.dot_dimension_numbers<[1], [0], [0], [1], [0, 0, 1, 1], [], []>} : vector<11x128xbf16>, vector<128x128xbf16>, vector<11x128xf32> -> vector<11x128xf32>
    %609 = arith.addf %603, %608 : vector<11x128xf32>
    %c3_527 = arith.constant 3 : index
    %c0_528 = arith.constant 0 : index
    %610 = vector.load %arg30[%c3_527, %c0_528] : memref<24x128xf32, #tpu.memory_space<vmem>>, vector<11x128xf32>
    %611 = arith.truncf %610 : vector<11x128xf32> to vector<11x128xbf16>
    %c3_529 = arith.constant 3 : index
    %c0_530 = arith.constant 0 : index
    %c0_531 = arith.constant 0 : index
    %612 = vector.load %arg21[%c3_529, %c0_530, %c0_531] : memref<6x128x128xbf16, #tpu.memory_space<vmem>>, vector<1x128x128xbf16>
    %613 = vector.shape_cast %612 : vector<1x128x128xbf16> to vector<128x128xbf16>
    %cst_532 = arith.constant dense<0.000000e+00> : vector<11x128xf32>
    %614 = tpu.matmul %611, %613, %cst_532 {dimension_numbers = #tpu.dot_dimension_numbers<[1], [0], [0], [1], [0, 0, 1, 1], [], []>} : vector<11x128xbf16>, vector<128x128xbf16>, vector<11x128xf32> -> vector<11x128xf32>
    %615 = arith.addf %609, %614 : vector<11x128xf32>
    %c4_533 = arith.constant 4 : index
    %c0_534 = arith.constant 0 : index
    %616 = vector.load %arg30[%c4_533, %c0_534] : memref<24x128xf32, #tpu.memory_space<vmem>>, vector<11x128xf32>
    %617 = arith.truncf %616 : vector<11x128xf32> to vector<11x128xbf16>
    %c4_535 = arith.constant 4 : index
    %c0_536 = arith.constant 0 : index
    %c0_537 = arith.constant 0 : index
    %618 = vector.load %arg21[%c4_535, %c0_536, %c0_537] : memref<6x128x128xbf16, #tpu.memory_space<vmem>>, vector<1x128x128xbf16>
    %619 = vector.shape_cast %618 : vector<1x128x128xbf16> to vector<128x128xbf16>
    %cst_538 = arith.constant dense<0.000000e+00> : vector<11x128xf32>
    %620 = tpu.matmul %617, %619, %cst_538 {dimension_numbers = #tpu.dot_dimension_numbers<[1], [0], [0], [1], [0, 0, 1, 1], [], []>} : vector<11x128xbf16>, vector<128x128xbf16>, vector<11x128xf32> -> vector<11x128xf32>
    %621 = arith.addf %615, %620 : vector<11x128xf32>
    %c5_539 = arith.constant 5 : index
    %c0_540 = arith.constant 0 : index
    %622 = vector.load %arg30[%c5_539, %c0_540] : memref<24x128xf32, #tpu.memory_space<vmem>>, vector<11x128xf32>
    %623 = arith.truncf %622 : vector<11x128xf32> to vector<11x128xbf16>
    %c5_541 = arith.constant 5 : index
    %c0_542 = arith.constant 0 : index
    %c0_543 = arith.constant 0 : index
    %624 = vector.load %arg21[%c5_541, %c0_542, %c0_543] : memref<6x128x128xbf16, #tpu.memory_space<vmem>>, vector<1x128x128xbf16>
    %625 = vector.shape_cast %624 : vector<1x128x128xbf16> to vector<128x128xbf16>
    %cst_544 = arith.constant dense<0.000000e+00> : vector<11x128xf32>
    %626 = tpu.matmul %623, %625, %cst_544 {dimension_numbers = #tpu.dot_dimension_numbers<[1], [0], [0], [1], [0, 0, 1, 1], [], []>} : vector<11x128xbf16>, vector<128x128xbf16>, vector<11x128xf32> -> vector<11x128xf32>
    %627 = arith.addf %621, %626 : vector<11x128xf32>
    %c0_545 = arith.constant 0 : index
    %c0_546 = arith.constant 0 : index
    %628 = vector.load %arg22[%c0_545, %c0_546] : memref<1x128xf32, #tpu.memory_space<vmem>>, vector<1x128xf32>
    %629 = vector.broadcast %628 : vector<1x128xf32> to vector<11x128xf32>
    %630 = arith.mulf %627, %629 : vector<11x128xf32>
    %c0_547 = arith.constant 0 : index
    %c0_548 = arith.constant 0 : index
    %631 = vector.load %arg23[%c0_547, %c0_548] : memref<1x128xf32, #tpu.memory_space<vmem>>, vector<1x128xf32>
    %632 = vector.broadcast %631 : vector<1x128xf32> to vector<11x128xf32>
    %633 = arith.addf %630, %632 : vector<11x128xf32>
    %cst_549 = arith.constant 0.000000e+00 : f32
    %634 = vector.broadcast %cst_549 : f32 to vector<11x128xf32>
    %635 = arith.maximumf %633, %634 : vector<11x128xf32>
    %cst_550 = arith.constant 0.000000e+00 : f32
    %636 = vector.broadcast %cst_550 : f32 to vector<24x128xf32>
    %c0_551 = arith.constant 0 : index
    %c0_552 = arith.constant 0 : index
    %637 = vector.load %arg30[%c0_551, %c0_552] : memref<24x128xf32, #tpu.memory_space<vmem>>, vector<24x128xf32>
    tpu.vector_store %arg30[%c0_551, %c0_552], %636 {strides = array<i32>} : memref<24x128xf32, #tpu.memory_space<vmem>>, vector<24x128xf32>,
    %c2_553 = arith.constant 2 : index
    %c0_554 = arith.constant 0 : index
    %638 = vector.load %arg30[%c2_553, %c0_554] : memref<24x128xf32, #tpu.memory_space<vmem>>, vector<11x128xf32>
    tpu.vector_store %arg30[%c2_553, %c0_554], %635 {strides = array<i32>} : memref<24x128xf32, #tpu.memory_space<vmem>>, vector<11x128xf32>,
    %cst_555 = arith.constant 0.000000e+00 : f32
    %639 = vector.broadcast %cst_555 : f32 to vector<10x128xf32>
    %c0_556 = arith.constant 0 : index
    %c0_557 = arith.constant 0 : index
    %640 = vector.load %arg30[%c0_556, %c0_557] : memref<24x128xf32, #tpu.memory_space<vmem>>, vector<10x128xf32>
    %641 = arith.truncf %640 : vector<10x128xf32> to vector<10x128xbf16>
    %c0_558 = arith.constant 0 : index
    %c0_559 = arith.constant 0 : index
    %c0_560 = arith.constant 0 : index
    %642 = vector.load %arg24[%c0_558, %c0_559, %c0_560] : memref<6x128x128xbf16, #tpu.memory_space<vmem>>, vector<1x128x128xbf16>
    %643 = vector.shape_cast %642 : vector<1x128x128xbf16> to vector<128x128xbf16>
    %cst_561 = arith.constant dense<0.000000e+00> : vector<10x128xf32>
    %644 = tpu.matmul %641, %643, %cst_561 {dimension_numbers = #tpu.dot_dimension_numbers<[1], [0], [0], [1], [0, 0, 1, 1], [], []>} : vector<10x128xbf16>, vector<128x128xbf16>, vector<10x128xf32> -> vector<10x128xf32>
    %645 = arith.addf %639, %644 : vector<10x128xf32>
    %c1_562 = arith.constant 1 : index
    %c0_563 = arith.constant 0 : index
    %646 = vector.load %arg30[%c1_562, %c0_563] : memref<24x128xf32, #tpu.memory_space<vmem>>, vector<10x128xf32>
    %647 = arith.truncf %646 : vector<10x128xf32> to vector<10x128xbf16>
    %c1_564 = arith.constant 1 : index
    %c0_565 = arith.constant 0 : index
    %c0_566 = arith.constant 0 : index
    %648 = vector.load %arg24[%c1_564, %c0_565, %c0_566] : memref<6x128x128xbf16, #tpu.memory_space<vmem>>, vector<1x128x128xbf16>
    %649 = vector.shape_cast %648 : vector<1x128x128xbf16> to vector<128x128xbf16>
    %cst_567 = arith.constant dense<0.000000e+00> : vector<10x128xf32>
    %650 = tpu.matmul %647, %649, %cst_567 {dimension_numbers = #tpu.dot_dimension_numbers<[1], [0], [0], [1], [0, 0, 1, 1], [], []>} : vector<10x128xbf16>, vector<128x128xbf16>, vector<10x128xf32> -> vector<10x128xf32>
    %651 = arith.addf %645, %650 : vector<10x128xf32>
    %c2_568 = arith.constant 2 : index
    %c0_569 = arith.constant 0 : index
    %652 = vector.load %arg30[%c2_568, %c0_569] : memref<24x128xf32, #tpu.memory_space<vmem>>, vector<10x128xf32>
    %653 = arith.truncf %652 : vector<10x128xf32> to vector<10x128xbf16>
    %c2_570 = arith.constant 2 : index
    %c0_571 = arith.constant 0 : index
    %c0_572 = arith.constant 0 : index
    %654 = vector.load %arg24[%c2_570, %c0_571, %c0_572] : memref<6x128x128xbf16, #tpu.memory_space<vmem>>, vector<1x128x128xbf16>
    %655 = vector.shape_cast %654 : vector<1x128x128xbf16> to vector<128x128xbf16>
    %cst_573 = arith.constant dense<0.000000e+00> : vector<10x128xf32>
    %656 = tpu.matmul %653, %655, %cst_573 {dimension_numbers = #tpu.dot_dimension_numbers<[1], [0], [0], [1], [0, 0, 1, 1], [], []>} : vector<10x128xbf16>, vector<128x128xbf16>, vector<10x128xf32> -> vector<10x128xf32>
    %657 = arith.addf %651, %656 : vector<10x128xf32>
    %c3_574 = arith.constant 3 : index
    %c0_575 = arith.constant 0 : index
    %658 = vector.load %arg30[%c3_574, %c0_575] : memref<24x128xf32, #tpu.memory_space<vmem>>, vector<10x128xf32>
    %659 = arith.truncf %658 : vector<10x128xf32> to vector<10x128xbf16>
    %c3_576 = arith.constant 3 : index
    %c0_577 = arith.constant 0 : index
    %c0_578 = arith.constant 0 : index
    %660 = vector.load %arg24[%c3_576, %c0_577, %c0_578] : memref<6x128x128xbf16, #tpu.memory_space<vmem>>, vector<1x128x128xbf16>
    %661 = vector.shape_cast %660 : vector<1x128x128xbf16> to vector<128x128xbf16>
    %cst_579 = arith.constant dense<0.000000e+00> : vector<10x128xf32>
    %662 = tpu.matmul %659, %661, %cst_579 {dimension_numbers = #tpu.dot_dimension_numbers<[1], [0], [0], [1], [0, 0, 1, 1], [], []>} : vector<10x128xbf16>, vector<128x128xbf16>, vector<10x128xf32> -> vector<10x128xf32>
    %663 = arith.addf %657, %662 : vector<10x128xf32>
    %c4_580 = arith.constant 4 : index
    %c0_581 = arith.constant 0 : index
    %664 = vector.load %arg30[%c4_580, %c0_581] : memref<24x128xf32, #tpu.memory_space<vmem>>, vector<10x128xf32>
    %665 = arith.truncf %664 : vector<10x128xf32> to vector<10x128xbf16>
    %c4_582 = arith.constant 4 : index
    %c0_583 = arith.constant 0 : index
    %c0_584 = arith.constant 0 : index
    %666 = vector.load %arg24[%c4_582, %c0_583, %c0_584] : memref<6x128x128xbf16, #tpu.memory_space<vmem>>, vector<1x128x128xbf16>
    %667 = vector.shape_cast %666 : vector<1x128x128xbf16> to vector<128x128xbf16>
    %cst_585 = arith.constant dense<0.000000e+00> : vector<10x128xf32>
    %668 = tpu.matmul %665, %667, %cst_585 {dimension_numbers = #tpu.dot_dimension_numbers<[1], [0], [0], [1], [0, 0, 1, 1], [], []>} : vector<10x128xbf16>, vector<128x128xbf16>, vector<10x128xf32> -> vector<10x128xf32>
    %669 = arith.addf %663, %668 : vector<10x128xf32>
    %c5_586 = arith.constant 5 : index
    %c0_587 = arith.constant 0 : index
    %670 = vector.load %arg30[%c5_586, %c0_587] : memref<24x128xf32, #tpu.memory_space<vmem>>, vector<10x128xf32>
    %671 = arith.truncf %670 : vector<10x128xf32> to vector<10x128xbf16>
    %c5_588 = arith.constant 5 : index
    %c0_589 = arith.constant 0 : index
    %c0_590 = arith.constant 0 : index
    %672 = vector.load %arg24[%c5_588, %c0_589, %c0_590] : memref<6x128x128xbf16, #tpu.memory_space<vmem>>, vector<1x128x128xbf16>
    %673 = vector.shape_cast %672 : vector<1x128x128xbf16> to vector<128x128xbf16>
    %cst_591 = arith.constant dense<0.000000e+00> : vector<10x128xf32>
    %674 = tpu.matmul %671, %673, %cst_591 {dimension_numbers = #tpu.dot_dimension_numbers<[1], [0], [0], [1], [0, 0, 1, 1], [], []>} : vector<10x128xbf16>, vector<128x128xbf16>, vector<10x128xf32> -> vector<10x128xf32>
    %675 = arith.addf %669, %674 : vector<10x128xf32>
    %c0_592 = arith.constant 0 : index
    %c0_593 = arith.constant 0 : index
    %676 = vector.load %arg25[%c0_592, %c0_593] : memref<1x128xf32, #tpu.memory_space<vmem>>, vector<1x128xf32>
    %677 = vector.broadcast %676 : vector<1x128xf32> to vector<10x128xf32>
    %678 = arith.mulf %675, %677 : vector<10x128xf32>
    %c0_594 = arith.constant 0 : index
    %c0_595 = arith.constant 0 : index
    %679 = vector.load %arg26[%c0_594, %c0_595] : memref<1x128xf32, #tpu.memory_space<vmem>>, vector<1x128xf32>
    %680 = vector.broadcast %679 : vector<1x128xf32> to vector<10x128xf32>
    %681 = arith.addf %678, %680 : vector<10x128xf32>
    %cst_596 = arith.constant 0.000000e+00 : f32
    %682 = vector.broadcast %cst_596 : f32 to vector<10x128xf32>
    %683 = arith.maximumf %681, %682 : vector<10x128xf32>
    %c0_597 = arith.constant 0 : index
    %c0_598 = arith.constant 0 : index
    %684 = vector.load %arg28[%c0_597, %c0_598] : memref<496x128xf32, #tpu.memory_space<vmem>>, vector<10x128xf32>
    tpu.vector_store %arg28[%c0_597, %c0_598], %683 {strides = array<i32>} : memref<496x128xf32, #tpu.memory_space<vmem>>, vector<10x128xf32>,
    %c0_599 = arith.constant 0 : index
    %c0_600 = arith.constant 0 : index
    %685 = vector.load %arg28[%c0_599, %c0_600] : memref<496x128xf32, #tpu.memory_space<vmem>>, vector<2x128xf32>
    %cst_601 = arith.constant dense<0xFF800000> : vector<128xf32>
    %686 = vector.multi_reduction <maximumf>, %685, %cst_601 [0] : vector<2x128xf32> to vector<128xf32>
    %687 = vector.shape_cast %686 : vector<128xf32> to vector<1x128xf32>
    %c0_602 = arith.constant 0 : index
    %c0_603 = arith.constant 0 : index
    %688 = vector.load %arg29[%c0_602, %c0_603] : memref<64x128xf32, #tpu.memory_space<vmem>>, vector<1x128xf32>
    tpu.vector_store %arg29[%c0_602, %c0_603], %687 {strides = array<i32>} : memref<64x128xf32, #tpu.memory_space<vmem>>, vector<1x128xf32>,
    %c2_604 = arith.constant 2 : index
    %c0_605 = arith.constant 0 : index
    %689 = vector.load %arg28[%c2_604, %c0_605] : memref<496x128xf32, #tpu.memory_space<vmem>>, vector<2x128xf32>
    %cst_606 = arith.constant dense<0xFF800000> : vector<128xf32>
    %690 = vector.multi_reduction <maximumf>, %689, %cst_606 [0] : vector<2x128xf32> to vector<128xf32>
    %691 = vector.shape_cast %690 : vector<128xf32> to vector<1x128xf32>
    %c1_607 = arith.constant 1 : index
    %c0_608 = arith.constant 0 : index
    %692 = vector.load %arg29[%c1_607, %c0_608] : memref<64x128xf32, #tpu.memory_space<vmem>>, vector<1x128xf32>
    tpu.vector_store %arg29[%c1_607, %c0_608], %691 {strides = array<i32>} : memref<64x128xf32, #tpu.memory_space<vmem>>, vector<1x128xf32>,
    %c4_609 = arith.constant 4 : index
    %c0_610 = arith.constant 0 : index
    %693 = vector.load %arg28[%c4_609, %c0_610] : memref<496x128xf32, #tpu.memory_space<vmem>>, vector<2x128xf32>
    %cst_611 = arith.constant dense<0xFF800000> : vector<128xf32>
    %694 = vector.multi_reduction <maximumf>, %693, %cst_611 [0] : vector<2x128xf32> to vector<128xf32>
    %695 = vector.shape_cast %694 : vector<128xf32> to vector<1x128xf32>
    %c2_612 = arith.constant 2 : index
    %c0_613 = arith.constant 0 : index
    %696 = vector.load %arg29[%c2_612, %c0_613] : memref<64x128xf32, #tpu.memory_space<vmem>>, vector<1x128xf32>
    tpu.vector_store %arg29[%c2_612, %c0_613], %695 {strides = array<i32>} : memref<64x128xf32, #tpu.memory_space<vmem>>, vector<1x128xf32>,
    %c6_614 = arith.constant 6 : index
    %c0_615 = arith.constant 0 : index
    %697 = vector.load %arg28[%c6_614, %c0_615] : memref<496x128xf32, #tpu.memory_space<vmem>>, vector<2x128xf32>
    %cst_616 = arith.constant dense<0xFF800000> : vector<128xf32>
    %698 = vector.multi_reduction <maximumf>, %697, %cst_616 [0] : vector<2x128xf32> to vector<128xf32>
    %699 = vector.shape_cast %698 : vector<128xf32> to vector<1x128xf32>
    %c3_617 = arith.constant 3 : index
    %c0_618 = arith.constant 0 : index
    %700 = vector.load %arg29[%c3_617, %c0_618] : memref<64x128xf32, #tpu.memory_space<vmem>>, vector<1x128xf32>
    tpu.vector_store %arg29[%c3_617, %c0_618], %699 {strides = array<i32>} : memref<64x128xf32, #tpu.memory_space<vmem>>, vector<1x128xf32>,
    %c8_619 = arith.constant 8 : index
    %c0_620 = arith.constant 0 : index
    %701 = vector.load %arg28[%c8_619, %c0_620] : memref<496x128xf32, #tpu.memory_space<vmem>>, vector<2x128xf32>
    %cst_621 = arith.constant dense<0xFF800000> : vector<128xf32>
    %702 = vector.multi_reduction <maximumf>, %701, %cst_621 [0] : vector<2x128xf32> to vector<128xf32>
    %703 = vector.shape_cast %702 : vector<128xf32> to vector<1x128xf32>
    %c4_622 = arith.constant 4 : index
    %c0_623 = arith.constant 0 : index
    %704 = vector.load %arg29[%c4_622, %c0_623] : memref<64x128xf32, #tpu.memory_space<vmem>>, vector<1x128xf32>
    tpu.vector_store %arg29[%c4_622, %c0_623], %703 {strides = array<i32>} : memref<64x128xf32, #tpu.memory_space<vmem>>, vector<1x128xf32>,
    %c0_624 = arith.constant 0 : index
    %c0_625 = arith.constant 0 : index
    %705 = vector.load %arg29[%c0_624, %c0_625] : memref<64x128xf32, #tpu.memory_space<vmem>>, vector<5x128xf32>
    %c0_626 = arith.constant 0 : index
    %c10_627 = arith.constant 10 : index
    %c0_628 = arith.constant 0 : index
    %706 = vector.load %arg27[%c0_626, %c10_627, %c0_628] : memref<1x15x128xf32, #tpu.memory_space<vmem>>, vector<1x5x128xf32>
    %707 = vector.shape_cast %706 : vector<1x5x128xf32> to vector<5x128xf32>
    %708 = vector.shape_cast %705 : vector<5x128xf32> to vector<1x5x128xf32>
    tpu.vector_store %arg27[%c0_626, %c10_627, %c0_628], %708 {strides = array<i32>} : memref<1x15x128xf32, #tpu.memory_space<vmem>>, vector<1x5x128xf32>,
    return
  }
  func.func @transform_0(%arg0: i32) -> (i32, i32, i32) {
    %c0_i32 = arith.constant 0 : i32
    %c0_i32_0 = arith.constant 0 : i32
    %c0_i32_1 = arith.constant 0 : i32
    return %arg0, %c0_i32, %c0_i32_0 : i32, i32, i32
  }
  func.func @transform_1(%arg0: i32) -> (i32, i32, i32) {
    %c0_i32 = arith.constant 0 : i32
    %c0_i32_0 = arith.constant 0 : i32
    %c0_i32_1 = arith.constant 0 : i32
    return %arg0, %c0_i32, %c0_i32_0 : i32, i32, i32
  }
  func.func @transform_2(%arg0: i32) -> (i32, i32) {
    %c0_i32 = arith.constant 0 : i32
    %c0_i32_0 = arith.constant 0 : i32
    %c0_i32_1 = arith.constant 0 : i32
    return %c0_i32, %c0_i32_0 : i32, i32
  }
  func.func @transform_3(%arg0: i32) -> (i32, i32) {
    %c0_i32 = arith.constant 0 : i32
    %c0_i32_0 = arith.constant 0 : i32
    %c0_i32_1 = arith.constant 0 : i32
    return %c0_i32, %c0_i32_0 : i32, i32
  }
  func.func @transform_4(%arg0: i32) -> (i32, i32) {
    %c0_i32 = arith.constant 0 : i32
    %c0_i32_0 = arith.constant 0 : i32
    %c0_i32_1 = arith.constant 0 : i32
    return %c0_i32, %c0_i32_0 : i32, i32
  }
  func.func @transform_5(%arg0: i32) -> (i32, i32, i32) {
    %c0_i32 = arith.constant 0 : i32
    %c0_i32_0 = arith.constant 0 : i32
    %c0_i32_1 = arith.constant 0 : i32
    %c0_i32_2 = arith.constant 0 : i32
    return %c0_i32, %c0_i32_0, %c0_i32_1 : i32, i32, i32
  }
  func.func @transform_6(%arg0: i32) -> (i32, i32) {
    %c0_i32 = arith.constant 0 : i32
    %c0_i32_0 = arith.constant 0 : i32
    %c0_i32_1 = arith.constant 0 : i32
    return %c0_i32, %c0_i32_0 : i32, i32
  }
  func.func @transform_7(%arg0: i32) -> (i32, i32) {
    %c0_i32 = arith.constant 0 : i32
    %c0_i32_0 = arith.constant 0 : i32
    %c0_i32_1 = arith.constant 0 : i32
    return %c0_i32, %c0_i32_0 : i32, i32
  }
  func.func @transform_8(%arg0: i32) -> (i32, i32, i32) {
    %c0_i32 = arith.constant 0 : i32
    %c0_i32_0 = arith.constant 0 : i32
    %c0_i32_1 = arith.constant 0 : i32
    %c0_i32_2 = arith.constant 0 : i32
    return %c0_i32, %c0_i32_0, %c0_i32_1 : i32, i32, i32
  }
  func.func @transform_9(%arg0: i32) -> (i32, i32) {
    %c0_i32 = arith.constant 0 : i32
    %c0_i32_0 = arith.constant 0 : i32
    %c0_i32_1 = arith.constant 0 : i32
    return %c0_i32, %c0_i32_0 : i32, i32
  }
  func.func @transform_10(%arg0: i32) -> (i32, i32) {
    %c0_i32 = arith.constant 0 : i32
    %c0_i32_0 = arith.constant 0 : i32
    %c0_i32_1 = arith.constant 0 : i32
    return %c0_i32, %c0_i32_0 : i32, i32
  }
  func.func @transform_11(%arg0: i32) -> (i32, i32, i32) {
    %c0_i32 = arith.constant 0 : i32
    %c0_i32_0 = arith.constant 0 : i32
    %c0_i32_1 = arith.constant 0 : i32
    %c0_i32_2 = arith.constant 0 : i32
    return %c0_i32, %c0_i32_0, %c0_i32_1 : i32, i32, i32
  }
  func.func @transform_12(%arg0: i32) -> (i32, i32) {
    %c0_i32 = arith.constant 0 : i32
    %c0_i32_0 = arith.constant 0 : i32
    %c0_i32_1 = arith.constant 0 : i32
    return %c0_i32, %c0_i32_0 : i32, i32
  }
  func.func @transform_13(%arg0: i32) -> (i32, i32) {
    %c0_i32 = arith.constant 0 : i32
    %c0_i32_0 = arith.constant 0 : i32
    %c0_i32_1 = arith.constant 0 : i32
    return %c0_i32, %c0_i32_0 : i32, i32
  }
  func.func @transform_14(%arg0: i32) -> (i32, i32) {
    %c0_i32 = arith.constant 0 : i32
    %c0_i32_0 = arith.constant 0 : i32
    %c0_i32_1 = arith.constant 0 : i32
    return %c0_i32, %c0_i32_0 : i32, i32
  }
  func.func @transform_15(%arg0: i32) -> (i32, i32) {
    %c0_i32 = arith.constant 0 : i32
    %c0_i32_0 = arith.constant 0 : i32
    %c0_i32_1 = arith.constant 0 : i32
    return %c0_i32, %c0_i32_0 : i32, i32
  }
  func.func @transform_16(%arg0: i32) -> (i32, i32) {
    %c0_i32 = arith.constant 0 : i32
    %c0_i32_0 = arith.constant 0 : i32
    %c0_i32_1 = arith.constant 0 : i32
    return %c0_i32, %c0_i32_0 : i32, i32
  }
  func.func @transform_17(%arg0: i32) -> (i32, i32, i32) {
    %c0_i32 = arith.constant 0 : i32
    %c0_i32_0 = arith.constant 0 : i32
    %c0_i32_1 = arith.constant 0 : i32
    %c0_i32_2 = arith.constant 0 : i32
    return %c0_i32, %c0_i32_0, %c0_i32_1 : i32, i32, i32
  }
  func.func @transform_18(%arg0: i32) -> (i32, i32) {
    %c0_i32 = arith.constant 0 : i32
    %c0_i32_0 = arith.constant 0 : i32
    %c0_i32_1 = arith.constant 0 : i32
    return %c0_i32, %c0_i32_0 : i32, i32
  }
  func.func @transform_19(%arg0: i32) -> (i32, i32) {
    %c0_i32 = arith.constant 0 : i32
    %c0_i32_0 = arith.constant 0 : i32
    %c0_i32_1 = arith.constant 0 : i32
    return %c0_i32, %c0_i32_0 : i32, i32
  }
  func.func @transform_20(%arg0: i32) -> (i32, i32, i32) {
    %c0_i32 = arith.constant 0 : i32
    %c0_i32_0 = arith.constant 0 : i32
    %c0_i32_1 = arith.constant 0 : i32
    %c0_i32_2 = arith.constant 0 : i32
    return %c0_i32, %c0_i32_0, %c0_i32_1 : i32, i32, i32
  }
  func.func @transform_21(%arg0: i32) -> (i32, i32) {
    %c0_i32 = arith.constant 0 : i32
    %c0_i32_0 = arith.constant 0 : i32
    %c0_i32_1 = arith.constant 0 : i32
    return %c0_i32, %c0_i32_0 : i32, i32
  }
  func.func @transform_22(%arg0: i32) -> (i32, i32) {
    %c0_i32 = arith.constant 0 : i32
    %c0_i32_0 = arith.constant 0 : i32
    %c0_i32_1 = arith.constant 0 : i32
    return %c0_i32, %c0_i32_0 : i32, i32
  }
  func.func @transform_23(%arg0: i32) -> (i32, i32, i32) {
    %c0_i32 = arith.constant 0 : i32
    %c0_i32_0 = arith.constant 0 : i32
    %c0_i32_1 = arith.constant 0 : i32
    %c0_i32_2 = arith.constant 0 : i32
    return %c0_i32, %c0_i32_0, %c0_i32_1 : i32, i32, i32
  }
  func.func @transform_24(%arg0: i32) -> (i32, i32) {
    %c0_i32 = arith.constant 0 : i32
    %c0_i32_0 = arith.constant 0 : i32
    %c0_i32_1 = arith.constant 0 : i32
    return %c0_i32, %c0_i32_0 : i32, i32
  }
  func.func @transform_25(%arg0: i32) -> (i32, i32) {
    %c0_i32 = arith.constant 0 : i32
    %c0_i32_0 = arith.constant 0 : i32
    %c0_i32_1 = arith.constant 0 : i32
    return %c0_i32, %c0_i32_0 : i32, i32
  }
  func.func @transform_26(%arg0: i32) -> (i32, i32, i32) {
    %c0_i32 = arith.constant 0 : i32
    %c0_i32_0 = arith.constant 0 : i32
    %c0_i32_1 = arith.constant 0 : i32
    return %arg0, %c0_i32, %c0_i32_0 : i32, i32, i32
  }
}

</mosaic_0001>

<bundles_post_ra>
// kernel: encoder_forward.1
= control target key start
LH: loop header
LB: loop body
LE: loop exit
PB: predicated region body
PF: predicated region fallthrough
CT: control target
= control target key end

     0   :  { %s11522_s27 = smov 0   ;;  %s13991_s0 = inlined_call_operand.vmem [shape: bf16[2,492,50], index: 0, kind: input, shape index: {}]   ;;  %s13992_s1 = inlined_call_operand.vmem [shape: bf16[2,53,400], index: 1, kind: input, shape index: {}]   ;;  %s13993_s2 = inlined_call_operand.vmem [shape: bf16[50,64], index: 2, kind: input, shape index: {}]   ;;  %s13994_s3 = inlined_call_operand.vmem [shape: f32[1,64], index: 3, kind: input, shape index: {}]   ;;  %s13995_s4 = inlined_call_operand.vmem [shape: f32[1,64], index: 4, kind: input, shape index: {}]   ;;  %s13996_s5 = inlined_call_operand.vmem [shape: bf16[8,64,128], index: 5, kind: input, shape index: {}]   ;;  %s13997_s6 = inlined_call_operand.vmem [shape: f32[1,128], index: 6, kind: input, shape index: {}]   ;;  %s13998_s7 = inlined_call_operand.vmem [shape: f32[1,128], index: 7, kind: input, shape index: {}]   ;;  %s13999_s8 = inlined_call_operand.vmem [shape: bf16[8,128,128], index: 8, kind: input, shape index: {}]   ;;  %s14000_s9 = inlined_call_operand.vmem [shape: f32[1,128], index: 9, kind: input, shape index: {}]   ;;  %s14001_s10 = inlined_call_operand.vmem [shape: f32[1,128], index: 10, kind: input, shape index: {}]   ;;  %s14002_s11 = inlined_call_operand.vmem [shape: bf16[8,128,128], index: 11, kind: input, shape index: {}]   ;;  %s14003_s12 = inlined_call_operand.vmem [shape: f32[1,128], index: 12, kind: input, shape index: {}]   ;;  %s14004_s13 = inlined_call_operand.vmem [shape: f32[1,128], index: 13, kind: input, shape index: {}]   ;;  %s14005_s14 = inlined_call_operand.vmem [shape: bf16[400,64], index: 14, kind: input, shape index: {}]   ;;  %s14006_s15 = inlined_call_operand.vmem [shape: f32[1,64], index: 15, kind: input, shape index: {}]   ;;  %s14007_s16 = inlined_call_operand.vmem [shape: f32[1,64], index: 16, kind: input, shape index: {}]   ;;  %s14008_s17 = inlined_call_operand.vmem [shape: bf16[6,64,128], index: 17, kind: input, shape index: {}]   ;;  %s14009_s18 = inlined_call_operand.vmem [shape: f32[1,128], index: 18, kind: input, shape index: {}]   ;;  %s14010_s19 = inlined_call_operand.vmem [shape: f32[1,128], index: 19, kind: input, shape index: {}]   ;;  %s14011_s20 = inlined_call_operand.vmem [shape: bf16[6,128,128], index: 20, kind: input, shape index: {}]   ;;  %s14012_s21 = inlined_call_operand.vmem [shape: f32[1,128], index: 21, kind: input, shape index: {}]   ;;  %s14013_s22 = inlined_call_operand.vmem [shape: f32[1,128], index: 22, kind: input, shape index: {}]   ;;  %s14014_s23 = inlined_call_operand.vmem [shape: bf16[6,128,128], index: 23, kind: input, shape index: {}]   ;;  %s14015_s24 = inlined_call_operand.vmem [shape: f32[1,128], index: 24, kind: input, shape index: {}]   ;;  %s14016_s25 = inlined_call_operand.vmem [shape: f32[1,128], index: 25, kind: input, shape index: {}]   ;;  %s14017_s26 = inlined_call_operand.vmem [shape: f32[2,15,128], index: 26, kind: output, shape index: {}]  }
   0x1   :  { %14026 = sst [smem:[#allocation5_spill]] %s13991_s0 }
   0x2   :  { %14027 = sst [smem:[#allocation6_spill]] %s13992_s1 }
   0x3   :  { %14028 = sst [smem:[#allocation7_spill]] %s13993_s2 }
   0x4   :  { %14029 = sst [smem:[#allocation8_spill]] %s13994_s3 }
   0x5   :  { %14030 = sst [smem:[#allocation9_spill]] %s13995_s4 }
   0x6   :  { %14031 = sst [smem:[#allocation10_spill]] %s13996_s5 }
   0x7   :  { %14032 = sst [smem:[#allocation11_spill]] %s13997_s6 }
   0x8   :  { %14033 = sst [smem:[#allocation12_spill]] %s13998_s7 }
   0x9   :  { %14034 = sst [smem:[#allocation13_spill]] %s13999_s8 }
   0xa   :  { %14035 = sst [smem:[#allocation14_spill]] %s14000_s9 }
   0xb   :  { %14036 = sst [smem:[#allocation15_spill]] %s14001_s10 }
   0xc LB: > { %s8301_s3 = sadd.s32 4294967295, %s11382_s27   ;;  %p8305_p0 = scmp.ge.s32.totalorder %s11382_s27, 1  ;;  %s11382_s27 = sphi %s11522_s27, %s36_s27  }
   0xd   : > { %p722_p1 = scmp.lt.s32.totalorder %s11382_s27, 3 }
   0xf   : > { %p723_p2 = pnand %p8305_p0, %p722_p1 }
  0x10   : > { %s14037_s8 = sld [smem:[#allocation7_spill]] (!%p723_p2)  ;;  %v11384_v1 = vmov (!%p723_p2), 0.0   ;;  %vm11385_vm0 = vmmov (!%p723_p2), 0   ;;  %p797_p3 = scmp.lt.s32.totalorder (!%p723_p2), %s8301_s3, 1  ;;  %vm1152_vm1 = vcmask (!%p723_p2), 1040384   ;;  %vm1058_vm2 = vcmask (!%p723_p2), 408576  }
  0x11   : > { %726 = sbr.rel (%p723_p2) target bundleno = 2963 (0xb93), region = 124  ;;  %9691 = vmatprep.subr.bf16.mxu0 (!%p723_p2), %v11384_v1  ;;  %6300 = vst [vmem:[#allocation4] sm:$0xff] (!%p723_p2), %v11384_v1  ;;  %6301 = vst [vmem:[#allocation4 + $0x8] sm:$0xff] (!%p723_p2), %v11384_v1  ;;  %9699 = vmatprep.mubr.msk.bf16.mxu0 (!%p723_p2), %vm11385_vm0, %v11384_v1  ;;  %s14038_s1 = sld [smem:[#allocation5_spill]] (!%p723_p2)  ;;  %vm1637_vm3 = vcmask (!%p723_p2), 523264   ;;  %vm1709_vm4 = vcmask (!%p723_p2), 516096  }
  0x12   : > { %6302 = vst [vmem:[#allocation4 + $0x10] sm:$0xff] (!%p723_p2), %v11384_v1  ;;  %s14039_s29 = sld [smem:[#allocation8_spill]] (!%p723_p2)  ;;  %s14040_s30 = sld [smem:[#allocation9_spill]] (!%p723_p2)  ;;  %vm2280_vm5 = vsmask.f32 (!%p723_p2), 7424  ;;  %vm1699_vm9 = vcmask (!%p723_p2), 519168  }
  0x13   : > { %s14041_s10 = sld [smem:[#allocation10_spill]] (!%p723_p2)  ;;  %vm2646_vm6 = vsmask.f32 (!%p723_p2), 6400  ;;  %vm2908_vm7 = vsmask.f32 (!%p723_p2), 5376  ;;  %vm2521_vm10 = vcmask (!%p723_p2), 1046528  }
  0x14   : > { %vm3164_vm8 = vsmask.f32 (!%p723_p2), 4352  ;;  %vm2784_vm11 = vcmask (!%p723_p2), 1045504   ;;  %vm3040_vm12 = vcmask (!%p723_p2), 1044480   ;;  %s14042_s0 = sld [smem:[#allocation13_spill]] (!%p723_p2)  ;;  %s14043_s9 = sld [smem:[#allocation11_spill]] (!%p723_p2) }
  0x15   : > { %s14046_s6 = sld [smem:[#allocation15_spill]] (!%p723_p2)  ;;  %vm5997_vm13 = vcmask (!%p723_p2), 130048   ;;  %vm5619_vm14 = vcmask (!%p723_p2), 1043456   ;;  %vm6179_vm15 = vcmask (!%p723_p2), 520192  }
  0x16   : > { %v11008_v0 = vld [vmem:[%s14037_s8] sm:$0xff] (!%p723_p2)   ;;  %v11009_v2 = vld [vmem:[%s14037_s8 + $0x8] sm:$0xff] (!%p723_p2)   ;;  %v11010_v3 = vld [vmem:[%s14037_s8 + $0x10] sm:$0xff] (!%p723_p2)  }
  0x17   : > { %9692 = vmatpush3.bf16.msra.mxu0 (!%p723_p2), %v11008_v0  ;;  %v11011_v4 = vld [vmem:[%s14037_s8 + $0x18] ss:$0 sps:$4 sm:$0x11] (!%p723_p2)   ;;  %s14045_s8 = sld [smem:[#allocation14_spill]] (!%p723_p2) }
  0x18   : > { %9693 = vmatprep.subr.bf16.mxu0 %v11384_v1  ;;  %s14049_s3 = smov (!%p797_p3, %s8301_s3), 1  ;;  %v1154_v5 = vsel %vm1152_vm1, %v11011_v4, 0  ;;  %v11634_v25 = vld [vmem:[#allocation4] sm:$0xff]  ;;  %v11670_v34 = vld [vmem:[%s14039_s29] ss:$0 sm:$0xff] }
  0x19   : > { %s10995_s5 = smul.u32 248, %s14049_s3  ;;  %v11676_v35 = vld [vmem:[%s14040_s30] ss:$0 sm:$0xff] }
  0x1b   : > { %9694 = vmatpush3.bf16.msra.mxu0 %v11009_v2  ;;  %s11556_s7 = scalar_lea.vmem %s14038_s1, %s10995_s5  ;;  %s9237_s1 = sshll.u32 %s14049_s3, 4 }
  0x1c   : > { %9695 = vmatprep.subr.bf16.mxu0 %v11384_v1  ;;  %v11012_v6 = vld [vmem:[%s11556_s7] sm:$0xff]   ;;  %v11013_v7 = vld [vmem:[%s11556_s7 + $0x8] sm:$0xff]   ;;  %v11014_v8 = vld [vmem:[%s11556_s7 + $0x10] sm:$0xff]   ;;  %s13363_s4 = scalar_lea.vmem %s14017_s26, %s9237_s1 }
  0x1d   : > { %v11015_v9 = vld [vmem:[%s11556_s7 + $0x18] sm:$0xff]   ;;  %v11016_v10 = vld [vmem:[%s11556_s7 + $0x20] sm:$0xff]   ;;  %v11017_v11 = vld [vmem:[%s11556_s7 + $0x28] sm:$0xff]  }
  0x1e   : > { %v11018_v12 = vld [vmem:[%s11556_s7 + $0x30] sm:$0xff]   ;;  %v11019_v13 = vld [vmem:[%s11556_s7 + $0x38] sm:$0xff]   ;;  %v11020_v14 = vld [vmem:[%s11556_s7 + $0x40] sm:$0xff]  }
  0x1f   : > { %9696 = vmatpush3.bf16.msra.mxu0 %v11010_v3  ;;  %v11021_v15 = vld [vmem:[%s11556_s7 + $0x48] sm:$0xff]   ;;  %v11022_v16 = vld [vmem:[%s11556_s7 + $0x50] sm:$0xff]   ;;  %v11023_v17 = vld [vmem:[%s11556_s7 + $0x58] sm:$0xff]  }
  0x20   : > { %9697 = vmatprep.subr.bf16.mxu0 %v11384_v1  ;;  %v11024_v18 = vld [vmem:[%s11556_s7 + $0x60] sm:$0xff]   ;;  %v11025_v19 = vld [vmem:[%s11556_s7 + $0x68] sm:$0xff]   ;;  %v11026_v20 = vld [vmem:[%s11556_s7 + $0x70] sm:$0xff]  }
  0x21   : > { %v11027_v21 = vld [vmem:[%s11556_s7 + $0x78] sm:$0xff]   ;;  %v11028_v22 = vld [vmem:[%s11556_s7 + $0x80] sm:$0xff]   ;;  %v11029_v23 = vld [vmem:[%s11556_s7 + $0x88] sm:$0xff]  }
  0x22   : > { %v11030_v24 = vld [vmem:[%s11556_s7 + $0x90] sm:$0xff]   ;;  %v11031_v26 = vld [vmem:[%s11556_s7 + $0x98] sm:$0xff]   ;;  %v11032_v27 = vld [vmem:[%s11556_s7 + $0xa0] sm:$0xff]  }
  0x23   : > { %9698 = vmatpush3.bf16.msra.mxu0 %v1154_v5  ;;  %v11033_v28 = vld [vmem:[%s11556_s7 + $0xa8] sm:$0xff]   ;;  %v11034_v29 = vld [vmem:[%s11556_s7 + $0xb0] sm:$0xff]   ;;  %v11035_v30 = vld [vmem:[%s11556_s7 + $0xb8] sm:$0xff]  }
  0x24   : > { %10175 = vmatprep.subr.bf16.mxu0 %v11384_v1  ;;  %v11036_v31 = vld [vmem:[%s11556_s7 + $0xc0] sm:$0xff]   ;;  %v11037_v32 = vld [vmem:[%s11556_s7 + $0xc8] sm:$0xff]   ;;  %v11038_v33 = vld [vmem:[%s11556_s7 + $0xd0] sm:$0xff]  }
  0x25   : > { %v11039_v39 = vld [vmem:[%s11556_s7 + $0xd8] sm:$0xff]   ;;  %v11040_v50 = vld [vmem:[%s11556_s7 + $0xe0] sm:$0xff]   ;;  %v11041_v63 = vld [vmem:[%s11556_s7 + $0xe8] sm:$0xff]  }
  0x26   : > { %9700 = vmatmul.mubr.msk.bf16.vlgmr.msra.gmra.mrb[0].mxu0 %vm1058_vm2, %v11012_v6 }
  0x27   : > { %9703 = vmatprep.mubr.msk.bf16.mxu0 %vm11385_vm0, %v11384_v1 }
  0x2e   : > { %9704 = vmatmul.mubr.msk.bf16.gmra.mrb[4].mxu0 %vm1058_vm2, %v11013_v7 }
  0x2f   : > { %9707 = vmatprep.mubr.msk.bf16.mxu0 %vm11385_vm0, %v11384_v1 }
  0x36   : > { %9708 = vmatmul.mubr.msk.bf16.gmra.mrb[8].mxu0 %vm1058_vm2, %v11014_v8 }
  0x37   : > { %9711 = vmatprep.mubr.msk.bf16.mxu0 %vm11385_vm0, %v11384_v1 }
  0x3e   : > { %9712 = vmatmul.mubr.msk.bf16.gmra.mrb[12].mxu0 %vm1058_vm2, %v11015_v9 }
  0x3f   : > { %9715 = vmatprep.mubr.msk.bf16.mxu0 %vm11385_vm0, %v11384_v1 }
  0x46   : > { %9716 = vmatmul.mubr.msk.bf16.gmra.mrb[16].mxu0 %vm1058_vm2, %v11016_v10 }
  0x47   : > { %9719 = vmatprep.mubr.msk.bf16.mxu0 %vm11385_vm0, %v11384_v1 }
  0x4e   : > { %9720 = vmatmul.mubr.msk.bf16.gmra.mrb[20].mxu0 %vm1058_vm2, %v11017_v11 }
  0x4f   : > { %9723 = vmatprep.mubr.msk.bf16.mxu0 %vm11385_vm0, %v11384_v1 }
  0x56   : > { %9724 = vmatmul.mubr.msk.bf16.gmra.mrb[24].mxu0 %vm1058_vm2, %v11018_v12 }
  0x57   : > { %9727 = vmatprep.mubr.msk.bf16.mxu0 %vm11385_vm0, %v11384_v1 }
  0x5e   : > { %9728 = vmatmul.mubr.msk.bf16.gmra.mrb[28].mxu0 %vm1058_vm2, %v11019_v13 }
  0x5f   : > { %9731 = vmatprep.mubr.msk.bf16.mxu0 %vm11385_vm0, %v11384_v1 }
  0x66   : > { %9732 = vmatmul.mubr.msk.bf16.gmra.mrb[32].mxu0 %vm1058_vm2, %v11020_v14 }
  0x67   : > { %9735 = vmatprep.mubr.msk.bf16.mxu0 %vm11385_vm0, %v11384_v1 }
  0x6e   : > { %9736 = vmatmul.mubr.msk.bf16.gmra.mrb[36].mxu0 %vm1058_vm2, %v11021_v15 }
  0x6f   : > { %9739 = vmatprep.mubr.msk.bf16.mxu0 %vm11385_vm0, %v11384_v1 }
  0x76   : > { %9740 = vmatmul.mubr.msk.bf16.gmra.mrb[40].mxu0 %vm1058_vm2, %v11022_v16 }
  0x77   : > { %9743 = vmatprep.mubr.msk.bf16.mxu0 %vm11385_vm0, %v11384_v1 }
  0x7e   : > { %9744 = vmatmul.mubr.msk.bf16.gmra.mrb[44].mxu0 %vm1058_vm2, %v11023_v17 }
  0x7f   : > { %9747 = vmatprep.mubr.msk.bf16.mxu0 %vm11385_vm0, %v11384_v1 }
  0x86   : > { %9748 = vmatmul.mubr.msk.bf16.gmra.mrb[48].mxu0 %vm1058_vm2, %v11024_v18 }
  0x87   : > { %9751 = vmatprep.mubr.msk.bf16.mxu0 %vm11385_vm0, %v11384_v1 }
  0x8e   : > { %9752 = vmatmul.mubr.msk.bf16.gmra.mrb[52].mxu0 %vm1058_vm2, %v11025_v19 }
  0x8f   : > { %9755 = vmatprep.mubr.msk.bf16.mxu0 %vm11385_vm0, %v11384_v1 }
  0x96   : > { %9756 = vmatmul.mubr.msk.bf16.gmra.mrb[56].mxu0 %vm1058_vm2, %v11026_v20 }
  0x97   : > { %9759 = vmatprep.mubr.msk.bf16.mxu0 %vm11385_vm0, %v11384_v1 }
  0x9e   : > { %9760 = vmatmul.mubr.msk.bf16.gmra.mrb[60].mxu0 %vm1058_vm2, %v11027_v21 }
  0x9f   : > { %9763 = vmatprep.mubr.msk.bf16.mxu0 %vm11385_vm0, %v11384_v1 }
  0xa6   : > { %9764 = vmatmul.mubr.msk.bf16.gmra.mrb[64].mxu0 %vm1058_vm2, %v11028_v22 }
  0xa7   : > { %9767 = vmatprep.mubr.msk.bf16.mxu0 %vm11385_vm0, %v11384_v1 }
  0xae   : > { %9768 = vmatmul.mubr.msk.bf16.gmra.mrb[68].mxu0 %vm1058_vm2, %v11029_v23 }
  0xaf   : > { %9771 = vmatprep.mubr.msk.bf16.mxu0 %vm11385_vm0, %v11384_v1 }
  0xb6   : > { %9772 = vmatmul.mubr.msk.bf16.gmra.mrb[72].mxu0 %vm1058_vm2, %v11030_v24 }
  0xb7   : > { %9775 = vmatprep.mubr.msk.bf16.mxu0 %vm11385_vm0, %v11634_v25 }
  0xbe   : > { %9776 = vmatmul.mubr.msk.bf16.gmra.mrb[76].mxu0 %vm1058_vm2, %v11031_v26 }
  0xbf   : > { %9779 = vmatprep.mubr.msk.bf16.mxu0 %vm11385_vm0, %v11634_v25 }
  0xc6   : > { %9780 = vmatmul.mubr.msk.bf16.gmra.mrb[80].mxu0 %vm1058_vm2, %v11032_v27  ;;  %v11042_v27 = vld [vmem:[%s11556_s7 + $0xf0] sm:$0x3f]  }
  0xc7   : > { %9783 = vmatprep.mubr.msk.bf16.mxu0 %vm11385_vm0, %v11634_v25 }
  0xce   : > { %9784 = vmatmul.mubr.msk.bf16.gmra.mrb[84].mxu0 %vm1058_vm2, %v11033_v28 }
  0xcf   : > { %9787 = vmatprep.mubr.msk.bf16.mxu0 %vm11385_vm0, %v11634_v25 }
  0xd6   : > { %9788 = vmatmul.mubr.msk.bf16.gmra.mrb[88].mxu0 %vm1058_vm2, %v11034_v29 }
  0xd7   : > { %9791 = vmatprep.mubr.msk.bf16.mxu0 %vm11385_vm0, %v11634_v25 }
  0xde   : > { %9792 = vmatmul.mubr.msk.bf16.gmra.mrb[92].mxu0 %vm1058_vm2, %v11035_v30 }
  0xdf   : > { %9795 = vmatprep.mubr.msk.bf16.mxu0 %vm11385_vm0, %v11634_v25 }
  0xe6   : > { %9796 = vmatmul.mubr.msk.bf16.gmra.mrb[96].mxu0 %vm1058_vm2, %v11036_v31 }
  0xe7   : > { %9799 = vmatprep.mubr.msk.bf16.mxu0 %vm11385_vm0, %v11634_v25 }
  0xee   : > { %9800 = vmatmul.mubr.msk.bf16.gmra.mrb[100].mxu0 %vm1058_vm2, %v11037_v32 }
  0xef   : > { %9803 = vmatprep.mubr.msk.bf16.mxu0 %vm11385_vm0, %v11634_v25 }
  0xf6   : > { %9804 = vmatmul.mubr.msk.bf16.gmra.mrb[104].mxu0 %vm1058_vm2, %v11038_v33 }
  0xf7   : > { %9807 = vmatprep.mubr.msk.bf16.mxu0 %vm11385_vm0, %v11634_v25 }
  0xf9   : > { %v1190_v36 = vpop.f32.mrb[0].mxu0 }
  0xfa   : > { %v1444_v37 = vmul.f32 %v11670_v34, %v1190_v36  ;;  %v9701_v38 = vpop.f32.mrb[1].mxu0 }
  0xfb   : > { %v1193_v40 = vpop.f32.mrb[2].mxu0 }
  0xfc   : > { %v1513_v41 = vadd.f32 %v11676_v35, %v1444_v37  ;;  %v1445_v42 = vmul.f32 %v11670_v34, %v1193_v40  ;;  %v9702_v43 = vpop.f32.mrb[3].mxu0 }
  0xfe   : > { %v1575_v44 = vmax.f32 %v1513_v41, 0.0  ;;  %v1514_v45 = vadd.f32 %v11676_v35, %v1445_v42  ;;  %9808 = vmatmul.mubr.msk.bf16.gmra.mrb[108].mxu0 %vm1058_vm2, %v11039_v39 }
  0xff   : > { %9811 = vmatprep.mubr.msk.bf16.mxu0 %vm11385_vm0, %v11634_v25 }
 0x100   : > { %1638 = vst.msk [vmem:[#allocation2] sm:$0xff] %vm1637_vm3, %v1575_v44  ;;  %v1576_v46 = vmax.f32 %v1514_v45, 0.0 }
 0x101   : > { %v1198_v47 = vpop.f32.mrb[4].mxu0 }
 0x102   : > { %1639 = vst.msk [vmem:[#allocation2 + $0x8] sm:$0xff] %vm1637_vm3, %v1576_v46  ;;  %v1446_v48 = vmul.f32 %v11670_v34, %v1198_v47  ;;  %v9705_v49 = vpop.f32.mrb[5].mxu0 }
 0x103   : > { %v1201_v51 = vpop.f32.mrb[6].mxu0 }
 0x104   : > { %v1515_v52 = vadd.f32 %v11676_v35, %v1446_v48  ;;  %v1447_v53 = vmul.f32 %v11670_v34, %v1201_v51  ;;  %v9706_v54 = vpop.f32.mrb[7].mxu0 }
 0x106   : > { %v1577_v55 = vmax.f32 %v1515_v52, 0.0  ;;  %v1516_v56 = vadd.f32 %v11676_v35, %v1447_v53  ;;  %9812 = vmatmul.mubr.msk.bf16.gmra.mrb[112].mxu0 %vm1058_vm2, %v11040_v50 }
 0x107   : > { %v1701_v57 = vld [vmem:[#allocation2] sm:$0xff]  ;;  %9815 = vmatprep.mubr.msk.bf16.mxu0 %vm11385_vm0, %v11634_v25 }
 0x108   : > { %v1702_v58 = vsel %vm1637_vm3, %v1701_v57, -inf  ;;  %1640 = vst.msk [vmem:[#allocation2 + $0x10] sm:$0xff] %vm1637_vm3, %v1577_v55  ;;  %v1578_v59 = vmax.f32 %v1516_v56, 0.0 }
 0x109   : > { %v1703_v60 = vrot.slane %v1702_v58, 4  ;;  %v1711_v61 = vld [vmem:[#allocation2 + $0x8] sm:$0xff]  ;;  %v1206_v62 = vpop.f32.mrb[8].mxu0 }
 0x10a   : > { %v1712_v0 = vsel %vm1637_vm3, %v1711_v61, -inf  ;;  %1641 = vst.msk [vmem:[#allocation2 + $0x18] sm:$0xff] %vm1637_vm3, %v1578_v59  ;;  %v1448_v1 = vmul.f32 %v11670_v34, %v1206_v62  ;;  %v9709_v2 = vpop.f32.mrb[9].mxu0 }
 0x10b   : > { %v1704_v3 = vmax.f32 %v1702_v58, %v1703_v60  ;;  %v1713_v4 = vrot.slane %v1712_v0, 4  ;;  %v1209_v5 = vpop.f32.mrb[10].mxu0 }
 0x10c   : > { %v1517_v6 = vadd.f32 %v11676_v35, %v1448_v1  ;;  %v1449_v7 = vmul.f32 %v11670_v34, %v1209_v5  ;;  %v9710_v8 = vpop.f32.mrb[11].mxu0 }
 0x10d   : > { %v1705_v9 = vrot.slane %v1704_v3, 2  ;;  %v1714_v10 = vmax.f32 %v1712_v0, %v1713_v4 }
 0x10e   : > { %v1579_v11 = vmax.f32 %v1517_v6, 0.0  ;;  %v1518_v12 = vadd.f32 %v11676_v35, %v1449_v7  ;;  %9816 = vmatmul.mubr.msk.bf16.gmra.mrb[116].mxu0 %vm1058_vm2, %v11041_v63 }
 0x10f   : > { %v1706_v13 = vmax.f32 %v1704_v3, %v1705_v9  ;;  %v1715_v14 = vrot.slane %v1714_v10, 2  ;;  %v1720_v15 = vld [vmem:[#allocation2 + $0x10] sm:$0xff]  ;;  %9819 = vmatprep.mubr.msk.bf16.mxu0 %vm11385_vm0, %v11634_v25 }
 0x110   : > { %v1721_v16 = vsel %vm1637_vm3, %v1720_v15, -inf  ;;  %1642 = vst.msk [vmem:[#allocation2 + $0x20] sm:$0xff] %vm1637_vm3, %v1579_v11  ;;  %v1580_v17 = vmax.f32 %v1518_v12, 0.0 }
 0x111   : > { %v1707_v18 = vrot.slane %v1706_v13, 1  ;;  %v1716_v19 = vmax.f32 %v1714_v10, %v1715_v14  ;;  %v1722_v20 = vrot.slane %v1721_v16, 4  ;;  %v1729_v21 = vld [vmem:[#allocation2 + $0x18] sm:$0xff]  ;;  %v1214_v22 = vpop.f32.mrb[12].mxu0 }
 0x112   : > { %v1730_v23 = vsel %vm1637_vm3, %v1729_v21, -inf  ;;  %1643 = vst.msk [vmem:[#allocation2 + $0x28] sm:$0xff] %vm1637_vm3, %v1580_v17  ;;  %v1450_v24 = vmul.f32 %v11670_v34, %v1214_v22  ;;  %v9713_v26 = vpop.f32.mrb[13].mxu0 }
 0x113   : > { %v1708_v28 = vmax.f32 %v1706_v13, %v1707_v18  ;;  %v1717_v29 = vrot.slane %v1716_v19, 1  ;;  %v1723_v30 = vmax.f32 %v1721_v16, %v1722_v20  ;;  %v1731_v31 = vrot.slane %v1730_v23, 4  ;;  %v1217_v32 = vpop.f32.mrb[14].mxu0 }
 0x114   : > { %v1519_v33 = vadd.f32 %v11676_v35, %v1450_v24  ;;  %v1451_v36 = vmul.f32 %v11670_v34, %v1217_v32  ;;  %v9714_v37 = vpop.f32.mrb[15].mxu0 }
 0x115   : > { %1710 = vst.msk [vmem:[#allocation3] sm:$0x1] %vm1709_vm4, %v1708_v28  ;;  %v1718_v38 = vmax.f32 %v1716_v19, %v1717_v29  ;;  %v1724_v39 = vrot.slane %v1723_v30, 2  ;;  %v1732_v40 = vmax.f32 %v1730_v23, %v1731_v31 }
 0x116   : > { %v1581_v41 = vmax.f32 %v1519_v33, 0.0  ;;  %v1520_v42 = vadd.f32 %v11676_v35, %v1451_v36  ;;  %9820 = vmatmul.mubr.msk.bf16.gmra.mrb[120].mxu0 %vm1058_vm2, %v11042_v27 }
 0x117   : > { %1719 = vst.msk [vmem:[#allocation3 + $0x1] sm:$0x1] %vm1709_vm4, %v1718_v38  ;;  %v1725_v43 = vmax.f32 %v1723_v30, %v1724_v39  ;;  %v1733_v44 = vrot.slane %v1732_v40, 2  ;;  %v1738_v45 = vld [vmem:[#allocation2 + $0x20] sm:$0xff]  ;;  %10191 = vmatprep.mubr.msk.bf16.mxu0 %vm11385_vm0, %v11634_v25 }
 0x118   : > { %v1739_v46 = vsel %vm1637_vm3, %v1738_v45, -inf  ;;  %1644 = vst.msk [vmem:[#allocation2 + $0x30] sm:$0xff] %vm1637_vm3, %v1581_v41  ;;  %v1582_v47 = vmax.f32 %v1520_v42, 0.0 }
 0x119   : > { %v1726_v48 = vrot.slane %v1725_v43, 1  ;;  %v1734_v49 = vmax.f32 %v1732_v40, %v1733_v44  ;;  %v1740_v50 = vrot.slane %v1739_v46, 4  ;;  %v1747_v51 = vld [vmem:[#allocation2 + $0x28] sm:$0xff]  ;;  %v1222_v52 = vpop.f32.mrb[16].mxu0 }
 0x11a   : > { %v1748_v53 = vsel %vm1637_vm3, %v1747_v51, -inf  ;;  %1645 = vst.msk [vmem:[#allocation2 + $0x38] sm:$0xff] %vm1637_vm3, %v1582_v47  ;;  %v1452_v54 = vmul.f32 %v11670_v34, %v1222_v52  ;;  %v9717_v55 = vpop.f32.mrb[17].mxu0 }
 0x11b   : > { %v1727_v56 = vmax.f32 %v1725_v43, %v1726_v48  ;;  %v1735_v57 = vrot.slane %v1734_v49, 1  ;;  %v1741_v25 = vmax.f32 %v1739_v46, %v1740_v50  ;;  %v1749_v58 = vrot.slane %v1748_v53, 4  ;;  %v1225_v59 = vpop.f32.mrb[18].mxu0 }
 0x11c   : > { %v1521_v60 = vadd.f32 %v11676_v35, %v1452_v54  ;;  %v1453_v61 = vmul.f32 %v11670_v34, %v1225_v59  ;;  %v9718_v62 = vpop.f32.mrb[19].mxu0 }
 0x11d   : > { %1728 = vst.msk [vmem:[#allocation3 + $0x2] sm:$0x1] %vm1709_vm4, %v1727_v56  ;;  %v1736_v63 = vmax.f32 %v1734_v49, %v1735_v57  ;;  %v1742_v0 = vrot.slane %v1741_v25, 2  ;;  %v1750_v1 = vmax.f32 %v1748_v53, %v1749_v58 }
 0x11e   : > { %v1583_v2 = vmax.f32 %v1521_v60, 0.0  ;;  %v1522_v3 = vadd.f32 %v11676_v35, %v1453_v61 }
 0x11f   : > { %1737 = vst.msk [vmem:[#allocation3 + $0x3] sm:$0x1] %vm1709_vm4, %v1736_v63  ;;  %v1743_v4 = vmax.f32 %v1741_v25, %v1742_v0  ;;  %v1751_v5 = vrot.slane %v1750_v1, 2  ;;  %v1756_v6 = vld [vmem:[#allocation2 + $0x30] sm:$0xff] }
 0x120   : > { %v1757_v7 = vsel %vm1637_vm3, %v1756_v6, -inf  ;;  %1646 = vst.msk [vmem:[#allocation2 + $0x40] sm:$0xff] %vm1637_vm3, %v1583_v2  ;;  %v1584_v8 = vmax.f32 %v1522_v3, 0.0 }
 0x121   : > { %v1744_v9 = vrot.slane %v1743_v4, 1  ;;  %v1752_v10 = vmax.f32 %v1750_v1, %v1751_v5  ;;  %v1758_v11 = vrot.slane %v1757_v7, 4  ;;  %v1765_v12 = vld [vmem:[#allocation2 + $0x38] sm:$0xff]  ;;  %v1230_v13 = vpop.f32.mrb[20].mxu0 }
 0x122   : > { %v1766_v14 = vsel %vm1637_vm3, %v1765_v12, -inf  ;;  %1647 = vst.msk [vmem:[#allocation2 + $0x48] sm:$0xff] %vm1637_vm3, %v1584_v8  ;;  %v1454_v15 = vmul.f32 %v11670_v34, %v1230_v13  ;;  %v9721_v16 = vpop.f32.mrb[21].mxu0 }
 0x123   : > { %v1745_v17 = vmax.f32 %v1743_v4, %v1744_v9  ;;  %v1753_v18 = vrot.slane %v1752_v10, 1  ;;  %v1759_v19 = vmax.f32 %v1757_v7, %v1758_v11  ;;  %v1767_v20 = vrot.slane %v1766_v14, 4  ;;  %v1233_v21 = vpop.f32.mrb[22].mxu0 }
 0x124   : > { %v1523_v22 = vadd.f32 %v11676_v35, %v1454_v15  ;;  %v1455_v23 = vmul.f32 %v11670_v34, %v1233_v21  ;;  %v9722_v24 = vpop.f32.mrb[23].mxu0 }
 0x125   : > { %1746 = vst.msk [vmem:[#allocation3 + $0x4] sm:$0x1] %vm1709_vm4, %v1745_v17  ;;  %v1754_v26 = vmax.f32 %v1752_v10, %v1753_v18  ;;  %v1760_v27 = vrot.slane %v1759_v19, 2  ;;  %v1768_v28 = vmax.f32 %v1766_v14, %v1767_v20 }
 0x126   : > { %v1585_v29 = vmax.f32 %v1523_v22, 0.0  ;;  %v1524_v30 = vadd.f32 %v11676_v35, %v1455_v23 }
 0x127   : > { %1755 = vst.msk [vmem:[#allocation3 + $0x5] sm:$0x1] %vm1709_vm4, %v1754_v26  ;;  %v1761_v31 = vmax.f32 %v1759_v19, %v1760_v27  ;;  %v1769_v32 = vrot.slane %v1768_v28, 2  ;;  %v1774_v33 = vld [vmem:[#allocation2 + $0x40] sm:$0xff] }
 0x128   : > { %v1775_v36 = vsel %vm1637_vm3, %v1774_v33, -inf  ;;  %1648 = vst.msk [vmem:[#allocation2 + $0x50] sm:$0xff] %vm1637_vm3, %v1585_v29  ;;  %v1586_v37 = vmax.f32 %v1524_v30, 0.0 }
 0x129   : > { %v1762_v38 = vrot.slane %v1761_v31, 1  ;;  %v1770_v39 = vmax.f32 %v1768_v28, %v1769_v32  ;;  %v1776_v40 = vrot.slane %v1775_v36, 4  ;;  %v1783_v41 = vld [vmem:[#allocation2 + $0x48] sm:$0xff]  ;;  %v1238_v42 = vpop.f32.mrb[24].mxu0 }
 0x12a   : > { %v1784_v43 = vsel %vm1637_vm3, %v1783_v41, -inf  ;;  %1649 = vst.msk [vmem:[#allocation2 + $0x58] sm:$0xff] %vm1637_vm3, %v1586_v37  ;;  %v1456_v44 = vmul.f32 %v11670_v34, %v1238_v42  ;;  %v9725_v45 = vpop.f32.mrb[25].mxu0 }
 0x12b   : > { %v1763_v46 = vmax.f32 %v1761_v31, %v1762_v38  ;;  %v1771_v47 = vrot.slane %v1770_v39, 1  ;;  %v1777_v48 = vmax.f32 %v1775_v36, %v1776_v40  ;;  %v1785_v49 = vrot.slane %v1784_v43, 4  ;;  %v1241_v50 = vpop.f32.mrb[26].mxu0 }
 0x12c   : > { %v1525_v51 = vadd.f32 %v11676_v35, %v1456_v44  ;;  %v1457_v52 = vmul.f32 %v11670_v34, %v1241_v50  ;;  %v9726_v53 = vpop.f32.mrb[27].mxu0 }
 0x12d   : > { %1764 = vst.msk [vmem:[#allocation3 + $0x6] sm:$0x1] %vm1709_vm4, %v1763_v46  ;;  %v1772_v54 = vmax.f32 %v1770_v39, %v1771_v47  ;;  %v1778_v55 = vrot.slane %v1777_v48, 2  ;;  %v1786_v56 = vmax.f32 %v1784_v43, %v1785_v49 }
 0x12e   : > { %v1587_v57 = vmax.f32 %v1525_v51, 0.0  ;;  %v1526_v25 = vadd.f32 %v11676_v35, %v1457_v52 }
 0x12f   : > { %1773 = vst.msk [vmem:[#allocation3 + $0x7] sm:$0x1] %vm1709_vm4, %v1772_v54  ;;  %v1779_v58 = vmax.f32 %v1777_v48, %v1778_v55  ;;  %v1787_v59 = vrot.slane %v1786_v56, 2  ;;  %v1792_v60 = vld [vmem:[#allocation2 + $0x50] sm:$0xff] }
 0x130   : > { %v1793_v61 = vsel %vm1637_vm3, %v1792_v60, -inf  ;;  %1650 = vst.msk [vmem:[#allocation2 + $0x60] sm:$0xff] %vm1637_vm3, %v1587_v57  ;;  %v1588_v62 = vmax.f32 %v1526_v25, 0.0 }
 0x131   : > { %v1780_v63 = vrot.slane %v1779_v58, 1  ;;  %v1788_v0 = vmax.f32 %v1786_v56, %v1787_v59  ;;  %v1794_v1 = vrot.slane %v1793_v61, 4  ;;  %v1801_v2 = vld [vmem:[#allocation2 + $0x58] sm:$0xff]  ;;  %v1246_v3 = vpop.f32.mrb[28].mxu0 }
 0x132   : > { %v1802_v4 = vsel %vm1637_vm3, %v1801_v2, -inf  ;;  %1651 = vst.msk [vmem:[#allocation2 + $0x68] sm:$0xff] %vm1637_vm3, %v1588_v62  ;;  %v1458_v5 = vmul.f32 %v11670_v34, %v1246_v3  ;;  %v9729_v6 = vpop.f32.mrb[29].mxu0 }
 0x133   : > { %v1781_v7 = vmax.f32 %v1779_v58, %v1780_v63  ;;  %v1789_v8 = vrot.slane %v1788_v0, 1  ;;  %v1795_v9 = vmax.f32 %v1793_v61, %v1794_v1  ;;  %v1803_v10 = vrot.slane %v1802_v4, 4  ;;  %v1249_v11 = vpop.f32.mrb[30].mxu0 }
 0x134   : > { %v1527_v12 = vadd.f32 %v11676_v35, %v1458_v5  ;;  %v1459_v13 = vmul.f32 %v11670_v34, %v1249_v11  ;;  %v9730_v14 = vpop.f32.mrb[31].mxu0 }
 0x135   : > { %1782 = vst.msk [vmem:[#allocation3 + $0x8] sm:$0x1] %vm1709_vm4, %v1781_v7  ;;  %v1790_v15 = vmax.f32 %v1788_v0, %v1789_v8  ;;  %v1796_v16 = vrot.slane %v1795_v9, 2  ;;  %v1804_v17 = vmax.f32 %v1802_v4, %v1803_v10 }
 0x136   : > { %v1589_v18 = vmax.f32 %v1527_v12, 0.0  ;;  %v1528_v19 = vadd.f32 %v11676_v35, %v1459_v13 }
 0x137   : > { %1791 = vst.msk [vmem:[#allocation3 + $0x9] sm:$0x1] %vm1709_vm4, %v1790_v15  ;;  %v1797_v20 = vmax.f32 %v1795_v9, %v1796_v16  ;;  %v1805_v21 = vrot.slane %v1804_v17, 2  ;;  %v1810_v22 = vld [vmem:[#allocation2 + $0x60] sm:$0xff] }
 0x138   : > { %v1811_v23 = vsel %vm1637_vm3, %v1810_v22, -inf  ;;  %1652 = vst.msk [vmem:[#allocation2 + $0x70] sm:$0xff] %vm1637_vm3, %v1589_v18  ;;  %v1590_v24 = vmax.f32 %v1528_v19, 0.0 }
 0x139   : > { %v1798_v26 = vrot.slane %v1797_v20, 1  ;;  %v1806_v27 = vmax.f32 %v1804_v17, %v1805_v21  ;;  %v1812_v28 = vrot.slane %v1811_v23, 4  ;;  %v1819_v29 = vld [vmem:[#allocation2 + $0x68] sm:$0xff]  ;;  %v1254_v30 = vpop.f32.mrb[32].mxu0 }
 0x13a   : > { %v1820_v31 = vsel %vm1637_vm3, %v1819_v29, -inf  ;;  %1653 = vst.msk [vmem:[#allocation2 + $0x78] sm:$0xff] %vm1637_vm3, %v1590_v24  ;;  %v1460_v32 = vmul.f32 %v11670_v34, %v1254_v30  ;;  %v9733_v33 = vpop.f32.mrb[33].mxu0 }
 0x13b   : > { %v1799_v36 = vmax.f32 %v1797_v20, %v1798_v26  ;;  %v1807_v37 = vrot.slane %v1806_v27, 1  ;;  %v1813_v38 = vmax.f32 %v1811_v23, %v1812_v28  ;;  %v1821_v39 = vrot.slane %v1820_v31, 4  ;;  %v1257_v40 = vpop.f32.mrb[34].mxu0 }
 0x13c   : > { %v1529_v41 = vadd.f32 %v11676_v35, %v1460_v32  ;;  %v1461_v42 = vmul.f32 %v11670_v34, %v1257_v40  ;;  %v9734_v43 = vpop.f32.mrb[35].mxu0 }
 0x13d   : > { %1800 = vst.msk [vmem:[#allocation3 + $0xa] sm:$0x1] %vm1709_vm4, %v1799_v36  ;;  %v1808_v44 = vmax.f32 %v1806_v27, %v1807_v37  ;;  %v1814_v45 = vrot.slane %v1813_v38, 2  ;;  %v1822_v46 = vmax.f32 %v1820_v31, %v1821_v39  ;;  %v11043_v37 = vld [vmem:[%s14041_s10 + $0x20] sm:$0xff]  }
 0x13e   : > { %v1591_v47 = vmax.f32 %v1529_v41, 0.0  ;;  %v1530_v48 = vadd.f32 %v11676_v35, %v1461_v42  ;;  %9823 = vmatprep.subr.bf16.mxu1 %v11043_v37 }
 0x13f   : > { %1809 = vst.msk [vmem:[#allocation3 + $0xb] sm:$0x1] %vm1709_vm4, %v1808_v44  ;;  %v1815_v49 = vmax.f32 %v1813_v38, %v1814_v45  ;;  %v1823_v50 = vrot.slane %v1822_v46, 2  ;;  %v1828_v51 = vld [vmem:[#allocation2 + $0x70] sm:$0xff]  ;;  %9824 = vmatpush3.bf16.msra.mxu1 %v11043_v37 }
 0x140   : > { %v1829_v52 = vsel %vm1637_vm3, %v1828_v51, -inf  ;;  %1654 = vst.msk [vmem:[#allocation2 + $0x80] sm:$0xff] %vm1637_vm3, %v1591_v47  ;;  %v1592_v53 = vmax.f32 %v1530_v48, 0.0 }
 0x141   : > { %v1816_v54 = vrot.slane %v1815_v49, 1  ;;  %v1824_v55 = vmax.f32 %v1822_v46, %v1823_v50  ;;  %v1830_v56 = vrot.slane %v1829_v52, 4  ;;  %v1837_v57 = vld [vmem:[#allocation2 + $0x78] sm:$0xff]  ;;  %v1262_v25 = vpop.f32.mrb[36].mxu0  ;;  %v11044_v50 = vld [vmem:[%s14041_s10 + $0x28] sm:$0xff]  }
 0x142   : > { %v1838_v58 = vsel %vm1637_vm3, %v1837_v57, -inf  ;;  %1655 = vst.msk [vmem:[#allocation2 + $0x88] sm:$0xff] %vm1637_vm3, %v1592_v53  ;;  %v1462_v59 = vmul.f32 %v11670_v34, %v1262_v25  ;;  %v9737_v60 = vpop.f32.mrb[37].mxu0  ;;  %9825 = vmatprep.subr.bf16.mxu1 %v11044_v50 }
 0x143   : > { %v1817_v61 = vmax.f32 %v1815_v49, %v1816_v54  ;;  %v1825_v62 = vrot.slane %v1824_v55, 1  ;;  %v1831_v63 = vmax.f32 %v1829_v52, %v1830_v56  ;;  %v1839_v0 = vrot.slane %v1838_v58, 4  ;;  %v1265_v1 = vpop.f32.mrb[38].mxu0  ;;  %9826 = vmatpush3.bf16.msra.mxu1 %v11044_v50 }
 0x144   : > { %v1531_v2 = vadd.f32 %v11676_v35, %v1462_v59  ;;  %v1463_v3 = vmul.f32 %v11670_v34, %v1265_v1  ;;  %v9738_v4 = vpop.f32.mrb[39].mxu0  ;;  %v2251_v1 = vld [vmem:[#allocation3] sm:$0xff] }
 0x145   : > { %1818 = vst.msk [vmem:[#allocation3 + $0xc] sm:$0x1] %vm1709_vm4, %v1817_v61  ;;  %v1826_v5 = vmax.f32 %v1824_v55, %v1825_v62  ;;  %v1832_v6 = vrot.slane %v1831_v63, 2  ;;  %v1840_v7 = vmax.f32 %v1838_v58, %v1839_v0  ;;  %v11045_v0 = vld [vmem:[%s14041_s10 + $0x30] sm:$0xff]  }
 0x146   : > { %v1593_v8 = vmax.f32 %v1531_v2, 0.0  ;;  %v1532_v9 = vadd.f32 %v11676_v35, %v1463_v3  ;;  %9827 = vmatprep.subr.bf16.mxu1 %v11045_v0 }
 0x147   : > { %1827 = vst.msk [vmem:[#allocation3 + $0xd] sm:$0x1] %vm1709_vm4, %v1826_v5  ;;  %v1833_v10 = vmax.f32 %v1831_v63, %v1832_v6  ;;  %v1841_v11 = vrot.slane %v1840_v7, 2  ;;  %v1846_v12 = vld [vmem:[#allocation2 + $0x80] sm:$0xff]  ;;  %9828 = vmatpush3.bf16.msra.mxu1 %v11045_v0 }
 0x148   : > { %v1847_v13 = vsel %vm1637_vm3, %v1846_v12, -inf  ;;  %1656 = vst.msk [vmem:[#allocation2 + $0x90] sm:$0xff] %vm1637_vm3, %v1593_v8  ;;  %v1594_v14 = vmax.f32 %v1532_v9, 0.0 }
 0x149   : > { %v1834_v15 = vrot.slane %v1833_v10, 1  ;;  %v1842_v16 = vmax.f32 %v1840_v7, %v1841_v11  ;;  %v1848_v17 = vrot.slane %v1847_v13, 4  ;;  %v1855_v18 = vld [vmem:[#allocation2 + $0x88] sm:$0xff]  ;;  %v1270_v19 = vpop.f32.mrb[40].mxu0 }
 0x14a   : > { %v1856_v20 = vsel %vm1637_vm3, %v1855_v18, -inf  ;;  %1657 = vst.msk [vmem:[#allocation2 + $0x98] sm:$0xff] %vm1637_vm3, %v1594_v14  ;;  %v1464_v21 = vmul.f32 %v11670_v34, %v1270_v19  ;;  %v9741_v22 = vpop.f32.mrb[41].mxu0 }
 0x14b   : > { %v1835_v23 = vmax.f32 %v1833_v10, %v1834_v15  ;;  %v1843_v24 = vrot.slane %v1842_v16, 1  ;;  %v1849_v26 = vmax.f32 %v1847_v13, %v1848_v17  ;;  %v1857_v27 = vrot.slane %v1856_v20, 4  ;;  %v1273_v28 = vpop.f32.mrb[42].mxu0  ;;  %v11046_v17 = vld [vmem:[%s14041_s10 + $0x38] sm:$0xff]  }
 0x14c   : > { %v1533_v29 = vadd.f32 %v11676_v35, %v1464_v21  ;;  %v1465_v30 = vmul.f32 %v11670_v34, %v1273_v28  ;;  %v9742_v31 = vpop.f32.mrb[43].mxu0  ;;  %9829 = vmatprep.subr.bf16.mxu1 %v11046_v17 }
 0x14d   : > { %1836 = vst.msk [vmem:[#allocation3 + $0xe] sm:$0x1] %vm1709_vm4, %v1835_v23  ;;  %v1844_v32 = vmax.f32 %v1842_v16, %v1843_v24  ;;  %v1850_v33 = vrot.slane %v1849_v26, 2  ;;  %v1858_v36 = vmax.f32 %v1856_v20, %v1857_v27  ;;  %9830 = vmatpush3.bf16.msra.mxu1 %v11046_v17 }
 0x14e   : > { %v1595_v38 = vmax.f32 %v1533_v29, 0.0  ;;  %v1534_v39 = vadd.f32 %v11676_v35, %v1465_v30 }
 0x14f   : > { %1845 = vst.msk [vmem:[#allocation3 + $0xf] sm:$0x1] %vm1709_vm4, %v1844_v32  ;;  %v1851_v40 = vmax.f32 %v1849_v26, %v1850_v33  ;;  %v1859_v41 = vrot.slane %v1858_v36, 2  ;;  %v1864_v42 = vld [vmem:[#allocation2 + $0x90] sm:$0xff] }
 0x150   : > { %v1865_v43 = vsel %vm1637_vm3, %v1864_v42, -inf  ;;  %1658 = vst.msk [vmem:[#allocation2 + $0xa0] sm:$0xff] %vm1637_vm3, %v1595_v38  ;;  %v1596_v44 = vmax.f32 %v1534_v39, 0.0 }
 0x151   : > { %v1852_v45 = vrot.slane %v1851_v40, 1  ;;  %v1860_v46 = vmax.f32 %v1858_v36, %v1859_v41  ;;  %v1866_v47 = vrot.slane %v1865_v43, 4  ;;  %v1873_v48 = vld [vmem:[#allocation2 + $0x98] sm:$0xff]  ;;  %v1278_v49 = vpop.f32.mrb[44].mxu0 }
 0x152   : > { %v1874_v51 = vsel %vm1637_vm3, %v1873_v48, -inf  ;;  %1659 = vst.msk [vmem:[#allocation2 + $0xa8] sm:$0xff] %vm1637_vm3, %v1596_v44  ;;  %v1466_v52 = vmul.f32 %v11670_v34, %v1278_v49  ;;  %v9745_v53 = vpop.f32.mrb[45].mxu0 }
 0x153   : > { %v1853_v54 = vmax.f32 %v1851_v40, %v1852_v45  ;;  %v1861_v55 = vrot.slane %v1860_v46, 1  ;;  %v1867_v56 = vmax.f32 %v1865_v43, %v1866_v47  ;;  %v1875_v57 = vrot.slane %v1874_v51, 4  ;;  %v1281_v25 = vpop.f32.mrb[46].mxu0 }
 0x154   : > { %v1535_v58 = vadd.f32 %v11676_v35, %v1466_v52  ;;  %v1467_v59 = vmul.f32 %v11670_v34, %v1281_v25  ;;  %v9746_v60 = vpop.f32.mrb[47].mxu0 }
 0x155   : > { %1854 = vst.msk [vmem:[#allocation3 + $0x10] sm:$0x1] %vm1709_vm4, %v1853_v54  ;;  %v1862_v61 = vmax.f32 %v1860_v46, %v1861_v55  ;;  %v1868_v62 = vrot.slane %v1867_v56, 2  ;;  %v1876_v63 = vmax.f32 %v1874_v51, %v1875_v57 }
 0x156   : > { %v1597_v2 = vmax.f32 %v1535_v58, 0.0  ;;  %v1536_v3 = vadd.f32 %v11676_v35, %v1467_v59  ;;  %v2252_v4 = vld [vmem:[#allocation3 + $0x8] sm:$0xff] }
 0x157   : > { %1863 = vst.msk [vmem:[#allocation3 + $0x11] sm:$0x1] %vm1709_vm4, %v1862_v61  ;;  %v1869_v5 = vmax.f32 %v1867_v56, %v1868_v62  ;;  %v1877_v6 = vrot.slane %v1876_v63, 2  ;;  %v1882_v7 = vld [vmem:[#allocation2 + $0xa0] sm:$0xff]  ;;  %v11813_v8 = vpack.c.bf16 %v2252_v4, %v2251_v1 }
 0x158   : > { %v1883_v9 = vsel %vm1637_vm3, %v1882_v7, -inf  ;;  %1660 = vst.msk [vmem:[#allocation2 + $0xb0] sm:$0xff] %vm1637_vm3, %v1597_v2  ;;  %v1598_v10 = vmax.f32 %v1536_v3, 0.0 }
 0x159   : > { %v1870_v11 = vrot.slane %v1869_v5, 1  ;;  %v1878_v12 = vmax.f32 %v1876_v63, %v1877_v6  ;;  %v1884_v13 = vrot.slane %v1883_v9, 4  ;;  %v1891_v14 = vld [vmem:[#allocation2 + $0xa8] sm:$0xff]  ;;  %v1286_v15 = vpop.f32.mrb[48].mxu0  ;;  %v11818_v16 = vshrl.u32 %v11813_v8, 16 }
 0x15a   : > { %v1892_v18 = vsel %vm1637_vm3, %v1891_v14, -inf  ;;  %1661 = vst.msk [vmem:[#allocation2 + $0xb8] sm:$0xff] %vm1637_vm3, %v1598_v10  ;;  %v1468_v19 = vmul.f32 %v11670_v34, %v1286_v15  ;;  %v9749_v20 = vpop.f32.mrb[49].mxu0  ;;  %v11827_v21 = vshll.u32 %v11813_v8, 16 }
 0x15b   : > { %v1871_v22 = vmax.f32 %v1869_v5, %v1870_v11  ;;  %v1879_v23 = vrot.slane %v1878_v12, 1  ;;  %v1885_v24 = vmax.f32 %v1883_v9, %v1884_v13  ;;  %v1893_v26 = vrot.slane %v1892_v18, 4  ;;  %v1289_v27 = vpop.f32.mrb[50].mxu0 }
 0x15c   : > { %v1537_v28 = vadd.f32 %v11676_v35, %v1468_v19  ;;  %v1469_v29 = vmul.f32 %v11670_v34, %v1289_v27  ;;  %v9750_v30 = vpop.f32.mrb[51].mxu0  ;;  %v2647_v31 = vrot.slane %v11818_v16, 1  ;;  %v2648_v37 = vrot.slane %v11827_v21, 2 }
 0x15d   : > { %1872 = vst.msk [vmem:[#allocation3 + $0x12] sm:$0x1] %vm1709_vm4, %v1871_v22  ;;  %v1880_v32 = vmax.f32 %v1878_v12, %v1879_v23  ;;  %v1886_v33 = vrot.slane %v1885_v24, 2  ;;  %v1894_v36 = vmax.f32 %v1892_v18, %v1893_v26  ;;  %v2909_v44 = vrot.slane %v11818_v16, 2 }
 0x15e   : > { %v1599_v38 = vmax.f32 %v1537_v28, 0.0  ;;  %v1538_v39 = vadd.f32 %v11676_v35, %v1469_v29  ;;  %v11836_v43 = vor.u32 %v2648_v37, %v2647_v31  ;;  %v2910_v47 = vrot.slane %v11827_v21, 3 }
 0x15f   : > { %1881 = vst.msk [vmem:[#allocation3 + $0x13] sm:$0x1] %vm1709_vm4, %v1880_v32  ;;  %v1887_v40 = vmax.f32 %v1885_v24, %v1886_v33  ;;  %v1895_v41 = vrot.slane %v1894_v36, 2  ;;  %v1900_v42 = vld [vmem:[#allocation2 + $0xb0] sm:$0xff]  ;;  %v3165_v53 = vrot.slane %v11818_v16, 3  ;;  %v3166_v25 = vrot.slane %v11827_v21, 4 }
 0x160   : > { %v1901_v45 = vsel %vm1637_vm3, %v1900_v42, -inf  ;;  %1662 = vst.msk [vmem:[#allocation2 + $0xc0] sm:$0xff] %vm1637_vm3, %v1599_v38  ;;  %v1600_v46 = vmax.f32 %v1538_v39, 0.0  ;;  %v11846_v57 = vor.u32 %v2910_v47, %v2909_v44 }
 0x161   : > { %v1888_v48 = vrot.slane %v1887_v40, 1  ;;  %v1896_v49 = vmax.f32 %v1894_v36, %v1895_v41  ;;  %v1902_v50 = vrot.slane %v1901_v45, 4  ;;  %v1909_v51 = vld [vmem:[#allocation2 + $0xb8] sm:$0xff]  ;;  %v1294_v52 = vpop.f32.mrb[52].mxu0  ;;  %v11851_v2 = vor.u32 %v3166_v25, %v3165_v53 }
 0x162   : > { %v1910_v54 = vsel %vm1637_vm3, %v1909_v51, -inf  ;;  %1663 = vst.msk [vmem:[#allocation2 + $0xc8] sm:$0xff] %vm1637_vm3, %v1600_v46  ;;  %v1470_v55 = vmul.f32 %v11670_v34, %v1294_v52  ;;  %v9753_v56 = vpop.f32.mrb[53].mxu0 }
 0x163   : > { %v1889_v58 = vmax.f32 %v1887_v40, %v1888_v48  ;;  %v1897_v59 = vrot.slane %v1896_v49, 1  ;;  %v1903_v60 = vmax.f32 %v1901_v45, %v1902_v50  ;;  %v1911_v61 = vrot.slane %v1910_v54, 4  ;;  %v1297_v62 = vpop.f32.mrb[54].mxu0 }
 0x164   : > { %v1539_v63 = vadd.f32 %v11676_v35, %v1470_v55  ;;  %v1471_v0 = vmul.f32 %v11670_v34, %v1297_v62  ;;  %v9754_v1 = vpop.f32.mrb[55].mxu0 }
 0x165   : > { %1890 = vst.msk [vmem:[#allocation3 + $0x14] sm:$0x1] %vm1709_vm4, %v1889_v58  ;;  %v1898_v3 = vmax.f32 %v1896_v49, %v1897_v59  ;;  %v1904_v4 = vrot.slane %v1903_v60, 2  ;;  %v1912_v5 = vmax.f32 %v1910_v54, %v1911_v61 }
 0x166   : > { %v1601_v6 = vmax.f32 %v1539_v63, 0.0  ;;  %v1540_v7 = vadd.f32 %v11676_v35, %v1471_v0 }
 0x167   : > { %1899 = vst.msk [vmem:[#allocation3 + $0x15] sm:$0x1] %vm1709_vm4, %v1898_v3  ;;  %v1905_v9 = vmax.f32 %v1903_v60, %v1904_v4  ;;  %v1913_v10 = vrot.slane %v1912_v5, 2  ;;  %v1918_v11 = vld [vmem:[#allocation2 + $0xc0] sm:$0xff] }
 0x168   : > { %v1919_v12 = vsel %vm1637_vm3, %v1918_v11, -inf  ;;  %1664 = vst.msk [vmem:[#allocation2 + $0xd0] sm:$0xff] %vm1637_vm3, %v1601_v6  ;;  %v1602_v13 = vmax.f32 %v1540_v7, 0.0  ;;  %v11875_v60 = vld [vmem:[%s14039_s29] ss:$0 sm:$0xff] }
 0x169   : > { %v1906_v14 = vrot.slane %v1905_v9, 1  ;;  %v1914_v15 = vmax.f32 %v1912_v5, %v1913_v10  ;;  %v1920_v17 = vrot.slane %v1919_v12, 4  ;;  %v1927_v18 = vld [vmem:[#allocation2 + $0xc8] sm:$0xff]  ;;  %v1302_v19 = vpop.f32.mrb[56].mxu0  ;;  %v11882_v3 = vld [vmem:[%s14040_s30] ss:$0 sm:$0xff] }
 0x16a   : > { %v1928_v20 = vsel %vm1637_vm3, %v1927_v18, -inf  ;;  %1665 = vst.msk [vmem:[#allocation2 + $0xd8] sm:$0xff] %vm1637_vm3, %v1602_v13  ;;  %v1472_v22 = vmul.f32 %v11670_v34, %v1302_v19  ;;  %v9757_v23 = vpop.f32.mrb[57].mxu0  ;;  %v11888_v4 = vld [vmem:[%s14041_s10] sm:$0xff]  }
 0x16b   : > { %v1907_v24 = vmax.f32 %v1905_v9, %v1906_v14  ;;  %v1915_v26 = vrot.slane %v1914_v15, 1  ;;  %v1921_v27 = vmax.f32 %v1919_v12, %v1920_v17  ;;  %v1929_v28 = vrot.slane %v1928_v20, 4  ;;  %v1305_v29 = vpop.f32.mrb[58].mxu0  ;;  %9839 = vmatprep.subr.bf16.mxu1 %v11888_v4 }
 0x16c   : > { %v1541_v30 = vadd.f32 %v11676_v35, %v1472_v22  ;;  %v1473_v31 = vmul.f32 %v11670_v34, %v1305_v29  ;;  %v9758_v32 = vpop.f32.mrb[59].mxu0 }
 0x16d   : > { %1908 = vst.msk [vmem:[#allocation3 + $0x16] sm:$0x1] %vm1709_vm4, %v1907_v24  ;;  %v1916_v33 = vmax.f32 %v1914_v15, %v1915_v26  ;;  %v1922_v36 = vrot.slane %v1921_v27, 2  ;;  %v1930_v37 = vmax.f32 %v1928_v20, %v1929_v28 }
 0x16e   : > { %v1603_v38 = vmax.f32 %v1541_v30, 0.0  ;;  %v1542_v39 = vadd.f32 %v11676_v35, %v1473_v31 }
 0x16f   : > { %1917 = vst.msk [vmem:[#allocation3 + $0x17] sm:$0x1] %vm1709_vm4, %v1916_v33  ;;  %v1923_v40 = vmax.f32 %v1921_v27, %v1922_v36  ;;  %v1931_v41 = vrot.slane %v1930_v37, 2  ;;  %v1936_v42 = vld [vmem:[#allocation2 + $0xd0] sm:$0xff] }
 0x170   : > { %v1937_v44 = vsel %vm1637_vm3, %v1936_v42, -inf  ;;  %1666 = vst.msk [vmem:[#allocation2 + $0xe0] sm:$0xff] %vm1637_vm3, %v1603_v38  ;;  %v1604_v45 = vmax.f32 %v1542_v39, 0.0 }
 0x171   : > { %v1924_v46 = vrot.slane %v1923_v40, 1  ;;  %v1932_v47 = vmax.f32 %v1930_v37, %v1931_v41  ;;  %v1938_v48 = vrot.slane %v1937_v44, 4  ;;  %v1945_v49 = vld [vmem:[#allocation2 + $0xd8] sm:$0xff]  ;;  %v1310_v50 = vpop.f32.mrb[60].mxu0 }
 0x172   : > { %v1946_v51 = vsel %vm1637_vm3, %v1945_v49, -inf  ;;  %1667 = vst.msk [vmem:[#allocation2 + $0xe8] sm:$0xff] %vm1637_vm3, %v1604_v45  ;;  %v1474_v52 = vmul.f32 %v11670_v34, %v1310_v50  ;;  %v9761_v53 = vpop.f32.mrb[61].mxu0 }
 0x173   : > { %v1925_v54 = vmax.f32 %v1923_v40, %v1924_v46  ;;  %v1933_v55 = vrot.slane %v1932_v47, 1  ;;  %v1939_v56 = vmax.f32 %v1937_v44, %v1938_v48  ;;  %v1947_v25 = vrot.slane %v1946_v51, 4  ;;  %v1313_v58 = vpop.f32.mrb[62].mxu0 }
 0x174   : > { %v1543_v59 = vadd.f32 %v11676_v35, %v1474_v52  ;;  %v1475_v61 = vmul.f32 %v11875_v60, %v1313_v58  ;;  %v9762_v62 = vpop.f32.mrb[63].mxu0 }
 0x175   : > { %1926 = vst.msk [vmem:[#allocation3 + $0x18] sm:$0x1] %vm1709_vm4, %v1925_v54  ;;  %v1934_v63 = vmax.f32 %v1932_v47, %v1933_v55  ;;  %v1940_v34 = vrot.slane %v1939_v56, 2  ;;  %v1948_v0 = vmax.f32 %v1946_v51, %v1947_v25 }
 0x176   : > { %v1605_v1 = vmax.f32 %v1543_v59, 0.0  ;;  %v1544_v35 = vadd.f32 %v11882_v3, %v1475_v61 }
 0x177   : > { %1935 = vst.msk [vmem:[#allocation3 + $0x19] sm:$0x1] %vm1709_vm4, %v1934_v63  ;;  %v1941_v5 = vmax.f32 %v1939_v56, %v1940_v34  ;;  %v1949_v6 = vrot.slane %v1948_v0, 2  ;;  %v1954_v7 = vld [vmem:[#allocation2 + $0xe0] sm:$0xff] }
 0x178   : > { %v1955_v9 = vsel %vm1637_vm3, %v1954_v7, -inf  ;;  %1668 = vst.msk [vmem:[#allocation2 + $0xf0] sm:$0xff] %vm1637_vm3, %v1605_v1  ;;  %v1606_v10 = vmax.f32 %v1544_v35, 0.0 }
 0x179   : > { %v1942_v11 = vrot.slane %v1941_v5, 1  ;;  %v1950_v12 = vmax.f32 %v1948_v0, %v1949_v6  ;;  %v1956_v13 = vrot.slane %v1955_v9, 4  ;;  %v1963_v14 = vld [vmem:[#allocation2 + $0xe8] sm:$0xff]  ;;  %v1318_v15 = vpop.f32.mrb[64].mxu0 }
 0x17a   : > { %v1964_v17 = vsel %vm1637_vm3, %v1963_v14, -inf  ;;  %1669 = vst.msk [vmem:[#allocation2 + $0xf8] sm:$0xff] %vm1637_vm3, %v1606_v10  ;;  %v1476_v18 = vmul.f32 %v11875_v60, %v1318_v15  ;;  %v9765_v19 = vpop.f32.mrb[65].mxu0 }
 0x17b   : > { %v1943_v20 = vmax.f32 %v1941_v5, %v1942_v11  ;;  %v1951_v22 = vrot.slane %v1950_v12, 1  ;;  %v1957_v23 = vmax.f32 %v1955_v9, %v1956_v13  ;;  %v1965_v24 = vrot.slane %v1964_v17, 4  ;;  %v1321_v26 = vpop.f32.mrb[66].mxu0 }
 0x17c   : > { %v1545_v27 = vadd.f32 %v11882_v3, %v1476_v18  ;;  %v1477_v28 = vmul.f32 %v11875_v60, %v1321_v26  ;;  %v9766_v29 = vpop.f32.mrb[67].mxu0 }
 0x17d   : > { %1944 = vst.msk [vmem:[#allocation3 + $0x1a] sm:$0x1] %vm1709_vm4, %v1943_v20  ;;  %v1952_v30 = vmax.f32 %v1950_v12, %v1951_v22  ;;  %v1958_v31 = vrot.slane %v1957_v23, 2  ;;  %v1966_v32 = vmax.f32 %v1964_v17, %v1965_v24 }
 0x17e   : > { %v1607_v33 = vmax.f32 %v1545_v27, 0.0  ;;  %v1546_v36 = vadd.f32 %v11882_v3, %v1477_v28 }
 0x17f   : > { %1953 = vst.msk [vmem:[#allocation3 + $0x1b] sm:$0x1] %vm1709_vm4, %v1952_v30  ;;  %v1959_v37 = vmax.f32 %v1957_v23, %v1958_v31  ;;  %v1967_v38 = vrot.slane %v1966_v32, 2  ;;  %v1972_v39 = vld [vmem:[#allocation2 + $0xf0] sm:$0xff] }
 0x180   : > { %v1973_v40 = vsel %vm1637_vm3, %v1972_v39, -inf  ;;  %1670 = vst.msk [vmem:[#allocation2 + $0x100] sm:$0xff] %vm1637_vm3, %v1607_v33  ;;  %v1608_v41 = vmax.f32 %v1546_v36, 0.0 }
 0x181   : > { %v1960_v42 = vrot.slane %v1959_v37, 1  ;;  %v1968_v44 = vmax.f32 %v1966_v32, %v1967_v38  ;;  %v1974_v45 = vrot.slane %v1973_v40, 4  ;;  %v1981_v46 = vld [vmem:[#allocation2 + $0xf8] sm:$0xff]  ;;  %v1326_v47 = vpop.f32.mrb[68].mxu0 }
 0x182   : > { %v1982_v48 = vsel %vm1637_vm3, %v1981_v46, -inf  ;;  %1671 = vst.msk [vmem:[#allocation2 + $0x108] sm:$0xff] %vm1637_vm3, %v1608_v41  ;;  %v1478_v49 = vmul.f32 %v11875_v60, %v1326_v47  ;;  %v9769_v50 = vpop.f32.mrb[69].mxu0 }
 0x183   : > { %v1961_v51 = vmax.f32 %v1959_v37, %v1960_v42  ;;  %v1969_v52 = vrot.slane %v1968_v44, 1  ;;  %v1975_v53 = vmax.f32 %v1973_v40, %v1974_v45  ;;  %v1983_v54 = vrot.slane %v1982_v48, 4  ;;  %v1329_v55 = vpop.f32.mrb[70].mxu0 }
 0x184   : > { %v1547_v56 = vadd.f32 %v11882_v3, %v1478_v49  ;;  %v1479_v25 = vmul.f32 %v11875_v60, %v1329_v55  ;;  %v9770_v58 = vpop.f32.mrb[71].mxu0 }
 0x185   : > { %1962 = vst.msk [vmem:[#allocation3 + $0x1c] sm:$0x1] %vm1709_vm4, %v1961_v51  ;;  %v1970_v59 = vmax.f32 %v1968_v44, %v1969_v52  ;;  %v1976_v61 = vrot.slane %v1975_v53, 2  ;;  %v1984_v62 = vmax.f32 %v1982_v48, %v1983_v54 }
 0x186   : > { %v1609_v63 = vmax.f32 %v1547_v56, 0.0  ;;  %v1548_v34 = vadd.f32 %v11882_v3, %v1479_v25 }
 0x187   : > { %1971 = vst.msk [vmem:[#allocation3 + $0x1d] sm:$0x1] %vm1709_vm4, %v1970_v59  ;;  %v1977_v0 = vmax.f32 %v1975_v53, %v1976_v61  ;;  %v1985_v1 = vrot.slane %v1984_v62, 2  ;;  %v1990_v35 = vld [vmem:[#allocation2 + $0x100] sm:$0xff] }
 0x188   : > { %v1991_v5 = vsel %vm1637_vm3, %v1990_v35, -inf  ;;  %1672 = vst.msk [vmem:[#allocation2 + $0x110] sm:$0xff] %vm1637_vm3, %v1609_v63  ;;  %v1610_v6 = vmax.f32 %v1548_v34, 0.0 }
 0x189   : > { %v1978_v7 = vrot.slane %v1977_v0, 1  ;;  %v1986_v9 = vmax.f32 %v1984_v62, %v1985_v1  ;;  %v1992_v10 = vrot.slane %v1991_v5, 4  ;;  %v1999_v11 = vld [vmem:[#allocation2 + $0x108] sm:$0xff]  ;;  %v1334_v12 = vpop.f32.mrb[72].mxu0  ;;  %v2253_v62 = vld [vmem:[#allocation3 + $0x10] sm:$0xff] }
 0x18a   : > { %v2000_v13 = vsel %vm1637_vm3, %v1999_v11, -inf  ;;  %1673 = vst.msk [vmem:[#allocation2 + $0x118] sm:$0xff] %vm1637_vm3, %v1610_v6  ;;  %v1480_v14 = vmul.f32 %v11875_v60, %v1334_v12  ;;  %v9773_v15 = vpop.f32.mrb[73].mxu0 }
 0x18b   : > { %v1979_v17 = vmax.f32 %v1977_v0, %v1978_v7  ;;  %v1987_v18 = vrot.slane %v1986_v9, 1  ;;  %v1993_v19 = vmax.f32 %v1991_v5, %v1992_v10  ;;  %v2001_v20 = vrot.slane %v2000_v13, 4  ;;  %v1337_v22 = vpop.f32.mrb[74].mxu0 }
 0x18c   : > { %v1549_v23 = vadd.f32 %v11882_v3, %v1480_v14  ;;  %v1481_v24 = vmul.f32 %v11875_v60, %v1337_v22  ;;  %v9774_v26 = vpop.f32.mrb[75].mxu0  ;;  %v2286_v7 = vrot.slane %v11827_v21, 1 }
 0x18d   : > { %1980 = vst.msk [vmem:[#allocation3 + $0x1e] sm:$0x1] %vm1709_vm4, %v1979_v17  ;;  %v1988_v27 = vmax.f32 %v1986_v9, %v1987_v18  ;;  %v1994_v28 = vrot.slane %v1993_v19, 2  ;;  %v2002_v29 = vmax.f32 %v2000_v13, %v2001_v20 }
 0x18e   : > { %v1611_v30 = vmax.f32 %v1549_v23, 0.0  ;;  %v1550_v31 = vadd.f32 %v11882_v3, %v1481_v24 }
 0x18f   : > { %1989 = vst.msk [vmem:[#allocation3 + $0x1f] sm:$0x1] %vm1709_vm4, %v1988_v27  ;;  %v1995_v32 = vmax.f32 %v1993_v19, %v1994_v28  ;;  %v2003_v33 = vrot.slane %v2002_v29, 2  ;;  %v2008_v36 = vld [vmem:[#allocation2 + $0x110] sm:$0xff] }
 0x190   : > { %v2009_v37 = vsel %vm1637_vm3, %v2008_v36, -inf  ;;  %1674 = vst.msk [vmem:[#allocation2 + $0x120] sm:$0xff] %vm1637_vm3, %v1611_v30  ;;  %v1612_v38 = vmax.f32 %v1550_v31, 0.0 }
 0x191   : > { %v1996_v39 = vrot.slane %v1995_v32, 1  ;;  %v2004_v40 = vmax.f32 %v2002_v29, %v2003_v33  ;;  %v2010_v41 = vrot.slane %v2009_v37, 4  ;;  %v2017_v42 = vld [vmem:[#allocation2 + $0x118] sm:$0xff]  ;;  %v1342_v44 = vpop.f32.mrb[76].mxu0  ;;  %v2287_v29 = vor.u32 %v2286_v7, %v11818_v16 }
 0x192   : > { %v2018_v45 = vsel %vm1637_vm3, %v2017_v42, -inf  ;;  %1675 = vst.msk [vmem:[#allocation2 + $0x128] sm:$0xff] %vm1637_vm3, %v1612_v38  ;;  %v1482_v46 = vmul.f32 %v11875_v60, %v1342_v44  ;;  %v9777_v47 = vpop.f32.mrb[77].mxu0 }
 0x193   : > { %v1997_v48 = vmax.f32 %v1995_v32, %v1996_v39  ;;  %v2005_v49 = vrot.slane %v2004_v40, 1  ;;  %v2011_v50 = vmax.f32 %v2009_v37, %v2010_v41  ;;  %v2019_v51 = vrot.slane %v2018_v45, 4  ;;  %v1345_v52 = vpop.f32.mrb[78].mxu0 }
 0x194   : > { %v1551_v53 = vadd.f32 %v11882_v3, %v1482_v46  ;;  %v1483_v54 = vmul.f32 %v11875_v60, %v1345_v52  ;;  %v9778_v55 = vpop.f32.mrb[79].mxu0 }
 0x195   : > { %1998 = vst.msk [vmem:[#allocation3 + $0x20] sm:$0x1] %vm1709_vm4, %v1997_v48  ;;  %v2006_v56 = vmax.f32 %v2004_v40, %v2005_v49  ;;  %v2012_v25 = vrot.slane %v2011_v50, 2  ;;  %v2020_v58 = vmax.f32 %v2018_v45, %v2019_v51 }
 0x196   : > { %v1613_v59 = vmax.f32 %v1551_v53, 0.0  ;;  %v1552_v61 = vadd.f32 %v11882_v3, %v1483_v54  ;;  %v2254_v63 = vld [vmem:[#allocation3 + $0x18] sm:$0xff] }
 0x197   : > { %2007 = vst.msk [vmem:[#allocation3 + $0x21] sm:$0x1] %vm1709_vm4, %v2006_v56  ;;  %v2013_v34 = vmax.f32 %v2011_v50, %v2012_v25  ;;  %v2021_v0 = vrot.slane %v2020_v58, 2  ;;  %v2026_v1 = vld [vmem:[#allocation2 + $0x120] sm:$0xff]  ;;  %v11932_v35 = vpack.c.bf16 %v2254_v63, %v2253_v62 }
 0x198   : > { %v2027_v5 = vsel %vm1637_vm3, %v2026_v1, -inf  ;;  %1676 = vst.msk [vmem:[#allocation2 + $0x130] sm:$0xff] %vm1637_vm3, %v1613_v59  ;;  %v1614_v6 = vmax.f32 %v1552_v61, 0.0 }
 0x199   : > { %v2014_v9 = vrot.slane %v2013_v34, 1  ;;  %v2022_v10 = vmax.f32 %v2020_v58, %v2021_v0  ;;  %v2028_v11 = vrot.slane %v2027_v5, 4  ;;  %v2035_v12 = vld [vmem:[#allocation2 + $0x128] sm:$0xff]  ;;  %v1350_v13 = vpop.f32.mrb[80].mxu0  ;;  %v11938_v14 = vshll.u32 %v11932_v35, 16 }
 0x19a   : > { %v2036_v15 = vsel %vm1637_vm3, %v2035_v12, -inf  ;;  %1677 = vst.msk [vmem:[#allocation2 + $0x138] sm:$0xff] %vm1637_vm3, %v1614_v6  ;;  %v1484_v17 = vmul.f32 %v11875_v60, %v1350_v13  ;;  %v9781_v18 = vpop.f32.mrb[81].mxu0  ;;  %v11944_v19 = vshrl.u32 %v11932_v35, 16 }
 0x19b   : > { %v2015_v21 = vmax.f32 %v2013_v34, %v2014_v9  ;;  %v2023_v20 = vrot.slane %v2022_v10, 1  ;;  %v2029_v22 = vmax.f32 %v2027_v5, %v2028_v11  ;;  %v2037_v23 = vrot.slane %v2036_v15, 4  ;;  %v1353_v24 = vpop.f32.mrb[82].mxu0 }
 0x19c   : > { %v1553_v26 = vadd.f32 %v11882_v3, %v1484_v17  ;;  %v1485_v27 = vmul.f32 %v11875_v60, %v1353_v24  ;;  %v9782_v28 = vpop.f32.mrb[83].mxu0  ;;  %v2291_v30 = vrot.slane %v11938_v14, 1  ;;  %v2650_v36 = vrot.slane %v11944_v19, 1 }
 0x19d   : > { %2016 = vst.msk [vmem:[#allocation3 + $0x22] sm:$0x1] %vm1709_vm4, %v2015_v21  ;;  %v2024_v31 = vmax.f32 %v2022_v10, %v2023_v20  ;;  %v2030_v32 = vrot.slane %v2029_v22, 2  ;;  %v2038_v33 = vmax.f32 %v2036_v15, %v2037_v23  ;;  %v2651_v42 = vrot.slane %v11938_v14, 2 }
 0x19e   : > { %v1615_v37 = vmax.f32 %v1553_v26, 0.0  ;;  %v1554_v38 = vadd.f32 %v11882_v3, %v1485_v27  ;;  %v2292_v39 = vsel %vm2280_vm5, %v2287_v29, %v2291_v30  ;;  %v2912_v46 = vrot.slane %v11944_v19, 2 }
 0x19f   : > { %2025 = vst.msk [vmem:[#allocation3 + $0x23] sm:$0x1] %vm1709_vm4, %v2024_v31  ;;  %v2031_v16 = vmax.f32 %v2029_v22, %v2030_v32  ;;  %v2039_v40 = vrot.slane %v2038_v33, 2  ;;  %v2044_v41 = vld [vmem:[#allocation2 + $0x130] sm:$0xff]  ;;  %9831 = vmatprep.mubr.msk.bf16.mxu1 %vm1637_vm3, %v2292_v39  ;;  %v2913_v47 = vrot.slane %v11938_v14, 3  ;;  %v11963_v53 = vor.u32 %v2651_v42, %v2650_v36 }
 0x1a0   : > { %v2045_v44 = vsel %vm1637_vm3, %v2044_v41, -inf  ;;  %1678 = vst.msk [vmem:[#allocation2 + $0x140] sm:$0xff] %vm1637_vm3, %v1615_v37  ;;  %v1616_v45 = vmax.f32 %v1554_v38, 0.0  ;;  %v3168_v13 = vrot.slane %v11944_v19, 3  ;;  %v3169_v15 = vrot.slane %v11938_v14, 4 }
 0x1a1   : > { %v2032_v48 = vrot.slane %v2031_v16, 1  ;;  %v2040_v49 = vmax.f32 %v2038_v33, %v2039_v40  ;;  %v2046_v50 = vrot.slane %v2045_v44, 4  ;;  %v2053_v51 = vld [vmem:[#allocation2 + $0x138] sm:$0xff]  ;;  %v1358_v52 = vpop.f32.mrb[84].mxu0  ;;  %v11968_v25 = vor.u32 %v2913_v47, %v2912_v46 }
 0x1a2   : > { %v2054_v54 = vsel %vm1637_vm3, %v2053_v51, -inf  ;;  %1679 = vst.msk [vmem:[#allocation2 + $0x148] sm:$0xff] %vm1637_vm3, %v1616_v45  ;;  %v1486_v55 = vmul.f32 %v11875_v60, %v1358_v52  ;;  %v9785_v56 = vpop.f32.mrb[85].mxu0  ;;  %v11975_v5 = vsel %vm2646_vm6, %v11836_v43, %v11963_v53  ;;  %v11989_v20 = vor.u32 %v3169_v15, %v3168_v13 }
 0x1a3   : > { %v2033_v58 = vmax.f32 %v2031_v16, %v2032_v48  ;;  %v2041_v59 = vrot.slane %v2040_v49, 1  ;;  %v2047_v61 = vmax.f32 %v2045_v44, %v2046_v50  ;;  %v2055_v62 = vrot.slane %v2054_v54, 4  ;;  %v1361_v63 = vpop.f32.mrb[86].mxu0 }
 0x1a4   : > { %v1555_v34 = vadd.f32 %v11882_v3, %v1486_v55  ;;  %v1487_v0 = vmul.f32 %v11875_v60, %v1361_v63  ;;  %v9786_v1 = vpop.f32.mrb[87].mxu0  ;;  %v11980_v6 = vsel %vm2908_vm7, %v11846_v57, %v11968_v25  ;;  %v11997_v32 = vsel %vm3164_vm8, %v11851_v2, %v11989_v20 }
 0x1a5   : > { %2034 = vst.msk [vmem:[#allocation3 + $0x24] sm:$0x1] %vm1709_vm4, %v2033_v58  ;;  %v2042_v7 = vmax.f32 %v2040_v49, %v2041_v59  ;;  %v2048_v9 = vrot.slane %v2047_v61, 2  ;;  %v2056_v10 = vmax.f32 %v2054_v54, %v2055_v62 }
 0x1a6   : > { %v1617_v11 = vmax.f32 %v1555_v34, 0.0  ;;  %v1556_v12 = vadd.f32 %v11882_v3, %v1487_v0 }
 0x1a7   : > { %2043 = vst.msk [vmem:[#allocation3 + $0x25] sm:$0x1] %vm1709_vm4, %v2042_v7  ;;  %v2049_v43 = vmax.f32 %v2047_v61, %v2048_v9  ;;  %v2057_v17 = vrot.slane %v2056_v10, 2  ;;  %v2062_v18 = vld [vmem:[#allocation2 + $0x140] sm:$0xff] }
 0x1a8   : > { %v2063_v57 = vsel %vm1637_vm3, %v2062_v18, -inf  ;;  %1680 = vst.msk [vmem:[#allocation2 + $0x150] sm:$0xff] %vm1637_vm3, %v1617_v11  ;;  %v1618_v21 = vmax.f32 %v1556_v12, 0.0 }
 0x1a9   : > { %v2050_v22 = vrot.slane %v2049_v43, 1  ;;  %v2058_v23 = vmax.f32 %v2056_v10, %v2057_v17  ;;  %v2064_v24 = vrot.slane %v2063_v57, 4  ;;  %v2071_v26 = vld [vmem:[#allocation2 + $0x148] sm:$0xff]  ;;  %v1366_v27 = vpop.f32.mrb[88].mxu0 }
 0x1aa   : > { %v2072_v28 = vsel %vm1637_vm3, %v2071_v26, -inf  ;;  %1681 = vst.msk [vmem:[#allocation2 + $0x158] sm:$0xff] %vm1637_vm3, %v1618_v21  ;;  %v1488_v29 = vmul.f32 %v11875_v60, %v1366_v27  ;;  %v9789_v31 = vpop.f32.mrb[89].mxu0 }
 0x1ab   : > { %v2051_v33 = vmax.f32 %v2049_v43, %v2050_v22  ;;  %v2059_v36 = vrot.slane %v2058_v23, 1  ;;  %v2065_v37 = vmax.f32 %v2063_v57, %v2064_v24  ;;  %v2073_v38 = vrot.slane %v2072_v28, 4  ;;  %v1369_v39 = vpop.f32.mrb[90].mxu0 }
 0x1ac   : > { %v1557_v16 = vadd.f32 %v11882_v3, %v1488_v29  ;;  %v1489_v40 = vmul.f32 %v11875_v60, %v1369_v39  ;;  %v9790_v41 = vpop.f32.mrb[91].mxu0 }
 0x1ad   : > { %2052 = vst.msk [vmem:[#allocation3 + $0x26] sm:$0x1] %vm1709_vm4, %v2051_v33  ;;  %v2060_v42 = vmax.f32 %v2058_v23, %v2059_v36  ;;  %v2066_v44 = vrot.slane %v2065_v37, 2  ;;  %v2074_v45 = vmax.f32 %v2072_v28, %v2073_v38 }
 0x1ae   : > { %v1619_v46 = vmax.f32 %v1557_v16, 0.0  ;;  %v1558_v47 = vadd.f32 %v11882_v3, %v1489_v40 }
 0x1af   : > { %2061 = vst.msk [vmem:[#allocation3 + $0x27] sm:$0x1] %vm1709_vm4, %v2060_v42  ;;  %v2067_v2 = vmax.f32 %v2065_v37, %v2066_v44  ;;  %v2075_v48 = vrot.slane %v2074_v45, 2  ;;  %v2080_v49 = vld [vmem:[#allocation2 + $0x150] sm:$0xff] }
 0x1b0   : > { %v2081_v50 = vsel %vm1637_vm3, %v2080_v49, -inf  ;;  %1682 = vst.msk [vmem:[#allocation2 + $0x160] sm:$0xff] %vm1637_vm3, %v1619_v46  ;;  %v1620_v51 = vmax.f32 %v1558_v47, 0.0 }
 0x1b1   : > { %v2068_v52 = vrot.slane %v2067_v2, 1  ;;  %v2076_v54 = vmax.f32 %v2074_v45, %v2075_v48  ;;  %v2082_v55 = vrot.slane %v2081_v50, 4  ;;  %v2089_v56 = vld [vmem:[#allocation2 + $0x158] sm:$0xff]  ;;  %v1374_v58 = vpop.f32.mrb[92].mxu0 }
 0x1b2   : > { %v2090_v59 = vsel %vm1637_vm3, %v2089_v56, -inf  ;;  %1683 = vst.msk [vmem:[#allocation2 + $0x168] sm:$0xff] %vm1637_vm3, %v1620_v51  ;;  %v1490_v61 = vmul.f32 %v11875_v60, %v1374_v58  ;;  %v9793_v62 = vpop.f32.mrb[93].mxu0 }
 0x1b3   : > { %v2069_v63 = vmax.f32 %v2067_v2, %v2068_v52  ;;  %v2077_v34 = vrot.slane %v2076_v54, 1  ;;  %v2083_v0 = vmax.f32 %v2081_v50, %v2082_v55  ;;  %v2091_v1 = vrot.slane %v2090_v59, 4  ;;  %v1377_v7 = vpop.f32.mrb[94].mxu0 }
 0x1b4   : > { %v1559_v9 = vadd.f32 %v11882_v3, %v1490_v61  ;;  %v1491_v10 = vmul.f32 %v11875_v60, %v1377_v7  ;;  %v9794_v11 = vpop.f32.mrb[95].mxu0 }
 0x1b5   : > { %2070 = vst.msk [vmem:[#allocation3 + $0x28] sm:$0x1] %vm1709_vm4, %v2069_v63  ;;  %v2078_v12 = vmax.f32 %v2076_v54, %v2077_v34  ;;  %v2084_v13 = vrot.slane %v2083_v0, 2  ;;  %v2092_v15 = vmax.f32 %v2090_v59, %v2091_v1 }
 0x1b6   : > { %v1621_v43 = vmax.f32 %v1559_v9, 0.0  ;;  %v1560_v17 = vadd.f32 %v11882_v3, %v1491_v10 }
 0x1b7   : > { %2079 = vst.msk [vmem:[#allocation3 + $0x29] sm:$0x1] %vm1709_vm4, %v2078_v12  ;;  %v2085_v18 = vmax.f32 %v2083_v0, %v2084_v13  ;;  %v2093_v57 = vrot.slane %v2092_v15, 2  ;;  %v2098_v21 = vld [vmem:[#allocation2 + $0x160] sm:$0xff] }
 0x1b8   : > { %v2099_v22 = vsel %vm1637_vm3, %v2098_v21, -inf  ;;  %1684 = vst.msk [vmem:[#allocation2 + $0x170] sm:$0xff] %vm1637_vm3, %v1621_v43  ;;  %v1622_v23 = vmax.f32 %v1560_v17, 0.0 }
 0x1b9   : > { %v2086_v24 = vrot.slane %v2085_v18, 1  ;;  %v2094_v26 = vmax.f32 %v2092_v15, %v2093_v57  ;;  %v2100_v27 = vrot.slane %v2099_v22, 4  ;;  %v2107_v28 = vld [vmem:[#allocation2 + $0x168] sm:$0xff]  ;;  %v1382_v29 = vpop.f32.mrb[96].mxu0 }
 0x1ba   : > { %v2108_v31 = vsel %vm1637_vm3, %v2107_v28, -inf  ;;  %1685 = vst.msk [vmem:[#allocation2 + $0x178] sm:$0xff] %vm1637_vm3, %v1622_v23  ;;  %v1492_v33 = vmul.f32 %v11875_v60, %v1382_v29  ;;  %v9797_v36 = vpop.f32.mrb[97].mxu0 }
 0x1bb   : > { %v2087_v37 = vmax.f32 %v2085_v18, %v2086_v24  ;;  %v2095_v38 = vrot.slane %v2094_v26, 1  ;;  %v2101_v39 = vmax.f32 %v2099_v22, %v2100_v27  ;;  %v2109_v16 = vrot.slane %v2108_v31, 4  ;;  %v1385_v40 = vpop.f32.mrb[98].mxu0 }
 0x1bc   : > { %v1561_v41 = vadd.f32 %v11882_v3, %v1492_v33  ;;  %v1493_v42 = vmul.f32 %v11875_v60, %v1385_v40  ;;  %v9798_v44 = vpop.f32.mrb[99].mxu0 }
 0x1bd   : > { %2088 = vst.msk [vmem:[#allocation3 + $0x2a] sm:$0x1] %vm1709_vm4, %v2087_v37  ;;  %v2096_v45 = vmax.f32 %v2094_v26, %v2095_v38  ;;  %v2102_v46 = vrot.slane %v2101_v39, 2  ;;  %v2110_v47 = vmax.f32 %v2108_v31, %v2109_v16 }
 0x1be   : > { %v1623_v2 = vmax.f32 %v1561_v41, 0.0  ;;  %v1562_v48 = vadd.f32 %v11882_v3, %v1493_v42 }
 0x1bf   : > { %2097 = vst.msk [vmem:[#allocation3 + $0x2b] sm:$0x1] %vm1709_vm4, %v2096_v45  ;;  %v2103_v49 = vmax.f32 %v2101_v39, %v2102_v46  ;;  %v2111_v50 = vrot.slane %v2110_v47, 2  ;;  %v2116_v51 = vld [vmem:[#allocation2 + $0x170] sm:$0xff] }
 0x1c0   : > { %v2117_v52 = vsel %vm1637_vm3, %v2116_v51, -inf  ;;  %1686 = vst.msk [vmem:[#allocation2 + $0x180] sm:$0xff] %vm1637_vm3, %v1623_v2  ;;  %v1624_v54 = vmax.f32 %v1562_v48, 0.0 }
 0x1c1   : > { %v2104_v55 = vrot.slane %v2103_v49, 1  ;;  %v2112_v56 = vmax.f32 %v2110_v47, %v2111_v50  ;;  %v2118_v58 = vrot.slane %v2117_v52, 4  ;;  %v2125_v59 = vld [vmem:[#allocation2 + $0x178] sm:$0xff]  ;;  %v1390_v61 = vpop.f32.mrb[100].mxu0 }
 0x1c2   : > { %v2126_v62 = vsel %vm1637_vm3, %v2125_v59, -inf  ;;  %1687 = vst.msk [vmem:[#allocation2 + $0x188] sm:$0xff] %vm1637_vm3, %v1624_v54  ;;  %v1494_v63 = vmul.f32 %v11875_v60, %v1390_v61  ;;  %v9801_v34 = vpop.f32.mrb[101].mxu0 }
 0x1c3   : > { %v2105_v0 = vmax.f32 %v2103_v49, %v2104_v55  ;;  %v2113_v1 = vrot.slane %v2112_v56, 1  ;;  %v2119_v7 = vmax.f32 %v2117_v52, %v2118_v58  ;;  %v2127_v9 = vrot.slane %v2126_v62, 4  ;;  %v1393_v10 = vpop.f32.mrb[102].mxu0 }
 0x1c4   : > { %v1563_v11 = vadd.f32 %v11882_v3, %v1494_v63  ;;  %v1495_v12 = vmul.f32 %v11875_v60, %v1393_v10  ;;  %v9802_v13 = vpop.f32.mrb[103].mxu0 }
 0x1c5   : > { %2106 = vst.msk [vmem:[#allocation3 + $0x2c] sm:$0x1] %vm1709_vm4, %v2105_v0  ;;  %v2114_v15 = vmax.f32 %v2112_v56, %v2113_v1  ;;  %v2120_v43 = vrot.slane %v2119_v7, 2  ;;  %v2128_v17 = vmax.f32 %v2126_v62, %v2127_v9 }
 0x1c6   : > { %v1625_v18 = vmax.f32 %v1563_v11, 0.0  ;;  %v1564_v57 = vadd.f32 %v11882_v3, %v1495_v12 }
 0x1c7   : > { %2115 = vst.msk [vmem:[#allocation3 + $0x2d] sm:$0x1] %vm1709_vm4, %v2114_v15  ;;  %v2121_v21 = vmax.f32 %v2119_v7, %v2120_v43  ;;  %v2129_v22 = vrot.slane %v2128_v17, 2  ;;  %v2134_v23 = vld [vmem:[#allocation2 + $0x180] sm:$0xff] }
 0x1c8   : > { %v2135_v24 = vsel %vm1637_vm3, %v2134_v23, -inf  ;;  %1688 = vst.msk [vmem:[#allocation2 + $0x190] sm:$0xff] %vm1637_vm3, %v1625_v18  ;;  %v1626_v26 = vmax.f32 %v1564_v57, 0.0  ;;  %v2255_v23 = vld [vmem:[#allocation3 + $0x20] sm:$0xff] }
 0x1c9   : > { %v2122_v27 = vrot.slane %v2121_v21, 1  ;;  %v2130_v28 = vmax.f32 %v2128_v17, %v2129_v22  ;;  %v2136_v29 = vrot.slane %v2135_v24, 4  ;;  %v2143_v31 = vld [vmem:[#allocation2 + $0x188] sm:$0xff]  ;;  %v1398_v33 = vpop.f32.mrb[104].mxu0 }
 0x1ca   : > { %v2144_v36 = vsel %vm1637_vm3, %v2143_v31, -inf  ;;  %1689 = vst.msk [vmem:[#allocation2 + $0x198] sm:$0xff] %vm1637_vm3, %v1626_v26  ;;  %v1496_v37 = vmul.f32 %v11875_v60, %v1398_v33  ;;  %v9805_v38 = vpop.f32.mrb[105].mxu0 }
 0x1cb   : > { %v2123_v39 = vmax.f32 %v2121_v21, %v2122_v27  ;;  %v2131_v16 = vrot.slane %v2130_v28, 1  ;;  %v2137_v40 = vmax.f32 %v2135_v24, %v2136_v29  ;;  %v2145_v41 = vrot.slane %v2144_v36, 4  ;;  %v1401_v42 = vpop.f32.mrb[106].mxu0 }
 0x1cc   : > { %v1565_v44 = vadd.f32 %v11882_v3, %v1496_v37  ;;  %v1497_v45 = vmul.f32 %v11875_v60, %v1401_v42  ;;  %v9806_v46 = vpop.f32.mrb[107].mxu0 }
 0x1cd   : > { %2124 = vst.msk [vmem:[#allocation3 + $0x2e] sm:$0x1] %vm1709_vm4, %v2123_v39  ;;  %v2132_v47 = vmax.f32 %v2130_v28, %v2131_v16  ;;  %v2138_v2 = vrot.slane %v2137_v40, 2  ;;  %v2146_v48 = vmax.f32 %v2144_v36, %v2145_v41 }
 0x1ce   : > { %v1627_v49 = vmax.f32 %v1565_v44, 0.0  ;;  %v1566_v50 = vadd.f32 %v11882_v3, %v1497_v45 }
 0x1cf   : > { %2133 = vst.msk [vmem:[#allocation3 + $0x2f] sm:$0x1] %vm1709_vm4, %v2132_v47  ;;  %v2139_v51 = vmax.f32 %v2137_v40, %v2138_v2  ;;  %v2147_v52 = vrot.slane %v2146_v48, 2  ;;  %v2152_v54 = vld [vmem:[#allocation2 + $0x190] sm:$0xff] }
 0x1d0   : > { %v2153_v55 = vsel %vm1637_vm3, %v2152_v54, -inf  ;;  %1690 = vst.msk [vmem:[#allocation2 + $0x1a0] sm:$0xff] %vm1637_vm3, %v1627_v49  ;;  %v1628_v56 = vmax.f32 %v1566_v50, 0.0  ;;  %v2295_v50 = vor.u32 %v11944_v19, %v2291_v30 }
 0x1d1   : > { %v2140_v58 = vrot.slane %v2139_v51, 1  ;;  %v2148_v59 = vmax.f32 %v2146_v48, %v2147_v52  ;;  %v2154_v61 = vrot.slane %v2153_v55, 4  ;;  %v2161_v62 = vld [vmem:[#allocation2 + $0x198] sm:$0xff]  ;;  %v1406_v63 = vpop.f32.mrb[108].mxu0 }
 0x1d2   : > { %v2162_v34 = vsel %vm1637_vm3, %v2161_v62, -inf  ;;  %1691 = vst.msk [vmem:[#allocation2 + $0x1a8] sm:$0xff] %vm1637_vm3, %v1628_v56  ;;  %v1498_v0 = vmul.f32 %v11875_v60, %v1406_v63  ;;  %v9809_v1 = vpop.f32.mrb[109].mxu0 }
 0x1d3   : > { %v2141_v7 = vmax.f32 %v2139_v51, %v2140_v58  ;;  %v2149_v9 = vrot.slane %v2148_v59, 1  ;;  %v2155_v10 = vmax.f32 %v2153_v55, %v2154_v61  ;;  %v2163_v11 = vrot.slane %v2162_v34, 4  ;;  %v1409_v12 = vpop.f32.mrb[110].mxu0  ;;  %v11048_v61 = vld [vmem:[%s14041_s10 + $0x8] sm:$0xff]  }
 0x1d4   : > { %v1567_v13 = vadd.f32 %v11882_v3, %v1498_v0  ;;  %v1499_v15 = vmul.f32 %v11875_v60, %v1409_v12  ;;  %v9810_v43 = vpop.f32.mrb[111].mxu0 }
 0x1d5   : > { %2142 = vst.msk [vmem:[#allocation3 + $0x30] sm:$0x1] %vm1709_vm4, %v2141_v7  ;;  %v2150_v17 = vmax.f32 %v2148_v59, %v2149_v9  ;;  %v2156_v18 = vrot.slane %v2155_v10, 2  ;;  %v2164_v57 = vmax.f32 %v2162_v34, %v2163_v11 }
 0x1d6   : > { %v1629_v21 = vmax.f32 %v1567_v13, 0.0  ;;  %v1568_v22 = vadd.f32 %v11882_v3, %v1499_v15  ;;  %v2256_v24 = vld [vmem:[#allocation3 + $0x28] sm:$0xff] }
 0x1d7   : > { %2151 = vst.msk [vmem:[#allocation3 + $0x31] sm:$0x1] %vm1709_vm4, %v2150_v17  ;;  %v2157_v26 = vmax.f32 %v2155_v10, %v2156_v18  ;;  %v2165_v27 = vrot.slane %v2164_v57, 2  ;;  %v2170_v28 = vld [vmem:[#allocation2 + $0x1a0] sm:$0xff]  ;;  %v12054_v29 = vpack.c.bf16 %v2256_v24, %v2255_v23  ;;  %v11049_v18 = vld [vmem:[%s14041_s10 + $0x10] sm:$0xff]  }
 0x1d8   : > { %v2171_v31 = vsel %vm1637_vm3, %v2170_v28, -inf  ;;  %1692 = vst.msk [vmem:[#allocation2 + $0x1b0] sm:$0xff] %vm1637_vm3, %v1629_v21  ;;  %v1630_v33 = vmax.f32 %v1568_v22, 0.0 }
 0x1d9   : > { %v2158_v36 = vrot.slane %v2157_v26, 1  ;;  %v2166_v37 = vmax.f32 %v2164_v57, %v2165_v27  ;;  %v2172_v38 = vrot.slane %v2171_v31, 4  ;;  %v2179_v39 = vld [vmem:[#allocation2 + $0x1a8] sm:$0xff]  ;;  %v12059_v16 = vshll.u32 %v12054_v29, 16  ;;  %v1414_v40 = vpop.f32.mrb[112].mxu0 }
 0x1da   : > { %v2180_v41 = vsel %vm1637_vm3, %v2179_v39, -inf  ;;  %1693 = vst.msk [vmem:[#allocation2 + $0x1b8] sm:$0xff] %vm1637_vm3, %v1630_v33  ;;  %v1500_v42 = vmul.f32 %v11875_v60, %v1414_v40  ;;  %v9813_v44 = vpop.f32.mrb[113].mxu0  ;;  %v12065_v45 = vshrl.u32 %v12054_v29, 16 }
 0x1db   : > { %v2159_v46 = vmax.f32 %v2157_v26, %v2158_v36  ;;  %v2167_v47 = vrot.slane %v2166_v37, 1  ;;  %v2173_v2 = vmax.f32 %v2171_v31, %v2172_v38  ;;  %v2181_v48 = vrot.slane %v2180_v41, 4  ;;  %v1417_v49 = vpop.f32.mrb[114].mxu0  ;;  %v11050_v44 = vld [vmem:[%s14041_s10 + $0x18] sm:$0xff]  }
 0x1dc   : > { %v2299_v51 = vrot.slane %v12059_v16, 1  ;;  %v1569_v52 = vadd.f32 %v11882_v3, %v1500_v42  ;;  %v1501_v54 = vmul.f32 %v11875_v60, %v1417_v49  ;;  %v9814_v55 = vpop.f32.mrb[115].mxu0  ;;  %v2654_v14 = vrot.slane %v12065_v45, 1 }
 0x1dd   : > { %2160 = vst.msk [vmem:[#allocation3 + $0x32] sm:$0x1] %vm1709_vm4, %v2159_v46  ;;  %v2168_v56 = vmax.f32 %v2166_v37, %v2167_v47  ;;  %v2174_v58 = vrot.slane %v2173_v2, 2  ;;  %v2182_v59 = vmax.f32 %v2180_v41, %v2181_v48  ;;  %v2655_v1 = vrot.slane %v12059_v16, 2 }
 0x1de   : > { %v2300_v19 = vsel %vm2280_vm5, %v2295_v50, %v2299_v51  ;;  %v1631_v30 = vmax.f32 %v1569_v52, 0.0  ;;  %v1570_v62 = vadd.f32 %v11882_v3, %v1501_v54  ;;  %v2916_v10 = vrot.slane %v12065_v45, 2 }
 0x1df   : > { %2169 = vst.msk [vmem:[#allocation3 + $0x33] sm:$0x1] %vm1709_vm4, %v2168_v56  ;;  %v2175_v63 = vmax.f32 %v2173_v2, %v2174_v58  ;;  %v2183_v34 = vrot.slane %v2182_v59, 2  ;;  %v2188_v0 = vld [vmem:[#allocation2 + $0x1b0] sm:$0xff]  ;;  %9832 = vmatmul.mubr.msk.bf16.vlgmr.msra.gmra.mrb[0].mxu1 %vm1637_vm3, %v2300_v19  ;;  %v2917_v11 = vrot.slane %v12059_v16, 3  ;;  %v12093_v57 = vor.u32 %v2655_v1, %v2654_v14  ;;  %v12127_v14 = vld [vmem:[%s14041_s10 + $0x40] sm:$0xff]  }
 0x1e0   : > { %v2189_v7 = vsel %vm1637_vm3, %v2188_v0, -inf  ;;  %1694 = vst.msk [vmem:[#allocation2 + $0x1c0] sm:$0xff] %vm1637_vm3, %v1631_v30  ;;  %v1632_v9 = vmax.f32 %v1570_v62, 0.0  ;;  %9840 = vmatpush3.bf16.msra.mxu1 %v11888_v4  ;;  %v3173_v2 = vrot.slane %v12059_v16, 4 }
 0x1e1   : > { %v2176_v12 = vrot.slane %v2175_v63, 1  ;;  %v2184_v13 = vmax.f32 %v2182_v59, %v2183_v34  ;;  %v2190_v15 = vrot.slane %v2189_v7, 4  ;;  %v2197_v43 = vld [vmem:[#allocation2 + $0x1b8] sm:$0xff]  ;;  %v1422_v17 = vpop.f32.mrb[116].mxu0  ;;  %9841 = vmatprep.subr.bf16.mxu1 %v11048_v61  ;;  %v12098_v23 = vor.u32 %v2917_v11, %v2916_v10 }
 0x1e2   : > { %v2198_v21 = vsel %vm1637_vm3, %v2197_v43, -inf  ;;  %1695 = vst.msk [vmem:[#allocation2 + $0x1c8] sm:$0xff] %vm1637_vm3, %v1632_v9  ;;  %v1502_v4 = vmul.f32 %v11875_v60, %v1422_v17  ;;  %v9817_v22 = vpop.f32.mrb[117].mxu0  ;;  %v12105_v38 = vsel %vm2646_vm6, %v11963_v53, %v12093_v57  ;;  %v3172_v53 = vrot.slane %v12065_v45, 3 }
 0x1e3   : > { %v2177_v24 = vmax.f32 %v2175_v63, %v2176_v12  ;;  %v2185_v26 = vrot.slane %v2184_v13, 1  ;;  %v2191_v27 = vmax.f32 %v2189_v7, %v2190_v15  ;;  %v2199_v28 = vrot.slane %v2198_v21, 4  ;;  %v1425_v31 = vpop.f32.mrb[118].mxu0 }
 0x1e4   : > { %v1571_v33 = vadd.f32 %v11882_v3, %v1502_v4  ;;  %v1503_v36 = vmul.f32 %v11875_v60, %v1425_v31  ;;  %v9818_v37 = vpop.f32.mrb[119].mxu0  ;;  %9842 = vmatpush3.bf16.msra.mxu1 %v11048_v61  ;;  %v12110_v39 = vsel %vm2908_vm7, %v11968_v25, %v12098_v23  ;;  %v12122_v54 = vor.u32 %v3173_v2, %v3172_v53 }
 0x1e5   : > { %2178 = vst.msk [vmem:[#allocation3 + $0x34] sm:$0x1] %vm1709_vm4, %v2177_v24  ;;  %v2186_v40 = vmax.f32 %v2184_v13, %v2185_v26  ;;  %v2192_v41 = vrot.slane %v2191_v27, 2  ;;  %v2200_v42 = vmax.f32 %v2198_v21, %v2199_v28  ;;  %9843 = vmatprep.subr.bf16.mxu1 %v11049_v18 }
 0x1e6   : > { %v1633_v46 = vmax.f32 %v1571_v33, 0.0  ;;  %v1572_v47 = vadd.f32 %v11882_v3, %v1503_v36  ;;  %v12135_v63 = vsel %vm3164_vm8, %v11989_v20, %v12122_v54 }
 0x1e7   : > { %2187 = vst.msk [vmem:[#allocation3 + $0x35] sm:$0x1] %vm1709_vm4, %v2186_v40  ;;  %v2193_v25 = vmax.f32 %v2191_v27, %v2192_v41  ;;  %v2201_v48 = vrot.slane %v2200_v42, 2  ;;  %v2206_v49 = vld [vmem:[#allocation2 + $0x1c0] sm:$0xff] }
 0x1e8   : > { %v2207_v50 = vsel %vm1637_vm3, %v2206_v49, -inf  ;;  %1696 = vst.msk [vmem:[#allocation2 + $0x1d0] sm:$0xff] %vm1637_vm3, %v1633_v46  ;;  %v1634_v52 = vmax.f32 %v1572_v47, 0.0  ;;  %9844 = vmatpush3.bf16.msra.mxu1 %v11049_v18  ;;  %v2303_v49 = vor.u32 %v12065_v45, %v2299_v51 }
 0x1e9   : > { %v2194_v55 = vrot.slane %v2193_v25, 1  ;;  %v2202_v56 = vmax.f32 %v2200_v42, %v2201_v48  ;;  %v2208_v58 = vrot.slane %v2207_v50, 4  ;;  %v2215_v59 = vld [vmem:[#allocation2 + $0x1c8] sm:$0xff]  ;;  %v1430_v61 = vpop.f32.mrb[120].mxu0  ;;  %9845 = vmatprep.subr.bf16.mxu1 %v11050_v44 }
 0x1ea   : > { %v2216_v19 = vsel %vm1637_vm3, %v2215_v59, -inf  ;;  %1697 = vst.msk [vmem:[#allocation2 + $0x1d8] sm:$0xff] %vm1637_vm3, %v1634_v52  ;;  %v1504_v30 = vmul.f32 %v11875_v60, %v1430_v61  ;;  %v9821_v62 = vpop.f32.mrb[121].mxu0 }
 0x1eb   : > { %v2195_v34 = vmax.f32 %v2193_v25, %v2194_v55  ;;  %v2203_v0 = vrot.slane %v2202_v56, 1  ;;  %v2209_v1 = vmax.f32 %v2207_v50, %v2208_v58  ;;  %v2217_v7 = vrot.slane %v2216_v19, 4  ;;  %v1433_v9 = vpop.f32.mrb[122].mxu0  ;;  %v11052_v62 = vld [vmem:[%s14041_s10 + $0x48] sm:$0xff]  }
 0x1ec   : > { %v1573_v10 = vadd.f32 %v11882_v3, %v1504_v30  ;;  %v9822_v11 = vpop.f32.mrb[123].mxu0  ;;  %9846 = vmatpush3.bf16.msra.mxu1 %v11050_v44  ;;  %v2522_v9 = vrot.slane %v11813_v8, 1 }
 0x1ed   : > { %2196 = vst.msk [vmem:[#allocation3 + $0x36] sm:$0x1] %vm1709_vm4, %v2195_v34  ;;  %v2204_v12 = vmax.f32 %v2202_v56, %v2203_v0  ;;  %v2210_v13 = vrot.slane %v2209_v1, 2  ;;  %v2218_v60 = vmax.f32 %v2216_v19, %v2217_v7  ;;  %9855 = vmatprep.subr.bf16.mxu1 %v12127_v14  ;;  %v11053_v34 = vld [vmem:[%s14041_s10 + $0x50] sm:$0xff]   ;;  %v2523_v0 = vrot.slane %v11932_v35, 1 }
 0x1ee   : > { %v1635_v15 = vmax.f32 %v1573_v10, 0.0 }
 0x1ef   : > { %2205 = vst.msk [vmem:[#allocation3 + $0x37] sm:$0x1] %vm1709_vm4, %v2204_v12  ;;  %v2211_v20 = vmax.f32 %v2209_v1, %v2210_v13  ;;  %v2219_v43 = vrot.slane %v2218_v60, 2  ;;  %v2224_v17 = vld [vmem:[#allocation2 + $0x1d0] sm:$0xff]  ;;  %v2524_v10 = vsel %vm2521_vm10, %v2522_v9, %v2523_v0  ;;  %v11055_v13 = vld [vmem:[%s14041_s10 + $0x60] sm:$0xff]  }
 0x1f0   : > { %v2225_v18 = vsel %vm1637_vm3, %v2224_v17, -inf  ;;  %1698 = vst.msk [vmem:[#allocation2 + $0x1e0] sm:$0xff] %vm1637_vm3, %v1635_v15  ;;  %v8498_v9 = vld [vmem:[%s14043_s9] ss:$0 sm:$0xff] }
 0x1f1   : > { %v2212_v3 = vrot.slane %v2211_v20, 1  ;;  %v2220_v21 = vmax.f32 %v2218_v60, %v2219_v43  ;;  %v2226_v4 = vrot.slane %v2225_v18, 4  ;;  %v2233_v22 = vld [vmem:[#allocation2 + $0x1d8] sm:$0xff]  ;;  %v2525_v60 = vrot.slane %v12054_v29, 1 }
 0x1f2   : > { %v2234_v24 = vsel %vm1637_vm3, %v2233_v22, -inf  ;;  %v11057_v22 = vld [vmem:[%s14041_s10 + $0x70] sm:$0xff]  }
 0x1f3   : > { %v2213_v26 = vmax.f32 %v2211_v20, %v2212_v3  ;;  %v2221_v27 = vrot.slane %v2220_v21, 1  ;;  %v2227_v28 = vmax.f32 %v2225_v18, %v2226_v4  ;;  %v2235_v31 = vrot.slane %v2234_v24, 4  ;;  %v11056_v18 = vld [vmem:[%s14041_s10 + $0x68] sm:$0xff]  }
 0x1f4   : > { %v2526_v3 = vsel %vm2521_vm10, %v2523_v0, %v2525_v60  ;;  %v11080_v0 = vld [vmem:[%s14042_s0 + $0x68] sm:$0xff]  }
 0x1f5   : > { %2214 = vst.msk [vmem:[#allocation3 + $0x38] sm:$0x1] %vm1709_vm4, %v2213_v26  ;;  %v2222_v33 = vmax.f32 %v2220_v21, %v2221_v27  ;;  %v2228_v36 = vrot.slane %v2227_v28, 2  ;;  %v2236_v37 = vmax.f32 %v2234_v24, %v2235_v31  ;;  %v11058_v24 = vld [vmem:[%s14041_s10 + $0x78] sm:$0xff]   ;;  %v11059_v27 = vld [vmem:[%s14041_s10 + $0x80] sm:$0xff]   ;;  %v11060_v31 = vld [vmem:[%s14041_s10 + $0x88] sm:$0xff]  }
 0x1f6   : > { %v2257_v40 = vld [vmem:[#allocation3 + $0x30] sm:$0xff] }
 0x1f7   : > { %2223 = vst.msk [vmem:[#allocation3 + $0x39] sm:$0x1] %vm1709_vm4, %v2222_v33  ;;  %v2229_v41 = vmax.f32 %v2227_v28, %v2228_v36  ;;  %v2237_v42 = vrot.slane %v2236_v37, 2  ;;  %v2242_v44 = vld [vmem:[#allocation2 + $0x1e0] sm:$0xff]  ;;  %v12146_v46 = vpack.c.bf16 %v2257_v40, %v2257_v40  ;;  %v2786_v36 = vrot.slane %v11932_v35, 2 }
 0x1f8   : > { %v2243_v47 = vsel %vm1637_vm3, %v2242_v44, -inf  ;;  %v11064_v44 = vld [vmem:[%s14041_s10 + $0xa8] sm:$0xff]  }
 0x1f9   : > { %v2230_v53 = vrot.slane %v2229_v41, 1  ;;  %v2238_v2 = vmax.f32 %v2236_v37, %v2237_v42  ;;  %v2244_v25 = vrot.slane %v2243_v47, 4  ;;  %v2305_v48 = vshll.u32 %v12146_v46, 16 }
 0x1fa   : > { %v2309_v50 = vshrl.u32 %v12146_v46, 16  ;;  %v2527_v43 = vrot.slane %v12146_v46, 1  ;;  %v2785_v37 = vrot.slane %v11813_v8, 2 }
 0x1fb   : > { %v2231_v52 = vmax.f32 %v2229_v41, %v2230_v53  ;;  %v2239_v55 = vrot.slane %v2238_v2, 1  ;;  %v2245_v56 = vmax.f32 %v2243_v47, %v2244_v25  ;;  %v2307_v58 = vrot.slane %v2305_v48, 1  ;;  %v11065_v53 = vld [vmem:[%s14041_s10 + $0xb0] sm:$0xff]  }
 0x1fc   : > { %v2528_v4 = vsel %vm2521_vm10, %v2525_v60, %v2527_v43  ;;  %v2788_v41 = vrot.slane %v12054_v29, 2 }
 0x1fd   : > { %2232 = vst.msk [vmem:[#allocation3 + $0x3a] sm:$0x1] %vm1709_vm4, %v2231_v52  ;;  %v2240_v59 = vmax.f32 %v2238_v2, %v2239_v55  ;;  %v2246_v61 = vrot.slane %v2245_v56, 2  ;;  %v2308_v19 = vsel %vm2280_vm5, %v2303_v49, %v2307_v58  ;;  %v2311_v30 = vor.u32 %v2309_v50, %v2307_v58  ;;  %v11066_v2 = vld [vmem:[%s14041_s10 + $0xb8] sm:$0xff]   ;;  %v11067_v49 = vld [vmem:[%s14041_s10 + $0xc0] sm:$0xff]   ;;  %v11068_v52 = vld [vmem:[%s14041_s10 + $0xc8] sm:$0xff]  }
 0x1fe   : > { %9835 = vmatprep.mubr.msk.bf16.mxu1 %vm1637_vm3, %v2308_v19  ;;  %v3041_v58 = vrot.slane %v11813_v8, 3 }
 0x1ff   : > { %2241 = vst.msk [vmem:[#allocation3 + $0x3b] sm:$0x1] %vm1709_vm4, %v2240_v59  ;;  %v2247_v16 = vmax.f32 %v2245_v56, %v2246_v61  ;;  %9836 = vmatmul.mubr.msk.bf16.gmra.mrb[4].mxu1 %vm1637_vm3, %v2311_v30  ;;  %v3042_v56 = vrot.slane %v11932_v35, 3  ;;  %v3044_v59 = vrot.slane %v12054_v29, 3  ;;  %v11072_v61 = vld [vmem:[%s14041_s10 + $0xe8] sm:$0xff]  }
 0x200   : > { %9847 = vmatprep.mubr.msk.bf16.mxu1 %vm1637_vm3, %v11813_v8 }
 0x201   : > { %v2248_v45 = vrot.slane %v2247_v16, 1  ;;  %v3045_v19 = vsel %vm3040_vm12, %v3042_v56, %v3044_v59 }
 0x203   : > { %v2249_v51 = vmax.f32 %v2247_v16, %v2248_v45  ;;  %v11074_v16 = vld [vmem:[%s14041_s10 + $0xf8] sm:$0xff]   ;;  %v11075_v45 = vld [vmem:[%s14042_s0 + $0x40] sm:$0xff]  }
 0x205   : > { %2250 = vst.msk [vmem:[#allocation3 + $0x3c] sm:$0x1] %vm1709_vm4, %v2249_v51  ;;  %v12313_v51 = vld [vmem:[#allocation4] sm:$0xff] }
 0x207   : > { %9848 = vmatmul.mubr.msk.bf16.vlgmr.msra.gmra.mrb[0].mxu1 %vm1637_vm3, %v11932_v35  ;;  %v11071_v35 = vld [vmem:[%s14041_s10 + $0xe0] sm:$0xff]  }
 0x208   : > { %9856 = vmatpush3.bf16.msra.mxu1 %v12127_v14  ;;  %9851 = vmatprep.mubr.msk.bf16.mxu1 %vm1637_vm3, %v12054_v29  ;;  %v11054_v14 = vld [vmem:[%s14041_s10 + $0x58] sm:$0xff]   ;;  %v11073_v29 = vld [vmem:[%s14041_s10 + $0xf0] sm:$0xff]  }
 0x209   : > { %9857 = vmatprep.subr.bf16.mxu1 %v11052_v62 }
 0x20c   : > { %v2258_v1 = vld [vmem:[#allocation3 + $0x38] sm:$0x1f]  ;;  %9858 = vmatpush3.bf16.msra.mxu1 %v11052_v62  ;;  %v11077_v62 = vld [vmem:[%s14042_s0 + $0x50] sm:$0xff]  }
 0x20d   : > { %v12174_v7 = vpack.c.bf16 %v2258_v1, %v2257_v40  ;;  %9859 = vmatprep.subr.bf16.mxu1 %v11053_v34  ;;  %v11063_v40 = vld [vmem:[%s14041_s10 + $0xa0] sm:$0xff]   ;;  %v11081_v1 = vld [vmem:[%s14042_s0 + $0x70] sm:$0xff]  }
 0x20f   : > { %9852 = vmatmul.mubr.msk.bf16.gmra.mrb[4].mxu1 %vm1637_vm3, %v12146_v46  ;;  %v12184_v11 = vshrl.u32 %v12174_v7, 16  ;;  %v12187_v12 = vshll.u32 %v12174_v7, 16  ;;  %v2790_v42 = vrot.slane %v12174_v7, 2  ;;  %v2789_v46 = vsel %vm2784_vm11, %v2786_v36, %v2788_v41 }
 0x210   : > { %9860 = vmatpush3.bf16.msra.mxu1 %v11053_v34  ;;  %9863 = vmatprep.mubr.msk.bf16.mxu1 %vm1637_vm3, %v2524_v10  ;;  %v3046_v8 = vrot.slane %v12174_v7, 3  ;;  %v11079_v34 = vld [vmem:[%s14042_s0 + $0x60] sm:$0xff]   ;;  %v11082_v7 = vld [vmem:[%s14042_s0 + $0x78] sm:$0xff]  }
 0x211   : > { %9861 = vmatprep.subr.bf16.mxu1 %v11054_v14  ;;  %v3176_v15 = vrot.slane %v12184_v11, 3  ;;  %v3177_v20 = vrot.slane %v12187_v12, 4  ;;  %v2664_v26 = vrot.slane %v12187_v12, 2  ;;  %v2791_v47 = vsel %vm2784_vm11, %v2788_v41, %v2790_v42 }
 0x212   : > { %v2920_v25 = vrot.slane %v12184_v11, 2  ;;  %v2921_v48 = vrot.slane %v12187_v12, 3  ;;  %v3047_v30 = vsel %vm3040_vm12, %v3044_v59, %v3046_v8 }
 0x213   : > { %v12197_v17 = vor.u32 %v3177_v20, %v3176_v15 }
 0x214   : > { %9862 = vmatpush3.bf16.msra.mxu1 %v11054_v14  ;;  %v2922_v50 = vor.u32 %v2921_v48, %v2920_v25 }
 0x215   : > { %9871 = vmatprep.subr.bf16.mxu1 %v11055_v13  ;;  %v12206_v21 = vsel %vm3164_vm8, %v12122_v54, %v12197_v17  ;;  %v2661_v54 = vrot.slane %v12184_v11, 1 }
 0x216   : > { %v2923_v55 = vsel %vm2908_vm7, %v12098_v23, %v2922_v50  ;;  %v3043_v23 = vsel %vm3040_vm12, %v3041_v58, %v3042_v56 }
 0x217   : > { %9864 = vmatmul.mubr.msk.bf16.vlgmr.msra.gmra.mrb[0].mxu1 %vm1637_vm3, %v2526_v3  ;;  %v2665_v28 = vor.u32 %v2664_v26, %v2661_v54 }
 0x218   : > { %9872 = vmatpush3.bf16.msra.mxu1 %v11055_v13  ;;  %9867 = vmatprep.mubr.msk.bf16.mxu1 %vm1637_vm3, %v2528_v4 }
 0x219   : > { %9873 = vmatprep.subr.bf16.mxu1 %v11056_v18  ;;  %v2666_v33 = vsel %vm2646_vm6, %v12093_v57, %v2665_v28  ;;  %v2787_v57 = vsel %vm2784_vm11, %v2785_v37, %v2786_v36 }
 0x21c   : > { %9874 = vmatpush3.bf16.msra.mxu1 %v11056_v18 }
 0x21d   : > { %9875 = vmatprep.subr.bf16.mxu1 %v11057_v22 }
 0x21f   : > { %9868 = vmatmul.mubr.msk.bf16.gmra.mrb[4].mxu1 %vm1637_vm3, %v2527_v43 }
 0x220   : > { %9876 = vmatpush3.bf16.msra.mxu1 %v11057_v22  ;;  %9879 = vmatprep.mubr.msk.bf16.mxu1 %vm1637_vm3, %v11975_v5  ;;  %v11061_v5 = vld [vmem:[%s14041_s10 + $0x90] sm:$0xff]  }
 0x221   : > { %9877 = vmatprep.subr.bf16.mxu1 %v11058_v24 }
 0x224   : > { %9878 = vmatpush3.bf16.msra.mxu1 %v11058_v24 }
 0x225   : > { %9887 = vmatprep.subr.bf16.mxu1 %v11059_v27 }
 0x227   : > { %9880 = vmatmul.mubr.msk.bf16.vlgmr.msra.gmra.mrb[0].mxu1 %vm1637_vm3, %v12105_v38  ;;  %v11062_v38 = vld [vmem:[%s14041_s10 + $0x98] sm:$0xff]  }
 0x228   : > { %9888 = vmatpush3.bf16.msra.mxu1 %v11059_v27  ;;  %9883 = vmatprep.mubr.msk.bf16.mxu1 %vm1637_vm3, %v2666_v33 }
 0x229   : > { %9889 = vmatprep.subr.bf16.mxu1 %v11060_v31 }
 0x22c   : > { %9890 = vmatpush3.bf16.msra.mxu1 %v11060_v31 }
 0x22d   : > { %9891 = vmatprep.subr.bf16.mxu1 %v11061_v5 }
 0x22f   : > { %9884 = vmatmul.mubr.msk.bf16.gmra.mrb[4].mxu1 %vm1637_vm3, %v2665_v28 }
 0x230   : > { %9892 = vmatpush3.bf16.msra.mxu1 %v11061_v5  ;;  %9895 = vmatprep.mubr.msk.bf16.mxu1 %vm1637_vm3, %v2787_v57 }
 0x231   : > { %9893 = vmatprep.subr.bf16.mxu1 %v11062_v38 }
 0x234   : > { %9894 = vmatpush3.bf16.msra.mxu1 %v11062_v38 }
 0x235   : > { %9903 = vmatprep.subr.bf16.mxu1 %v11063_v40 }
 0x237   : > { %9896 = vmatmul.mubr.msk.bf16.vlgmr.msra.gmra.mrb[0].mxu1 %vm1637_vm3, %v2789_v46 }
 0x238   : > { %9904 = vmatpush3.bf16.msra.mxu1 %v11063_v40  ;;  %9899 = vmatprep.mubr.msk.bf16.mxu1 %vm1637_vm3, %v2791_v47 }
 0x239   : > { %9905 = vmatprep.subr.bf16.mxu1 %v11064_v44 }
 0x23c   : > { %9906 = vmatpush3.bf16.msra.mxu1 %v11064_v44 }
 0x23d   : > { %9907 = vmatprep.subr.bf16.mxu1 %v11065_v53 }
 0x23f   : > { %9900 = vmatmul.mubr.msk.bf16.gmra.mrb[4].mxu1 %vm1637_vm3, %v2790_v42 }
 0x240   : > { %9908 = vmatpush3.bf16.msra.mxu1 %v11065_v53  ;;  %9911 = vmatprep.mubr.msk.bf16.mxu1 %vm1637_vm3, %v11980_v6  ;;  %v11069_v6 = vld [vmem:[%s14041_s10 + $0xd0] sm:$0xff]  }
 0x241   : > { %9909 = vmatprep.subr.bf16.mxu1 %v11066_v2 }
 0x244   : > { %9910 = vmatpush3.bf16.msra.mxu1 %v11066_v2 }
 0x245   : > { %9919 = vmatprep.subr.bf16.mxu1 %v11067_v49 }
 0x247   : > { %9912 = vmatmul.mubr.msk.bf16.vlgmr.msra.gmra.mrb[0].mxu1 %vm1637_vm3, %v12110_v39  ;;  %v11070_v39 = vld [vmem:[%s14041_s10 + $0xd8] sm:$0xff]   ;;  %s14044_s10 = sld [smem:[#allocation12_spill]] }
 0x248   : > { %9920 = vmatpush3.bf16.msra.mxu1 %v11067_v49  ;;  %9915 = vmatprep.mubr.msk.bf16.mxu1 %vm1637_vm3, %v2923_v55 }
 0x249   : > { %9921 = vmatprep.subr.bf16.mxu1 %v11068_v52 }
 0x24c   : > { %9922 = vmatpush3.bf16.msra.mxu1 %v11068_v52 }
 0x24d   : > { %9923 = vmatprep.subr.bf16.mxu1 %v11069_v6  ;;  %v8499_v10 = vld [vmem:[%s14044_s10] ss:$0 sm:$0xff] }
 0x24f   : > { %9916 = vmatmul.mubr.msk.bf16.gmra.mrb[4].mxu1 %vm1637_vm3, %v2922_v50 }
 0x250   : > { %9924 = vmatpush3.bf16.msra.mxu1 %v11069_v6  ;;  %9927 = vmatprep.mubr.msk.bf16.mxu1 %vm1637_vm3, %v3043_v23 }
 0x251   : > { %9925 = vmatprep.subr.bf16.mxu1 %v11070_v39 }
 0x254   : > { %9926 = vmatpush3.bf16.msra.mxu1 %v11070_v39 }
 0x255   : > { %9935 = vmatprep.subr.bf16.mxu1 %v11071_v35 }
 0x257   : > { %9928 = vmatmul.mubr.msk.bf16.vlgmr.msra.gmra.mrb[0].mxu1 %vm1637_vm3, %v3045_v19 }
 0x258   : > { %9936 = vmatpush3.bf16.msra.mxu1 %v11071_v35  ;;  %9931 = vmatprep.mubr.msk.bf16.mxu1 %vm1637_vm3, %v3047_v30  ;;  %v11083_v35 = vld [vmem:[%s14042_s0] sm:$0xff]  }
 0x259   : > { %9937 = vmatprep.subr.bf16.mxu1 %v11072_v61 }
 0x25c   : > { %9938 = vmatpush3.bf16.msra.mxu1 %v11072_v61 }
 0x25d   : > { %9939 = vmatprep.subr.bf16.mxu1 %v11073_v29 }
 0x25f   : > { %9932 = vmatmul.mubr.msk.bf16.gmra.mrb[4].mxu1 %vm1637_vm3, %v3046_v8 }
 0x260   : > { %9940 = vmatpush3.bf16.msra.mxu1 %v11073_v29  ;;  %9943 = vmatprep.mubr.msk.bf16.mxu1 %vm1637_vm3, %v11997_v32  ;;  %v11076_v32 = vld [vmem:[%s14042_s0 + $0x48] sm:$0xff]  }
 0x261   : > { %9941 = vmatprep.subr.bf16.mxu1 %v11074_v16 }
 0x264   : > { %9942 = vmatpush3.bf16.msra.mxu1 %v11074_v16 }
 0x265   : > { %9951 = vmatprep.subr.bf16.mxu1 %v12313_v51 }
 0x267   : > { %9944 = vmatmul.mubr.msk.bf16.vlgmr.msra.gmra.mrb[0].mxu1 %vm1637_vm3, %v12135_v63  ;;  %v11078_v63 = vld [vmem:[%s14042_s0 + $0x58] sm:$0xff]  }
 0x268   : > { %9947 = vmatprep.mubr.msk.bf16.mxu1 %vm1637_vm3, %v12206_v21  ;;  %9952 = vmatpush3.bf16.msra.mxu1 %v11075_v45 }
 0x269   : > { %9953 = vmatprep.subr.bf16.mxu1 %v12313_v51 }
 0x26c   : > { %9954 = vmatpush3.bf16.msra.mxu1 %v11076_v32 }
 0x26d   : > { %9955 = vmatprep.subr.bf16.mxu1 %v12313_v51 }
 0x26f   : > { %9948 = vmatmul.mubr.msk.bf16.gmra.mrb[4].mxu1 %vm1637_vm3, %v12197_v17 }
 0x270   : > { %9956 = vmatpush3.bf16.msra.mxu1 %v11077_v62  ;;  %9967 = vmatprep.mubr.msk.bf16.mxu1 %vm11385_vm0, %v12313_v51 }
 0x271   : > { %9957 = vmatprep.subr.bf16.mxu1 %v12313_v51 }
 0x274   : > { %9958 = vmatpush3.bf16.msra.mxu1 %v11078_v63 }
 0x275   : > { %9959 = vmatprep.subr.bf16.mxu1 %v12313_v51 }
 0x278   : > { %9960 = vmatpush3.bf16.msra.mxu1 %v11079_v34 }
 0x279   : > { %9961 = vmatprep.subr.bf16.mxu1 %v12313_v51 }
 0x27c   : > { %9962 = vmatpush3.bf16.msra.mxu1 %v11080_v0 }
 0x27d   : > { %9963 = vmatprep.subr.bf16.mxu1 %v12313_v51 }
 0x280   : > { %9964 = vmatpush3.bf16.msra.mxu1 %v11081_v1 }
 0x281   : > { %9965 = vmatprep.subr.bf16.mxu1 %v12313_v51 }
 0x284   : > { %9966 = vmatpush3.bf16.msra.mxu1 %v11082_v7  ;;  %v11084_v7 = vld [vmem:[%s14042_s0 + $0x8] sm:$0xff]  }
 0x285   : > { %9979 = vmatprep.subr.bf16.mxu1 %v12313_v51 }
 0x33a   : > { %v9945_v14 = vpop.f32.mrb[0].mxu1 }
 0x33b   : > { %v3296_v11 = vmul.f32 %v9945_v14, %v8498_v9  ;;  %v3250_v12 = vpop.f32.mrb[1].mxu1 }
 0x33c   : > { %v3294_v13 = vmul.f32 %v8498_v9, %v3250_v12  ;;  %v9946_v60 = vpop.f32.mrb[2].mxu1 }
 0x33d   : > { %v3310_v15 = vadd.f32 %v8499_v10, %v3296_v11  ;;  %v3297_v20 = vmul.f32 %v9946_v60, %v8498_v9  ;;  %v3253_v43 = vpop.f32.mrb[3].mxu1 }
 0x33e   : > { %v3308_v17 = vadd.f32 %v8499_v10, %v3294_v13  ;;  %v3295_v18 = vmul.f32 %v8498_v9, %v3253_v43 }
 0x33f   : > { %v3311_v3 = vadd.f32 %v8499_v10, %v3297_v20  ;;  %v3317_v4 = vmax.f32 %v3310_v15, 0.0 }
 0x340   : > { %v3309_v21 = vadd.f32 %v8499_v10, %v3295_v18  ;;  %v3315_v24 = vmax.f32 %v3308_v17, 0.0 }
 0x341   : > { %v3318_v22 = vmax.f32 %v3311_v3, 0.0 }
 0x342   : > { %v3316_v54 = vmax.f32 %v3309_v21, 0.0  ;;  %v9949_v26 = vpop.f32.mrb[4].mxu1 }
 0x343   : > { %v12359_v27 = vpack.c.bf16 %v3318_v22, %v3317_v4  ;;  %v3300_v28 = vmul.f32 %v9949_v26, %v8498_v9  ;;  %v3266_v31 = vpop.f32.mrb[5].mxu1 }
 0x344   : > { %v12361_v33 = vpack.c.bf16 %v3316_v54, %v3315_v24  ;;  %v3298_v5 = vmul.f32 %v8498_v9, %v3266_v31  ;;  %v9950_v36 = vpop.f32.mrb[6].mxu1  ;;  %v11085_v54 = vld [vmem:[%s14042_s0 + $0x10] sm:$0xff]  }
 0x345   : > { %v3314_v37 = vadd.f32 %v8499_v10, %v3300_v28  ;;  %v3269_v38 = vpop.f32.mrb[7].mxu1  ;;  %v12364_v57 = vshll.u32 %v12359_v27, 16  ;;  %v12367_v40 = vshrl.u32 %v12359_v27, 16  ;;  %v3617_v41 = vrot.slane %v12359_v27, 1 }
 0x346   : > { %v3312_v42 = vadd.f32 %v8499_v10, %v3298_v5  ;;  %v3299_v44 = vmul.f32 %v8498_v9, %v3269_v38  ;;  %v12371_v46 = vshrl.u32 %v12361_v33, 16  ;;  %v12374_v47 = vshll.u32 %v12361_v33, 16 }
 0x347   : > { %v3321_v53 = vmax.f32 %v3314_v37, 0.0  ;;  %v3368_v2 = vrot.slane %v12364_v57, 1  ;;  %v3616_v25 = vrot.slane %v12361_v33, 1  ;;  %v3757_v52 = vrot.slane %v12367_v40, 1 }
 0x348   : > { %v3313_v48 = vadd.f32 %v8499_v10, %v3299_v44  ;;  %v3363_v49 = vrot.slane %v12374_v47, 1  ;;  %v3754_v50 = vrot.slane %v12371_v46, 1  ;;  %v3319_v6 = vmax.f32 %v3312_v42, 0.0 }
 0x349   : > { %v12381_v55 = vpack.c.bf16 %v3321_v53, %v3321_v53  ;;  %v12384_v56 = vsel %vm2521_vm10, %v3616_v25, %v3617_v41  ;;  %v3755_v58 = vrot.slane %v12374_v47, 2  ;;  %v3372_v59 = vor.u32 %v12367_v40, %v3368_v2 }
 0x34a   : > { %v3320_v39 = vmax.f32 %v3313_v48, 0.0  ;;  %v3364_v23 = vor.u32 %v3363_v49, %v12371_v46  ;;  %v3758_v8 = vrot.slane %v12364_v57, 2  ;;  %v3905_v29 = vrot.slane %v12361_v33, 2 }
 0x34b   : > { %v3756_v61 = vor.u32 %v3755_v58, %v3754_v50  ;;  %v12394_v19 = vshrl.u32 %v12381_v55, 16  ;;  %v12397_v30 = vshll.u32 %v12381_v55, 16  ;;  %v3906_v62 = vrot.slane %v12359_v27, 2  ;;  %v11086_v50 = vld [vmem:[%s14042_s0 + $0x18] sm:$0xff]  }
 0x34c   : > { %v12400_v16 = vpack.c.bf16 %v3320_v39, %v3319_v6  ;;  %v3369_v45 = vsel %vm2280_vm5, %v3364_v23, %v3368_v2  ;;  %v3759_v32 = vor.u32 %v3758_v8, %v3757_v52  ;;  %v3621_v63 = vrot.slane %v12381_v55, 1 }
 0x34d   : > { %9968 = vmatmul.mubr.bf16.vlgmr.msra.gmra.mrb[8].mxu1 %v3369_v45  ;;  %v3768_v34 = vrot.slane %v12394_v19, 1  ;;  %v3771_v0 = vrot.slane %v12397_v30, 2  ;;  %v4043_v1 = vrot.slane %v12371_v46, 2  ;;  %v12425_v12 = vsel %vm2784_vm11, %v3905_v29, %v3906_v62 }
 0x34e   : > { %9980 = vmatpush3.bf16.msra.mxu1 %v11083_v35  ;;  %9971 = vmatprep.mubr.msk.bf16.mxu1 %vm11385_vm0, %v12313_v51  ;;  %v12414_v9 = vshll.u32 %v12400_v16, 16  ;;  %v12417_v14 = vshrl.u32 %v12400_v16, 16  ;;  %v3619_v10 = vrot.slane %v12400_v16, 1  ;;  %v12421_v11 = vsel %vm2646_vm6, %v3756_v61, %v3759_v32 }
 0x34f   : > { %9981 = vmatprep.subr.bf16.mxu1 %v12313_v51  ;;  %v3908_v13 = vrot.slane %v12400_v16, 2  ;;  %v3910_v60 = vrot.slane %v12381_v55, 2  ;;  %v4044_v15 = vrot.slane %v12374_v47, 3  ;;  %v3772_v26 = vor.u32 %v3771_v0, %v3768_v34 }
 0x350   : > { %v3376_v20 = vrot.slane %v12414_v9, 1  ;;  %v12432_v43 = vsel %vm2521_vm10, %v3617_v41, %v3619_v10  ;;  %v12435_v17 = vsel %vm2521_vm10, %v3619_v10, %v3621_v63  ;;  %v3761_v18 = vrot.slane %v12417_v14, 1  ;;  %v11090_v10 = vld [vmem:[%s14042_s0 + $0x38] sm:$0xff]  }
 0x351   : > { %v3762_v3 = vrot.slane %v12414_v9, 2  ;;  %v12440_v21 = vsel %vm2784_vm11, %v3906_v62, %v3908_v13  ;;  %v12443_v4 = vsel %vm2784_vm11, %v3908_v13, %v3910_v60  ;;  %v4045_v22 = vor.u32 %v4044_v15, %v4043_v1  ;;  %v11091_v13 = vld [vmem:[%s14042_s0 + $0x80] sm:$0xff]   ;;  %v11092_v60 = vld [vmem:[%s14042_s0 + $0x88] sm:$0xff]   ;;  %v11093_v15 = vld [vmem:[%s14042_s0 + $0x90] sm:$0xff]  }
 0x352   : > { %9982 = vmatpush3.bf16.msra.mxu1 %v11084_v7  ;;  %v3377_v24 = vsel %vm2280_vm5, %v3372_v59, %v3376_v20  ;;  %v4046_v28 = vrot.slane %v12367_v40, 2  ;;  %v4047_v31 = vrot.slane %v12364_v57, 3  ;;  %v4050_v36 = vrot.slane %v12417_v14, 2 }
 0x353   : > { %9983 = vmatprep.subr.bf16.mxu1 %v12313_v51  ;;  %v3763_v5 = vor.u32 %v3762_v3, %v3761_v18  ;;  %v4051_v37 = vrot.slane %v12414_v9, 3  ;;  %v4054_v38 = vrot.slane %v12394_v19, 2  ;;  %v4055_v42 = vrot.slane %v12397_v30, 3  ;;  %v11097_v18 = vld [vmem:[%s14042_s0 + $0xb0] sm:$0xff]   ;;  %v11099_v3 = vld [vmem:[%s14042_s0 + $0xc0] sm:$0xff]  }
 0x354   : > { %v4048_v41 = vor.u32 %v4047_v31, %v4046_v28  ;;  %v4189_v44 = vrot.slane %v12361_v33, 3  ;;  %v4190_v53 = vrot.slane %v12359_v27, 3  ;;  %v4192_v49 = vrot.slane %v12400_v16, 3  ;;  %v11106_v28 = vld [vmem:[%s14042_s0 + $0xf8] sm:$0xff]   ;;  %v11107_v31 = vld [vmem:[%s14042_s0 + $0x100] sm:$0xff]  }
 0x355   : > { %9972 = vmatmul.mubr.bf16.gmra.mrb[12].mxu1 %v3377_v24  ;;  %v12459_v2 = vsel %vm2646_vm6, %v3759_v32, %v3763_v5  ;;  %v12462_v25 = vsel %vm2646_vm6, %v3763_v5, %v3772_v26  ;;  %v4052_v48 = vor.u32 %v4051_v37, %v4050_v36  ;;  %v4056_v6 = vor.u32 %v4055_v42, %v4054_v38  ;;  %v11101_v24 = vld [vmem:[%s14042_s0 + $0xd0] sm:$0xff]   ;;  %v11136_v26 = vld [vmem:[%s14002_s11 + $0x40] sm:$0xff]   ;;  %v11108_v5 = vld [vmem:[%s14042_s0 + $0x108] sm:$0xff]  }
 0x356   : > { %9984 = vmatpush3.bf16.msra.mxu1 %v11085_v54  ;;  %9975 = vmatprep.mubr.msk.bf16.mxu1 %vm11385_vm0, %v12313_v51  ;;  %v12471_v52 = vsel %vm2908_vm7, %v4045_v22, %v4048_v41  ;;  %v12474_v58 = vsel %vm3040_vm12, %v4189_v44, %v4190_v53  ;;  %v4194_v39 = vrot.slane %v12381_v55, 3  ;;  %v12482_v35 = vsel %vm3040_vm12, %v4190_v53, %v4192_v49  ;;  %v11100_v22 = vld [vmem:[%s14042_s0 + $0xc8] sm:$0xff]   ;;  %v11103_v54 = vld [vmem:[%s14042_s0 + $0xe0] sm:$0xff]   ;;  %v11109_v36 = vld [vmem:[%s14042_s0 + $0x110] sm:$0xff]  }
 0x357   : > { %9985 = vmatprep.subr.bf16.mxu1 %v12313_v51  ;;  %v12479_v23 = vsel %vm2908_vm7, %v4048_v41, %v4052_v48  ;;  %v4327_v59 = vrot.slane %v12371_v46, 3  ;;  %v4328_v8 = vrot.slane %v12374_v47, 4  ;;  %v12487_v61 = vsel %vm2908_vm7, %v4052_v48, %v4056_v6  ;;  %v11087_v46 = vld [vmem:[%s14042_s0 + $0x20] sm:$0xff]   ;;  %10176 = vmatpush3.bf16.msra.mxu0 %v11136_v26  ;;  %v11140_v38 = vld [vmem:[%s14002_s11 + $0x48] sm:$0xff]   ;;  %v11141_v42 = vld [vmem:[%s14002_s11 + $0x50] sm:$0xff]  }
 0x358   : > { %v12490_v29 = vsel %vm3040_vm12, %v4192_v49, %v4194_v39  ;;  %v4330_v55 = vrot.slane %v12367_v40, 3  ;;  %v4331_v45 = vrot.slane %v12364_v57, 4  ;;  %v4334_v62 = vrot.slane %v12417_v14, 3  ;;  %10177 = vmatprep.subr.bf16.mxu0 %v12313_v51  ;;  %v11111_v37 = vld [vmem:[%s14042_s0 + $0x120] sm:$0xff]   ;;  %v11112_v41 = vld [vmem:[%s14042_s0 + $0x128] sm:$0xff]   ;;  %v11113_v44 = vld [vmem:[%s14042_s0 + $0x130] sm:$0xff]  }
 0x359   : > { %v4329_v32 = vor.u32 %v4328_v8, %v4327_v59  ;;  %v4335_v63 = vrot.slane %v12414_v9, 4  ;;  %v4338_v34 = vrot.slane %v12394_v19, 3  ;;  %v4339_v0 = vrot.slane %v12397_v30, 4  ;;  %v11088_v9 = vld [vmem:[%s14042_s0 + $0x28] sm:$0xff]   ;;  %v11142_v53 = vld [vmem:[%s14002_s11 + $0x58] sm:$0xff]   ;;  %v11115_v48 = vld [vmem:[%s14042_s0 + $0x140] sm:$0xff]  }
 0x35a   : > { %9986 = vmatpush3.bf16.msra.mxu1 %v11086_v50  ;;  %v4332_v47 = vor.u32 %v4331_v45, %v4330_v55  ;;  %v3380_v40 = vor.u32 %v12417_v14, %v3376_v20  ;;  %v11089_v14 = vld [vmem:[%s14042_s0 + $0x30] sm:$0xff]   ;;  %v11095_v20 = vld [vmem:[%s14042_s0 + $0xa0] sm:$0xff]   ;;  %v11144_v49 = vld [vmem:[%s14002_s11 + $0x68] sm:$0xff]  }
 0x35b   : > { %9987 = vmatprep.subr.bf16.mxu1 %v12313_v51  ;;  %v4336_v57 = vor.u32 %v4335_v63, %v4334_v62  ;;  %v4340_v7 = vor.u32 %v4339_v0, %v4338_v34  ;;  %10178 = vmatpush3.bf16.msra.mxu0 %v11140_v38  ;;  %v11116_v50 = vld [vmem:[%s14042_s0 + $0x148] sm:$0xff]   ;;  %v11145_v6 = vld [vmem:[%s14002_s11 + $0x70] sm:$0xff]   ;;  %v11146_v39 = vld [vmem:[%s14002_s11 + $0x78] sm:$0xff]  }
 0x35c   : > { %v12504_v1 = vsel %vm3164_vm8, %v4329_v32, %v4332_v47  ;;  %10179 = vmatprep.subr.bf16.mxu0 %v12313_v51  ;;  %v11118_v59 = vld [vmem:[%s14042_s0 + $0x158] sm:$0xff]   ;;  %v11119_v8 = vld [vmem:[%s14042_s0 + $0x160] sm:$0xff]   ;;  %v11121_v55 = vld [vmem:[%s14042_s0 + $0x170] sm:$0xff]  }
 0x35d   : > { %9976 = vmatmul.mubr.bf16.gmra.mrb[16].mxu1 %v3380_v40  ;;  %v12507_v19 = vsel %vm3164_vm8, %v4332_v47, %v4336_v57  ;;  %v12515_v30 = vsel %vm3164_vm8, %v4336_v57, %v4340_v7  ;;  %v11123_v45 = vld [vmem:[%s14042_s0 + $0x180] sm:$0xff]   ;;  %v11124_v32 = vld [vmem:[%s14042_s0 + $0x188] sm:$0xff]   ;;  %v11125_v62 = vld [vmem:[%s14042_s0 + $0x190] sm:$0xff]  }
 0x35e   : > { %9988 = vmatpush3.bf16.msra.mxu1 %v11087_v46  ;;  %9995 = vmatprep.mubr.msk.bf16.mxu1 %vm11385_vm0, %v12313_v51  ;;  %v11127_v63 = vld [vmem:[%s14042_s0 + $0x1a0] sm:$0xff]   ;;  %v11129_v34 = vld [vmem:[%s14042_s0 + $0x1b0] sm:$0xff]   ;;  %v11132_v47 = vld [vmem:[%s14042_s0 + $0x1c8] sm:$0xff]  }
 0x35f   : > { %9989 = vmatprep.subr.bf16.mxu1 %v12313_v51  ;;  %10180 = vmatpush3.bf16.msra.mxu0 %v11141_v42  ;;  %v11131_v46 = vld [vmem:[%s14042_s0 + $0x1c0] sm:$0xff]   ;;  %v11133_v0 = vld [vmem:[%s14042_s0 + $0x1d0] sm:$0xff]  }
 0x360   : > { %10181 = vmatprep.subr.bf16.mxu0 %v12313_v51  ;;  %v11135_v40 = vld [vmem:[%s14042_s0 + $0x1e0] sm:$0xff]   ;;  %v11138_v57 = vld [vmem:[%s14042_s0 + $0x1f0] sm:$0xff]  }
 0x361   : > { %v8676_v7 = vld [vmem:[%s14045_s8] ss:$0 sm:$0xff]  ;;  %s10996_s8 = smul.u32 112, %s14049_s3 }
 0x362   : > { %9990 = vmatpush3.bf16.msra.mxu1 %v11088_v9 }
 0x363   : > { %9991 = vmatprep.subr.bf16.mxu1 %v12313_v51  ;;  %10182 = vmatpush3.bf16.msra.mxu0 %v11142_v53 }
 0x364   : > { %10183 = vmatprep.subr.bf16.mxu0 %v12313_v51 }
 0x366   : > { %9992 = vmatpush3.bf16.msra.mxu1 %v11089_v14  ;;  %v8677_v14 = vld [vmem:[%s14046_s6] ss:$0 sm:$0xff]  ;;  %s14047_s6 = sld [smem:[#allocation6_spill]] }
 0x367   : > { %9993 = vmatprep.subr.bf16.mxu1 %v12313_v51 }
 0x36a   : > { %9994 = vmatpush3.bf16.msra.mxu1 %v11090_v10 }
 0x36b   : > { %10007 = vmatprep.subr.bf16.mxu1 %v12313_v51 }
 0x36d   : > { %9996 = vmatmul.mubr.bf16.vlgmr.msra.gmra.mrb[8].mxu1 %v12361_v33  ;;  %v11094_v33 = vld [vmem:[%s14042_s0 + $0x98] sm:$0xff]  }
 0x36e   : > { %10008 = vmatpush3.bf16.msra.mxu1 %v11091_v13  ;;  %9999 = vmatprep.mubr.msk.bf16.mxu1 %vm11385_vm0, %v12313_v51 }
 0x36f   : > { %10009 = vmatprep.subr.bf16.mxu1 %v12313_v51 }
 0x372   : > { %10010 = vmatpush3.bf16.msra.mxu1 %v11092_v60 }
 0x373   : > { %10011 = vmatprep.subr.bf16.mxu1 %v12313_v51 }
 0x375   : > { %10000 = vmatmul.mubr.bf16.gmra.mrb[12].mxu1 %v12359_v27  ;;  %v11096_v27 = vld [vmem:[%s14042_s0 + $0xa8] sm:$0xff]  }
 0x376   : > { %10012 = vmatpush3.bf16.msra.mxu1 %v11093_v15  ;;  %10003 = vmatprep.mubr.msk.bf16.mxu1 %vm11385_vm0, %v12313_v51 }
 0x377   : > { %10013 = vmatprep.subr.bf16.mxu1 %v12313_v51 }
 0x37a   : > { %10014 = vmatpush3.bf16.msra.mxu1 %v11094_v33 }
 0x37b   : > { %10015 = vmatprep.subr.bf16.mxu1 %v12313_v51 }
 0x37d   : > { %10004 = vmatmul.mubr.bf16.gmra.mrb[16].mxu1 %v12400_v16  ;;  %v11098_v16 = vld [vmem:[%s14042_s0 + $0xb8] sm:$0xff]  }
 0x37e   : > { %10016 = vmatpush3.bf16.msra.mxu1 %v11095_v20  ;;  %10023 = vmatprep.mubr.msk.bf16.mxu1 %vm11385_vm0, %v12313_v51 }
 0x37f   : > { %10017 = vmatprep.subr.bf16.mxu1 %v12313_v51 }
 0x382   : > { %10018 = vmatpush3.bf16.msra.mxu1 %v11096_v27 }
 0x383   : > { %10019 = vmatprep.subr.bf16.mxu1 %v12313_v51 }
 0x386   : > { %10020 = vmatpush3.bf16.msra.mxu1 %v11097_v18 }
 0x387   : > { %10021 = vmatprep.subr.bf16.mxu1 %v12313_v51 }
 0x38a   : > { %10022 = vmatpush3.bf16.msra.mxu1 %v11098_v16 }
 0x38b   : > { %10035 = vmatprep.subr.bf16.mxu1 %v12313_v51 }
 0x38d   : > { %10024 = vmatmul.mubr.bf16.vlgmr.msra.gmra.mrb[8].mxu1 %v12384_v56  ;;  %v11102_v56 = vld [vmem:[%s14042_s0 + $0xd8] sm:$0xff]  }
 0x38e   : > { %10036 = vmatpush3.bf16.msra.mxu1 %v11099_v3  ;;  %10027 = vmatprep.mubr.msk.bf16.mxu1 %vm11385_vm0, %v12313_v51 }
 0x38f   : > { %10037 = vmatprep.subr.bf16.mxu1 %v12313_v51 }
 0x392   : > { %10038 = vmatpush3.bf16.msra.mxu1 %v11100_v22 }
 0x393   : > { %10039 = vmatprep.subr.bf16.mxu1 %v12313_v51 }
 0x395   : > { %10028 = vmatmul.mubr.bf16.gmra.mrb[12].mxu1 %v12432_v43  ;;  %v11104_v43 = vld [vmem:[%s14042_s0 + $0xe8] sm:$0xff]  }
 0x396   : > { %10040 = vmatpush3.bf16.msra.mxu1 %v11101_v24  ;;  %10031 = vmatprep.mubr.msk.bf16.mxu1 %vm11385_vm0, %v12313_v51 }
 0x397   : > { %10041 = vmatprep.subr.bf16.mxu1 %v12313_v51 }
 0x39a   : > { %10042 = vmatpush3.bf16.msra.mxu1 %v11102_v56 }
 0x39b   : > { %10043 = vmatprep.subr.bf16.mxu1 %v12313_v51 }
 0x39d   : > { %10032 = vmatmul.mubr.bf16.gmra.mrb[16].mxu1 %v12435_v17  ;;  %v11105_v17 = vld [vmem:[%s14042_s0 + $0xf0] sm:$0xff]  }
 0x39e   : > { %10044 = vmatpush3.bf16.msra.mxu1 %v11103_v54  ;;  %10051 = vmatprep.mubr.msk.bf16.mxu1 %vm11385_vm0, %v12313_v51 }
 0x39f   : > { %10045 = vmatprep.subr.bf16.mxu1 %v12313_v51 }
 0x3a2   : > { %10046 = vmatpush3.bf16.msra.mxu1 %v11104_v43 }
 0x3a3   : > { %10047 = vmatprep.subr.bf16.mxu1 %v12313_v51 }
 0x3a6   : > { %10048 = vmatpush3.bf16.msra.mxu1 %v11105_v17 }
 0x3a7   : > { %10049 = vmatprep.subr.bf16.mxu1 %v12313_v51 }
 0x3aa   : > { %10050 = vmatpush3.bf16.msra.mxu1 %v11106_v28 }
 0x3ab   : > { %10063 = vmatprep.subr.bf16.mxu1 %v12313_v51 }
 0x3ad   : > { %10052 = vmatmul.mubr.bf16.vlgmr.msra.gmra.mrb[8].mxu1 %v12421_v11  ;;  %v11110_v11 = vld [vmem:[%s14042_s0 + $0x118] sm:$0xff]  }
 0x3ae   : > { %10064 = vmatpush3.bf16.msra.mxu1 %v11107_v31  ;;  %10055 = vmatprep.mubr.msk.bf16.mxu1 %vm11385_vm0, %v12313_v51 }
 0x3af   : > { %10065 = vmatprep.subr.bf16.mxu1 %v12313_v51 }
 0x3b2   : > { %10066 = vmatpush3.bf16.msra.mxu1 %v11108_v5 }
 0x3b3   : > { %10067 = vmatprep.subr.bf16.mxu1 %v12313_v51 }
 0x3b5   : > { %10056 = vmatmul.mubr.bf16.gmra.mrb[12].mxu1 %v12459_v2  ;;  %v11114_v2 = vld [vmem:[%s14042_s0 + $0x138] sm:$0xff]  }
 0x3b6   : > { %10068 = vmatpush3.bf16.msra.mxu1 %v11109_v36  ;;  %10059 = vmatprep.mubr.msk.bf16.mxu1 %vm11385_vm0, %v12313_v51 }
 0x3b7   : > { %10069 = vmatprep.subr.bf16.mxu1 %v12313_v51 }
 0x3ba   : > { %10070 = vmatpush3.bf16.msra.mxu1 %v11110_v11 }
 0x3bb   : > { %10071 = vmatprep.subr.bf16.mxu1 %v12313_v51 }
 0x3bd   : > { %10060 = vmatmul.mubr.bf16.gmra.mrb[16].mxu1 %v12462_v25  ;;  %v11143_v25 = vld [vmem:[%s14002_s11 + $0x60] sm:$0xff]  }
 0x3be   : > { %10072 = vmatpush3.bf16.msra.mxu1 %v11111_v37  ;;  %10079 = vmatprep.mubr.msk.bf16.mxu1 %vm11385_vm0, %v12313_v51 }
 0x3bf   : > { %10073 = vmatprep.subr.bf16.mxu1 %v12313_v51  ;;  %10184 = vmatpush3.bf16.msra.mxu0 %v11143_v25 }
 0x3c0   : > { %10185 = vmatprep.subr.bf16.mxu0 %v12313_v51 }
 0x3c2   : > { %10074 = vmatpush3.bf16.msra.mxu1 %v11112_v41 }
 0x3c3   : > { %10075 = vmatprep.subr.bf16.mxu1 %v12313_v51  ;;  %10186 = vmatpush3.bf16.msra.mxu0 %v11144_v49 }
 0x3c4   : > { %10187 = vmatprep.subr.bf16.mxu0 %v12313_v51 }
 0x3c6   : > { %10076 = vmatpush3.bf16.msra.mxu1 %v11113_v44 }
 0x3c7   : > { %10077 = vmatprep.subr.bf16.mxu1 %v12313_v51  ;;  %10188 = vmatpush3.bf16.msra.mxu0 %v11145_v6 }
 0x3c8   : > { %10189 = vmatprep.subr.bf16.mxu0 %v12313_v51 }
 0x3ca   : > { %10078 = vmatpush3.bf16.msra.mxu1 %v11114_v2 }
 0x3cb   : > { %10091 = vmatprep.subr.bf16.mxu1 %v12313_v51  ;;  %10190 = vmatpush3.bf16.msra.mxu0 %v11146_v39 }
 0x3cc   : > { %10203 = vmatprep.subr.bf16.mxu0 %v12313_v51 }
 0x3cd   : > { %10080 = vmatmul.mubr.bf16.vlgmr.msra.gmra.mrb[8].mxu1 %v12425_v12  ;;  %v11117_v12 = vld [vmem:[%s14042_s0 + $0x150] sm:$0xff]  }
 0x3ce   : > { %10092 = vmatpush3.bf16.msra.mxu1 %v11115_v48  ;;  %10083 = vmatprep.mubr.msk.bf16.mxu1 %vm11385_vm0, %v12313_v51 }
 0x3cf   : > { %10093 = vmatprep.subr.bf16.mxu1 %v12313_v51 }
 0x3d2   : > { %10094 = vmatpush3.bf16.msra.mxu1 %v11116_v50 }
 0x3d3   : > { %10095 = vmatprep.subr.bf16.mxu1 %v12313_v51 }
 0x3d5   : > { %10084 = vmatmul.mubr.bf16.gmra.mrb[12].mxu1 %v12440_v21  ;;  %v11120_v21 = vld [vmem:[%s14042_s0 + $0x168] sm:$0xff]  }
 0x3d6   : > { %10096 = vmatpush3.bf16.msra.mxu1 %v11117_v12  ;;  %10087 = vmatprep.mubr.msk.bf16.mxu1 %vm11385_vm0, %v12313_v51 }
 0x3d7   : > { %10097 = vmatprep.subr.bf16.mxu1 %v12313_v51 }
 0x3da   : > { %10098 = vmatpush3.bf16.msra.mxu1 %v11118_v59 }
 0x3db   : > { %10099 = vmatprep.subr.bf16.mxu1 %v12313_v51 }
 0x3dd   : > { %10088 = vmatmul.mubr.bf16.gmra.mrb[16].mxu1 %v12443_v4  ;;  %v11122_v4 = vld [vmem:[%s14042_s0 + $0x178] sm:$0xff]  }
 0x3de   : > { %10100 = vmatpush3.bf16.msra.mxu1 %v11119_v8  ;;  %10107 = vmatprep.mubr.msk.bf16.mxu1 %vm11385_vm0, %v12313_v51 }
 0x3df   : > { %10101 = vmatprep.subr.bf16.mxu1 %v12313_v51 }
 0x3e2   : > { %10102 = vmatpush3.bf16.msra.mxu1 %v11120_v21 }
 0x3e3   : > { %10103 = vmatprep.subr.bf16.mxu1 %v12313_v51 }
 0x3e6   : > { %10104 = vmatpush3.bf16.msra.mxu1 %v11121_v55 }
 0x3e7   : > { %10105 = vmatprep.subr.bf16.mxu1 %v12313_v51 }
 0x3ea   : > { %10106 = vmatpush3.bf16.msra.mxu1 %v11122_v4 }
 0x3eb   : > { %10119 = vmatprep.subr.bf16.mxu1 %v12313_v51 }
 0x3ed   : > { %10108 = vmatmul.mubr.bf16.vlgmr.msra.gmra.mrb[8].mxu1 %v12471_v52  ;;  %v11126_v52 = vld [vmem:[%s14042_s0 + $0x198] sm:$0xff]  }
 0x3ee   : > { %10120 = vmatpush3.bf16.msra.mxu1 %v11123_v45  ;;  %10111 = vmatprep.mubr.msk.bf16.mxu1 %vm11385_vm0, %v12313_v51 }
 0x3ef   : > { %10121 = vmatprep.subr.bf16.mxu1 %v12313_v51 }
 0x3f2   : > { %10122 = vmatpush3.bf16.msra.mxu1 %v11124_v32 }
 0x3f3   : > { %10123 = vmatprep.subr.bf16.mxu1 %v12313_v51 }
 0x3f5   : > { %10112 = vmatmul.mubr.bf16.gmra.mrb[12].mxu1 %v12479_v23  ;;  %v11128_v23 = vld [vmem:[%s14042_s0 + $0x1a8] sm:$0xff]  }
 0x3f6   : > { %10124 = vmatpush3.bf16.msra.mxu1 %v11125_v62  ;;  %10115 = vmatprep.mubr.msk.bf16.mxu1 %vm11385_vm0, %v12313_v51 }
 0x3f7   : > { %10125 = vmatprep.subr.bf16.mxu1 %v12313_v51 }
 0x3fa   : > { %10126 = vmatpush3.bf16.msra.mxu1 %v11126_v52 }
 0x3fb   : > { %10127 = vmatprep.subr.bf16.mxu1 %v12313_v51 }
 0x3fd   : > { %10116 = vmatmul.mubr.bf16.gmra.mrb[16].mxu1 %v12487_v61  ;;  %v11130_v61 = vld [vmem:[%s14042_s0 + $0x1b8] sm:$0xff]  }
 0x3fe   : > { %10128 = vmatpush3.bf16.msra.mxu1 %v11127_v63  ;;  %10135 = vmatprep.mubr.msk.bf16.mxu1 %vm11385_vm0, %v12313_v51 }
 0x3ff   : > { %10129 = vmatprep.subr.bf16.mxu1 %v12313_v51 }
 0x402   : > { %10130 = vmatpush3.bf16.msra.mxu1 %v11128_v23 }
 0x403   : > { %10131 = vmatprep.subr.bf16.mxu1 %v12313_v51 }
 0x406   : > { %10132 = vmatpush3.bf16.msra.mxu1 %v11129_v34 }
 0x407   : > { %10133 = vmatprep.subr.bf16.mxu1 %v12313_v51 }
 0x40a   : > { %10134 = vmatpush3.bf16.msra.mxu1 %v11130_v61  ;;  %v11147_v61 = vld [vmem:[%s14002_s11] sm:$0xff]  }
 0x40b   : > { %10147 = vmatprep.subr.bf16.mxu1 %v12313_v51 }
 0x40d   : > { %10136 = vmatmul.mubr.bf16.vlgmr.msra.gmra.mrb[8].mxu1 %v12474_v58  ;;  %v11134_v58 = vld [vmem:[%s14042_s0 + $0x1d8] sm:$0xff]  }
 0x40e   : > { %10148 = vmatpush3.bf16.msra.mxu1 %v11131_v46  ;;  %10139 = vmatprep.mubr.msk.bf16.mxu1 %vm11385_vm0, %v12313_v51 }
 0x40f   : > { %10149 = vmatprep.subr.bf16.mxu1 %v12313_v51 }
 0x412   : > { %10150 = vmatpush3.bf16.msra.mxu1 %v11132_v47 }
 0x413   : > { %10151 = vmatprep.subr.bf16.mxu1 %v12313_v51 }
 0x415   : > { %10140 = vmatmul.mubr.bf16.gmra.mrb[12].mxu1 %v12482_v35  ;;  %v11137_v35 = vld [vmem:[%s14042_s0 + $0x1e8] sm:$0xff]  }
 0x416   : > { %10152 = vmatpush3.bf16.msra.mxu1 %v11133_v0  ;;  %10143 = vmatprep.mubr.msk.bf16.mxu1 %vm11385_vm0, %v12313_v51 }
 0x417   : > { %10153 = vmatprep.subr.bf16.mxu1 %v12313_v51 }
 0x41a   : > { %10154 = vmatpush3.bf16.msra.mxu1 %v11134_v58 }
 0x41b   : > { %10155 = vmatprep.subr.bf16.mxu1 %v12313_v51 }
 0x41d   : > { %10144 = vmatmul.mubr.bf16.gmra.mrb[16].mxu1 %v12490_v29  ;;  %v11139_v29 = vld [vmem:[%s14042_s0 + $0x1f8] sm:$0xff]   ;;  %s13110_s0 = scalar_lea.vmem %s14047_s6, %s10996_s8 }
 0x41e   : > { %10156 = vmatpush3.bf16.msra.mxu1 %v11135_v40  ;;  %10163 = vmatprep.mubr.msk.bf16.mxu1 %vm11385_vm0, %v12313_v51 }
 0x41f   : > { %10157 = vmatprep.subr.bf16.mxu1 %v12313_v51 }
 0x422   : > { %10158 = vmatpush3.bf16.msra.mxu1 %v11137_v35 }
 0x423   : > { %10159 = vmatprep.subr.bf16.mxu1 %v12313_v51 }
 0x426   : > { %10160 = vmatpush3.bf16.msra.mxu1 %v11138_v57 }
 0x427   : > { %10161 = vmatprep.subr.bf16.mxu1 %v12313_v51 }
 0x42a   : > { %10162 = vmatpush3.bf16.msra.mxu1 %v11139_v29 }
 0x42d   : > { %10164 = vmatmul.mubr.bf16.vlgmr.msra.gmra.mrb[8].mxu1 %v12504_v1 }
 0x42e   : > { %10167 = vmatprep.mubr.msk.bf16.mxu1 %vm11385_vm0, %v12313_v51 }
 0x435   : > { %10168 = vmatmul.mubr.bf16.gmra.mrb[12].mxu1 %v12507_v19 }
 0x436   : > { %10171 = vmatprep.mubr.msk.bf16.mxu1 %vm11385_vm0, %v12313_v51 }
 0x43d   : > { %10172 = vmatmul.mubr.bf16.gmra.mrb[16].mxu1 %v12515_v30 }
 0x500   : > { %v4427_v9 = vpop.f32.mrb[8].mxu1 }
 0x501   : > { %v4463_v1 = vmul.f32 %v8676_v7, %v4427_v9  ;;  %v10165_v10 = vpop.f32.mrb[9].mxu1 }
 0x502   : > { %v4430_v13 = vpop.f32.mrb[10].mxu1 }
 0x503   : > { %v4476_v60 = vadd.f32 %v8677_v14, %v4463_v1  ;;  %v4464_v15 = vmul.f32 %v8676_v7, %v4430_v13  ;;  %v10166_v19 = vpop.f32.mrb[11].mxu1  ;;  %v11148_v13 = vld [vmem:[%s14002_s11 + $0x8] sm:$0xff]  }
 0x505   : > { %v4477_v33 = vadd.f32 %v8677_v14, %v4464_v15  ;;  %v4482_v20 = vmax.f32 %v4476_v60, 0.0 }
 0x507   : > { %v4483_v27 = vmax.f32 %v4477_v33, 0.0 }
 0x508   : > { %v4435_v18 = vpop.f32.mrb[12].mxu1 }
 0x509   : > { %v12817_v30 = vpack.c.bf16 %v4483_v27, %v4482_v20  ;;  %v4465_v16 = vmul.f32 %v8676_v7, %v4435_v18  ;;  %v10169_v3 = vpop.f32.mrb[13].mxu1 }
 0x50a   : > { %v4438_v22 = vpop.f32.mrb[14].mxu1 }
 0x50b   : > { %v4478_v24 = vadd.f32 %v8677_v14, %v4465_v16  ;;  %v4466_v56 = vmul.f32 %v8676_v7, %v4438_v22  ;;  %v10170_v54 = vpop.f32.mrb[15].mxu1  ;;  %v4526_v43 = vshrl.u32 %v12817_v30, 16  ;;  %v4528_v26 = vshll.u32 %v12817_v30, 16 }
 0x50c   : > { %v4779_v12 = vrot.slane %v12817_v30, 1  ;;  %v5053_v39 = vrot.slane %v12817_v30, 2  ;;  %v5327_v62 = vrot.slane %v12817_v30, 3  ;;  %v11149_v54 = vld [vmem:[%s14002_s11 + $0x10] sm:$0xff]  }
 0x50d   : > { %v4479_v17 = vadd.f32 %v8677_v14, %v4466_v56  ;;  %v4913_v28 = vrot.slane %v4526_v43, 1  ;;  %v4914_v31 = vrot.slane %v4528_v26, 2  ;;  %v5187_v5 = vrot.slane %v4526_v43, 2 }
 0x50e   : > { %v5188_v36 = vrot.slane %v4528_v26, 3  ;;  %v5461_v11 = vrot.slane %v4526_v43, 3  ;;  %v4484_v37 = vmax.f32 %v4478_v24, 0.0  ;;  %v5462_v41 = vrot.slane %v4528_v26, 4 }
 0x50f   : > { %v4485_v38 = vmax.f32 %v4479_v17, 0.0  ;;  %v4915_v44 = vor.u32 %v4914_v31, %v4913_v28  ;;  %v4530_v49 = vrot.slane %v4528_v26, 1 }
 0x510   : > { %v4443_v42 = vpop.f32.mrb[16].mxu1  ;;  %v5189_v53 = vor.u32 %v5188_v36, %v5187_v5  ;;  %v5463_v50 = vor.u32 %v5462_v41, %v5461_v11 }
 0x511   : > { %v12821_v2 = vpack.c.bf16 %v4485_v38, %v4484_v37  ;;  %v4467_v25 = vmul.f32 %v8676_v7, %v4443_v42  ;;  %v10173_v48 = vpop.f32.mrb[17].mxu1  ;;  %v4531_v23 = vor.u32 %v4530_v49, %v4526_v43 }
 0x512   : > { %v4446_v6 = vpop.f32.mrb[18].mxu1 }
 0x513   : > { %v4480_v59 = vadd.f32 %v8677_v14, %v4467_v25  ;;  %v4468_v8 = vmul.f32 %v8676_v7, %v4446_v6  ;;  %v10174_v21 = vpop.f32.mrb[19].mxu1  ;;  %v4533_v55 = vshll.u32 %v12821_v2, 16  ;;  %v4537_v4 = vshrl.u32 %v12821_v2, 16  ;;  %v11151_v6 = vld [vmem:[%s14002_s11 + $0x20] sm:$0xff]  }
 0x514   : > { %v4780_v45 = vrot.slane %v12821_v2, 1  ;;  %v5054_v32 = vrot.slane %v12821_v2, 2  ;;  %v5328_v52 = vrot.slane %v12821_v2, 3  ;;  %v11155_v21 = vld [vmem:[%s14002_s11 + $0x80] sm:$0xff]  }
 0x515   : > { %v4481_v63 = vadd.f32 %v8677_v14, %v4468_v8  ;;  %v4535_v34 = vrot.slane %v4533_v55, 1  ;;  %v4916_v46 = vrot.slane %v4537_v4, 1  ;;  %v4917_v0 = vrot.slane %v4533_v55, 2  ;;  %v11154_v8 = vld [vmem:[%s14002_s11 + $0x38] sm:$0xff]  }
 0x516   : > { %v12835_v47 = vsel %vm2521_vm10, %v4779_v12, %v4780_v45  ;;  %v12838_v58 = vsel %vm2784_vm11, %v5053_v39, %v5054_v32  ;;  %v5190_v40 = vrot.slane %v4537_v4, 2  ;;  %v12840_v35 = vmax.f32 %v4480_v59, 0.0  ;;  %v11152_v39 = vld [vmem:[%s14002_s11 + $0x28] sm:$0xff]   ;;  %v11153_v59 = vld [vmem:[%s14002_s11 + $0x30] sm:$0xff]  }
 0x517   : > { %v4487_v57 = vmax.f32 %v4481_v63, 0.0  ;;  %v4536_v29 = vsel %vm2280_vm5, %v4531_v23, %v4535_v34  ;;  %v4918_v7 = vor.u32 %v4917_v0, %v4916_v46  ;;  %v5191_v9 = vrot.slane %v4533_v55, 3  ;;  %v11163_v63 = vld [vmem:[%s14002_s11 + $0xc0] sm:$0xff]   ;;  %v11164_v23 = vld [vmem:[%s14002_s11 + $0xc8] sm:$0xff]   ;;  %v11169_v0 = vld [vmem:[%s14002_s11 + $0xf0] sm:$0xff]  }
 0x518   : > { %10192 = vmatmul.mubr.bf16.vlgmr.msra.gmra.mrb[124].mxu0 %v4536_v29  ;;  %v12844_v14 = vsel %vm3040_vm12, %v5327_v62, %v5328_v52  ;;  %v5464_v1 = vrot.slane %v4537_v4, 3  ;;  %v5465_v60 = vrot.slane %v4533_v55, 4  ;;  %v4539_v16 = vor.u32 %v4537_v4, %v4535_v34  ;;  %v11156_v55 = vld [vmem:[%s14002_s11 + $0x88] sm:$0xff]   ;;  %v12939_v4 = vld [vmem:[#allocation4] sm:$0xff]  ;;  %v11167_v46 = vld [vmem:[%s14002_s11 + $0xe0] sm:$0xff]  }
 0x519   : > { %v12847_v10 = vpack.c.bf16 %v4487_v57, %v12840_v35  ;;  %10204 = vmatpush3.bf16.msra.mxu0 %v11147_v61  ;;  %10195 = vmatprep.mubr.msk.bf16.mxu0 %vm11385_vm0, %v12313_v51  ;;  %v12856_v15 = vsel %vm2646_vm6, %v4915_v44, %v4918_v7  ;;  %v5192_v19 = vor.u32 %v5191_v9, %v5190_v40  ;;  %v11161_v62 = vld [vmem:[%s14002_s11 + $0xb0] sm:$0xff]   ;;  %v11166_v61 = vld [vmem:[%s14002_s11 + $0xd8] sm:$0xff]   ;;  %v11203_v57 = vld [vmem:[%s14005_s14 + $0x40] sm:$0xff]  }
 0x51a   : > { %10205 = vmatprep.subr.bf16.mxu0 %v12313_v51  ;;  %v5466_v24 = vor.u32 %v5465_v60, %v5464_v1  ;;  %v11165_v34 = vld [vmem:[%s14002_s11 + $0xd0] sm:$0xff]   ;;  %v11170_v40 = vld [vmem:[%s14002_s11 + $0xf8] sm:$0xff]   ;;  %v11204_v29 = vld [vmem:[%s14005_s14] sm:$0xff]   ;;  %9513 = vmatprep.subr.bf16.mxu1 %v11203_v57 }
 0x51b   : > { %v4541_v33 = vshll.u32 %v12847_v10, 16  ;;  %v4545_v20 = vshrl.u32 %v12847_v10, 16  ;;  %v4782_v27 = vrot.slane %v12847_v10, 1  ;;  %v5056_v18 = vrot.slane %v12847_v10, 2  ;;  %9514 = vmatpush3.bf16.msra.mxu1 %v11204_v29  ;;  %v11206_v9 = vld [vmem:[%s14005_s14 + $0x48] sm:$0xff]   ;;  %v11209_v60 = vld [vmem:[%s14005_s14 + $0x50] sm:$0xff]  }
 0x51c   : > { %v12863_v3 = vsel %vm2908_vm7, %v5189_v53, %v5192_v19  ;;  %v5330_v22 = vrot.slane %v12847_v10, 3  ;;  %v12889_v38 = vsel %vm3164_vm8, %v5463_v50, %v5466_v24  ;;  %v11150_v53 = vld [vmem:[%s14002_s11 + $0x18] sm:$0xff]   ;;  %v11207_v1 = vld [vmem:[%s14005_s14 + $0x8] sm:$0xff]   ;;  %9515 = vmatprep.subr.bf16.mxu1 %v11206_v9  ;;  %v11217_v57 = vld [vmem:[%s14005_s14 + $0xa0] sm:$0xff]  }
 0x51d   : > { %10206 = vmatpush3.bf16.msra.mxu0 %v11148_v13  ;;  %v4543_v56 = vrot.slane %v4541_v33, 1  ;;  %v12872_v43 = vsel %vm2521_vm10, %v4780_v45, %v4782_v27  ;;  %v4920_v26 = vrot.slane %v4545_v20, 1  ;;  %v4921_v17 = vrot.slane %v4541_v33, 2  ;;  %v11157_v45 = vld [vmem:[%s14002_s11 + $0x90] sm:$0xff]   ;;  %v11202_v10 = vld [vmem:[%s14002_s11 + $0x1f8] sm:$0xff]   ;;  %v11230_v9 = vld [vmem:[%s14005_s14 + $0xc0] sm:$0xff]  }
 0x51e   : > { %10207 = vmatprep.subr.bf16.mxu0 %v12313_v51  ;;  %v12878_v28 = vsel %vm2784_vm11, %v5054_v32, %v5056_v18  ;;  %v5194_v31 = vrot.slane %v4545_v20, 2  ;;  %v5195_v5 = vrot.slane %v4541_v33, 3  ;;  %v12883_v36 = vsel %vm3040_vm12, %v5328_v52, %v5330_v22  ;;  %v11162_v52 = vld [vmem:[%s14002_s11 + $0xb8] sm:$0xff]   ;;  %v11173_v13 = vld [vmem:[%s14002_s11 + $0x110] sm:$0xff]  }
 0x51f   : > { %v4544_v11 = vsel %vm2280_vm5, %v4539_v16, %v4543_v56  ;;  %v12886_v37 = vor.u32 %v4921_v17, %v4920_v26  ;;  %v5468_v42 = vrot.slane %v4545_v20, 3  ;;  %v5469_v44 = vrot.slane %v4541_v33, 4  ;;  %9516 = vmatpush3.bf16.msra.mxu1 %v11207_v1  ;;  %v11212_v33 = vld [vmem:[%s14005_s14 + $0x58] sm:$0xff]   ;;  %v11215_v16 = vld [vmem:[%s14005_s14 + $0x60] sm:$0xff]   ;;  %v11177_v26 = vld [vmem:[%s14002_s11 + $0x130] sm:$0xff]  }
 0x520   : > { %10196 = vmatmul.mubr.bf16.gmra.mrb[128].mxu0 %v4544_v11  ;;  %v12891_v41 = vor.u32 %v5195_v5, %v5194_v31  ;;  %v4547_v12 = vor.u32 %v4545_v20, %v4543_v56  ;;  %v4490_v32 = vpack.c.bf16 %v12840_v35, %v12840_v35  ;;  %v11171_v35 = vld [vmem:[%s14002_s11 + $0x100] sm:$0xff]   ;;  %9517 = vmatprep.subr.bf16.mxu1 %v11209_v60  ;;  %v11213_v20 = vld [vmem:[%s14005_s14 + $0x18] sm:$0xff]   ;;  %v11176_v56 = vld [vmem:[%s14002_s11 + $0x128] sm:$0xff]  }
 0x521   : > { %10208 = vmatpush3.bf16.msra.mxu0 %v11149_v54  ;;  %10199 = vmatprep.mubr.msk.bf16.mxu0 %vm11385_vm0, %v12313_v51  ;;  %v12900_v25 = vsel %vm2646_vm6, %v4918_v7, %v12886_v37  ;;  %v12907_v49 = vor.u32 %v5469_v44, %v5468_v42  ;;  %v11172_v7 = vld [vmem:[%s14002_s11 + $0x108] sm:$0xff]   ;;  %v11221_v17 = vld [vmem:[%s14005_s14 + $0x70] sm:$0xff]   ;;  %v11178_v5 = vld [vmem:[%s14002_s11 + $0x138] sm:$0xff]  }
 0x522   : > { %10209 = vmatprep.subr.bf16.mxu0 %v12313_v51  ;;  %v12905_v48 = vsel %vm2908_vm7, %v5192_v19, %v12891_v41  ;;  %v11174_v19 = vld [vmem:[%s14002_s11 + $0x118] sm:$0xff]   ;;  %v11218_v54 = vld [vmem:[%s14005_s14 + $0x68] sm:$0xff]   ;;  %v11222_v31 = vld [vmem:[%s14005_s14 + $0x30] sm:$0xff]  }
 0x523   : > { %v12911_v50 = vsel %vm3164_vm8, %v5466_v24, %v12907_v49  ;;  %v11216_v24 = vld [vmem:[%s14005_s14 + $0x20] sm:$0xff]   ;;  %v11224_v11 = vld [vmem:[%s14005_s14 + $0x78] sm:$0xff]  }
 0x524   : > { %v11179_v42 = vld [vmem:[%s14002_s11 + $0x140] sm:$0xff]   ;;  %v11233_v29 = vld [vmem:[%s13110_s0 + $0xc] ss:$16 sps:$4 sm:$0xff]   ;;  %v11231_v1 = vld [vmem:[%s13110_s0 + $0x8] ss:$16 sps:$4 sm:$0xff]  }
 0x525   : > { %10210 = vmatpush3.bf16.msra.mxu0 %v11150_v53  ;;  %v11226_v44 = vld [vmem:[%s13110_s0] ss:$16 sps:$4 sm:$0xff]   ;;  %v11228_v53 = vld [vmem:[%s13110_s0 + $0x4] ss:$16 sps:$4 sm:$0xff]   ;;  %v11239_v60 = vld [vmem:[%s13110_s0 + $0x28] ss:$16 sps:$4 sm:$0xff]  }
 0x526   : > { %10211 = vmatprep.subr.bf16.mxu0 %v12313_v51  ;;  %6042 = vmatprep.mubr.bf16.mxu1 %v11228_v53 }
 0x528   : > { %10200 = vmatmul.mubr.bf16.gmra.mrb[132].mxu0 %v4547_v12  ;;  %v11236_v12 = vld [vmem:[%s13110_s0 + $0x20] ss:$16 sps:$4 sm:$0xff]  }
 0x529   : > { %10212 = vmatpush3.bf16.msra.mxu0 %v11151_v6  ;;  %10219 = vmatprep.mubr.msk.bf16.mxu0 %vm11385_vm0, %v12313_v51  ;;  %v11234_v6 = vld [vmem:[%s13110_s0 + $0x24] ss:$16 sps:$4 sm:$0xff]  }
 0x52a   : > { %10213 = vmatprep.subr.bf16.mxu0 %v12313_v51 }
 0x52d   : > { %10214 = vmatpush3.bf16.msra.mxu0 %v11152_v39  ;;  %v11182_v39 = vld [vmem:[%s14002_s11 + $0x158] sm:$0xff]  }
 0x52e   : > { %10215 = vmatprep.subr.bf16.mxu0 %v12313_v51 }
 0x531   : > { %10216 = vmatpush3.bf16.msra.mxu0 %v11153_v59  ;;  %v11240_v59 = vld [vmem:[%s13110_s0 + $0x44] ss:$16 sps:$4 sm:$0xff]  }
 0x532   : > { %10217 = vmatprep.subr.bf16.mxu0 %v12313_v51 }
 0x535   : > { %10218 = vmatpush3.bf16.msra.mxu0 %v11154_v8  ;;  %v11183_v8 = vld [vmem:[%s14002_s11 + $0x160] sm:$0xff]  }
 0x536   : > { %10231 = vmatprep.subr.bf16.mxu0 %v12313_v51  ;;  %v11158_v51 = vld [vmem:[%s14002_s11 + $0x98] sm:$0xff]  }
 0x538   : > { %10220 = vmatmul.mubr.bf16.vlgmr.msra.gmra.mrb[124].mxu0 %v12817_v30  ;;  %v11159_v30 = vld [vmem:[%s14002_s11 + $0xa0] sm:$0xff]  }
 0x539   : > { %10232 = vmatpush3.bf16.msra.mxu0 %v11155_v21  ;;  %10223 = vmatprep.mubr.msk.bf16.mxu0 %vm11385_vm0, %v12939_v4  ;;  %v11184_v21 = vld [vmem:[%s14002_s11 + $0x168] sm:$0xff]  }
 0x53a   : > { %10233 = vmatprep.subr.bf16.mxu0 %v12939_v4 }
 0x53d   : > { %10234 = vmatpush3.bf16.msra.mxu0 %v11156_v55  ;;  %v5725_v55 = vld [vmem:[%s13110_s0 + $0x60] sm:$0x77] }
 0x53e   : > { %10235 = vmatprep.subr.bf16.mxu0 %v12939_v4 }
 0x540   : > { %10224 = vmatmul.mubr.bf16.gmra.mrb[128].mxu0 %v12821_v2  ;;  %v11160_v2 = vld [vmem:[%s14002_s11 + $0xa8] sm:$0xff]  }
 0x541   : > { %10236 = vmatpush3.bf16.msra.mxu0 %v11157_v45  ;;  %10227 = vmatprep.mubr.msk.bf16.mxu0 %vm11385_vm0, %v12939_v4  ;;  %v11185_v45 = vld [vmem:[%s14002_s11 + $0x170] sm:$0xff]  }
 0x542   : > { %10237 = vmatprep.subr.bf16.mxu0 %v12939_v4 }
 0x545   : > { %10238 = vmatpush3.bf16.msra.mxu0 %v11158_v51  ;;  %v8869_v51 = vcombine.high %v5725_v55, %v5725_v55 }
 0x546   : > { %10239 = vmatprep.subr.bf16.mxu0 %v12939_v4 }
 0x548   : > { %10228 = vmatmul.mubr.bf16.gmra.mrb[132].mxu0 %v4490_v32  ;;  %v11187_v32 = vld [vmem:[%s14002_s11 + $0x180] sm:$0xff]  }
 0x549   : > { %10240 = vmatpush3.bf16.msra.mxu0 %v11159_v30  ;;  %10247 = vmatprep.mubr.msk.bf16.mxu0 %vm11385_vm0, %v12939_v4  ;;  %v11186_v30 = vld [vmem:[%s14002_s11 + $0x178] sm:$0xff]  }
 0x54a   : > { %10241 = vmatprep.subr.bf16.mxu0 %v12939_v4 }
 0x54d   : > { %10242 = vmatpush3.bf16.msra.mxu0 %v11160_v2  ;;  %v11188_v2 = vld [vmem:[%s14002_s11 + $0x188] sm:$0xff]  }
 0x54e   : > { %10243 = vmatprep.subr.bf16.mxu0 %v12939_v4 }
 0x551   : > { %10244 = vmatpush3.bf16.msra.mxu0 %v11161_v62  ;;  %v11189_v62 = vld [vmem:[%s14002_s11 + $0x190] sm:$0xff]  }
 0x552   : > { %10245 = vmatprep.subr.bf16.mxu0 %v12939_v4 }
 0x555   : > { %10246 = vmatpush3.bf16.msra.mxu0 %v11162_v52  ;;  %v11191_v52 = vld [vmem:[%s14002_s11 + $0x1a0] sm:$0xff]  }
 0x556   : > { %10259 = vmatprep.subr.bf16.mxu0 %v12939_v4 }
 0x558   : > { %10248 = vmatmul.mubr.bf16.vlgmr.msra.gmra.mrb[124].mxu0 %v12835_v47  ;;  %v11168_v47 = vld [vmem:[%s14002_s11 + $0xe8] sm:$0xff]  }
 0x559   : > { %10260 = vmatpush3.bf16.msra.mxu0 %v11163_v63  ;;  %10251 = vmatprep.mubr.msk.bf16.mxu0 %vm11385_vm0, %v12939_v4  ;;  %v11193_v63 = vld [vmem:[%s14002_s11 + $0x1b0] sm:$0xff]  }
 0x55a   : > { %10261 = vmatprep.subr.bf16.mxu0 %v12939_v4 }
 0x55d   : > { %10262 = vmatpush3.bf16.msra.mxu0 %v11164_v23  ;;  %v11195_v23 = vld [vmem:[%s14002_s11 + $0x1c0] sm:$0xff]  }
 0x55e   : > { %10263 = vmatprep.subr.bf16.mxu0 %v12939_v4 }
 0x560   : > { %10252 = vmatmul.mubr.bf16.gmra.mrb[128].mxu0 %v12872_v43  ;;  %v11219_v43 = vld [vmem:[%s14005_s14 + $0x28] sm:$0xff]  }
 0x561   : > { %10264 = vmatpush3.bf16.msra.mxu0 %v11165_v34  ;;  %10255 = vmatprep.mubr.msk.bf16.mxu0 %vm11385_vm0, %v12939_v4  ;;  %v11196_v34 = vld [vmem:[%s14002_s11 + $0x1c8] sm:$0xff]  }
 0x562   : > { %10265 = vmatprep.subr.bf16.mxu0 %v12939_v4 }
 0x565   : > { %10266 = vmatpush3.bf16.msra.mxu0 %v11166_v61  ;;  %v11197_v61 = vld [vmem:[%s14002_s11 + $0x1d0] sm:$0xff]  }
 0x566   : > { %10267 = vmatprep.subr.bf16.mxu0 %v12939_v4 }
 0x568   : > { %10256 = vmatmul.mubr.bf16.gmra.mrb[132].mxu0 %v4782_v27  ;;  %v11175_v27 = vld [vmem:[%s14002_s11 + $0x120] sm:$0xff]  }
 0x569   : > { %10268 = vmatpush3.bf16.msra.mxu0 %v11167_v46  ;;  %10275 = vmatprep.mubr.msk.bf16.mxu0 %vm11385_vm0, %v12939_v4  ;;  %v11199_v46 = vld [vmem:[%s14002_s11 + $0x1e0] sm:$0xff]  }
 0x56a   : > { %10269 = vmatprep.subr.bf16.mxu0 %v12939_v4 }
 0x56d   : > { %10270 = vmatpush3.bf16.msra.mxu0 %v11168_v47  ;;  %v11201_v47 = vld [vmem:[%s14002_s11 + $0x1f0] sm:$0xff]  }
 0x56e   : > { %10271 = vmatprep.subr.bf16.mxu0 %v12939_v4 }
 0x571   : > { %10272 = vmatpush3.bf16.msra.mxu0 %v11169_v0  ;;  %v11386_v0 = vmov 0  }
 0x572   : > { %10273 = vmatprep.subr.bf16.mxu0 %v12939_v4 }
 0x575   : > { %10274 = vmatpush3.bf16.msra.mxu0 %v11170_v40  ;;  %v11208_v40 = vld [vmem:[%s14005_s14 + $0x88] sm:$0xff]  }
 0x576   : > { %10287 = vmatprep.subr.bf16.mxu0 %v12939_v4 }
 0x578   : > { %10276 = vmatmul.mubr.bf16.vlgmr.msra.gmra.mrb[124].mxu0 %v12856_v15  ;;  %v11210_v15 = vld [vmem:[%s14005_s14 + $0x10] sm:$0xff]  }
 0x579   : > { %10288 = vmatpush3.bf16.msra.mxu0 %v11171_v35  ;;  %10279 = vmatprep.mubr.msk.bf16.mxu0 %vm11385_vm0, %v12939_v4  ;;  %v11211_v35 = vld [vmem:[%s14005_s14 + $0x90] sm:$0xff]  }
 0x57a   : > { %10289 = vmatprep.subr.bf16.mxu0 %v12939_v4  ;;  %9518 = vmatpush3.bf16.msra.mxu1 %v11210_v15  ;;  %v11243_v15 = vld [vmem:[%s13110_s0 + $0x4c] ss:$16 sps:$4 sm:$0xff]  }
 0x57b   : > { %9519 = vmatprep.subr.bf16.mxu1 %v11212_v33  ;;  %v11245_v33 = vld [vmem:[%s13110_s0 + $0x48] ss:$16 sps:$4 sm:$0xff]  }
 0x57d   : > { %10290 = vmatpush3.bf16.msra.mxu0 %v11172_v7  ;;  %v11223_v7 = vld [vmem:[%s14005_s14 + $0xb0] sm:$0xff]  }
 0x57e   : > { %10291 = vmatprep.subr.bf16.mxu0 %v12939_v4  ;;  %9520 = vmatpush3.bf16.msra.mxu1 %v11213_v20 }
 0x57f   : > { %9521 = vmatprep.subr.bf16.mxu1 %v11215_v16 }
 0x580   : > { %10280 = vmatmul.mubr.bf16.gmra.mrb[128].mxu0 %v12900_v25  ;;  %v11180_v25 = vld [vmem:[%s14002_s11 + $0x148] sm:$0xff]  }
 0x581   : > { %10292 = vmatpush3.bf16.msra.mxu0 %v11173_v13  ;;  %10283 = vmatprep.mubr.msk.bf16.mxu0 %vm11385_vm0, %v12939_v4  ;;  %v11237_v13 = vld [vmem:[%s13110_s0 + $0x2c] ss:$16 sps:$4 sm:$0xff]  }
 0x582   : > { %10293 = vmatprep.subr.bf16.mxu0 %v12939_v4  ;;  %9522 = vmatpush3.bf16.msra.mxu1 %v11216_v24 }
 0x583   : > { %9523 = vmatprep.subr.bf16.mxu1 %v11218_v54 }
 0x585   : > { %10294 = vmatpush3.bf16.msra.mxu0 %v11174_v19  ;;  %v5726_v19 = vld [vmem:[%s13110_s0 + $0x68] sm:$0x77] }
 0x586   : > { %10295 = vmatprep.subr.bf16.mxu0 %v12939_v4  ;;  %9524 = vmatpush3.bf16.msra.mxu1 %v11219_v43  ;;  %v8871_v20 = vcombine.high %v5726_v19, %v5726_v19 }
 0x587   : > { %9525 = vmatprep.subr.bf16.mxu1 %v11221_v17 }
 0x588   : > { %10284 = vmatmul.mubr.bf16.gmra.mrb[132].mxu0 %v12886_v37  ;;  %v11225_v37 = vld [vmem:[%s14005_s14 + $0x38] sm:$0xff]  }
 0x589   : > { %10296 = vmatpush3.bf16.msra.mxu0 %v11175_v27  ;;  %10303 = vmatprep.mubr.msk.bf16.mxu0 %vm11385_vm0, %v12939_v4  ;;  %v8870_v27 = vcombine.low %v5726_v19, %v5726_v19 }
 0x58a   : > { %10297 = vmatprep.subr.bf16.mxu0 %v12939_v4  ;;  %9526 = vmatpush3.bf16.msra.mxu1 %v11222_v31 }
 0x58b   : > { %9527 = vmatprep.subr.bf16.mxu1 %v11224_v11 }
 0x58d   : > { %10298 = vmatpush3.bf16.msra.mxu0 %v11176_v56 }
 0x58e   : > { %10299 = vmatprep.subr.bf16.mxu0 %v12939_v4  ;;  %9528 = vmatpush3.bf16.msra.mxu1 %v11225_v37 }
 0x58f   : > { %10399 = vmatprep.subr.bf16.mxu1 %v12939_v4 }
 0x591   : > { %10300 = vmatpush3.bf16.msra.mxu0 %v11177_v26  ;;  %6043 = vmatmul.mubr.bf16.vlgmr.msra.gmra.mrb[20].mxu1 %v11226_v44 }
 0x592   : > { %10301 = vmatprep.subr.bf16.mxu0 %v12939_v4  ;;  %6050 = vmatprep.mubr.bf16.mxu1 %v11234_v6 }
 0x595   : > { %10302 = vmatpush3.bf16.msra.mxu0 %v11178_v5 }
 0x596   : > { %10315 = vmatprep.subr.bf16.mxu0 %v12939_v4 }
 0x598   : > { %10304 = vmatmul.mubr.bf16.vlgmr.msra.gmra.mrb[124].mxu0 %v12838_v58  ;;  %v11181_v58 = vld [vmem:[%s14002_s11 + $0x150] sm:$0xff]  }
 0x599   : > { %10316 = vmatpush3.bf16.msra.mxu0 %v11179_v42  ;;  %10307 = vmatprep.mubr.msk.bf16.mxu0 %vm11385_vm0, %v12939_v4 }
 0x59a   : > { %10317 = vmatprep.subr.bf16.mxu0 %v12939_v4  ;;  %6051 = vmatmul.mubr.bf16.gmra.mrb[24].mxu1 %v11236_v12 }
 0x59b   : > { %6058 = vmatprep.mubr.bf16.mxu1 %v11240_v59 }
 0x59d   : > { %10318 = vmatpush3.bf16.msra.mxu0 %v11180_v25 }
 0x59e   : > { %10319 = vmatprep.subr.bf16.mxu0 %v12939_v4 }
 0x5a0   : > { %10308 = vmatmul.mubr.bf16.gmra.mrb[128].mxu0 %v12878_v28  ;;  %v11242_v28 = vld [vmem:[%s13110_s0 + $0x40] ss:$16 sps:$4 sm:$0xff]  }
 0x5a1   : > { %10320 = vmatpush3.bf16.msra.mxu0 %v11181_v58  ;;  %10311 = vmatprep.mubr.msk.bf16.mxu0 %vm11385_vm0, %v12939_v4 }
 0x5a2   : > { %10321 = vmatprep.subr.bf16.mxu0 %v12939_v4  ;;  %6059 = vmatmul.mubr.bf16.gmra.mrb[28].mxu1 %v11242_v28 }
 0x5a3   : > { %6066 = vmatprep.mubr.bf16.mxu1 %v8869_v51  ;;  %v11252_v51 = vld [vmem:[%s14008_s17 + $0x30] sm:$0xff]  }
 0x5a5   : > { %10322 = vmatpush3.bf16.msra.mxu0 %v11182_v39 }
 0x5a6   : > { %10323 = vmatprep.subr.bf16.mxu0 %v12939_v4 }
 0x5a8   : > { %10312 = vmatmul.mubr.bf16.gmra.mrb[132].mxu0 %v5056_v18  ;;  %v8868_v18 = vcombine.low %v5725_v55, %v5725_v55  ;;  %v11250_v55 = vld [vmem:[%s14008_s17 + $0x20] sm:$0xff]  }
 0x5a9   : > { %10324 = vmatpush3.bf16.msra.mxu0 %v11183_v8  ;;  %10331 = vmatprep.mubr.msk.bf16.mxu0 %vm11385_vm0, %v12939_v4 }
 0x5aa   : > { %10325 = vmatprep.subr.bf16.mxu0 %v12939_v4  ;;  %6067 = vmatmul.mubr.bf16.gmra.mrb[32].mxu1 %v8868_v18  ;;  %v11253_v18 = vld [vmem:[%s14008_s17 + $0x38] sm:$0xff]  }
 0x5ab   : > { %10407 = vmatprep.mubr.msk.bf16.mxu1 %vm11385_vm0, %v12939_v4  ;;  %10400 = vmatpush3.bf16.msra.mxu1 %v11250_v55 }
 0x5ac   : > { %10401 = vmatprep.subr.bf16.mxu1 %v12939_v4 }
 0x5ad   : > { %10326 = vmatpush3.bf16.msra.mxu0 %v11184_v21 }
 0x5ae   : > { %10327 = vmatprep.subr.bf16.mxu0 %v12939_v4 }
 0x5b1   : > { %10328 = vmatpush3.bf16.msra.mxu0 %v11185_v45  ;;  %v11251_v45 = vld [vmem:[%s14008_s17 + $0x28] sm:$0xff]  }
 0x5b2   : > { %10329 = vmatprep.subr.bf16.mxu0 %v12939_v4  ;;  %10402 = vmatpush3.bf16.msra.mxu1 %v11251_v45 }
 0x5b3   : > { %10403 = vmatprep.subr.bf16.mxu1 %v12939_v4 }
 0x5b5   : > { %10330 = vmatpush3.bf16.msra.mxu0 %v11186_v30  ;;  %v8854_v30 = vld [vmem:[%s14003_s12] ss:$0 sm:$0xff] }
 0x5b6   : > { %10343 = vmatprep.subr.bf16.mxu0 %v12939_v4  ;;  %10404 = vmatpush3.bf16.msra.mxu1 %v11252_v51 }
 0x5b7   : > { %10405 = vmatprep.subr.bf16.mxu1 %v12939_v4 }
 0x5b8   : > { %10332 = vmatmul.mubr.bf16.vlgmr.msra.gmra.mrb[124].mxu0 %v12863_v3  ;;  %v11190_v3 = vld [vmem:[%s14002_s11 + $0x198] sm:$0xff]  }
 0x5b9   : > { %10344 = vmatpush3.bf16.msra.mxu0 %v11187_v32  ;;  %10335 = vmatprep.mubr.msk.bf16.mxu0 %vm11385_vm0, %v12939_v4 }
 0x5ba   : > { %10345 = vmatprep.subr.bf16.mxu0 %v12939_v4  ;;  %10406 = vmatpush3.bf16.msra.mxu1 %v11253_v18 }
 0x5bb   : > { %10411 = vmatprep.subr.bf16.mxu1 %v12939_v4 }
 0x5bd   : > { %10346 = vmatpush3.bf16.msra.mxu0 %v11188_v2  ;;  %v8855_v2 = vld [vmem:[%s14004_s13] ss:$0 sm:$0xff] }
 0x5be   : > { %10347 = vmatprep.subr.bf16.mxu0 %v12939_v4 }
 0x5c0   : > { %10336 = vmatmul.mubr.bf16.gmra.mrb[128].mxu0 %v12905_v48  ;;  %v11192_v48 = vld [vmem:[%s14002_s11 + $0x1a8] sm:$0xff]  }
 0x5c1   : > { %10348 = vmatpush3.bf16.msra.mxu0 %v11189_v62  ;;  %10339 = vmatprep.mubr.msk.bf16.mxu0 %vm11385_vm0, %v12939_v4 }
 0x5c2   : > { %10349 = vmatprep.subr.bf16.mxu0 %v12939_v4 }
 0x5c5   : > { %10350 = vmatpush3.bf16.msra.mxu0 %v11190_v3 }
 0x5c6   : > { %10351 = vmatprep.subr.bf16.mxu0 %v12939_v4 }
 0x5c8   : > { %10340 = vmatmul.mubr.bf16.gmra.mrb[132].mxu0 %v12891_v41  ;;  %v11194_v41 = vld [vmem:[%s14002_s11 + $0x1b8] sm:$0xff]  }
 0x5c9   : > { %10352 = vmatpush3.bf16.msra.mxu0 %v11191_v52  ;;  %10359 = vmatprep.mubr.msk.bf16.mxu0 %vm11385_vm0, %v12939_v4 }
 0x5ca   : > { %10353 = vmatprep.subr.bf16.mxu0 %v12939_v4 }
 0x5cd   : > { %10354 = vmatpush3.bf16.msra.mxu0 %v11192_v48 }
 0x5ce   : > { %10355 = vmatprep.subr.bf16.mxu0 %v12939_v4 }
 0x5d1   : > { %10356 = vmatpush3.bf16.msra.mxu0 %v11193_v63 }
 0x5d2   : > { %10357 = vmatprep.subr.bf16.mxu0 %v12939_v4 }
 0x5d5   : > { %10358 = vmatpush3.bf16.msra.mxu0 %v11194_v41 }
 0x5d6   : > { %10371 = vmatprep.subr.bf16.mxu0 %v12939_v4 }
 0x5d8   : > { %10360 = vmatmul.mubr.bf16.vlgmr.msra.gmra.mrb[124].mxu0 %v12844_v14  ;;  %v11198_v14 = vld [vmem:[%s14002_s11 + $0x1d8] sm:$0xff]  }
 0x5d9   : > { %10372 = vmatpush3.bf16.msra.mxu0 %v11195_v23  ;;  %10363 = vmatprep.mubr.msk.bf16.mxu0 %vm11385_vm0, %v12939_v4 }
 0x5da   : > { %10373 = vmatprep.subr.bf16.mxu0 %v12939_v4 }
 0x5dd   : > { %10374 = vmatpush3.bf16.msra.mxu0 %v11196_v34 }
 0x5de   : > { %10375 = vmatprep.subr.bf16.mxu0 %v12939_v4 }
 0x5e0   : > { %10364 = vmatmul.mubr.bf16.gmra.mrb[128].mxu0 %v12883_v36  ;;  %v11200_v36 = vld [vmem:[%s14002_s11 + $0x1e8] sm:$0xff]  }
 0x5e1   : > { %10376 = vmatpush3.bf16.msra.mxu0 %v11197_v61  ;;  %10367 = vmatprep.mubr.msk.bf16.mxu0 %vm11385_vm0, %v12939_v4 }
 0x5e2   : > { %10377 = vmatprep.subr.bf16.mxu0 %v12939_v4 }
 0x5e5   : > { %10378 = vmatpush3.bf16.msra.mxu0 %v11198_v14 }
 0x5e6   : > { %10379 = vmatprep.subr.bf16.mxu0 %v12939_v4 }
 0x5e8   : > { %10368 = vmatmul.mubr.bf16.gmra.mrb[132].mxu0 %v5330_v22  ;;  %v11205_v22 = vld [vmem:[%s14005_s14 + $0x80] sm:$0xff]  }
 0x5e9   : > { %10380 = vmatpush3.bf16.msra.mxu0 %v11199_v46  ;;  %10387 = vmatprep.mubr.msk.bf16.mxu0 %vm11385_vm0, %v12939_v4 }
 0x5ea   : > { %10381 = vmatprep.subr.bf16.mxu0 %v12939_v4 }
 0x5ed   : > { %10382 = vmatpush3.bf16.msra.mxu0 %v11200_v36 }
 0x5ee   : > { %10383 = vmatprep.subr.bf16.mxu0 %v12939_v4 }
 0x5f1   : > { %10384 = vmatpush3.bf16.msra.mxu0 %v11201_v47 }
 0x5f2   : > { %10385 = vmatprep.subr.bf16.mxu0 %v12939_v4 }
 0x5f5   : > { %10386 = vmatpush3.bf16.msra.mxu0 %v11202_v10 }
 0x5f6   : > { %6074 = vmatprep.subr.bf16.mxu0 %v11386_v0 }
 0x5f8   : > { %10388 = vmatmul.mubr.bf16.vlgmr.msra.gmra.mrb[124].mxu0 %v12889_v38  ;;  %v11214_v38 = vld [vmem:[%s14005_s14 + $0x98] sm:$0xff]  }
 0x5f9   : > { %6075 = vmatpush1.bf16.msra.mxu0 %v11205_v22  ;;  %10391 = vmatprep.mubr.msk.bf16.mxu0 %vm11385_vm0, %v12939_v4 }
 0x5fa   : > { %6076 = vmatprep.subr.bf16.mxu0 %v11386_v0 }
 0x5fd   : > { %6077 = vmatpush1.bf16.msra.mxu0 %v11208_v40 }
 0x5fe   : > { %6078 = vmatprep.subr.bf16.mxu0 %v11386_v0 }
 0x600   : > { %10392 = vmatmul.mubr.bf16.gmra.mrb[128].mxu0 %v12911_v50  ;;  %v11220_v50 = vld [vmem:[%s14005_s14 + $0xa8] sm:$0xff]  }
 0x601   : > { %6079 = vmatpush1.bf16.msra.mxu0 %v11211_v35  ;;  %10395 = vmatprep.mubr.msk.bf16.mxu0 %vm11385_vm0, %v12939_v4 }
 0x602   : > { %6080 = vmatprep.subr.bf16.mxu0 %v11386_v0 }
 0x605   : > { %6081 = vmatpush1.bf16.msra.mxu0 %v11214_v38 }
 0x606   : > { %6082 = vmatprep.subr.bf16.mxu0 %v11386_v0 }
 0x608   : > { %10396 = vmatmul.mubr.bf16.gmra.mrb[132].mxu0 %v12907_v49  ;;  %v11229_v49 = vld [vmem:[%s14005_s14 + $0xb8] sm:$0xff]  }
 0x609   : > { %6083 = vmatpush1.bf16.msra.mxu0 %v11217_v57  ;;  %8897 = vmatprep.mubr.msk.bf16.mxu0 %vm5997_vm13, %v11233_v29 }
 0x60a   : > { %6084 = vmatprep.subr.bf16.mxu0 %v11386_v0 }
 0x60d   : > { %6085 = vmatpush1.bf16.msra.mxu0 %v11220_v50 }
 0x60e   : > { %6086 = vmatprep.subr.bf16.mxu0 %v11386_v0 }
 0x611   : > { %6087 = vmatpush1.bf16.msra.mxu0 %v11223_v7 }
 0x612   : > { %6088 = vmatprep.subr.bf16.mxu0 %v11386_v0 }
 0x615   : > { %6089 = vmatpush1.bf16.msra.mxu0 %v11229_v49 }
 0x616   : > { %6090 = vmatprep.subr.bf16.mxu0 %v11386_v0 }
 0x619   : > { %6091 = vmatpush1.bf16.msra.mxu0 %v11230_v9 }
 0x61a   : > { %10471 = vmatprep.subr.bf16.mxu0 %v12939_v4 }
 0x61c   : > { %6107 = vmatmul.mubr.bf16.vlgmr.msra.gmra.mrb[136].mxu0 %v11231_v1 }
 0x61d   : > { %8898 = vmatprep.mubr.msk.bf16.mxu0 %vm5997_vm13, %v11237_v13 }
 0x624   : > { %6115 = vmatmul.mubr.bf16.gmra.mrb[140].mxu0 %v11239_v60 }
 0x625   : > { %8899 = vmatprep.mubr.msk.bf16.mxu0 %vm5997_vm13, %v11243_v15 }
 0x62c   : > { %6123 = vmatmul.mubr.bf16.gmra.mrb[144].mxu0 %v11245_v33 }
 0x62d   : > { %8900 = vmatprep.mubr.msk.bf16.mxu0 %vm5997_vm13, %v8871_v20 }
 0x634   : > { %6131 = vmatmul.mubr.bf16.gmra.mrb[148].mxu0 %v8870_v27 }
 0x635   : > { %10487 = vmatprep.mubr.msk.bf16.mxu0 %vm11385_vm0, %v12939_v4 }
 0x664   : > { %v9529_v16 = vpop.f32.mrb[20].mxu1 }
 0x665   : > { %v9530_v24 = vpop.f32.mrb[21].mxu1 }
 0x666   : > { %v13295_v56 = vadd.f32 %v9530_v24, %v9529_v16  ;;  %v9532_v54 = vpop.f32.mrb[22].mxu1 }
 0x667   : > { %v9533_v43 = vpop.f32.mrb[23].mxu1 }
 0x668   : > { %v13297_v26 = vadd.f32 %v9533_v43, %v9532_v54 }
 0x66d   : > { %v9535_v17 = vpop.f32.mrb[24].mxu1 }
 0x66e   : > { %v9536_v31 = vpop.f32.mrb[25].mxu1 }
 0x66f   : > { %v9538_v5 = vpop.f32.mrb[26].mxu1  ;;  %v13299_v37 = vadd.f32 %v9536_v31, %v9535_v17 }
 0x670   : > { %v9539_v11 = vpop.f32.mrb[27].mxu1 }
 0x671   : > { %v13301_v42 = vadd.f32 %v9539_v11, %v9538_v5 }
 0x675   : > { %v9541_v44 = vpop.f32.mrb[28].mxu1 }
 0x676   : > { %v9542_v53 = vpop.f32.mrb[29].mxu1 }
 0x677   : > { %v9544_v25 = vpop.f32.mrb[30].mxu1  ;;  %v13303_v58 = vadd.f32 %v9542_v53, %v9541_v44 }
 0x678   : > { %v9545_v6 = vpop.f32.mrb[31].mxu1 }
 0x679   : > { %v13305_v12 = vadd.f32 %v9545_v6, %v9544_v25 }
 0x67d   : > { %v9547_v39 = vpop.f32.mrb[32].mxu1 }
 0x67e   : > { %v9548_v59 = vpop.f32.mrb[33].mxu1 }
 0x67f   : > { %v9550_v8 = vpop.f32.mrb[34].mxu1  ;;  %v13307_v21 = vadd.f32 %v9548_v59, %v9547_v39 }
 0x680   : > { %v9551_v28 = vpop.f32.mrb[35].mxu1 }
 0x6cb   : > { %v5557_v32 = vpop.f32.mrb[124].mxu0 }
 0x6cc   : > { %v5591_v62 = vmul.f32 %v8854_v30, %v5557_v32  ;;  %v10389_v3 = vpop.f32.mrb[125].mxu0 }
 0x6cd   : > { %v5560_v52 = vpop.f32.mrb[126].mxu0 }
 0x6ce   : > { %v5603_v48 = vadd.f32 %v8855_v2, %v5591_v62  ;;  %v5592_v63 = vmul.f32 %v8854_v30, %v5560_v52  ;;  %v10390_v41 = vpop.f32.mrb[127].mxu0 }
 0x6d0   : > { %v5608_v23 = vmax.f32 %v5603_v48, 0.0  ;;  %v5604_v34 = vadd.f32 %v8855_v2, %v5592_v63 }
 0x6d2   : > { %5613 = vst [vmem:[#allocation2] sm:$0xff] %v5608_v23  ;;  %v5609_v61 = vmax.f32 %v5604_v34, 0.0 }
 0x6d3   : > { %v5565_v4 = vpop.f32.mrb[128].mxu0 }
 0x6d4   : > { %5614 = vst [vmem:[#allocation2 + $0x8] sm:$0xff] %v5609_v61  ;;  %v5593_v14 = vmul.f32 %v8854_v30, %v5565_v4  ;;  %v10393_v46 = vpop.f32.mrb[129].mxu0 }
 0x6d5   : > { %v5568_v36 = vpop.f32.mrb[130].mxu0 }
 0x6d6   : > { %v5605_v47 = vadd.f32 %v8855_v2, %v5593_v14  ;;  %v5594_v10 = vmul.f32 %v8854_v30, %v5568_v36  ;;  %v10394_v22 = vpop.f32.mrb[131].mxu0 }
 0x6d8   : > { %v5610_v0 = vmax.f32 %v5605_v47, 0.0  ;;  %v5606_v40 = vadd.f32 %v8855_v2, %v5594_v10 }
 0x6d9   : > { %v5618_v35 = vld [vmem:[#allocation2] sm:$0xf]  ;;  %v5628_v38 = vld [vmem:[#allocation2 + $0x4] sm:$0xf] }
 0x6da   : > { %5615 = vst [vmem:[#allocation2 + $0x10] sm:$0xff] %v5610_v0  ;;  %v5611_v57 = vmax.f32 %v5606_v40, 0.0  ;;  %v5620_v29 = vsel %vm5619_vm14, %v5618_v35, -inf  ;;  %v5629_v50 = vsel %vm5619_vm14, %v5628_v38, -inf }
 0x6db   : > { %v5573_v7 = vpop.f32.mrb[132].mxu0  ;;  %v5621_v49 = vrot.slane %v5620_v29, 4  ;;  %v5630_v9 = vrot.slane %v5629_v50, 4  ;;  %v5637_v1 = vld [vmem:[#allocation2 + $0x8] sm:$0xf] }
 0x6dc   : > { %5616 = vst [vmem:[#allocation2 + $0x18] sm:$0xff] %v5611_v57  ;;  %v5595_v13 = vmul.f32 %v8854_v30, %v5573_v7  ;;  %v10397_v60 = vpop.f32.mrb[133].mxu0  ;;  %v5638_v15 = vsel %vm5619_vm14, %v5637_v1, -inf  ;;  %v5646_v19 = vld [vmem:[#allocation2 + $0xc] sm:$0xf] }
 0x6dd   : > { %v5576_v33 = vpop.f32.mrb[134].mxu0  ;;  %v5622_v20 = vmax.f32 %v5620_v29, %v5621_v49  ;;  %v5631_v27 = vmax.f32 %v5629_v50, %v5630_v9  ;;  %v5639_v16 = vrot.slane %v5638_v15, 4  ;;  %v5647_v24 = vsel %vm5619_vm14, %v5646_v19, -inf }
 0x6de   : > { %v5607_v54 = vadd.f32 %v8855_v2, %v5595_v13  ;;  %v10398_v43 = vpop.f32.mrb[135].mxu0  ;;  %v5648_v17 = vrot.slane %v5647_v24, 4 }
 0x6df   : > { %v5623_v31 = vrot.slane %v5622_v20, 2  ;;  %v5632_v5 = vrot.slane %v5631_v27, 2  ;;  %v5640_v11 = vmax.f32 %v5638_v15, %v5639_v16 }
 0x6e0   : > { %v5612_v44 = vmax.f32 %v5607_v54, 0.0  ;;  %v5649_v53 = vmax.f32 %v5647_v24, %v5648_v17 }
 0x6e1   : > { %v5624_v25 = vmax.f32 %v5622_v20, %v5623_v31  ;;  %v5633_v6 = vmax.f32 %v5631_v27, %v5632_v5  ;;  %v5641_v39 = vrot.slane %v5640_v11, 2  ;;  %v5655_v59 = vld [vmem:[#allocation2 + $0x10] sm:$0xf]  ;;  %v5664_v8 = vld [vmem:[#allocation2 + $0x14] sm:$0xf] }
 0x6e2   : > { %5617 = vst [vmem:[#allocation2 + $0x20] sm:$0xff] %v5612_v44  ;;  %v5650_v28 = vrot.slane %v5649_v53, 2  ;;  %v5656_v55 = vsel %vm5619_vm14, %v5655_v59, -inf  ;;  %v5665_v45 = vsel %vm5619_vm14, %v5664_v8, -inf  ;;  %v13344_v31 = vld [vmem:[%s14006_s15] ss:$0 sm:$0xff] }
 0x6e3   : > { %v5625_v51 = vrot.slane %v5624_v25, 1  ;;  %v5634_v18 = vrot.slane %v5633_v6, 1  ;;  %v5642_v30 = vmax.f32 %v5640_v11, %v5641_v39  ;;  %v5657_v32 = vrot.slane %v5656_v55, 4  ;;  %v5673_v2 = vld [vmem:[#allocation2 + $0x18] sm:$0xf] }
 0x6e4   : > { %v5651_v62 = vmax.f32 %v5649_v53, %v5650_v28  ;;  %v5666_v3 = vrot.slane %v5665_v45, 4  ;;  %v5674_v52 = vsel %vm5619_vm14, %v5673_v2, -inf  ;;  %v5682_v48 = vld [vmem:[#allocation2 + $0x1c] sm:$0xf]  ;;  %v13350_v39 = vld [vmem:[%s14007_s16] ss:$0 sm:$0xff] }
 0x6e5   : > { %v5626_v63 = vmax.f32 %v5624_v25, %v5625_v51  ;;  %v5635_v41 = vmax.f32 %v5633_v6, %v5634_v18  ;;  %v5643_v23 = vrot.slane %v5642_v30, 1  ;;  %v5658_v34 = vmax.f32 %v5656_v55, %v5657_v32 }
 0x6e6   : > { %v5652_v61 = vrot.slane %v5651_v62, 1  ;;  %v5667_v4 = vmax.f32 %v5665_v45, %v5666_v3  ;;  %v5675_v14 = vrot.slane %v5674_v52, 4  ;;  %v5683_v46 = vsel %vm5619_vm14, %v5682_v48, -inf }
 0x6e7   : > { %5627 = vst [vmem:[#allocation3] sm:$0x1] %v5626_v63  ;;  %5636 = vst [vmem:[#allocation3 + $0x1] sm:$0x1] %v5635_v41  ;;  %v5644_v36 = vmax.f32 %v5642_v30, %v5643_v23  ;;  %v5659_v47 = vrot.slane %v5658_v34, 2  ;;  %v5684_v10 = vrot.slane %v5683_v46, 4 }
 0x6e8   : > { %v5653_v22 = vmax.f32 %v5651_v62, %v5652_v61  ;;  %v5668_v0 = vrot.slane %v5667_v4, 2  ;;  %v5676_v40 = vmax.f32 %v5674_v52, %v5675_v14 }
 0x6e9   : > { %5645 = vst [vmem:[#allocation3 + $0x2] sm:$0x1] %v5644_v36  ;;  %v5660_v35 = vmax.f32 %v5658_v34, %v5659_v47  ;;  %v5685_v38 = vmax.f32 %v5683_v46, %v5684_v10  ;;  %v5691_v57 = vld [vmem:[#allocation2 + $0x20] sm:$0xf]  ;;  %v5700_v29 = vld [vmem:[#allocation2 + $0x24] sm:$0xf] }
 0x6ea   : > { %5654 = vst [vmem:[#allocation3 + $0x3] sm:$0x1] %v5653_v22  ;;  %v5669_v50 = vmax.f32 %v5667_v4, %v5668_v0  ;;  %v5677_v7 = vrot.slane %v5676_v40, 2  ;;  %v5692_v49 = vsel %vm5619_vm14, %v5691_v57, -inf  ;;  %v5701_v9 = vsel %vm5619_vm14, %v5700_v29, -inf }
 0x6eb   : > { %v5661_v1 = vrot.slane %v5660_v35, 1  ;;  %v5686_v13 = vrot.slane %v5685_v38, 2  ;;  %v5693_v60 = vrot.slane %v5692_v49, 4  ;;  %v5702_v15 = vrot.slane %v5701_v9, 4 }
 0x6ec   : > { %v5670_v19 = vrot.slane %v5669_v50, 1  ;;  %v5678_v33 = vmax.f32 %v5676_v40, %v5677_v7 }
 0x6ed   : > { %v5662_v20 = vmax.f32 %v5660_v35, %v5661_v1  ;;  %v5687_v27 = vmax.f32 %v5685_v38, %v5686_v13  ;;  %v5694_v16 = vmax.f32 %v5692_v49, %v5693_v60  ;;  %v5703_v24 = vmax.f32 %v5701_v9, %v5702_v15 }
 0x6ee   : > { %v5671_v54 = vmax.f32 %v5669_v50, %v5670_v19  ;;  %v5679_v43 = vrot.slane %v5678_v33, 1 }
 0x6ef   : > { %v6108_v17 = vpop.f32.mrb[136].mxu0  ;;  %5663 = vst [vmem:[#allocation3 + $0x4] sm:$0x1] %v5662_v20  ;;  %v5688_v5 = vrot.slane %v5687_v27, 1  ;;  %v5695_v11 = vrot.slane %v5694_v16, 2  ;;  %v5704_v44 = vrot.slane %v5703_v24, 2 }
 0x6f0   : > { %v6109_v53 = vadd.f32 %v13295_v56, %v6108_v17  ;;  %v6110_v25 = vpop.f32.mrb[137].mxu0  ;;  %5672 = vst [vmem:[#allocation3 + $0x5] sm:$0x1] %v5671_v54  ;;  %v5680_v6 = vmax.f32 %v5678_v33, %v5679_v43 }
 0x6f1   : > { %v6111_v59 = vpop.f32.mrb[138].mxu0  ;;  %v5689_v8 = vmax.f32 %v5687_v27, %v5688_v5  ;;  %v5696_v28 = vmax.f32 %v5694_v16, %v5695_v11  ;;  %v5705_v55 = vmax.f32 %v5703_v24, %v5704_v44 }
 0x6f2   : > { %v6145_v45 = vmul.f32 %v13344_v31, %v6109_v53  ;;  %v6112_v51 = vadd.f32 %v13297_v26, %v6111_v59  ;;  %v6113_v18 = vpop.f32.mrb[139].mxu0  ;;  %5681 = vst [vmem:[#allocation3 + $0x6] sm:$0x1] %v5680_v6 }
 0x6f3   : > { %5690 = vst [vmem:[#allocation3 + $0x7] sm:$0x1] %v5689_v8  ;;  %v5697_v56 = vrot.slane %v5696_v28, 1  ;;  %v5706_v30 = vrot.slane %v5705_v55, 1 }
 0x6f4   : > { %v6159_v32 = vadd.f32 %v13350_v39, %v6145_v45  ;;  %v6146_v2 = vmul.f32 %v13344_v31, %v6112_v51 }
 0x6f5   : > { %v5698_v62 = vmax.f32 %v5696_v28, %v5697_v56  ;;  %v5707_v3 = vmax.f32 %v5705_v55, %v5706_v30 }
 0x6f6   : > { %v6166_v52 = vmax.f32 %v6159_v32, 0.0  ;;  %v6160_v48 = vadd.f32 %v13350_v39, %v6146_v2 }
 0x6f7   : > { %v6116_v63 = vpop.f32.mrb[140].mxu0  ;;  %5699 = vst [vmem:[#allocation3 + $0x8] sm:$0x1] %v5698_v62  ;;  %5708 = vst [vmem:[#allocation3 + $0x9] sm:$0x1] %v5707_v3 }
 0x6f8   : > { %6173 = vst.msk [vmem:[#allocation2] sm:$0xff] %vm1637_vm3, %v6166_v52  ;;  %v6167_v26 = vmax.f32 %v6160_v48, 0.0  ;;  %v6117_v41 = vadd.f32 %v13299_v37, %v6116_v63  ;;  %v6118_v23 = vpop.f32.mrb[141].mxu0 }
 0x6f9   : > { %v6119_v34 = vpop.f32.mrb[142].mxu0 }
 0x6fa   : > { %6174 = vst.msk [vmem:[#allocation2 + $0x8] sm:$0xff] %vm1637_vm3, %v6167_v26  ;;  %v6147_v61 = vmul.f32 %v13344_v31, %v6117_v41  ;;  %v5709_v4 = vld [vmem:[#allocation3] sm:$0xff]  ;;  %v6120_v14 = vadd.f32 %v13301_v42, %v6119_v34  ;;  %v6121_v46 = vpop.f32.mrb[143].mxu0 }
 0x6fb   : > { %5711 = vst [vmem:[%s13363_s4] sm:$0xff] %v5709_v4 }
 0x6fc   : > { %v6161_v37 = vadd.f32 %v13350_v39, %v6147_v61  ;;  %v6148_v36 = vmul.f32 %v13344_v31, %v6120_v14 }
 0x6fe   : > { %v6168_v47 = vmax.f32 %v6161_v37, 0.0  ;;  %v6162_v10 = vadd.f32 %v13350_v39, %v6148_v36  ;;  %v5710_v22 = vld [vmem:[#allocation3 + $0x8] sm:$0x3] }
 0x6ff   : > { %v6181_v0 = vld [vmem:[#allocation2] sm:$0xf]  ;;  %v6190_v40 = vld [vmem:[#allocation2 + $0x4] sm:$0xf]  ;;  %5712 = vst [vmem:[%s13363_s4 + $0x8] sm:$0x3] %v5710_v22 }
 0x700   : > { %v6124_v35 = vpop.f32.mrb[144].mxu0  ;;  %v6182_v38 = vsel %vm1699_vm9, %v6181_v0, -inf  ;;  %v6191_v57 = vsel %vm1699_vm9, %v6190_v40, -inf  ;;  %6175 = vst.msk [vmem:[#allocation2 + $0x10] sm:$0xff] %vm1637_vm3, %v6168_v47  ;;  %v6169_v42 = vmax.f32 %v6162_v10, 0.0  ;;  %v11274_v22 = vld [vmem:[%s14011_s20 + $0x40] sm:$0xff]  }
 0x701   : > { %v6125_v29 = vadd.f32 %v13303_v58, %v6124_v35  ;;  %v6126_v50 = vpop.f32.mrb[145].mxu0  ;;  %v6183_v7 = vrot.slane %v6182_v38, 4  ;;  %v6192_v49 = vrot.slane %v6191_v57, 4  ;;  %v6199_v9 = vld [vmem:[#allocation2 + $0x8] sm:$0xf]  ;;  %10472 = vmatpush3.bf16.msra.mxu0 %v11274_v22 }
 0x702   : > { %v6208_v1 = vld [vmem:[#allocation2 + $0xc] sm:$0xf]  ;;  %v6200_v13 = vsel %vm1699_vm9, %v6199_v9, -inf  ;;  %6176 = vst.msk [vmem:[#allocation2 + $0x18] sm:$0xff] %vm1637_vm3, %v6169_v42  ;;  %v6127_v19 = vpop.f32.mrb[146].mxu0 }
 0x703   : > { %v6209_v60 = vsel %vm1699_vm9, %v6208_v1, -inf  ;;  %v6149_v15 = vmul.f32 %v13344_v31, %v6125_v29  ;;  %v6184_v33 = vmax.f32 %v6182_v38, %v6183_v7  ;;  %v6193_v20 = vmax.f32 %v6191_v57, %v6192_v49  ;;  %v6129_v24 = vpop.f32.mrb[147].mxu0  ;;  %v11275_v7 = vld [vmem:[%s14011_s20 + $0x48] sm:$0xff]  }
 0x704   : > { %v6201_v27 = vrot.slane %v6200_v13, 4  ;;  %v6210_v16 = vrot.slane %v6209_v60, 4  ;;  %v6128_v54 = vadd.f32 %v13305_v12, %v6127_v19 }
 0x705   : > { %v6163_v58 = vadd.f32 %v13350_v39, %v6149_v15  ;;  %v6185_v43 = vrot.slane %v6184_v33, 2  ;;  %v6194_v17 = vrot.slane %v6193_v20, 2 }
 0x706   : > { %v6202_v5 = vmax.f32 %v6200_v13, %v6201_v27  ;;  %v6211_v11 = vmax.f32 %v6209_v60, %v6210_v16  ;;  %v6150_v53 = vmul.f32 %v13344_v31, %v6128_v54 }
 0x707   : > { %v6170_v44 = vmax.f32 %v6163_v58, 0.0  ;;  %v6186_v25 = vmax.f32 %v6184_v33, %v6185_v43  ;;  %v6195_v6 = vmax.f32 %v6193_v20, %v6194_v17  ;;  %v6217_v28 = vld [vmem:[#allocation2 + $0x10] sm:$0xf]  ;;  %v6226_v55 = vld [vmem:[#allocation2 + $0x14] sm:$0xf]  ;;  %v6132_v18 = vpop.f32.mrb[148].mxu0 }
 0x708   : > { %v6203_v59 = vrot.slane %v6202_v5, 2  ;;  %v6212_v8 = vrot.slane %v6211_v11, 2  ;;  %v6218_v45 = vsel %vm1699_vm9, %v6217_v28, -inf  ;;  %v6227_v51 = vsel %vm1699_vm9, %v6226_v55, -inf  ;;  %v6134_v41 = vpop.f32.mrb[149].mxu0 }
 0x709   : > { %6177 = vst.msk [vmem:[#allocation2 + $0x20] sm:$0xff] %vm1637_vm3, %v6170_v44  ;;  %v6164_v12 = vadd.f32 %v13350_v39, %v6150_v53  ;;  %v6187_v56 = vrot.slane %v6186_v25, 1  ;;  %v6196_v30 = vrot.slane %v6195_v6, 1  ;;  %v6235_v62 = vld [vmem:[#allocation2 + $0x18] sm:$0xf]  ;;  %v6219_v52 = vrot.slane %v6218_v45, 4 }
 0x70a   : > { %v6204_v32 = vmax.f32 %v6202_v5, %v6203_v59  ;;  %v6213_v2 = vmax.f32 %v6211_v11, %v6212_v8  ;;  %v6244_v3 = vld [vmem:[#allocation2 + $0x1c] sm:$0xf]  ;;  %v6228_v48 = vrot.slane %v6227_v51, 4  ;;  %v6236_v63 = vsel %vm1699_vm9, %v6235_v62, -inf  ;;  %v6135_v14 = vpop.f32.mrb[150].mxu0 }
 0x70b   : > { %v6245_v26 = vsel %vm1699_vm9, %v6244_v3, -inf  ;;  %v6188_v23 = vmax.f32 %v6186_v25, %v6187_v56  ;;  %v6197_v34 = vmax.f32 %v6195_v6, %v6196_v30  ;;  %v6220_v46 = vmax.f32 %v6218_v45, %v6219_v52  ;;  %v6136_v10 = vpop.f32.mrb[151].mxu0  ;;  %v11277_v45 = vld [vmem:[%s14011_s20 + $0x58] sm:$0xff]  }
 0x70c   : > { %v6205_v61 = vrot.slane %v6204_v32, 1  ;;  %v6214_v4 = vrot.slane %v6213_v2, 1  ;;  %v6229_v37 = vmax.f32 %v6227_v51, %v6228_v48  ;;  %v6237_v36 = vrot.slane %v6236_v63, 4 }
 0x70d   : > { %v6246_v47 = vrot.slane %v6245_v26, 4  ;;  %6189 = vst.msk [vmem:[#allocation3] sm:$0x1] %vm1709_vm4, %v6188_v23  ;;  %6198 = vst.msk [vmem:[#allocation3 + $0x1] sm:$0x1] %vm1709_vm4, %v6197_v34  ;;  %v6171_v35 = vmax.f32 %v6164_v12, 0.0  ;;  %v6133_v38 = vadd.f32 %v13307_v21, %v6132_v18 }
 0x70e   : > { %v6206_v0 = vmax.f32 %v6204_v32, %v6205_v61  ;;  %v6215_v40 = vmax.f32 %v6213_v2, %v6214_v4  ;;  %v6221_v57 = vrot.slane %v6220_v46, 2  ;;  %v6230_v42 = vrot.slane %v6229_v37, 2  ;;  %v13403_v21 = vld [vmem:[#allocation4] sm:$0xff] }
 0x70f   : > { %v6238_v29 = vmax.f32 %v6236_v63, %v6237_v36  ;;  %v6247_v50 = vmax.f32 %v6245_v26, %v6246_v47  ;;  %6178 = vst.msk [vmem:[#allocation2 + $0x28] sm:$0xff] %vm1637_vm3, %v6171_v35  ;;  %v6151_v1 = vmul.f32 %v13344_v31, %v6133_v38  ;;  %10473 = vmatprep.subr.bf16.mxu0 %v13403_v21  ;;  %v11276_v31 = vld [vmem:[%s14011_s20 + $0x50] sm:$0xff]  }
 0x710   : > { %6207 = vst.msk [vmem:[#allocation3 + $0x2] sm:$0x1] %vm1709_vm4, %v6206_v0  ;;  %6216 = vst.msk [vmem:[#allocation3 + $0x3] sm:$0x1] %vm1709_vm4, %v6215_v40  ;;  %v6253_v49 = vld [vmem:[#allocation2 + $0x20] sm:$0xf]  ;;  %v6222_v13 = vmax.f32 %v6220_v46, %v6221_v57  ;;  %v6231_v60 = vmax.f32 %v6229_v37, %v6230_v42  ;;  %10474 = vmatpush3.bf16.msra.mxu0 %v11275_v7 }
 0x711   : > { %v6262_v9 = vld [vmem:[#allocation2 + $0x24] sm:$0xf]  ;;  %v6239_v15 = vrot.slane %v6238_v29, 2  ;;  %v6248_v19 = vrot.slane %v6247_v50, 2  ;;  %v6254_v33 = vsel %vm1699_vm9, %v6253_v49, -inf  ;;  %v6165_v27 = vadd.f32 %v13350_v39, %v6151_v1  ;;  %10475 = vmatprep.subr.bf16.mxu0 %v13403_v21 }
 0x712   : > { %v6263_v20 = vsel %vm1699_vm9, %v6262_v9, -inf  ;;  %v6223_v16 = vrot.slane %v6222_v13, 1  ;;  %v6232_v24 = vrot.slane %v6231_v60, 1  ;;  %v6255_v43 = vrot.slane %v6254_v33, 4  ;;  %v11254_v7 = vld [vmem:[%s14008_s17] sm:$0xff]  }
 0x713   : > { %v6240_v58 = vmax.f32 %v6238_v29, %v6239_v15  ;;  %v6249_v54 = vmax.f32 %v6247_v50, %v6248_v19  ;;  %v6264_v17 = vrot.slane %v6263_v20, 4  ;;  %v6172_v5 = vmax.f32 %v6165_v27, 0.0 }
 0x714   : > { %v6224_v11 = vmax.f32 %v6222_v13, %v6223_v16  ;;  %v6233_v44 = vmax.f32 %v6231_v60, %v6232_v24  ;;  %v6256_v39 = vmax.f32 %v6254_v33, %v6255_v43  ;;  %10476 = vmatpush3.bf16.msra.mxu0 %v11276_v31  ;;  %v11257_v31 = vld [vmem:[%s14008_s17 + $0x18] sm:$0xff]   ;;  %v11258_v43 = vld [vmem:[%s14008_s17 + $0x40] sm:$0xff]  }
 0x715   : > { %v6241_v53 = vrot.slane %v6240_v58, 1  ;;  %v6250_v25 = vrot.slane %v6249_v54, 1  ;;  %v6265_v6 = vmax.f32 %v6263_v20, %v6264_v17  ;;  %6180 = vst.msk [vmem:[#allocation2 + $0x30] sm:$0x1f] %vm6179_vm15, %v6172_v5  ;;  %10477 = vmatprep.subr.bf16.mxu0 %v13403_v21  ;;  %v11259_v5 = vld [vmem:[%s14008_s17 + $0x48] sm:$0xff]  }
 0x716   : > { %6225 = vst.msk [vmem:[#allocation3 + $0x4] sm:$0x1] %vm1709_vm4, %v6224_v11  ;;  %6234 = vst.msk [vmem:[#allocation3 + $0x5] sm:$0x1] %vm1709_vm4, %v6233_v44  ;;  %v6271_v28 = vld [vmem:[#allocation2 + $0x28] sm:$0xf] }
 0x717   : > { %v6242_v59 = vmax.f32 %v6240_v58, %v6241_v53  ;;  %v6251_v8 = vmax.f32 %v6249_v54, %v6250_v25  ;;  %v6280_v55 = vld [vmem:[#allocation2 + $0x2c] sm:$0xf]  ;;  %v6257_v51 = vrot.slane %v6256_v39, 2  ;;  %v6266_v12 = vrot.slane %v6265_v6, 2  ;;  %v11256_v54 = vld [vmem:[%s14008_s17 + $0x10] sm:$0xff]   ;;  %v11261_v44 = vld [vmem:[%s14008_s17 + $0x58] sm:$0xff]  }
 0x718   : > { %v6272_v18 = vsel %vm1699_vm9, %v6271_v28, -inf  ;;  %v6281_v56 = vsel %vm1699_vm9, %v6280_v55, -inf  ;;  %10478 = vmatpush3.bf16.msra.mxu0 %v11277_v45  ;;  %v11255_v58 = vld [vmem:[%s14008_s17 + $0x8] sm:$0xff]   ;;  %v11260_v11 = vld [vmem:[%s14008_s17 + $0x50] sm:$0xff]   ;;  %v11262_v53 = vld [vmem:[%s14008_s17 + $0x60] sm:$0xff]  }
 0x719   : > { %6243 = vst.msk [vmem:[#allocation3 + $0x6] sm:$0x1] %vm1709_vm4, %v6242_v59  ;;  %6252 = vst.msk [vmem:[#allocation3 + $0x7] sm:$0x1] %vm1709_vm4, %v6251_v8  ;;  %v6273_v30 = vrot.slane %v6272_v18, 4  ;;  %v6282_v32 = vrot.slane %v6281_v56, 4  ;;  %v6258_v2 = vmax.f32 %v6256_v39, %v6257_v51  ;;  %v6267_v62 = vmax.f32 %v6265_v6, %v6266_v12  ;;  %10479 = vmatprep.subr.bf16.mxu0 %v13403_v21 }
 0x71a   : > { %v11263_v39 = vld [vmem:[%s14008_s17 + $0x68] sm:$0xff]   ;;  %v11264_v6 = vld [vmem:[%s14008_s17 + $0x70] sm:$0xff]   ;;  %v11265_v59 = vld [vmem:[%s14008_s17 + $0x78] sm:$0xff]  }
 0x71b   : > { %v6274_v3 = vmax.f32 %v6272_v18, %v6273_v30  ;;  %v6283_v52 = vmax.f32 %v6281_v56, %v6282_v32  ;;  %v6259_v48 = vrot.slane %v6258_v2, 1  ;;  %v6268_v63 = vrot.slane %v6267_v62, 1  ;;  %v11266_v8 = vld [vmem:[%s14008_s17 + $0x80] sm:$0xff]   ;;  %v11267_v55 = vld [vmem:[%s14008_s17 + $0x88] sm:$0xff]   ;;  %v11268_v45 = vld [vmem:[%s14008_s17 + $0x90] sm:$0xff]  }
 0x71c   : > { %v6289_v23 = vld [vmem:[#allocation2 + $0x30] sm:$0xf]  ;;  %v11269_v51 = vld [vmem:[%s14008_s17 + $0x98] sm:$0xff]   ;;  %v11270_v12 = vld [vmem:[%s14008_s17 + $0xa0] sm:$0xff]  }
 0x71d   : > { %v6275_v26 = vrot.slane %v6274_v3, 2  ;;  %v6284_v41 = vrot.slane %v6283_v52, 2  ;;  %v6260_v34 = vmax.f32 %v6258_v2, %v6259_v48  ;;  %v6269_v61 = vmax.f32 %v6267_v62, %v6268_v63  ;;  %v11271_v56 = vld [vmem:[%s14008_s17 + $0xa8] sm:$0xff]   ;;  %v11272_v30 = vld [vmem:[%s14008_s17 + $0xb0] sm:$0xff]   ;;  %v11273_v32 = vld [vmem:[%s14008_s17 + $0xb8] sm:$0xff]  }
 0x71e   : > { %v6290_v4 = vsel %vm1699_vm9, %v6289_v23, -inf  ;;  %v11278_v62 = vld [vmem:[%s14011_s20 + $0x60] sm:$0xff]   ;;  %v11281_v48 = vld [vmem:[%s14011_s20 + $0x78] sm:$0xff]  }
 0x71f   : > { %v6276_v14 = vmax.f32 %v6274_v3, %v6275_v26  ;;  %v6285_v46 = vmax.f32 %v6283_v52, %v6284_v41  ;;  %v6291_v37 = vrot.slane %v6290_v4, 4  ;;  %6261 = vst.msk [vmem:[#allocation3 + $0x8] sm:$0x1] %vm1709_vm4, %v6260_v34  ;;  %6270 = vst.msk [vmem:[#allocation3 + $0x9] sm:$0x1] %vm1709_vm4, %v6269_v61  ;;  %10480 = vmatpush3.bf16.msra.mxu0 %v11278_v62  ;;  %v11279_v3 = vld [vmem:[%s14011_s20 + $0x68] sm:$0xff]  }
 0x720   : > { %v6298_v36 = vld [vmem:[#allocation3] sm:$0xff]  ;;  %10481 = vmatprep.subr.bf16.mxu0 %v13403_v21  ;;  %v8973_v63 = vld [vmem:[%s14009_s18] ss:$0 sm:$0xff] }
 0x721   : > { %v6277_v47 = vrot.slane %v6276_v14, 1  ;;  %v6286_v10 = vrot.slane %v6285_v46, 1  ;;  %v6292_v22 = vmax.f32 %v6290_v4, %v6291_v37  ;;  %6303 = vst.msk [vmem:[#allocation4 + $0x2] sm:$0xff] %vm1637_vm3, %v6298_v36  ;;  %v11280_v52 = vld [vmem:[%s14011_s20 + $0x70] sm:$0xff]   ;;  %v8974_v41 = vld [vmem:[%s14010_s19] ss:$0 sm:$0xff] }
 0x722   : > { %v11310_v62 = vld [vmem:[%s14011_s20 + $0x120] sm:$0xff]  }
 0x723   : > { %v6278_v0 = vmax.f32 %v6276_v14, %v6277_v47  ;;  %v6287_v40 = vmax.f32 %v6285_v46, %v6286_v10  ;;  %v6293_v35 = vrot.slane %v6292_v22, 2  ;;  %10482 = vmatpush3.bf16.msra.mxu0 %v11279_v3  ;;  %v11311_v3 = vld [vmem:[%s14011_s20 + $0x128] sm:$0xff]  }
 0x724   : > { %10483 = vmatprep.subr.bf16.mxu0 %v13403_v21 }
 0x725   : > { %6279 = vst.msk [vmem:[#allocation3 + $0xa] sm:$0x1] %vm1709_vm4, %v6278_v0  ;;  %6288 = vst.msk [vmem:[#allocation3 + $0xb] sm:$0x1] %vm1709_vm4, %v6287_v40  ;;  %v6294_v38 = vmax.f32 %v6292_v22, %v6293_v35  ;;  %v11282_v22 = vld [vmem:[%s14011_s20] sm:$0xff]  }
 0x727   : > { %v6295_v57 = vrot.slane %v6294_v38, 1  ;;  %10484 = vmatpush3.bf16.msra.mxu0 %v11280_v52  ;;  %v11312_v52 = vld [vmem:[%s14011_s20 + $0x130] sm:$0xff]  }
 0x728   : > { %v6316_v50 = vld [vmem:[#allocation4 + $0x1] sm:$0xff]  ;;  %10485 = vmatprep.subr.bf16.mxu0 %v13403_v21 }
 0x729   : > { %v6296_v42 = vmax.f32 %v6294_v38, %v6295_v57  ;;  %v6305_v9 = vld [vmem:[#allocation4] sm:$0xff] }
 0x72a   : > { %v6464_v13 = vld [vmem:[#allocation4 + $0x2] sm:$0xff] }
 0x72b   : > { %6297 = vst.msk [vmem:[#allocation3 + $0xc] sm:$0x1] %vm1709_vm4, %v6296_v42  ;;  %10486 = vmatpush3.bf16.msra.mxu0 %v11281_v48  ;;  %v11313_v48 = vld [vmem:[%s14011_s20 + $0x138] sm:$0xff]  }
 0x72c   : > { %10491 = vmatprep.subr.bf16.mxu0 %v13403_v21 }
 0x732   : > { %v6299_v29 = vld [vmem:[#allocation3 + $0x8] sm:$0x1f] }
 0x733   : > { %6304 = vst.msk [vmem:[#allocation4 + $0xa] sm:$0x1f] %vm6179_vm15, %v6299_v29 }
 0x73a   : > { %v6317_v49 = vld [vmem:[#allocation4 + $0x9] sm:$0xf]  ;;  %v13442_v24 = vld [vmem:[#allocation4 + $0xd] sm:$0xf] }
 0x73b   : > { %v6306_v1 = vld [vmem:[#allocation4 + $0x8] sm:$0xf]  ;;  %v6318_v15 = vpack.c.bf16 %v6317_v49, %v6316_v50  ;;  %v13438_v27 = vld [vmem:[#allocation4 + $0xc] sm:$0xf]  ;;  %7500 = vst [vmem:[#allocation4 + $0x10] sm:$0xff] %v13403_v21 }
 0x73c   : > { %v6465_v60 = vld [vmem:[#allocation4 + $0xa] sm:$0xf]  ;;  %v6307_v17 = vpack.c.bf16 %v6306_v1, %v6305_v9  ;;  %v11283_v1 = vld [vmem:[%s14011_s20 + $0x8] sm:$0xff]  }
 0x73d   : > { %v6546_v19 = vld [vmem:[#allocation4 + $0x3] sm:$0xff]  ;;  %v6547_v33 = vld [vmem:[#allocation4 + $0xb] sm:$0xf]  ;;  %10408 = vmatmul.mubr.msk.bf16.vlgmr.msra.gmra.mrb[36].mxu1 %vm1637_vm3, %v6318_v15  ;;  %v6466_v25 = vpack.c.bf16 %v6465_v60, %v6464_v13  ;;  %v11286_v15 = vld [vmem:[%s14011_s20 + $0x20] sm:$0xff]  }
 0x73e   : > { %v13436_v20 = vld [vmem:[#allocation4 + $0x4] sm:$0xff]  ;;  %10412 = vmatpush3.bf16.msra.mxu1 %v11254_v7  ;;  %10419 = vmatprep.mubr.msk.bf16.mxu1 %vm11385_vm0, %v13403_v21  ;;  %v6548_v28 = vpack.c.bf16 %v6547_v33, %v6546_v19  ;;  %v11287_v19 = vld [vmem:[%s14011_s20 + $0x28] sm:$0xff]  }
 0x73f   : > { %v13440_v16 = vld [vmem:[#allocation4 + $0x5] sm:$0xff]  ;;  %10413 = vmatprep.subr.bf16.mxu1 %v13403_v21  ;;  %v6630_v18 = vpack.c.bf16 %v13438_v27, %v13436_v20  ;;  %v11290_v27 = vld [vmem:[%s14011_s20 + $0x80] sm:$0xff]  }
 0x740   : > { %6812 = vst [vmem:[#allocation4] sm:$0xff] %v13403_v21  ;;  %6813 = vst [vmem:[#allocation4 + $0x8] sm:$0xff] %v13403_v21  ;;  %v6712_v2 = vpack.c.bf16 %v13442_v24, %v13440_v16  ;;  %v11284_v13 = vld [vmem:[%s14011_s20 + $0x10] sm:$0xff]   ;;  %v11285_v60 = vld [vmem:[%s14011_s20 + $0x18] sm:$0xff]  }
 0x741   : > { %v11288_v33 = vld [vmem:[%s14011_s20 + $0x30] sm:$0xff]   ;;  %v11289_v20 = vld [vmem:[%s14011_s20 + $0x38] sm:$0xff]   ;;  %v11322_v24 = vld [vmem:[%s14014_s23 + $0x40] sm:$0xff]  }
 0x742   : > { %10414 = vmatpush3.bf16.msra.mxu1 %v11255_v58  ;;  %v11291_v58 = vld [vmem:[%s14011_s20 + $0x88] sm:$0xff]  }
 0x743   : > { %10415 = vmatprep.subr.bf16.mxu1 %v13403_v21 }
 0x746   : > { %10416 = vmatpush3.bf16.msra.mxu1 %v11256_v54  ;;  %v11323_v54 = vld [vmem:[%s14014_s23 + $0x48] sm:$0xff]  }
 0x747   : > { %10417 = vmatprep.subr.bf16.mxu1 %v13403_v21 }
 0x74a   : > { %10418 = vmatpush3.bf16.msra.mxu1 %v11257_v31  ;;  %v11292_v31 = vld [vmem:[%s14011_s20 + $0x90] sm:$0xff]  }
 0x74b   : > { %10423 = vmatprep.subr.bf16.mxu1 %v13403_v21 }
 0x74d   : > { %10420 = vmatmul.mubr.msk.bf16.vlgmr.msra.gmra.mrb[36].mxu1 %vm1637_vm3, %v6307_v17  ;;  %v11293_v17 = vld [vmem:[%s14011_s20 + $0x98] sm:$0xff]  }
 0x74e   : > { %10424 = vmatpush3.bf16.msra.mxu1 %v11258_v43  ;;  %10431 = vmatprep.mubr.msk.bf16.mxu1 %vm11385_vm0, %v13403_v21  ;;  %v11324_v43 = vld [vmem:[%s14014_s23 + $0x50] sm:$0xff]  }
 0x74f   : > { %10425 = vmatprep.subr.bf16.mxu1 %v13403_v21 }
 0x752   : > { %10426 = vmatpush3.bf16.msra.mxu1 %v11259_v5  ;;  %v11325_v5 = vld [vmem:[%s14014_s23 + $0x58] sm:$0xff]  }
 0x753   : > { %10427 = vmatprep.subr.bf16.mxu1 %v13403_v21 }
 0x756   : > { %10428 = vmatpush3.bf16.msra.mxu1 %v11260_v11  ;;  %v11294_v11 = vld [vmem:[%s14011_s20 + $0xa0] sm:$0xff]  }
 0x757   : > { %10429 = vmatprep.subr.bf16.mxu1 %v13403_v21 }
 0x75a   : > { %10430 = vmatpush3.bf16.msra.mxu1 %v11261_v44  ;;  %v11295_v44 = vld [vmem:[%s14011_s20 + $0xa8] sm:$0xff]  }
 0x75b   : > { %10435 = vmatprep.subr.bf16.mxu1 %v13403_v21 }
 0x75d   : > { %10432 = vmatmul.mubr.msk.bf16.vlgmr.msra.gmra.mrb[36].mxu1 %vm1637_vm3, %v6466_v25  ;;  %v11297_v25 = vld [vmem:[%s14011_s20 + $0xb8] sm:$0xff]  }
 0x75e   : > { %10436 = vmatpush3.bf16.msra.mxu1 %v11262_v53  ;;  %10443 = vmatprep.mubr.msk.bf16.mxu1 %vm11385_vm0, %v13403_v21  ;;  %v11296_v53 = vld [vmem:[%s14011_s20 + $0xb0] sm:$0xff]  }
 0x75f   : > { %10437 = vmatprep.subr.bf16.mxu1 %v13403_v21 }
 0x762   : > { %10438 = vmatpush3.bf16.msra.mxu1 %v11263_v39  ;;  %v11298_v39 = vld [vmem:[%s14011_s20 + $0xc0] sm:$0xff]  }
 0x763   : > { %10439 = vmatprep.subr.bf16.mxu1 %v13403_v21 }
 0x766   : > { %10440 = vmatpush3.bf16.msra.mxu1 %v11264_v6 }
 0x767   : > { %10441 = vmatprep.subr.bf16.mxu1 %v13403_v21 }
 0x76a   : > { %10442 = vmatpush3.bf16.msra.mxu1 %v11265_v59  ;;  %v11299_v59 = vld [vmem:[%s14011_s20 + $0xc8] sm:$0xff]  }
 0x76b   : > { %10447 = vmatprep.subr.bf16.mxu1 %v13403_v21 }
 0x76d   : > { %10444 = vmatmul.mubr.msk.bf16.vlgmr.msra.gmra.mrb[36].mxu1 %vm1637_vm3, %v6548_v28  ;;  %v11301_v28 = vld [vmem:[%s14011_s20 + $0xd8] sm:$0xff]  }
 0x76e   : > { %10448 = vmatpush3.bf16.msra.mxu1 %v11266_v8  ;;  %10455 = vmatprep.mubr.msk.bf16.mxu1 %vm11385_vm0, %v13403_v21  ;;  %v11300_v8 = vld [vmem:[%s14011_s20 + $0xd0] sm:$0xff]  }
 0x76f   : > { %10449 = vmatprep.subr.bf16.mxu1 %v13403_v21 }
 0x772   : > { %10450 = vmatpush3.bf16.msra.mxu1 %v11267_v55  ;;  %v11302_v55 = vld [vmem:[%s14011_s20 + $0xe0] sm:$0xff]  }
 0x773   : > { %10451 = vmatprep.subr.bf16.mxu1 %v13403_v21 }
 0x776   : > { %10452 = vmatpush3.bf16.msra.mxu1 %v11268_v45  ;;  %v11303_v45 = vld [vmem:[%s14011_s20 + $0xe8] sm:$0xff]  }
 0x777   : > { %10453 = vmatprep.subr.bf16.mxu1 %v13403_v21 }
 0x77a   : > { %10454 = vmatpush3.bf16.msra.mxu1 %v11269_v51  ;;  %v11304_v51 = vld [vmem:[%s14011_s20 + $0xf0] sm:$0xff]  }
 0x77b   : > { %10459 = vmatprep.subr.bf16.mxu1 %v13403_v21 }
 0x77d   : > { %10456 = vmatmul.mubr.msk.bf16.vlgmr.msra.gmra.mrb[36].mxu1 %vm1637_vm3, %v6630_v18  ;;  %v11306_v18 = vld [vmem:[%s14011_s20 + $0x100] sm:$0xff]  }
 0x77e   : > { %10460 = vmatpush3.bf16.msra.mxu1 %v11270_v12  ;;  %10467 = vmatprep.mubr.msk.bf16.mxu1 %vm11385_vm0, %v13403_v21  ;;  %v11305_v12 = vld [vmem:[%s14011_s20 + $0xf8] sm:$0xff]  }
 0x77f   : > { %10461 = vmatprep.subr.bf16.mxu1 %v13403_v21 }
 0x782   : > { %10462 = vmatpush3.bf16.msra.mxu1 %v11271_v56 }
 0x783   : > { %10463 = vmatprep.subr.bf16.mxu1 %v13403_v21 }
 0x786   : > { %10464 = vmatpush3.bf16.msra.mxu1 %v11272_v30  ;;  %v11307_v30 = vld [vmem:[%s14011_s20 + $0x108] sm:$0xff]  }
 0x787   : > { %10465 = vmatprep.subr.bf16.mxu1 %v13403_v21 }
 0x78a   : > { %10466 = vmatpush3.bf16.msra.mxu1 %v11273_v32  ;;  %v11308_v32 = vld [vmem:[%s14011_s20 + $0x110] sm:$0xff]  }
 0x78b   : > { %10591 = vmatprep.subr.bf16.mxu1 %v13403_v21 }
 0x78d   : > { %10468 = vmatmul.mubr.msk.bf16.vlgmr.msra.gmra.mrb[36].mxu1 %vm1637_vm3, %v6712_v2  ;;  %v11309_v2 = vld [vmem:[%s14011_s20 + $0x118] sm:$0xff]  }
 0x78e   : > { %10607 = vmatprep.mubr.msk.bf16.mxu1 %vm11385_vm0, %v13403_v21  ;;  %10592 = vmatpush3.bf16.msra.mxu1 %v11322_v24  ;;  %v11335_v24 = vld [vmem:[%s14014_s23 + $0x28] sm:$0xff]  }
 0x78f   : > { %10593 = vmatprep.subr.bf16.mxu1 %v13403_v21 }
 0x792   : > { %10594 = vmatpush3.bf16.msra.mxu1 %v11323_v54  ;;  %v11337_v54 = vld [vmem:[%s14014_s23 + $0x38] sm:$0xff]  }
 0x793   : > { %10595 = vmatprep.subr.bf16.mxu1 %v13403_v21 }
 0x796   : > { %10596 = vmatpush3.bf16.msra.mxu1 %v11324_v43 }
 0x797   : > { %10597 = vmatprep.subr.bf16.mxu1 %v13403_v21 }
 0x79a   : > { %10598 = vmatpush3.bf16.msra.mxu1 %v11325_v5 }
 0x79b   : > { %10599 = vmatprep.subr.bf16.mxu1 %v13403_v21 }
 0x860   : > { %v6783_v26 = vpop.f32.mrb[36].mxu1 }
 0x861   : > { %v6799_v23 = vmul.f32 %v8973_v63, %v6783_v26  ;;  %v10469_v34 = vpop.f32.mrb[37].mxu1 }
 0x862   : > { %v6786_v61 = vpop.f32.mrb[38].mxu1  ;;  %v11317_v34 = vld [vmem:[%s14011_s20 + $0x158] sm:$0xff]  }
 0x863   : > { %v13568_v4 = vadd.f32 %v8974_v41, %v6799_v23  ;;  %v6800_v14 = vmul.f32 %v8973_v63, %v6786_v61  ;;  %v10470_v46 = vpop.f32.mrb[39].mxu1  ;;  %v11314_v63 = vld [vmem:[%s14011_s20 + $0x140] sm:$0xff]   ;;  %v11316_v23 = vld [vmem:[%s14011_s20 + $0x150] sm:$0xff]  }
 0x864   : > { %v11318_v61 = vld [vmem:[%s14011_s20 + $0x160] sm:$0xff]   ;;  %v11321_v46 = vld [vmem:[%s14011_s20 + $0x178] sm:$0xff]  }
 0x865   : > { %v6810_v37 = vmax.f32 %v13568_v4, 0.0  ;;  %v6809_v36 = vadd.f32 %v8974_v41, %v6800_v14  ;;  %v11315_v41 = vld [vmem:[%s14011_s20 + $0x148] sm:$0xff]   ;;  %v11320_v14 = vld [vmem:[%s14011_s20 + $0x170] sm:$0xff]  }
 0x866   : > { %v11319_v4 = vld [vmem:[%s14011_s20 + $0x168] sm:$0xff]  }
 0x867   : > { %6815 = vst [vmem:[#allocation4 + $0x2] sm:$0xff] %v6810_v37  ;;  %v6811_v47 = vmax.f32 %v6809_v36, 0.0  ;;  %v11326_v36 = vld [vmem:[%s14014_s23 + $0x60] sm:$0xff]  }
 0x868   : > { %10600 = vmatpush3.bf16.msra.mxu1 %v11326_v36  ;;  %v11363_v36 = vld [vmem:[%s14014_s23 + $0x148] sm:$0xff]  }
 0x869   : > { %6816 = vst [vmem:[#allocation4 + $0xa] sm:$0xf] %v6811_v47  ;;  %v11327_v47 = vld [vmem:[%s14014_s23 + $0x68] sm:$0xff]   ;;  %10601 = vmatprep.subr.bf16.mxu1 %v13403_v21 }
 0x86c   : > { %10602 = vmatpush3.bf16.msra.mxu1 %v11327_v47  ;;  %v11364_v47 = vld [vmem:[%s14014_s23 + $0x150] sm:$0xff]  }
 0x86d   : > { %10603 = vmatprep.subr.bf16.mxu1 %v13403_v21 }
 0x86e   : > { %v6836_v10 = vld [vmem:[#allocation4 + $0x1] sm:$0xff] }
 0x86f   : > { %v6817_v40 = vld [vmem:[#allocation4] sm:$0xff] }
 0x870   : > { %v6837_v0 = vld [vmem:[#allocation4 + $0x9] sm:$0x7]  ;;  %v13584_v7 = vld [vmem:[#allocation4 + $0xc] sm:$0x7] }
 0x871   : > { %v6818_v35 = vld [vmem:[#allocation4 + $0x8] sm:$0x7]  ;;  %v6838_v57 = vpack.c.bf16 %v6837_v0, %v6836_v10  ;;  %v13580_v29 = vld [vmem:[#allocation4 + $0xb] sm:$0x7]  ;;  %v11328_v10 = vld [vmem:[%s14014_s23 + $0x70] sm:$0xff]  }
 0x872   : > { %v13576_v38 = vld [vmem:[#allocation4 + $0xa] sm:$0x7]  ;;  %v13588_v9 = vld [vmem:[#allocation4 + $0xd] sm:$0x7]  ;;  %v6819_v16 = vpack.c.bf16 %v6818_v35, %v6817_v40  ;;  %10604 = vmatpush3.bf16.msra.mxu1 %v11328_v10  ;;  %v9103_v0 = vld [vmem:[%s14012_s21] ss:$0 sm:$0xff] }
 0x873   : > { %v13578_v42 = vld [vmem:[#allocation4 + $0x3] sm:$0xff]  ;;  %10488 = vmatmul.mubr.bf16.vlgmr.msra.gmra.mrb[152].mxu0 %v6838_v57  ;;  %v7036_v6 = vpack.c.bf16 %v13576_v38, %v6810_v37  ;;  %10605 = vmatprep.subr.bf16.mxu1 %v13403_v21  ;;  %v9104_v35 = vld [vmem:[%s14013_s22] ss:$0 sm:$0xff] }
 0x874   : > { %v13582_v50 = vld [vmem:[#allocation4 + $0x4] sm:$0xff]  ;;  %10492 = vmatpush3.bf16.msra.mxu0 %v11282_v22  ;;  %10507 = vmatprep.mubr.msk.bf16.mxu0 %vm11385_vm0, %v13403_v21  ;;  %v7147_v56 = vpack.c.bf16 %v13580_v29, %v13578_v42 }
 0x875   : > { %v13586_v49 = vld [vmem:[#allocation4 + $0x5] sm:$0xff]  ;;  %10493 = vmatprep.subr.bf16.mxu0 %v13403_v21  ;;  %v7258_v26 = vpack.c.bf16 %v13584_v7, %v13582_v50 }
 0x876   : > { %7498 = vst [vmem:[#allocation4] sm:$0xff] %v13403_v21  ;;  %7499 = vst [vmem:[#allocation4 + $0x8] sm:$0xff] %v13403_v21  ;;  %v7369_v37 = vpack.c.bf16 %v13588_v9, %v13586_v49  ;;  %v11329_v22 = vld [vmem:[%s14014_s23 + $0x78] sm:$0xff]  }
 0x877   : > { %10606 = vmatpush3.bf16.msra.mxu1 %v11329_v22  ;;  %v11365_v10 = vld [vmem:[%s14014_s23 + $0x158] sm:$0xff]   ;;  %v11366_v22 = vld [vmem:[%s14014_s23 + $0x160] sm:$0xff]  }
 0x878   : > { %10494 = vmatpush3.bf16.msra.mxu0 %v11283_v1  ;;  %10611 = vmatprep.subr.bf16.mxu1 %v13403_v21 }
 0x879   : > { %10495 = vmatprep.subr.bf16.mxu0 %v13403_v21 }
 0x87c   : > { %10496 = vmatpush3.bf16.msra.mxu0 %v11284_v13 }
 0x87d   : > { %10497 = vmatprep.subr.bf16.mxu0 %v13403_v21 }
 0x880   : > { %10498 = vmatpush3.bf16.msra.mxu0 %v11285_v60 }
 0x881   : > { %10499 = vmatprep.subr.bf16.mxu0 %v13403_v21 }
 0x884   : > { %10500 = vmatpush3.bf16.msra.mxu0 %v11286_v15  ;;  %v11330_v15 = vld [vmem:[%s14014_s23] sm:$0xff]  }
 0x885   : > { %10501 = vmatprep.subr.bf16.mxu0 %v13403_v21 }
 0x888   : > { %10502 = vmatpush3.bf16.msra.mxu0 %v11287_v19 }
 0x889   : > { %10503 = vmatprep.subr.bf16.mxu0 %v13403_v21 }
 0x88c   : > { %10504 = vmatpush3.bf16.msra.mxu0 %v11288_v33  ;;  %v11331_v33 = vld [vmem:[%s14014_s23 + $0x8] sm:$0xff]  }
 0x88d   : > { %10505 = vmatprep.subr.bf16.mxu0 %v13403_v21 }
 0x890   : > { %10506 = vmatpush3.bf16.msra.mxu0 %v11289_v20  ;;  %v11332_v20 = vld [vmem:[%s14014_s23 + $0x10] sm:$0xff]  }
 0x891   : > { %10511 = vmatprep.subr.bf16.mxu0 %v13403_v21 }
 0x893   : > { %10508 = vmatmul.mubr.bf16.vlgmr.msra.gmra.mrb[152].mxu0 %v6819_v16  ;;  %v11334_v16 = vld [vmem:[%s14014_s23 + $0x20] sm:$0xff]  }
 0x894   : > { %10512 = vmatpush3.bf16.msra.mxu0 %v11290_v27  ;;  %10527 = vmatprep.mubr.msk.bf16.mxu0 %vm11385_vm0, %v13403_v21  ;;  %v11333_v27 = vld [vmem:[%s14014_s23 + $0x18] sm:$0xff]  }
 0x895   : > { %10513 = vmatprep.subr.bf16.mxu0 %v13403_v21 }
 0x898   : > { %10514 = vmatpush3.bf16.msra.mxu0 %v11291_v58  ;;  %v11336_v58 = vld [vmem:[%s14014_s23 + $0x30] sm:$0xff]  }
 0x899   : > { %10515 = vmatprep.subr.bf16.mxu0 %v13403_v21 }
 0x89c   : > { %10516 = vmatpush3.bf16.msra.mxu0 %v11292_v31 }
 0x89d   : > { %10517 = vmatprep.subr.bf16.mxu0 %v13403_v21 }
 0x8a0   : > { %10518 = vmatpush3.bf16.msra.mxu0 %v11293_v17  ;;  %v11338_v17 = vld [vmem:[%s14014_s23 + $0x80] sm:$0xff]  }
 0x8a1   : > { %10519 = vmatprep.subr.bf16.mxu0 %v13403_v21 }
 0x8a4   : > { %10520 = vmatpush3.bf16.msra.mxu0 %v11294_v11  ;;  %v11339_v11 = vld [vmem:[%s14014_s23 + $0x88] sm:$0xff]  }
 0x8a5   : > { %10521 = vmatprep.subr.bf16.mxu0 %v13403_v21 }
 0x8a8   : > { %10522 = vmatpush3.bf16.msra.mxu0 %v11295_v44  ;;  %v11340_v44 = vld [vmem:[%s14014_s23 + $0x90] sm:$0xff]  }
 0x8a9   : > { %10523 = vmatprep.subr.bf16.mxu0 %v13403_v21 }
 0x8ac   : > { %10524 = vmatpush3.bf16.msra.mxu0 %v11296_v53  ;;  %v11341_v53 = vld [vmem:[%s14014_s23 + $0x98] sm:$0xff]  }
 0x8ad   : > { %10525 = vmatprep.subr.bf16.mxu0 %v13403_v21 }
 0x8b0   : > { %10526 = vmatpush3.bf16.msra.mxu0 %v11297_v25  ;;  %v11342_v25 = vld [vmem:[%s14014_s23 + $0xa0] sm:$0xff]  }
 0x8b1   : > { %10531 = vmatprep.subr.bf16.mxu0 %v13403_v21 }
 0x8b3   : > { %10528 = vmatmul.mubr.bf16.vlgmr.msra.gmra.mrb[152].mxu0 %v7036_v6  ;;  %v11344_v6 = vld [vmem:[%s14014_s23 + $0xb0] sm:$0xff]  }
 0x8b4   : > { %10532 = vmatpush3.bf16.msra.mxu0 %v11298_v39  ;;  %10547 = vmatprep.mubr.msk.bf16.mxu0 %vm11385_vm0, %v13403_v21  ;;  %v11343_v39 = vld [vmem:[%s14014_s23 + $0xa8] sm:$0xff]  }
 0x8b5   : > { %10533 = vmatprep.subr.bf16.mxu0 %v13403_v21 }
 0x8b8   : > { %10534 = vmatpush3.bf16.msra.mxu0 %v11299_v59  ;;  %v11345_v59 = vld [vmem:[%s14014_s23 + $0xb8] sm:$0xff]  }
 0x8b9   : > { %10535 = vmatprep.subr.bf16.mxu0 %v13403_v21 }
 0x8bc   : > { %10536 = vmatpush3.bf16.msra.mxu0 %v11300_v8 }
 0x8bd   : > { %10537 = vmatprep.subr.bf16.mxu0 %v13403_v21 }
 0x8c0   : > { %10538 = vmatpush3.bf16.msra.mxu0 %v11301_v28  ;;  %v11346_v28 = vld [vmem:[%s14014_s23 + $0xc0] sm:$0xff]  }
 0x8c1   : > { %10539 = vmatprep.subr.bf16.mxu0 %v13403_v21 }
 0x8c4   : > { %10540 = vmatpush3.bf16.msra.mxu0 %v11302_v55 }
 0x8c5   : > { %10541 = vmatprep.subr.bf16.mxu0 %v13403_v21 }
 0x8c8   : > { %10542 = vmatpush3.bf16.msra.mxu0 %v11303_v45  ;;  %v11347_v45 = vld [vmem:[%s14014_s23 + $0xc8] sm:$0xff]  }
 0x8c9   : > { %10543 = vmatprep.subr.bf16.mxu0 %v13403_v21 }
 0x8cc   : > { %10544 = vmatpush3.bf16.msra.mxu0 %v11304_v51  ;;  %v11348_v51 = vld [vmem:[%s14014_s23 + $0xd0] sm:$0xff]  }
 0x8cd   : > { %10545 = vmatprep.subr.bf16.mxu0 %v13403_v21 }
 0x8d0   : > { %10546 = vmatpush3.bf16.msra.mxu0 %v11305_v12  ;;  %v11349_v12 = vld [vmem:[%s14014_s23 + $0xd8] sm:$0xff]  }
 0x8d1   : > { %10551 = vmatprep.subr.bf16.mxu0 %v13403_v21 }
 0x8d3   : > { %10548 = vmatmul.mubr.bf16.vlgmr.msra.gmra.mrb[152].mxu0 %v7147_v56  ;;  %v11351_v56 = vld [vmem:[%s14014_s23 + $0xe8] sm:$0xff]  }
 0x8d4   : > { %10552 = vmatpush3.bf16.msra.mxu0 %v11306_v18  ;;  %10567 = vmatprep.mubr.msk.bf16.mxu0 %vm11385_vm0, %v13403_v21  ;;  %v11350_v18 = vld [vmem:[%s14014_s23 + $0xe0] sm:$0xff]  }
 0x8d5   : > { %10553 = vmatprep.subr.bf16.mxu0 %v13403_v21 }
 0x8d8   : > { %10554 = vmatpush3.bf16.msra.mxu0 %v11307_v30  ;;  %v11352_v30 = vld [vmem:[%s14014_s23 + $0xf0] sm:$0xff]  }
 0x8d9   : > { %10555 = vmatprep.subr.bf16.mxu0 %v13403_v21 }
 0x8dc   : > { %10556 = vmatpush3.bf16.msra.mxu0 %v11308_v32  ;;  %v11353_v32 = vld [vmem:[%s14014_s23 + $0xf8] sm:$0xff]  }
 0x8dd   : > { %10557 = vmatprep.subr.bf16.mxu0 %v13403_v21 }
 0x8e0   : > { %10558 = vmatpush3.bf16.msra.mxu0 %v11309_v2 }
 0x8e1   : > { %10559 = vmatprep.subr.bf16.mxu0 %v13403_v21 }
 0x8e4   : > { %10560 = vmatpush3.bf16.msra.mxu0 %v11310_v62 }
 0x8e5   : > { %10561 = vmatprep.subr.bf16.mxu0 %v13403_v21 }
 0x8e8   : > { %10562 = vmatpush3.bf16.msra.mxu0 %v11311_v3  ;;  %v11354_v3 = vld [vmem:[%s14014_s23 + $0x100] sm:$0xff]  }
 0x8e9   : > { %10563 = vmatprep.subr.bf16.mxu0 %v13403_v21 }
 0x8ec   : > { %10564 = vmatpush3.bf16.msra.mxu0 %v11312_v52 }
 0x8ed   : > { %10565 = vmatprep.subr.bf16.mxu0 %v13403_v21 }
 0x8f0   : > { %10566 = vmatpush3.bf16.msra.mxu0 %v11313_v48  ;;  %v11355_v48 = vld [vmem:[%s14014_s23 + $0x108] sm:$0xff]  }
 0x8f1   : > { %10571 = vmatprep.subr.bf16.mxu0 %v13403_v21 }
 0x8f3   : > { %10568 = vmatmul.mubr.bf16.vlgmr.msra.gmra.mrb[152].mxu0 %v7258_v26  ;;  %v11357_v26 = vld [vmem:[%s14014_s23 + $0x118] sm:$0xff]  }
 0x8f4   : > { %10572 = vmatpush3.bf16.msra.mxu0 %v11314_v63  ;;  %10587 = vmatprep.mubr.msk.bf16.mxu0 %vm11385_vm0, %v13403_v21  ;;  %v11356_v63 = vld [vmem:[%s14014_s23 + $0x110] sm:$0xff]  }
 0x8f5   : > { %10573 = vmatprep.subr.bf16.mxu0 %v13403_v21 }
 0x8f8   : > { %10574 = vmatpush3.bf16.msra.mxu0 %v11315_v41  ;;  %v11358_v41 = vld [vmem:[%s14014_s23 + $0x120] sm:$0xff]  }
 0x8f9   : > { %10575 = vmatprep.subr.bf16.mxu0 %v13403_v21 }
 0x8fc   : > { %10576 = vmatpush3.bf16.msra.mxu0 %v11316_v23  ;;  %v11359_v23 = vld [vmem:[%s14014_s23 + $0x128] sm:$0xff]  }
 0x8fd   : > { %10577 = vmatprep.subr.bf16.mxu0 %v13403_v21 }
 0x900   : > { %10578 = vmatpush3.bf16.msra.mxu0 %v11317_v34  ;;  %v11360_v34 = vld [vmem:[%s14014_s23 + $0x130] sm:$0xff]  }
 0x901   : > { %10579 = vmatprep.subr.bf16.mxu0 %v13403_v21 }
 0x904   : > { %10580 = vmatpush3.bf16.msra.mxu0 %v11318_v61  ;;  %v11361_v61 = vld [vmem:[%s14014_s23 + $0x138] sm:$0xff]  }
 0x905   : > { %10581 = vmatprep.subr.bf16.mxu0 %v13403_v21 }
 0x908   : > { %10582 = vmatpush3.bf16.msra.mxu0 %v11319_v4 }
 0x909   : > { %10583 = vmatprep.subr.bf16.mxu0 %v13403_v21 }
 0x90c   : > { %10584 = vmatpush3.bf16.msra.mxu0 %v11320_v14 }
 0x90d   : > { %10585 = vmatprep.subr.bf16.mxu0 %v13403_v21 }
 0x910   : > { %10586 = vmatpush3.bf16.msra.mxu0 %v11321_v46  ;;  %v11362_v46 = vld [vmem:[%s14014_s23 + $0x140] sm:$0xff]  }
 0x913   : > { %10588 = vmatmul.mubr.bf16.vlgmr.msra.gmra.mrb[152].mxu0 %v7369_v37 }
 0x9e6   : > { %v7469_v40 = vpop.f32.mrb[152].mxu0 }
 0x9e7   : > { %v7485_v38 = vmul.f32 %v9103_v0, %v7469_v40  ;;  %v10589_v57 = vpop.f32.mrb[153].mxu0  ;;  %v11368_v40 = vld [vmem:[%s14014_s23 + $0x170] sm:$0xff]  }
 0x9e8   : > { %v7472_v42 = vpop.f32.mrb[154].mxu0  ;;  %v8054_v57 = vld [vmem:[#allocation4 + $0xd] sm:$0x3] }
 0x9e9   : > { %v13805_v29 = vadd.f32 %v9104_v35, %v7485_v38  ;;  %v7486_v50 = vmul.f32 %v9103_v0, %v7472_v42  ;;  %v10590_v7 = vpop.f32.mrb[155].mxu0  ;;  %v11367_v0 = vld [vmem:[%s14014_s23 + $0x168] sm:$0xff]  }
 0x9ea   : > { %v9234_v7 = vld [vmem:[%s14016_s25] ss:$0 sm:$0xff] }
 0x9eb   : > { %v7496_v49 = vmax.f32 %v13805_v29, 0.0  ;;  %v7495_v9 = vadd.f32 %v9104_v35, %v7486_v50  ;;  %v11369_v35 = vld [vmem:[%s14014_s23 + $0x178] sm:$0xff]   ;;  %v9233_v29 = vld [vmem:[%s14015_s24] ss:$0 sm:$0xff] }
 0x9ed   : > { %7501 = vst [vmem:[#allocation4 + $0x2] sm:$0xff] %v7496_v49  ;;  %v7497_v1 = vmax.f32 %v7495_v9, 0.0 }
 0x9ef   : > { %7502 = vst [vmem:[#allocation4 + $0xa] sm:$0x7] %v7497_v1 }
 0x9f4   : > { %v7522_v13 = vld [vmem:[#allocation4 + $0x1] sm:$0xff] }
 0x9f5   : > { %v7503_v31 = vld [vmem:[#allocation4] sm:$0xff]  ;;  %v7504_v43 = vld [vmem:[#allocation4 + $0x8] sm:$0x3] }
 0x9f6   : > { %v7523_v60 = vld [vmem:[#allocation4 + $0x9] sm:$0x3]  ;;  %v7505_v5 = vpack.c.bf16 %v7504_v43, %v7503_v31  ;;  %v7832_v62 = vld [vmem:[#allocation4 + $0xb] sm:$0x3] }
 0x9f7   : > { %v7524_v19 = vpack.c.bf16 %v7523_v60, %v7522_v13  ;;  %v7721_v8 = vld [vmem:[#allocation4 + $0xa] sm:$0x3]  ;;  %v7943_v14 = vld [vmem:[#allocation4 + $0xc] sm:$0x3] }
 0x9f8   : > { %v7722_v55 = vpack.c.bf16 %v7721_v8, %v7496_v49  ;;  %v7831_v2 = vld [vmem:[#allocation4 + $0x3] sm:$0xff] }
 0x9f9   : > { %10608 = vmatmul.mubr.bf16.vlgmr.msra.gmra.mrb[40].mxu1 %v7524_v19  ;;  %v7833_v52 = vpack.c.bf16 %v7832_v62, %v7831_v2  ;;  %v7942_v4 = vld [vmem:[#allocation4 + $0x4] sm:$0xff] }
 0x9fa   : > { %10612 = vmatpush3.bf16.msra.mxu1 %v11330_v15  ;;  %10627 = vmatprep.mubr.msk.bf16.mxu1 %vm11385_vm0, %v13403_v21  ;;  %v7944_v37 = vpack.c.bf16 %v7943_v14, %v7942_v4  ;;  %v8053_v38 = vld [vmem:[#allocation4 + $0x5] sm:$0xff] }
 0x9fb   : > { %10613 = vmatprep.subr.bf16.mxu1 %v13403_v21  ;;  %v8055_v42 = vpack.c.bf16 %v8054_v57, %v8053_v38 }
 0x9fe   : > { %10614 = vmatpush3.bf16.msra.mxu1 %v11331_v33 }
 0x9ff   : > { %10615 = vmatprep.subr.bf16.mxu1 %v13403_v21 }
 0xa02   : > { %10616 = vmatpush3.bf16.msra.mxu1 %v11332_v20 }
 0xa03   : > { %10617 = vmatprep.subr.bf16.mxu1 %v13403_v21 }
 0xa06   : > { %10618 = vmatpush3.bf16.msra.mxu1 %v11333_v27 }
 0xa07   : > { %10619 = vmatprep.subr.bf16.mxu1 %v13403_v21 }
 0xa0a   : > { %10620 = vmatpush3.bf16.msra.mxu1 %v11334_v16 }
 0xa0b   : > { %10621 = vmatprep.subr.bf16.mxu1 %v13403_v21 }
 0xa0e   : > { %10622 = vmatpush3.bf16.msra.mxu1 %v11335_v24 }
 0xa0f   : > { %10623 = vmatprep.subr.bf16.mxu1 %v13403_v21 }
 0xa12   : > { %10624 = vmatpush3.bf16.msra.mxu1 %v11336_v58 }
 0xa13   : > { %10625 = vmatprep.subr.bf16.mxu1 %v13403_v21 }
 0xa16   : > { %10626 = vmatpush3.bf16.msra.mxu1 %v11337_v54 }
 0xa17   : > { %10631 = vmatprep.subr.bf16.mxu1 %v13403_v21 }
 0xa19   : > { %10628 = vmatmul.mubr.bf16.vlgmr.msra.gmra.mrb[40].mxu1 %v7505_v5 }
 0xa1a   : > { %10632 = vmatpush3.bf16.msra.mxu1 %v11338_v17  ;;  %10647 = vmatprep.mubr.msk.bf16.mxu1 %vm11385_vm0, %v13403_v21 }
 0xa1b   : > { %10633 = vmatprep.subr.bf16.mxu1 %v13403_v21 }
 0xa1e   : > { %10634 = vmatpush3.bf16.msra.mxu1 %v11339_v11 }
 0xa1f   : > { %10635 = vmatprep.subr.bf16.mxu1 %v13403_v21 }
 0xa22   : > { %10636 = vmatpush3.bf16.msra.mxu1 %v11340_v44 }
 0xa23   : > { %10637 = vmatprep.subr.bf16.mxu1 %v13403_v21 }
 0xa26   : > { %10638 = vmatpush3.bf16.msra.mxu1 %v11341_v53 }
 0xa27   : > { %10639 = vmatprep.subr.bf16.mxu1 %v13403_v21 }
 0xa2a   : > { %10640 = vmatpush3.bf16.msra.mxu1 %v11342_v25 }
 0xa2b   : > { %10641 = vmatprep.subr.bf16.mxu1 %v13403_v21 }
 0xa2e   : > { %10642 = vmatpush3.bf16.msra.mxu1 %v11343_v39 }
 0xa2f   : > { %10643 = vmatprep.subr.bf16.mxu1 %v13403_v21 }
 0xa32   : > { %10644 = vmatpush3.bf16.msra.mxu1 %v11344_v6 }
 0xa33   : > { %10645 = vmatprep.subr.bf16.mxu1 %v13403_v21 }
 0xa36   : > { %10646 = vmatpush3.bf16.msra.mxu1 %v11345_v59 }
 0xa37   : > { %10651 = vmatprep.subr.bf16.mxu1 %v13403_v21 }
 0xa39   : > { %10648 = vmatmul.mubr.bf16.vlgmr.msra.gmra.mrb[40].mxu1 %v7722_v55 }
 0xa3a   : > { %10652 = vmatpush3.bf16.msra.mxu1 %v11346_v28  ;;  %10667 = vmatprep.mubr.msk.bf16.mxu1 %vm11385_vm0, %v13403_v21 }
 0xa3b   : > { %10653 = vmatprep.subr.bf16.mxu1 %v13403_v21 }
 0xa3e   : > { %10654 = vmatpush3.bf16.msra.mxu1 %v11347_v45 }
 0xa3f   : > { %10655 = vmatprep.subr.bf16.mxu1 %v13403_v21 }
 0xa42   : > { %10656 = vmatpush3.bf16.msra.mxu1 %v11348_v51 }
 0xa43   : > { %10657 = vmatprep.subr.bf16.mxu1 %v13403_v21 }
 0xa46   : > { %10658 = vmatpush3.bf16.msra.mxu1 %v11349_v12 }
 0xa47   : > { %10659 = vmatprep.subr.bf16.mxu1 %v13403_v21 }
 0xa4a   : > { %10660 = vmatpush3.bf16.msra.mxu1 %v11350_v18 }
 0xa4b   : > { %10661 = vmatprep.subr.bf16.mxu1 %v13403_v21 }
 0xa4e   : > { %10662 = vmatpush3.bf16.msra.mxu1 %v11351_v56 }
 0xa4f   : > { %10663 = vmatprep.subr.bf16.mxu1 %v13403_v21 }
 0xa52   : > { %10664 = vmatpush3.bf16.msra.mxu1 %v11352_v30 }
 0xa53   : > { %10665 = vmatprep.subr.bf16.mxu1 %v13403_v21 }
 0xa56   : > { %10666 = vmatpush3.bf16.msra.mxu1 %v11353_v32 }
 0xa57   : > { %10671 = vmatprep.subr.bf16.mxu1 %v13403_v21 }
 0xa59   : > { %10668 = vmatmul.mubr.bf16.vlgmr.msra.gmra.mrb[40].mxu1 %v7833_v52 }
 0xa5a   : > { %10672 = vmatpush3.bf16.msra.mxu1 %v11354_v3  ;;  %10687 = vmatprep.mubr.msk.bf16.mxu1 %vm11385_vm0, %v13403_v21 }
 0xa5b   : > { %10673 = vmatprep.subr.bf16.mxu1 %v13403_v21 }
 0xa5e   : > { %10674 = vmatpush3.bf16.msra.mxu1 %v11355_v48 }
 0xa5f   : > { %10675 = vmatprep.subr.bf16.mxu1 %v13403_v21 }
 0xa62   : > { %10676 = vmatpush3.bf16.msra.mxu1 %v11356_v63 }
 0xa63   : > { %10677 = vmatprep.subr.bf16.mxu1 %v13403_v21 }
 0xa66   : > { %10678 = vmatpush3.bf16.msra.mxu1 %v11357_v26 }
 0xa67   : > { %10679 = vmatprep.subr.bf16.mxu1 %v13403_v21 }
 0xa6a   : > { %10680 = vmatpush3.bf16.msra.mxu1 %v11358_v41 }
 0xa6b   : > { %10681 = vmatprep.subr.bf16.mxu1 %v13403_v21 }
 0xa6e   : > { %10682 = vmatpush3.bf16.msra.mxu1 %v11359_v23 }
 0xa6f   : > { %10683 = vmatprep.subr.bf16.mxu1 %v13403_v21 }
 0xa72   : > { %10684 = vmatpush3.bf16.msra.mxu1 %v11360_v34 }
 0xa73   : > { %10685 = vmatprep.subr.bf16.mxu1 %v13403_v21 }
 0xa76   : > { %10686 = vmatpush3.bf16.msra.mxu1 %v11361_v61 }
 0xa77   : > { %10691 = vmatprep.subr.bf16.mxu1 %v13403_v21 }
 0xa79   : > { %10688 = vmatmul.mubr.bf16.vlgmr.msra.gmra.mrb[40].mxu1 %v7944_v37 }
 0xa7a   : > { %10692 = vmatpush3.bf16.msra.mxu1 %v11362_v46  ;;  %10707 = vmatprep.mubr.msk.bf16.mxu1 %vm11385_vm0, %v13403_v21  ;;  %vm8187_vm0 = vcmask 1041408  }
 0xa7b   : > { %10693 = vmatprep.subr.bf16.mxu1 %v13403_v21 }
 0xa7e   : > { %10694 = vmatpush3.bf16.msra.mxu1 %v11363_v36 }
 0xa7f   : > { %10695 = vmatprep.subr.bf16.mxu1 %v13403_v21 }
 0xa82   : > { %10696 = vmatpush3.bf16.msra.mxu1 %v11364_v47 }
 0xa83   : > { %10697 = vmatprep.subr.bf16.mxu1 %v13403_v21 }
 0xa86   : > { %10698 = vmatpush3.bf16.msra.mxu1 %v11365_v10 }
 0xa87   : > { %10699 = vmatprep.subr.bf16.mxu1 %v13403_v21 }
 0xa8a   : > { %10700 = vmatpush3.bf16.msra.mxu1 %v11366_v22 }
 0xa8b   : > { %10701 = vmatprep.subr.bf16.mxu1 %v13403_v21 }
 0xa8e   : > { %10702 = vmatpush3.bf16.msra.mxu1 %v11367_v0 }
 0xa8f   : > { %10703 = vmatprep.subr.bf16.mxu1 %v13403_v21 }
 0xa92   : > { %10704 = vmatpush3.bf16.msra.mxu1 %v11368_v40 }
 0xa93   : > { %10705 = vmatprep.subr.bf16.mxu1 %v13403_v21 }
 0xa96   : > { %10706 = vmatpush3.bf16.msra.mxu1 %v11369_v35 }
 0xa99   : > { %10708 = vmatmul.mubr.bf16.vlgmr.msra.gmra.mrb[40].mxu1 %v8055_v42 }
 0xb6c   : > { %v8155_v50 = vpop.f32.mrb[40].mxu1 }
 0xb6d   : > { %v8171_v49 = vmul.f32 %v9233_v29, %v8155_v50  ;;  %v10709_v9 = vpop.f32.mrb[41].mxu1 }
 0xb6e   : > { %v8158_v1 = vpop.f32.mrb[42].mxu1 }
 0xb6f   : > { %v8180_v13 = vadd.f32 %v9234_v7, %v8171_v49  ;;  %v8172_v60 = vmul.f32 %v9233_v29, %v8158_v1  ;;  %v10710_v21 = vpop.f32.mrb[43].mxu1 }
 0xb71   : > { %v8182_v15 = vmax.f32 %v8180_v13, 0.0  ;;  %v8181_v19 = vadd.f32 %v9234_v7, %v8172_v60 }
 0xb73   : > { %8184 = vst [vmem:[#allocation2] sm:$0xff] %v8182_v15  ;;  %v8183_v33 = vmax.f32 %v8181_v19, 0.0 }
 0xb75   : > { %8185 = vst [vmem:[#allocation2 + $0x8] sm:$0x3] %v8183_v33 }
 0xb7a   : > { %v8186_v20 = vld [vmem:[#allocation2] sm:$0x3]  ;;  %v8196_v27 = vld [vmem:[#allocation2 + $0x2] sm:$0x3]  ;;  %v8205_v16 = vld [vmem:[#allocation2 + $0x4] sm:$0x3] }
 0xb7b   : > { %v8214_v24 = vld [vmem:[#allocation2 + $0x6] sm:$0x3]  ;;  %v8188_v58 = vsel %vm8187_vm0, %v8186_v20, -inf  ;;  %v8197_v54 = vsel %vm8187_vm0, %v8196_v27, -inf  ;;  %v8206_v31 = vsel %vm8187_vm0, %v8205_v16, -inf }
 0xb7c   : > { %v8189_v43 = vrot.slane %v8188_v58, 4  ;;  %v8198_v17 = vrot.slane %v8197_v54, 4  ;;  %v8207_v5 = vrot.slane %v8206_v31, 4  ;;  %v8215_v11 = vsel %vm8187_vm0, %v8214_v24, -inf  ;;  %v8223_v44 = vld [vmem:[#allocation2 + $0x8] sm:$0x3] }
 0xb7d   : > { %v8216_v53 = vrot.slane %v8215_v11, 4  ;;  %v8224_v25 = vsel %vm8187_vm0, %v8223_v44, -inf }
 0xb7e   : > { %v8190_v39 = vmax.f32 %v8188_v58, %v8189_v43  ;;  %v8199_v6 = vmax.f32 %v8197_v54, %v8198_v17  ;;  %v8208_v59 = vmax.f32 %v8206_v31, %v8207_v5  ;;  %v8225_v8 = vrot.slane %v8224_v25, 4 }
 0xb7f   : > { %v8217_v28 = vmax.f32 %v8215_v11, %v8216_v53 }
 0xb80   : > { %v8191_v55 = vrot.slane %v8190_v39, 2  ;;  %v8200_v45 = vrot.slane %v8199_v6, 2  ;;  %v8209_v51 = vrot.slane %v8208_v59, 2  ;;  %v8226_v12 = vmax.f32 %v8224_v25, %v8225_v8 }
 0xb81   : > { %v8218_v18 = vrot.slane %v8217_v28, 2 }
 0xb82   : > { %v8192_v56 = vmax.f32 %v8190_v39, %v8191_v55  ;;  %v8201_v30 = vmax.f32 %v8199_v6, %v8200_v45  ;;  %v8210_v32 = vmax.f32 %v8208_v59, %v8209_v51  ;;  %v8227_v2 = vrot.slane %v8226_v12, 2 }
 0xb83   : > { %v8219_v62 = vmax.f32 %v8217_v28, %v8218_v18 }
 0xb84   : > { %v8193_v3 = vrot.slane %v8192_v56, 1  ;;  %v8202_v52 = vrot.slane %v8201_v30, 1  ;;  %v8211_v48 = vrot.slane %v8210_v32, 1  ;;  %v8228_v63 = vmax.f32 %v8226_v12, %v8227_v2 }
 0xb85   : > { %v8220_v26 = vrot.slane %v8219_v62, 1 }
 0xb86   : > { %v8194_v41 = vmax.f32 %v8192_v56, %v8193_v3  ;;  %v8203_v23 = vmax.f32 %v8201_v30, %v8202_v52  ;;  %v8212_v34 = vmax.f32 %v8210_v32, %v8211_v48  ;;  %v8229_v61 = vrot.slane %v8228_v63, 1 }
 0xb87   : > { %v8221_v4 = vmax.f32 %v8219_v62, %v8220_v26 }
 0xb88   : > { %8195 = vst [vmem:[#allocation3] sm:$0x1] %v8194_v41  ;;  %8204 = vst [vmem:[#allocation3 + $0x1] sm:$0x1] %v8203_v23  ;;  %v8230_v14 = vmax.f32 %v8228_v63, %v8229_v61 }
 0xb89   : > { %8213 = vst [vmem:[#allocation3 + $0x2] sm:$0x1] %v8212_v34  ;;  %8222 = vst [vmem:[#allocation3 + $0x3] sm:$0x1] %v8221_v4 }
 0xb8a   : > { %8231 = vst [vmem:[#allocation3 + $0x4] sm:$0x1] %v8230_v14 }
 0xb91   : > { %v8232_v46 = vld [vmem:[#allocation3] sm:$0x1f] }
 0xb92   : > { %8233 = vst [vmem:[%s13363_s4 + $0xa] sm:$0x1f] %v8232_v46 }
 0xb93 PF: > { %s36_s27 = sadd.s32 1, %s11382_s27  }
 0xb94   : > { %p33_p4 = scmp.ge.s32.totalorder %s36_s27, 4  }
 0xb96   :  { %35 = sbr.rel (!%p33_p4) target bundleno = 12 (0xc), region = 193 }

</bundles_post_ra>
